<compile_context>
chip_gen: v7x
topology: tpu7x:2x2x1
jax: 0.10.0
libtpu: 0.0.40
codegen_flags: <defaults>
</compile_context>

<pallas_src>
import jax
import jax.numpy as jnp
from jax import lax
from jax.experimental import pallas as pl
from jax.experimental.pallas import tpu as pltpu

LANE = 128


def _round_up(x, m):
    return (x + m - 1) // m * m


# ----------------------------- Pallas kernel ------------------------------

def _basic_block_kernel(x_ref, w1_ref, b1_ref, w2_ref, b2_ref, o_ref,
                        y1_ref, acc_ref):
    """Fused BasicBlock forward for one image.

    x_ref : (1, H+2, W+2, Cp) bf16  spatially zero-padded, channel-padded input
    w1_ref: (9, Cp, Cq)       bf16  conv1 taps, BN1 scale folded in
    b1_ref: (1, Cq)           f32   BN1 bias
    w2_ref: (9, Cq, Cq)       bf16  conv2 taps, BN2 scale folded in
    b2_ref: (1, Cq)           f32   BN2 bias
    o_ref : (1, H, W, Cq)     f32   block output
    y1_ref: (H+2, W+2, Cq)    bf16  scratch: conv1 output with zero halo
    acc_ref:(H*W, Cq)         f32   scratch accumulator
    """
    H = o_ref.shape[1]
    W = o_ref.shape[2]
    Cq = o_ref.shape[3]

    # ---- conv1 (3x3, stride 1, pad 1) as 9 shifted matmuls, + BN1 + ReLU ----
    acc_ref[...] = jnp.zeros_like(acc_ref)
    for t in range(9):
        dh, dw = t // 3, t % 3
        patch = x_ref[0, dh:dh + H, dw:dw + W, :].reshape(H * W, -1)
        acc_ref[...] += jnp.dot(patch, w1_ref[t],
                                preferred_element_type=jnp.float32)
    y1 = jnp.maximum(acc_ref[...] + b1_ref[...], 0.0)

    # Stage conv1 output in VMEM with a zero halo (never goes to HBM).
    y1_ref[...] = jnp.zeros_like(y1_ref)
    y1_ref[1:H + 1, 1:W + 1, :] = y1.reshape(H, W, Cq).astype(y1_ref.dtype)

    # ---- conv2 + BN2 + residual add + ReLU ----
    acc_ref[...] = jnp.zeros_like(acc_ref)
    for t in range(9):
        dh, dw = t // 3, t % 3
        patch = y1_ref[dh:dh + H, dw:dw + W, :].reshape(H * W, Cq)
        acc_ref[...] += jnp.dot(patch, w2_ref[t],
                                preferred_element_type=jnp.float32)

    # identity residual = interior of the padded input tile (inplanes == planes)
    residual = x_ref[0, 1:H + 1, 1:W + 1, :].reshape(H * W, Cq)
    out = acc_ref[...] + b2_ref[...] + residual.astype(jnp.float32)
    o_ref[...] = jnp.maximum(out, 0.0).astype(o_ref.dtype).reshape(o_ref.shape)


# ------------------------------- wrapper -----------------------------------

def _fold_bn(gamma, beta, mean, var, eps=1e-5):
    scale = gamma / jnp.sqrt(var + eps)
    bias = beta - mean * scale
    return scale, bias


def _prep_weight(w_oihw, scale, cin_pad, cout_pad):
    """(Cout, Cin, 3, 3) PyTorch conv weight -> (9, cin_pad, cout_pad) bf16 taps
    with the folded BN scale multiplied into the output channels."""
    cout, cin = w_oihw.shape[:2]
    w = w_oihw * scale[:, None, None, None]            # fold BN scale (f32)
    w = jnp.transpose(w, (2, 3, 1, 0)).reshape(9, cin, cout)  # tap = dh*3+dw
    w = jnp.pad(w, ((0, 0), (0, cin_pad - cin), (0, cout_pad - cout)))
    return w.astype(jnp.bfloat16)


def basic_block_forward(x_nchw, params):
    """Forward of BasicBlock(inplanes=planes, stride=1, downsample=None)."""
    (w1, g1, be1, m1, v1, w2, g2, be2, m2, v2) = params
    N, C, H, W = x_nchw.shape
    planes = w1.shape[0]
    # TODO(synk): stride>1 / downsample / training-mode BN not implemented.
    assert w1.shape[1] == C and w2.shape[:2] == (planes, planes)
    assert C == planes, "identity residual requires inplanes == planes"

    Cp = _round_up(C, LANE)        # lane-aligned input channels
    Cq = _round_up(planes, LANE)   # lane-aligned output channels
    assert Cp == Cq

    s1, b1 = _fold_bn(g1, be1, m1, v1)
    s2, b2 = _fold_bn(g2, be2, m2, v2)

    w1_t = _prep_weight(w1, s1, Cp, Cq)
    w2_t = _prep_weight(w2, s2, Cq, Cq)
    b1_p = jnp.pad(b1, (0, Cq - planes)).reshape(1, Cq).astype(jnp.float32)
    b2_p = jnp.pad(b2, (0, Cq - planes)).reshape(1, Cq).astype(jnp.float32)

    # NCHW -> NHWC, channel pad to lane width, spatial pad 1, cast bf16.
    x = jnp.transpose(x_nchw, (0, 2, 3, 1))
    x = jnp.pad(x, ((0, 0), (1, 1), (1, 1), (0, Cp - C))).astype(jnp.bfloat16)

    flops = int(2 * 2 * 9 * N * H * W * Cp * Cq)          # two 3x3 convs
    bytes_accessed = int(x.size * 2 + w1_t.size * 2 + w2_t.size * 2 +
                         (b1_p.size + b2_p.size) * 4 + N * H * W * Cq * 4)

    out = pl.pallas_call(
        _basic_block_kernel,
        out_shape=jax.ShapeDtypeStruct((N, H, W, Cq), jnp.float32),
        grid=(N,),
        in_specs=[
            pl.BlockSpec((1, H + 2, W + 2, Cp), lambda n: (n, 0, 0, 0)),
            pl.BlockSpec((9, Cp, Cq), lambda n: (0, 0, 0)),
            pl.BlockSpec((1, Cq), lambda n: (0, 0)),
            pl.BlockSpec((9, Cq, Cq), lambda n: (0, 0, 0)),
            pl.BlockSpec((1, Cq), lambda n: (0, 0)),
        ],
        out_specs=pl.BlockSpec((1, H, W, Cq), lambda n: (n, 0, 0, 0)),
        scratch_shapes=[
            pltpu.VMEM((H + 2, W + 2, Cq), jnp.bfloat16),   # conv1 output (halo'd)
            pltpu.VMEM((H * W, Cq), jnp.float32),           # f32 accumulator
        ],
        compiler_params=pltpu.CompilerParams(
            dimension_semantics=("parallel",),
            vmem_limit_bytes=48 * 1024 * 1024),
        cost_estimate=pl.CostEstimate(flops=flops, transcendentals=0,
                                      bytes_accessed=bytes_accessed),
    )(x, w1_t, b1_p, w2_t, b2_p)

    out = out[..., :planes]                      # drop channel padding
    return jnp.transpose(out, (0, 3, 1, 2))      # NHWC -> NCHW


# --------------------------- pure-JAX reference ----------------------------

def _reference_forward(x_nchw, params):
    (w1, g1, be1, m1, v1, w2, g2, be2, m2, v2) = params
    s1, b1 = _fold_bn(g1, be1, m1, v1)
    s2, b2 = _fold_bn(g2, be2, m2, v2)
    dn = ("NCHW", "OIHW", "NCHW")

    y = lax.conv_general_dilated(x_nchw, w1, (1, 1), [(1, 1), (1, 1)],
                                 dimension_numbers=dn)
    y = y * s1[None, :, None, None] + b1[None, :, None, None]
    y = jnp.maximum(y, 0.0)
    y = lax.conv_general_dilated(y, w2, (1, 1), [(1, 1), (1, 1)],
                                 dimension_numbers=dn)
    y = y * s2[None, :, None, None] + b2[None, :, None, None]
    return jnp.maximum(y + x_nchw, 0.0)


# ---------------------------------- main -----------------------------------

if __name__ == "__main__":
    key = jax.random.PRNGKey(0)
    ks = jax.random.split(key, 12)

    N, C, H, W = 2, 4, 16, 16   # inplanes = planes = 4, stride = 1
    planes = 4

    x = jax.random.normal(ks[0], (N, C, H, W), jnp.float32)

    w1 = 0.1 * jax.random.normal(ks[1], (planes, C, 3, 3), jnp.float32)
    w2 = 0.1 * jax.random.normal(ks[2], (planes, planes, 3, 3), jnp.float32)
    g1 = 1.0 + 0.1 * jax.random.normal(ks[3], (planes,), jnp.float32)
    be1 = 0.1 * jax.random.normal(ks[4], (planes,), jnp.float32)
    m1 = 0.1 * jax.random.normal(ks[5], (planes,), jnp.float32)
    v1 = 1.0 + 0.5 * jax.random.uniform(ks[6], (planes,), jnp.float32)
    g2 = 1.0 + 0.1 * jax.random.normal(ks[7], (planes,), jnp.float32)
    be2 = 0.1 * jax.random.normal(ks[8], (planes,), jnp.float32)
    m2 = 0.1 * jax.random.normal(ks[9], (planes,), jnp.float32)
    v2 = 1.0 + 0.5 * jax.random.uniform(ks[10], (planes,), jnp.float32)

    params = (w1, g1, be1, m1, v1, w2, g2, be2, m2, v2)

    fwd = jax.jit(basic_block_forward)
    out = jax.block_until_ready(fwd(x, params))
    ref = jax.block_until_ready(_reference_forward(x, params))

    assert out.shape == (N, planes, H, W), out.shape
    # bf16 inputs / weights (f32 accumulation) -> loosened tolerance vs f32 ref.
    assert jnp.allclose(out, ref, atol=5e-2, rtol=5e-2), \
        float(jnp.max(jnp.abs(out - ref)))

    print("KERNEL_OK")
</pallas_src>

<mosaic_0001>
module attributes {stable_mosaic.version = 11 : i64} {
  func.func @_basic_block_kernel(%arg0: i32, %arg1: memref<1x18x18x128xbf16, #tpu.memory_space<vmem>>, %arg2: memref<9x128x128xbf16, #tpu.memory_space<vmem>>, %arg3: memref<1x128xf32, #tpu.memory_space<vmem>>, %arg4: memref<9x128x128xbf16, #tpu.memory_space<vmem>>, %arg5: memref<1x128xf32, #tpu.memory_space<vmem>>, %arg6: memref<1x16x16x128xf32, #tpu.memory_space<vmem>>, %arg7: memref<18x18x128xbf16, #tpu.memory_space<vmem>>, %arg8: memref<256x128xf32, #tpu.memory_space<vmem>>) attributes {dimension_semantics = [#tpu.dimension_semantics<parallel>], iteration_bounds = array<i64: 2>, scalar_prefetch = 0 : i64, scratch_operands = 2 : i64, tpu.core_type = #tpu.core_type<tc>, window_params = [{transform_indices = @transform_0, window_bounds = array<i64: 1, 18, 18, 128>}, {pipeline_mode = #tpu.pipeline_mode<synchronous>, transform_indices = @transform_1, window_bounds = array<i64: 9, 128, 128>}, {pipeline_mode = #tpu.pipeline_mode<synchronous>, transform_indices = @transform_2, window_bounds = array<i64: 1, 128>}, {pipeline_mode = #tpu.pipeline_mode<synchronous>, transform_indices = @transform_3, window_bounds = array<i64: 9, 128, 128>}, {pipeline_mode = #tpu.pipeline_mode<synchronous>, transform_indices = @transform_4, window_bounds = array<i64: 1, 128>}, {transform_indices = @transform_5, window_bounds = array<i64: 1, 16, 16, 128>}]} {
    %cst = arith.constant 0.000000e+00 : f32
    %0 = vector.broadcast %cst : f32 to vector<256x128xf32>
    %c0 = arith.constant 0 : index
    %c0_0 = arith.constant 0 : index
    %1 = vector.load %arg8[%c0, %c0_0] : memref<256x128xf32, #tpu.memory_space<vmem>>, vector<256x128xf32>
    tpu.vector_store %arg8[%c0, %c0_0], %0 {strides = array<i32>} : memref<256x128xf32, #tpu.memory_space<vmem>>, vector<256x128xf32>,
    %c0_1 = arith.constant 0 : index
    %c0_2 = arith.constant 0 : index
    %c0_3 = arith.constant 0 : index
    %c0_4 = arith.constant 0 : index
    %2 = vector.load %arg1[%c0_1, %c0_2, %c0_3, %c0_4] : memref<1x18x18x128xbf16, #tpu.memory_space<vmem>>, vector<1x16x16x128xbf16>
    %3 = vector.shape_cast %2 : vector<1x16x16x128xbf16> to vector<16x16x128xbf16>
    %4 = vector.shape_cast %3 : vector<16x16x128xbf16> to vector<256x128xbf16>
    %c0_5 = arith.constant 0 : index
    %c0_6 = arith.constant 0 : index
    %5 = vector.load %arg8[%c0_5, %c0_6] : memref<256x128xf32, #tpu.memory_space<vmem>>, vector<256x128xf32>
    %c0_7 = arith.constant 0 : index
    %c0_8 = arith.constant 0 : index
    %c0_9 = arith.constant 0 : index
    %6 = vector.load %arg2[%c0_7, %c0_8, %c0_9] : memref<9x128x128xbf16, #tpu.memory_space<vmem>>, vector<1x128x128xbf16>
    %7 = vector.shape_cast %6 : vector<1x128x128xbf16> to vector<128x128xbf16>
    %cst_10 = arith.constant dense<0.000000e+00> : vector<256x128xf32>
    %8 = tpu.matmul %4, %7, %cst_10 {dimension_numbers = #tpu.dot_dimension_numbers<[1], [0], [0], [1], [0, 0, 1, 1], [], []>} : vector<256x128xbf16>, vector<128x128xbf16>, vector<256x128xf32> -> vector<256x128xf32>
    %9 = arith.addf %5, %8 : vector<256x128xf32>
    %c0_11 = arith.constant 0 : index
    %c0_12 = arith.constant 0 : index
    %10 = vector.load %arg8[%c0_11, %c0_12] : memref<256x128xf32, #tpu.memory_space<vmem>>, vector<256x128xf32>
    tpu.vector_store %arg8[%c0_11, %c0_12], %9 {strides = array<i32>} : memref<256x128xf32, #tpu.memory_space<vmem>>, vector<256x128xf32>,
    %c0_13 = arith.constant 0 : index
    %c0_14 = arith.constant 0 : index
    %c1 = arith.constant 1 : index
    %c0_15 = arith.constant 0 : index
    %11 = vector.load %arg1[%c0_13, %c0_14, %c1, %c0_15] : memref<1x18x18x128xbf16, #tpu.memory_space<vmem>>, vector<1x16x16x128xbf16>
    %12 = vector.shape_cast %11 : vector<1x16x16x128xbf16> to vector<16x16x128xbf16>
    %13 = vector.shape_cast %12 : vector<16x16x128xbf16> to vector<256x128xbf16>
    %c0_16 = arith.constant 0 : index
    %c0_17 = arith.constant 0 : index
    %14 = vector.load %arg8[%c0_16, %c0_17] : memref<256x128xf32, #tpu.memory_space<vmem>>, vector<256x128xf32>
    %c1_18 = arith.constant 1 : index
    %c0_19 = arith.constant 0 : index
    %c0_20 = arith.constant 0 : index
    %15 = vector.load %arg2[%c1_18, %c0_19, %c0_20] : memref<9x128x128xbf16, #tpu.memory_space<vmem>>, vector<1x128x128xbf16>
    %16 = vector.shape_cast %15 : vector<1x128x128xbf16> to vector<128x128xbf16>
    %cst_21 = arith.constant dense<0.000000e+00> : vector<256x128xf32>
    %17 = tpu.matmul %13, %16, %cst_21 {dimension_numbers = #tpu.dot_dimension_numbers<[1], [0], [0], [1], [0, 0, 1, 1], [], []>} : vector<256x128xbf16>, vector<128x128xbf16>, vector<256x128xf32> -> vector<256x128xf32>
    %18 = arith.addf %14, %17 : vector<256x128xf32>
    %c0_22 = arith.constant 0 : index
    %c0_23 = arith.constant 0 : index
    %19 = vector.load %arg8[%c0_22, %c0_23] : memref<256x128xf32, #tpu.memory_space<vmem>>, vector<256x128xf32>
    tpu.vector_store %arg8[%c0_22, %c0_23], %18 {strides = array<i32>} : memref<256x128xf32, #tpu.memory_space<vmem>>, vector<256x128xf32>,
    %c0_24 = arith.constant 0 : index
    %c0_25 = arith.constant 0 : index
    %c2 = arith.constant 2 : index
    %c0_26 = arith.constant 0 : index
    %20 = vector.load %arg1[%c0_24, %c0_25, %c2, %c0_26] : memref<1x18x18x128xbf16, #tpu.memory_space<vmem>>, vector<1x16x16x128xbf16>
    %21 = vector.shape_cast %20 : vector<1x16x16x128xbf16> to vector<16x16x128xbf16>
    %22 = vector.shape_cast %21 : vector<16x16x128xbf16> to vector<256x128xbf16>
    %c0_27 = arith.constant 0 : index
    %c0_28 = arith.constant 0 : index
    %23 = vector.load %arg8[%c0_27, %c0_28] : memref<256x128xf32, #tpu.memory_space<vmem>>, vector<256x128xf32>
    %c2_29 = arith.constant 2 : index
    %c0_30 = arith.constant 0 : index
    %c0_31 = arith.constant 0 : index
    %24 = vector.load %arg2[%c2_29, %c0_30, %c0_31] : memref<9x128x128xbf16, #tpu.memory_space<vmem>>, vector<1x128x128xbf16>
    %25 = vector.shape_cast %24 : vector<1x128x128xbf16> to vector<128x128xbf16>
    %cst_32 = arith.constant dense<0.000000e+00> : vector<256x128xf32>
    %26 = tpu.matmul %22, %25, %cst_32 {dimension_numbers = #tpu.dot_dimension_numbers<[1], [0], [0], [1], [0, 0, 1, 1], [], []>} : vector<256x128xbf16>, vector<128x128xbf16>, vector<256x128xf32> -> vector<256x128xf32>
    %27 = arith.addf %23, %26 : vector<256x128xf32>
    %c0_33 = arith.constant 0 : index
    %c0_34 = arith.constant 0 : index
    %28 = vector.load %arg8[%c0_33, %c0_34] : memref<256x128xf32, #tpu.memory_space<vmem>>, vector<256x128xf32>
    tpu.vector_store %arg8[%c0_33, %c0_34], %27 {strides = array<i32>} : memref<256x128xf32, #tpu.memory_space<vmem>>, vector<256x128xf32>,
    %c0_35 = arith.constant 0 : index
    %c1_36 = arith.constant 1 : index
    %c0_37 = arith.constant 0 : index
    %c0_38 = arith.constant 0 : index
    %29 = vector.load %arg1[%c0_35, %c1_36, %c0_37, %c0_38] : memref<1x18x18x128xbf16, #tpu.memory_space<vmem>>, vector<1x16x16x128xbf16>
    %30 = vector.shape_cast %29 : vector<1x16x16x128xbf16> to vector<16x16x128xbf16>
    %31 = vector.shape_cast %30 : vector<16x16x128xbf16> to vector<256x128xbf16>
    %c0_39 = arith.constant 0 : index
    %c0_40 = arith.constant 0 : index
    %32 = vector.load %arg8[%c0_39, %c0_40] : memref<256x128xf32, #tpu.memory_space<vmem>>, vector<256x128xf32>
    %c3 = arith.constant 3 : index
    %c0_41 = arith.constant 0 : index
    %c0_42 = arith.constant 0 : index
    %33 = vector.load %arg2[%c3, %c0_41, %c0_42] : memref<9x128x128xbf16, #tpu.memory_space<vmem>>, vector<1x128x128xbf16>
    %34 = vector.shape_cast %33 : vector<1x128x128xbf16> to vector<128x128xbf16>
    %cst_43 = arith.constant dense<0.000000e+00> : vector<256x128xf32>
    %35 = tpu.matmul %31, %34, %cst_43 {dimension_numbers = #tpu.dot_dimension_numbers<[1], [0], [0], [1], [0, 0, 1, 1], [], []>} : vector<256x128xbf16>, vector<128x128xbf16>, vector<256x128xf32> -> vector<256x128xf32>
    %36 = arith.addf %32, %35 : vector<256x128xf32>
    %c0_44 = arith.constant 0 : index
    %c0_45 = arith.constant 0 : index
    %37 = vector.load %arg8[%c0_44, %c0_45] : memref<256x128xf32, #tpu.memory_space<vmem>>, vector<256x128xf32>
    tpu.vector_store %arg8[%c0_44, %c0_45], %36 {strides = array<i32>} : memref<256x128xf32, #tpu.memory_space<vmem>>, vector<256x128xf32>,
    %c0_46 = arith.constant 0 : index
    %c1_47 = arith.constant 1 : index
    %c1_48 = arith.constant 1 : index
    %c0_49 = arith.constant 0 : index
    %38 = vector.load %arg1[%c0_46, %c1_47, %c1_48, %c0_49] : memref<1x18x18x128xbf16, #tpu.memory_space<vmem>>, vector<1x16x16x128xbf16>
    %39 = vector.shape_cast %38 : vector<1x16x16x128xbf16> to vector<16x16x128xbf16>
    %40 = vector.shape_cast %39 : vector<16x16x128xbf16> to vector<256x128xbf16>
    %c0_50 = arith.constant 0 : index
    %c0_51 = arith.constant 0 : index
    %41 = vector.load %arg8[%c0_50, %c0_51] : memref<256x128xf32, #tpu.memory_space<vmem>>, vector<256x128xf32>
    %c4 = arith.constant 4 : index
    %c0_52 = arith.constant 0 : index
    %c0_53 = arith.constant 0 : index
    %42 = vector.load %arg2[%c4, %c0_52, %c0_53] : memref<9x128x128xbf16, #tpu.memory_space<vmem>>, vector<1x128x128xbf16>
    %43 = vector.shape_cast %42 : vector<1x128x128xbf16> to vector<128x128xbf16>
    %cst_54 = arith.constant dense<0.000000e+00> : vector<256x128xf32>
    %44 = tpu.matmul %40, %43, %cst_54 {dimension_numbers = #tpu.dot_dimension_numbers<[1], [0], [0], [1], [0, 0, 1, 1], [], []>} : vector<256x128xbf16>, vector<128x128xbf16>, vector<256x128xf32> -> vector<256x128xf32>
    %45 = arith.addf %41, %44 : vector<256x128xf32>
    %c0_55 = arith.constant 0 : index
    %c0_56 = arith.constant 0 : index
    %46 = vector.load %arg8[%c0_55, %c0_56] : memref<256x128xf32, #tpu.memory_space<vmem>>, vector<256x128xf32>
    tpu.vector_store %arg8[%c0_55, %c0_56], %45 {strides = array<i32>} : memref<256x128xf32, #tpu.memory_space<vmem>>, vector<256x128xf32>,
    %c0_57 = arith.constant 0 : index
    %c1_58 = arith.constant 1 : index
    %c2_59 = arith.constant 2 : index
    %c0_60 = arith.constant 0 : index
    %47 = vector.load %arg1[%c0_57, %c1_58, %c2_59, %c0_60] : memref<1x18x18x128xbf16, #tpu.memory_space<vmem>>, vector<1x16x16x128xbf16>
    %48 = vector.shape_cast %47 : vector<1x16x16x128xbf16> to vector<16x16x128xbf16>
    %49 = vector.shape_cast %48 : vector<16x16x128xbf16> to vector<256x128xbf16>
    %c0_61 = arith.constant 0 : index
    %c0_62 = arith.constant 0 : index
    %50 = vector.load %arg8[%c0_61, %c0_62] : memref<256x128xf32, #tpu.memory_space<vmem>>, vector<256x128xf32>
    %c5 = arith.constant 5 : index
    %c0_63 = arith.constant 0 : index
    %c0_64 = arith.constant 0 : index
    %51 = vector.load %arg2[%c5, %c0_63, %c0_64] : memref<9x128x128xbf16, #tpu.memory_space<vmem>>, vector<1x128x128xbf16>
    %52 = vector.shape_cast %51 : vector<1x128x128xbf16> to vector<128x128xbf16>
    %cst_65 = arith.constant dense<0.000000e+00> : vector<256x128xf32>
    %53 = tpu.matmul %49, %52, %cst_65 {dimension_numbers = #tpu.dot_dimension_numbers<[1], [0], [0], [1], [0, 0, 1, 1], [], []>} : vector<256x128xbf16>, vector<128x128xbf16>, vector<256x128xf32> -> vector<256x128xf32>
    %54 = arith.addf %50, %53 : vector<256x128xf32>
    %c0_66 = arith.constant 0 : index
    %c0_67 = arith.constant 0 : index
    %55 = vector.load %arg8[%c0_66, %c0_67] : memref<256x128xf32, #tpu.memory_space<vmem>>, vector<256x128xf32>
    tpu.vector_store %arg8[%c0_66, %c0_67], %54 {strides = array<i32>} : memref<256x128xf32, #tpu.memory_space<vmem>>, vector<256x128xf32>,
    %c0_68 = arith.constant 0 : index
    %c2_69 = arith.constant 2 : index
    %c0_70 = arith.constant 0 : index
    %c0_71 = arith.constant 0 : index
    %56 = vector.load %arg1[%c0_68, %c2_69, %c0_70, %c0_71] : memref<1x18x18x128xbf16, #tpu.memory_space<vmem>>, vector<1x16x16x128xbf16>
    %57 = vector.shape_cast %56 : vector<1x16x16x128xbf16> to vector<16x16x128xbf16>
    %58 = vector.shape_cast %57 : vector<16x16x128xbf16> to vector<256x128xbf16>
    %c0_72 = arith.constant 0 : index
    %c0_73 = arith.constant 0 : index
    %59 = vector.load %arg8[%c0_72, %c0_73] : memref<256x128xf32, #tpu.memory_space<vmem>>, vector<256x128xf32>
    %c6 = arith.constant 6 : index
    %c0_74 = arith.constant 0 : index
    %c0_75 = arith.constant 0 : index
    %60 = vector.load %arg2[%c6, %c0_74, %c0_75] : memref<9x128x128xbf16, #tpu.memory_space<vmem>>, vector<1x128x128xbf16>
    %61 = vector.shape_cast %60 : vector<1x128x128xbf16> to vector<128x128xbf16>
    %cst_76 = arith.constant dense<0.000000e+00> : vector<256x128xf32>
    %62 = tpu.matmul %58, %61, %cst_76 {dimension_numbers = #tpu.dot_dimension_numbers<[1], [0], [0], [1], [0, 0, 1, 1], [], []>} : vector<256x128xbf16>, vector<128x128xbf16>, vector<256x128xf32> -> vector<256x128xf32>
    %63 = arith.addf %59, %62 : vector<256x128xf32>
    %c0_77 = arith.constant 0 : index
    %c0_78 = arith.constant 0 : index
    %64 = vector.load %arg8[%c0_77, %c0_78] : memref<256x128xf32, #tpu.memory_space<vmem>>, vector<256x128xf32>
    tpu.vector_store %arg8[%c0_77, %c0_78], %63 {strides = array<i32>} : memref<256x128xf32, #tpu.memory_space<vmem>>, vector<256x128xf32>,
    %c0_79 = arith.constant 0 : index
    %c2_80 = arith.constant 2 : index
    %c1_81 = arith.constant 1 : index
    %c0_82 = arith.constant 0 : index
    %65 = vector.load %arg1[%c0_79, %c2_80, %c1_81, %c0_82] : memref<1x18x18x128xbf16, #tpu.memory_space<vmem>>, vector<1x16x16x128xbf16>
    %66 = vector.shape_cast %65 : vector<1x16x16x128xbf16> to vector<16x16x128xbf16>
    %67 = vector.shape_cast %66 : vector<16x16x128xbf16> to vector<256x128xbf16>
    %c0_83 = arith.constant 0 : index
    %c0_84 = arith.constant 0 : index
    %68 = vector.load %arg8[%c0_83, %c0_84] : memref<256x128xf32, #tpu.memory_space<vmem>>, vector<256x128xf32>
    %c7 = arith.constant 7 : index
    %c0_85 = arith.constant 0 : index
    %c0_86 = arith.constant 0 : index
    %69 = vector.load %arg2[%c7, %c0_85, %c0_86] : memref<9x128x128xbf16, #tpu.memory_space<vmem>>, vector<1x128x128xbf16>
    %70 = vector.shape_cast %69 : vector<1x128x128xbf16> to vector<128x128xbf16>
    %cst_87 = arith.constant dense<0.000000e+00> : vector<256x128xf32>
    %71 = tpu.matmul %67, %70, %cst_87 {dimension_numbers = #tpu.dot_dimension_numbers<[1], [0], [0], [1], [0, 0, 1, 1], [], []>} : vector<256x128xbf16>, vector<128x128xbf16>, vector<256x128xf32> -> vector<256x128xf32>
    %72 = arith.addf %68, %71 : vector<256x128xf32>
    %c0_88 = arith.constant 0 : index
    %c0_89 = arith.constant 0 : index
    %73 = vector.load %arg8[%c0_88, %c0_89] : memref<256x128xf32, #tpu.memory_space<vmem>>, vector<256x128xf32>
    tpu.vector_store %arg8[%c0_88, %c0_89], %72 {strides = array<i32>} : memref<256x128xf32, #tpu.memory_space<vmem>>, vector<256x128xf32>,
    %c0_90 = arith.constant 0 : index
    %c2_91 = arith.constant 2 : index
    %c2_92 = arith.constant 2 : index
    %c0_93 = arith.constant 0 : index
    %74 = vector.load %arg1[%c0_90, %c2_91, %c2_92, %c0_93] : memref<1x18x18x128xbf16, #tpu.memory_space<vmem>>, vector<1x16x16x128xbf16>
    %75 = vector.shape_cast %74 : vector<1x16x16x128xbf16> to vector<16x16x128xbf16>
    %76 = vector.shape_cast %75 : vector<16x16x128xbf16> to vector<256x128xbf16>
    %c0_94 = arith.constant 0 : index
    %c0_95 = arith.constant 0 : index
    %77 = vector.load %arg8[%c0_94, %c0_95] : memref<256x128xf32, #tpu.memory_space<vmem>>, vector<256x128xf32>
    %c8 = arith.constant 8 : index
    %c0_96 = arith.constant 0 : index
    %c0_97 = arith.constant 0 : index
    %78 = vector.load %arg2[%c8, %c0_96, %c0_97] : memref<9x128x128xbf16, #tpu.memory_space<vmem>>, vector<1x128x128xbf16>
    %79 = vector.shape_cast %78 : vector<1x128x128xbf16> to vector<128x128xbf16>
    %cst_98 = arith.constant dense<0.000000e+00> : vector<256x128xf32>
    %80 = tpu.matmul %76, %79, %cst_98 {dimension_numbers = #tpu.dot_dimension_numbers<[1], [0], [0], [1], [0, 0, 1, 1], [], []>} : vector<256x128xbf16>, vector<128x128xbf16>, vector<256x128xf32> -> vector<256x128xf32>
    %81 = arith.addf %77, %80 : vector<256x128xf32>
    %c0_99 = arith.constant 0 : index
    %c0_100 = arith.constant 0 : index
    %82 = vector.load %arg8[%c0_99, %c0_100] : memref<256x128xf32, #tpu.memory_space<vmem>>, vector<256x128xf32>
    tpu.vector_store %arg8[%c0_99, %c0_100], %81 {strides = array<i32>} : memref<256x128xf32, #tpu.memory_space<vmem>>, vector<256x128xf32>,
    %c0_101 = arith.constant 0 : index
    %c0_102 = arith.constant 0 : index
    %83 = vector.load %arg8[%c0_101, %c0_102] : memref<256x128xf32, #tpu.memory_space<vmem>>, vector<256x128xf32>
    %c0_103 = arith.constant 0 : index
    %c0_104 = arith.constant 0 : index
    %84 = vector.load %arg3[%c0_103, %c0_104] : memref<1x128xf32, #tpu.memory_space<vmem>>, vector<1x128xf32>
    %85 = vector.broadcast %84 : vector<1x128xf32> to vector<256x128xf32>
    %86 = arith.addf %83, %85 : vector<256x128xf32>
    %cst_105 = arith.constant 0.000000e+00 : f32
    %87 = vector.broadcast %cst_105 : f32 to vector<256x128xf32>
    %88 = arith.maximumf %86, %87 : vector<256x128xf32>
    %cst_106 = arith.constant 0.000000e+00 : bf16
    %89 = vector.broadcast %cst_106 : bf16 to vector<18x18x128xbf16>
    %c0_107 = arith.constant 0 : index
    %c0_108 = arith.constant 0 : index
    %c0_109 = arith.constant 0 : index
    %90 = vector.load %arg7[%c0_107, %c0_108, %c0_109] : memref<18x18x128xbf16, #tpu.memory_space<vmem>>, vector<18x18x128xbf16>
    tpu.vector_store %arg7[%c0_107, %c0_108, %c0_109], %89 {strides = array<i32>} : memref<18x18x128xbf16, #tpu.memory_space<vmem>>, vector<18x18x128xbf16>,
    %91 = vector.shape_cast %88 : vector<256x128xf32> to vector<16x16x128xf32>
    %92 = arith.truncf %91 : vector<16x16x128xf32> to vector<16x16x128xbf16>
    %c1_110 = arith.constant 1 : index
    %c1_111 = arith.constant 1 : index
    %c0_112 = arith.constant 0 : index
    %93 = vector.load %arg7[%c1_110, %c1_111, %c0_112] : memref<18x18x128xbf16, #tpu.memory_space<vmem>>, vector<16x16x128xbf16>
    tpu.vector_store %arg7[%c1_110, %c1_111, %c0_112], %92 {strides = array<i32>} : memref<18x18x128xbf16, #tpu.memory_space<vmem>>, vector<16x16x128xbf16>,
    %cst_113 = arith.constant 0.000000e+00 : f32
    %94 = vector.broadcast %cst_113 : f32 to vector<256x128xf32>
    %c0_114 = arith.constant 0 : index
    %c0_115 = arith.constant 0 : index
    %95 = vector.load %arg8[%c0_114, %c0_115] : memref<256x128xf32, #tpu.memory_space<vmem>>, vector<256x128xf32>
    tpu.vector_store %arg8[%c0_114, %c0_115], %94 {strides = array<i32>} : memref<256x128xf32, #tpu.memory_space<vmem>>, vector<256x128xf32>,
    %c0_116 = arith.constant 0 : index
    %c0_117 = arith.constant 0 : index
    %c0_118 = arith.constant 0 : index
    %96 = vector.load %arg7[%c0_116, %c0_117, %c0_118] : memref<18x18x128xbf16, #tpu.memory_space<vmem>>, vector<16x16x128xbf16>
    %97 = vector.shape_cast %96 : vector<16x16x128xbf16> to vector<256x128xbf16>
    %c0_119 = arith.constant 0 : index
    %c0_120 = arith.constant 0 : index
    %98 = vector.load %arg8[%c0_119, %c0_120] : memref<256x128xf32, #tpu.memory_space<vmem>>, vector<256x128xf32>
    %c0_121 = arith.constant 0 : index
    %c0_122 = arith.constant 0 : index
    %c0_123 = arith.constant 0 : index
    %99 = vector.load %arg4[%c0_121, %c0_122, %c0_123] : memref<9x128x128xbf16, #tpu.memory_space<vmem>>, vector<1x128x128xbf16>
    %100 = vector.shape_cast %99 : vector<1x128x128xbf16> to vector<128x128xbf16>
    %cst_124 = arith.constant dense<0.000000e+00> : vector<256x128xf32>
    %101 = tpu.matmul %97, %100, %cst_124 {dimension_numbers = #tpu.dot_dimension_numbers<[1], [0], [0], [1], [0, 0, 1, 1], [], []>} : vector<256x128xbf16>, vector<128x128xbf16>, vector<256x128xf32> -> vector<256x128xf32>
    %102 = arith.addf %98, %101 : vector<256x128xf32>
    %c0_125 = arith.constant 0 : index
    %c0_126 = arith.constant 0 : index
    %103 = vector.load %arg8[%c0_125, %c0_126] : memref<256x128xf32, #tpu.memory_space<vmem>>, vector<256x128xf32>
    tpu.vector_store %arg8[%c0_125, %c0_126], %102 {strides = array<i32>} : memref<256x128xf32, #tpu.memory_space<vmem>>, vector<256x128xf32>,
    %c0_127 = arith.constant 0 : index
    %c1_128 = arith.constant 1 : index
    %c0_129 = arith.constant 0 : index
    %104 = vector.load %arg7[%c0_127, %c1_128, %c0_129] : memref<18x18x128xbf16, #tpu.memory_space<vmem>>, vector<16x16x128xbf16>
    %105 = vector.shape_cast %104 : vector<16x16x128xbf16> to vector<256x128xbf16>
    %c0_130 = arith.constant 0 : index
    %c0_131 = arith.constant 0 : index
    %106 = vector.load %arg8[%c0_130, %c0_131] : memref<256x128xf32, #tpu.memory_space<vmem>>, vector<256x128xf32>
    %c1_132 = arith.constant 1 : index
    %c0_133 = arith.constant 0 : index
    %c0_134 = arith.constant 0 : index
    %107 = vector.load %arg4[%c1_132, %c0_133, %c0_134] : memref<9x128x128xbf16, #tpu.memory_space<vmem>>, vector<1x128x128xbf16>
    %108 = vector.shape_cast %107 : vector<1x128x128xbf16> to vector<128x128xbf16>
    %cst_135 = arith.constant dense<0.000000e+00> : vector<256x128xf32>
    %109 = tpu.matmul %105, %108, %cst_135 {dimension_numbers = #tpu.dot_dimension_numbers<[1], [0], [0], [1], [0, 0, 1, 1], [], []>} : vector<256x128xbf16>, vector<128x128xbf16>, vector<256x128xf32> -> vector<256x128xf32>
    %110 = arith.addf %106, %109 : vector<256x128xf32>
    %c0_136 = arith.constant 0 : index
    %c0_137 = arith.constant 0 : index
    %111 = vector.load %arg8[%c0_136, %c0_137] : memref<256x128xf32, #tpu.memory_space<vmem>>, vector<256x128xf32>
    tpu.vector_store %arg8[%c0_136, %c0_137], %110 {strides = array<i32>} : memref<256x128xf32, #tpu.memory_space<vmem>>, vector<256x128xf32>,
    %c0_138 = arith.constant 0 : index
    %c2_139 = arith.constant 2 : index
    %c0_140 = arith.constant 0 : index
    %112 = vector.load %arg7[%c0_138, %c2_139, %c0_140] : memref<18x18x128xbf16, #tpu.memory_space<vmem>>, vector<16x16x128xbf16>
    %113 = vector.shape_cast %112 : vector<16x16x128xbf16> to vector<256x128xbf16>
    %c0_141 = arith.constant 0 : index
    %c0_142 = arith.constant 0 : index
    %114 = vector.load %arg8[%c0_141, %c0_142] : memref<256x128xf32, #tpu.memory_space<vmem>>, vector<256x128xf32>
    %c2_143 = arith.constant 2 : index
    %c0_144 = arith.constant 0 : index
    %c0_145 = arith.constant 0 : index
    %115 = vector.load %arg4[%c2_143, %c0_144, %c0_145] : memref<9x128x128xbf16, #tpu.memory_space<vmem>>, vector<1x128x128xbf16>
    %116 = vector.shape_cast %115 : vector<1x128x128xbf16> to vector<128x128xbf16>
    %cst_146 = arith.constant dense<0.000000e+00> : vector<256x128xf32>
    %117 = tpu.matmul %113, %116, %cst_146 {dimension_numbers = #tpu.dot_dimension_numbers<[1], [0], [0], [1], [0, 0, 1, 1], [], []>} : vector<256x128xbf16>, vector<128x128xbf16>, vector<256x128xf32> -> vector<256x128xf32>
    %118 = arith.addf %114, %117 : vector<256x128xf32>
    %c0_147 = arith.constant 0 : index
    %c0_148 = arith.constant 0 : index
    %119 = vector.load %arg8[%c0_147, %c0_148] : memref<256x128xf32, #tpu.memory_space<vmem>>, vector<256x128xf32>
    tpu.vector_store %arg8[%c0_147, %c0_148], %118 {strides = array<i32>} : memref<256x128xf32, #tpu.memory_space<vmem>>, vector<256x128xf32>,
    %c1_149 = arith.constant 1 : index
    %c0_150 = arith.constant 0 : index
    %c0_151 = arith.constant 0 : index
    %120 = vector.load %arg7[%c1_149, %c0_150, %c0_151] : memref<18x18x128xbf16, #tpu.memory_space<vmem>>, vector<16x16x128xbf16>
    %121 = vector.shape_cast %120 : vector<16x16x128xbf16> to vector<256x128xbf16>
    %c0_152 = arith.constant 0 : index
    %c0_153 = arith.constant 0 : index
    %122 = vector.load %arg8[%c0_152, %c0_153] : memref<256x128xf32, #tpu.memory_space<vmem>>, vector<256x128xf32>
    %c3_154 = arith.constant 3 : index
    %c0_155 = arith.constant 0 : index
    %c0_156 = arith.constant 0 : index
    %123 = vector.load %arg4[%c3_154, %c0_155, %c0_156] : memref<9x128x128xbf16, #tpu.memory_space<vmem>>, vector<1x128x128xbf16>
    %124 = vector.shape_cast %123 : vector<1x128x128xbf16> to vector<128x128xbf16>
    %cst_157 = arith.constant dense<0.000000e+00> : vector<256x128xf32>
    %125 = tpu.matmul %121, %124, %cst_157 {dimension_numbers = #tpu.dot_dimension_numbers<[1], [0], [0], [1], [0, 0, 1, 1], [], []>} : vector<256x128xbf16>, vector<128x128xbf16>, vector<256x128xf32> -> vector<256x128xf32>
    %126 = arith.addf %122, %125 : vector<256x128xf32>
    %c0_158 = arith.constant 0 : index
    %c0_159 = arith.constant 0 : index
    %127 = vector.load %arg8[%c0_158, %c0_159] : memref<256x128xf32, #tpu.memory_space<vmem>>, vector<256x128xf32>
    tpu.vector_store %arg8[%c0_158, %c0_159], %126 {strides = array<i32>} : memref<256x128xf32, #tpu.memory_space<vmem>>, vector<256x128xf32>,
    %c1_160 = arith.constant 1 : index
    %c1_161 = arith.constant 1 : index
    %c0_162 = arith.constant 0 : index
    %128 = vector.load %arg7[%c1_160, %c1_161, %c0_162] : memref<18x18x128xbf16, #tpu.memory_space<vmem>>, vector<16x16x128xbf16>
    %129 = vector.shape_cast %128 : vector<16x16x128xbf16> to vector<256x128xbf16>
    %c0_163 = arith.constant 0 : index
    %c0_164 = arith.constant 0 : index
    %130 = vector.load %arg8[%c0_163, %c0_164] : memref<256x128xf32, #tpu.memory_space<vmem>>, vector<256x128xf32>
    %c4_165 = arith.constant 4 : index
    %c0_166 = arith.constant 0 : index
    %c0_167 = arith.constant 0 : index
    %131 = vector.load %arg4[%c4_165, %c0_166, %c0_167] : memref<9x128x128xbf16, #tpu.memory_space<vmem>>, vector<1x128x128xbf16>
    %132 = vector.shape_cast %131 : vector<1x128x128xbf16> to vector<128x128xbf16>
    %cst_168 = arith.constant dense<0.000000e+00> : vector<256x128xf32>
    %133 = tpu.matmul %129, %132, %cst_168 {dimension_numbers = #tpu.dot_dimension_numbers<[1], [0], [0], [1], [0, 0, 1, 1], [], []>} : vector<256x128xbf16>, vector<128x128xbf16>, vector<256x128xf32> -> vector<256x128xf32>
    %134 = arith.addf %130, %133 : vector<256x128xf32>
    %c0_169 = arith.constant 0 : index
    %c0_170 = arith.constant 0 : index
    %135 = vector.load %arg8[%c0_169, %c0_170] : memref<256x128xf32, #tpu.memory_space<vmem>>, vector<256x128xf32>
    tpu.vector_store %arg8[%c0_169, %c0_170], %134 {strides = array<i32>} : memref<256x128xf32, #tpu.memory_space<vmem>>, vector<256x128xf32>,
    %c1_171 = arith.constant 1 : index
    %c2_172 = arith.constant 2 : index
    %c0_173 = arith.constant 0 : index
    %136 = vector.load %arg7[%c1_171, %c2_172, %c0_173] : memref<18x18x128xbf16, #tpu.memory_space<vmem>>, vector<16x16x128xbf16>
    %137 = vector.shape_cast %136 : vector<16x16x128xbf16> to vector<256x128xbf16>
    %c0_174 = arith.constant 0 : index
    %c0_175 = arith.constant 0 : index
    %138 = vector.load %arg8[%c0_174, %c0_175] : memref<256x128xf32, #tpu.memory_space<vmem>>, vector<256x128xf32>
    %c5_176 = arith.constant 5 : index
    %c0_177 = arith.constant 0 : index
    %c0_178 = arith.constant 0 : index
    %139 = vector.load %arg4[%c5_176, %c0_177, %c0_178] : memref<9x128x128xbf16, #tpu.memory_space<vmem>>, vector<1x128x128xbf16>
    %140 = vector.shape_cast %139 : vector<1x128x128xbf16> to vector<128x128xbf16>
    %cst_179 = arith.constant dense<0.000000e+00> : vector<256x128xf32>
    %141 = tpu.matmul %137, %140, %cst_179 {dimension_numbers = #tpu.dot_dimension_numbers<[1], [0], [0], [1], [0, 0, 1, 1], [], []>} : vector<256x128xbf16>, vector<128x128xbf16>, vector<256x128xf32> -> vector<256x128xf32>
    %142 = arith.addf %138, %141 : vector<256x128xf32>
    %c0_180 = arith.constant 0 : index
    %c0_181 = arith.constant 0 : index
    %143 = vector.load %arg8[%c0_180, %c0_181] : memref<256x128xf32, #tpu.memory_space<vmem>>, vector<256x128xf32>
    tpu.vector_store %arg8[%c0_180, %c0_181], %142 {strides = array<i32>} : memref<256x128xf32, #tpu.memory_space<vmem>>, vector<256x128xf32>,
    %c2_182 = arith.constant 2 : index
    %c0_183 = arith.constant 0 : index
    %c0_184 = arith.constant 0 : index
    %144 = vector.load %arg7[%c2_182, %c0_183, %c0_184] : memref<18x18x128xbf16, #tpu.memory_space<vmem>>, vector<16x16x128xbf16>
    %145 = vector.shape_cast %144 : vector<16x16x128xbf16> to vector<256x128xbf16>
    %c0_185 = arith.constant 0 : index
    %c0_186 = arith.constant 0 : index
    %146 = vector.load %arg8[%c0_185, %c0_186] : memref<256x128xf32, #tpu.memory_space<vmem>>, vector<256x128xf32>
    %c6_187 = arith.constant 6 : index
    %c0_188 = arith.constant 0 : index
    %c0_189 = arith.constant 0 : index
    %147 = vector.load %arg4[%c6_187, %c0_188, %c0_189] : memref<9x128x128xbf16, #tpu.memory_space<vmem>>, vector<1x128x128xbf16>
    %148 = vector.shape_cast %147 : vector<1x128x128xbf16> to vector<128x128xbf16>
    %cst_190 = arith.constant dense<0.000000e+00> : vector<256x128xf32>
    %149 = tpu.matmul %145, %148, %cst_190 {dimension_numbers = #tpu.dot_dimension_numbers<[1], [0], [0], [1], [0, 0, 1, 1], [], []>} : vector<256x128xbf16>, vector<128x128xbf16>, vector<256x128xf32> -> vector<256x128xf32>
    %150 = arith.addf %146, %149 : vector<256x128xf32>
    %c0_191 = arith.constant 0 : index
    %c0_192 = arith.constant 0 : index
    %151 = vector.load %arg8[%c0_191, %c0_192] : memref<256x128xf32, #tpu.memory_space<vmem>>, vector<256x128xf32>
    tpu.vector_store %arg8[%c0_191, %c0_192], %150 {strides = array<i32>} : memref<256x128xf32, #tpu.memory_space<vmem>>, vector<256x128xf32>,
    %c2_193 = arith.constant 2 : index
    %c1_194 = arith.constant 1 : index
    %c0_195 = arith.constant 0 : index
    %152 = vector.load %arg7[%c2_193, %c1_194, %c0_195] : memref<18x18x128xbf16, #tpu.memory_space<vmem>>, vector<16x16x128xbf16>
    %153 = vector.shape_cast %152 : vector<16x16x128xbf16> to vector<256x128xbf16>
    %c0_196 = arith.constant 0 : index
    %c0_197 = arith.constant 0 : index
    %154 = vector.load %arg8[%c0_196, %c0_197] : memref<256x128xf32, #tpu.memory_space<vmem>>, vector<256x128xf32>
    %c7_198 = arith.constant 7 : index
    %c0_199 = arith.constant 0 : index
    %c0_200 = arith.constant 0 : index
    %155 = vector.load %arg4[%c7_198, %c0_199, %c0_200] : memref<9x128x128xbf16, #tpu.memory_space<vmem>>, vector<1x128x128xbf16>
    %156 = vector.shape_cast %155 : vector<1x128x128xbf16> to vector<128x128xbf16>
    %cst_201 = arith.constant dense<0.000000e+00> : vector<256x128xf32>
    %157 = tpu.matmul %153, %156, %cst_201 {dimension_numbers = #tpu.dot_dimension_numbers<[1], [0], [0], [1], [0, 0, 1, 1], [], []>} : vector<256x128xbf16>, vector<128x128xbf16>, vector<256x128xf32> -> vector<256x128xf32>
    %158 = arith.addf %154, %157 : vector<256x128xf32>
    %c0_202 = arith.constant 0 : index
    %c0_203 = arith.constant 0 : index
    %159 = vector.load %arg8[%c0_202, %c0_203] : memref<256x128xf32, #tpu.memory_space<vmem>>, vector<256x128xf32>
    tpu.vector_store %arg8[%c0_202, %c0_203], %158 {strides = array<i32>} : memref<256x128xf32, #tpu.memory_space<vmem>>, vector<256x128xf32>,
    %c2_204 = arith.constant 2 : index
    %c2_205 = arith.constant 2 : index
    %c0_206 = arith.constant 0 : index
    %160 = vector.load %arg7[%c2_204, %c2_205, %c0_206] : memref<18x18x128xbf16, #tpu.memory_space<vmem>>, vector<16x16x128xbf16>
    %161 = vector.shape_cast %160 : vector<16x16x128xbf16> to vector<256x128xbf16>
    %c0_207 = arith.constant 0 : index
    %c0_208 = arith.constant 0 : index
    %162 = vector.load %arg8[%c0_207, %c0_208] : memref<256x128xf32, #tpu.memory_space<vmem>>, vector<256x128xf32>
    %c8_209 = arith.constant 8 : index
    %c0_210 = arith.constant 0 : index
    %c0_211 = arith.constant 0 : index
    %163 = vector.load %arg4[%c8_209, %c0_210, %c0_211] : memref<9x128x128xbf16, #tpu.memory_space<vmem>>, vector<1x128x128xbf16>
    %164 = vector.shape_cast %163 : vector<1x128x128xbf16> to vector<128x128xbf16>
    %cst_212 = arith.constant dense<0.000000e+00> : vector<256x128xf32>
    %165 = tpu.matmul %161, %164, %cst_212 {dimension_numbers = #tpu.dot_dimension_numbers<[1], [0], [0], [1], [0, 0, 1, 1], [], []>} : vector<256x128xbf16>, vector<128x128xbf16>, vector<256x128xf32> -> vector<256x128xf32>
    %166 = arith.addf %162, %165 : vector<256x128xf32>
    %c0_213 = arith.constant 0 : index
    %c0_214 = arith.constant 0 : index
    %167 = vector.load %arg8[%c0_213, %c0_214] : memref<256x128xf32, #tpu.memory_space<vmem>>, vector<256x128xf32>
    tpu.vector_store %arg8[%c0_213, %c0_214], %166 {strides = array<i32>} : memref<256x128xf32, #tpu.memory_space<vmem>>, vector<256x128xf32>,
    %c0_215 = arith.constant 0 : index
    %c1_216 = arith.constant 1 : index
    %c1_217 = arith.constant 1 : index
    %c0_218 = arith.constant 0 : index
    %168 = vector.load %arg1[%c0_215, %c1_216, %c1_217, %c0_218] : memref<1x18x18x128xbf16, #tpu.memory_space<vmem>>, vector<1x16x16x128xbf16>
    %169 = vector.shape_cast %168 : vector<1x16x16x128xbf16> to vector<16x16x128xbf16>
    %170 = vector.shape_cast %169 : vector<16x16x128xbf16> to vector<256x128xbf16>
    %c0_219 = arith.constant 0 : index
    %c0_220 = arith.constant 0 : index
    %171 = vector.load %arg8[%c0_219, %c0_220] : memref<256x128xf32, #tpu.memory_space<vmem>>, vector<256x128xf32>
    %c0_221 = arith.constant 0 : index
    %c0_222 = arith.constant 0 : index
    %172 = vector.load %arg5[%c0_221, %c0_222] : memref<1x128xf32, #tpu.memory_space<vmem>>, vector<1x128xf32>
    %173 = vector.broadcast %172 : vector<1x128xf32> to vector<256x128xf32>
    %174 = arith.addf %171, %173 : vector<256x128xf32>
    %175 = arith.extf %170 : vector<256x128xbf16> to vector<256x128xf32>
    %176 = arith.addf %174, %175 : vector<256x128xf32>
    %cst_223 = arith.constant 0.000000e+00 : f32
    %177 = vector.broadcast %cst_223 : f32 to vector<256x128xf32>
    %178 = arith.maximumf %176, %177 : vector<256x128xf32>
    %179 = vector.shape_cast %178 : vector<256x128xf32> to vector<1x16x16x128xf32>
    %c0_224 = arith.constant 0 : index
    %c0_225 = arith.constant 0 : index
    %c0_226 = arith.constant 0 : index
    %c0_227 = arith.constant 0 : index
    %180 = vector.load %arg6[%c0_224, %c0_225, %c0_226, %c0_227] : memref<1x16x16x128xf32, #tpu.memory_space<vmem>>, vector<1x16x16x128xf32>
    tpu.vector_store %arg6[%c0_224, %c0_225, %c0_226, %c0_227], %179 {strides = array<i32>} : memref<1x16x16x128xf32, #tpu.memory_space<vmem>>, vector<1x16x16x128xf32>,
    return
  }
  func.func @transform_0(%arg0: i32) -> (i32, i32, i32, i32) {
    %c0_i32 = arith.constant 0 : i32
    %c0_i32_0 = arith.constant 0 : i32
    %c0_i32_1 = arith.constant 0 : i32
    %c0_i32_2 = arith.constant 0 : i32
    return %arg0, %c0_i32, %c0_i32_0, %c0_i32_1 : i32, i32, i32, i32
  }
  func.func @transform_1(%arg0: i32) -> (i32, i32, i32) {
    %c0_i32 = arith.constant 0 : i32
    %c0_i32_0 = arith.constant 0 : i32
    %c0_i32_1 = arith.constant 0 : i32
    %c0_i32_2 = arith.constant 0 : i32
    return %c0_i32, %c0_i32_0, %c0_i32_1 : i32, i32, i32
  }
  func.func @transform_2(%arg0: i32) -> (i32, i32) {
    %c0_i32 = arith.constant 0 : i32
    %c0_i32_0 = arith.constant 0 : i32
    %c0_i32_1 = arith.constant 0 : i32
    return %c0_i32, %c0_i32_0 : i32, i32
  }
  func.func @transform_3(%arg0: i32) -> (i32, i32, i32) {
    %c0_i32 = arith.constant 0 : i32
    %c0_i32_0 = arith.constant 0 : i32
    %c0_i32_1 = arith.constant 0 : i32
    %c0_i32_2 = arith.constant 0 : i32
    return %c0_i32, %c0_i32_0, %c0_i32_1 : i32, i32, i32
  }
  func.func @transform_4(%arg0: i32) -> (i32, i32) {
    %c0_i32 = arith.constant 0 : i32
    %c0_i32_0 = arith.constant 0 : i32
    %c0_i32_1 = arith.constant 0 : i32
    return %c0_i32, %c0_i32_0 : i32, i32
  }
  func.func @transform_5(%arg0: i32) -> (i32, i32, i32, i32) {
    %c0_i32 = arith.constant 0 : i32
    %c0_i32_0 = arith.constant 0 : i32
    %c0_i32_1 = arith.constant 0 : i32
    %c0_i32_2 = arith.constant 0 : i32
    return %arg0, %c0_i32, %c0_i32_0, %c0_i32_1 : i32, i32, i32, i32
  }
}

</mosaic_0001>

<bundles_post_ra>
// kernel: basic_block_forward.1
= control target key start
LH: loop header
LB: loop body
LE: loop exit
PB: predicated region body
PF: predicated region fallthrough
CT: control target
= control target key end

     0   :  { %s16143_s18 = smov 0   ;;  %s18793_s0 = inlined_call_operand.vmem [shape: bf16[2,18,18,128], index: 0, kind: input, shape index: {}]   ;;  %s18794_s1 = inlined_call_operand.vmem [shape: bf16[9,128,128], index: 1, kind: input, shape index: {}]   ;;  %s18795_s2 = inlined_call_operand.vmem [shape: f32[1,128], index: 2, kind: input, shape index: {}]   ;;  %s18796_s3 = inlined_call_operand.vmem [shape: bf16[9,128,128], index: 3, kind: input, shape index: {}]   ;;  %s18797_s4 = inlined_call_operand.vmem [shape: f32[1,128], index: 4, kind: input, shape index: {}]   ;;  %s18798_s5 = inlined_call_operand.vmem [shape: f32[2,16,16,128], index: 5, kind: output, shape index: {}]  }
   0x1 LB: > { %s12881_s19 = sadd.s32 4294967295, %s16110_s18   ;;  %p12885_p0 = scmp.ge.s32.totalorder %s16110_s18, 1  ;;  %s16110_s18 = sphi %s16143_s18, %s15_s18  }
   0x2   : > { %p187_p1 = scmp.lt.s32.totalorder %s16110_s18, 3 }
   0x4   : > { %p188_p2 = pnand %p12885_p0, %p187_p1 }
   0x5   : > { %v15864_v0 = vld [vmem:[%s18794_s1] sm:$0xff] (!%p188_p2)   ;;  %p215_p3 = scmp.lt.s32.totalorder (!%p188_p2), %s12881_s19, 1  ;;  %v15865_v1 = vld [vmem:[%s18794_s1 + $0x8] sm:$0xff] (!%p188_p2)   ;;  %v15866_v2 = vld [vmem:[%s18794_s1 + $0x10] sm:$0xff] (!%p188_p2)   ;;  %vm755_vm0 = vsmask.f32 (!%p188_p2), 3328 }
   0x6   : > { %191 = sbr.rel (%p188_p2) target bundleno = 1590 (0x636), region = 40  ;;  %14478 = vmatprep.subr.bf16.mxu0 (!%p188_p2), %v15864_v0  ;;  %v15867_v3 = vld [vmem:[%s18794_s1 + $0x18] sm:$0xff] (!%p188_p2)   ;;  %v15868_v5 = vld [vmem:[%s18794_s1 + $0x20] sm:$0xff] (!%p188_p2)   ;;  %v15869_v6 = vld [vmem:[%s18794_s1 + $0x28] sm:$0xff] (!%p188_p2)   ;;  %vm756_vm1 = vsmask.f32 (!%p188_p2), 7440 }
   0x7   : > { %14479 = vmatpush3.bf16.msra.mxu0 (!%p188_p2), %v15864_v0  ;;  %v15870_v7 = vld [vmem:[%s18794_s1 + $0x30] sm:$0xff] (!%p188_p2)   ;;  %v15871_v8 = vld [vmem:[%s18794_s1 + $0x38] sm:$0xff] (!%p188_p2)   ;;  %v15874_v9 = vld [vmem:[%s18794_s1 + $0x40] sm:$0xff] (!%p188_p2)   ;;  %vm1624_vm3 = vcmask (!%p188_p2), 1042432   ;;  %vm1625_vm4 = vcmask (!%p188_p2), 1046532   ;;  %vm6428_vm6 = vcmask (!%p188_p2), 1043456  }
   0x8   : > { %14480 = vmatprep.subr.bf16.mxu0 (!%p188_p2), %v15865_v1  ;;  %v15877_v12 = vld [vmem:[%s18794_s1 + $0x48] sm:$0xff] (!%p188_p2)   ;;  %v15880_v13 = vld [vmem:[%s18794_s1 + $0x50] sm:$0xff] (!%p188_p2)   ;;  %v15883_v16 = vld [vmem:[%s18794_s1 + $0x58] sm:$0xff] (!%p188_p2)   ;;  %vm6429_vm7 = vsmask.f32 (!%p188_p2), 7938  ;;  %vm6435_vm10 = vcmask (!%p188_p2), 1040384  }
   0x9   : > { %v15886_v17 = vld [vmem:[%s18794_s1 + $0x60] sm:$0xff] (!%p188_p2)   ;;  %v15889_v20 = vld [vmem:[%s18794_s1 + $0x68] sm:$0xff] (!%p188_p2)   ;;  %v15892_v21 = vld [vmem:[%s18794_s1 + $0x70] sm:$0xff] (!%p188_p2)   ;;  %vm6104_vm8 = vsmask.f32 (!%p188_p2), 256 }
   0xa   : > { %v15895_v24 = vld [vmem:[%s18794_s1 + $0x78] sm:$0xff] (!%p188_p2)   ;;  %v16223_v29 = vld [vmem:[%s18794_s1 + $0x80] sm:$0xff] (!%p188_p2)   ;;  %vm16248_vm2 = vmor (!%p188_p2), %vm755_vm0, %vm756_vm1  ;;  %vm6105_vm9 = vsmask.f32 (!%p188_p2), 4368 }
   0xb   : > { %14481 = vmatpush3.bf16.msra.mxu0 (!%p188_p2), %v15865_v1  ;;  %vm16467_vm5 = vmor (!%p188_p2), %vm1624_vm3, %vm1625_vm4 }
   0xc   : > { %14482 = vmatprep.subr.bf16.mxu0 (!%p188_p2), %v15866_v2  ;;  %vm17539_vm11 = vmand (!%p188_p2), %vm6428_vm6, %vm6429_vm7 }
   0xd   : > { %s18810_s19 = smov (!%p215_p3, %s12881_s19), 1  ;;  %vm17546_vm12 = vmor %vm6104_vm8, %vm6105_vm9 }
   0xe   : > { %s15854_s26 = smul.u32 216, %s18810_s19  ;;  %vm17552_vm13 = vmand %vm6435_vm10, %vm6104_vm8  ;;  %s14013_s30 = sshll.u32 %s18810_s19, 8 }
   0xf   : > { %14483 = vmatpush3.bf16.msra.mxu0 %v15866_v2  ;;  %s18614_s7 = scalar_lea.vmem %s18798_s5, %s14013_s30 }
  0x10   : > { %s16166_s29 = scalar_lea.vmem %s18793_s0, %s15854_s26  ;;  %14484 = vmatprep.subr.bf16.mxu0 %v15867_v3 }
  0x11   : > { %v15872_v4 = vld [vmem:[%s16166_s29] sm:$0xff]   ;;  %v15873_v10 = vld [vmem:[%s16166_s29 + $0xc] sm:$0xff]   ;;  %v15875_v11 = vld [vmem:[%s16166_s29 + $0x18] sm:$0xff]  }
  0x12   : > { %14494 = vmatprep.mubr.bf16.mxu0 %v15872_v4  ;;  %v15876_v14 = vld [vmem:[%s16166_s29 + $0x24] sm:$0xff]   ;;  %v15878_v15 = vld [vmem:[%s16166_s29 + $0x30] sm:$0xff]   ;;  %v15879_v18 = vld [vmem:[%s16166_s29 + $0x3c] sm:$0xff]  }
  0x13   : > { %14485 = vmatpush3.bf16.msra.mxu0 %v15867_v3  ;;  %v15881_v19 = vld [vmem:[%s16166_s29 + $0x48] sm:$0xff]   ;;  %v15882_v22 = vld [vmem:[%s16166_s29 + $0x54] sm:$0xff]   ;;  %v15884_v23 = vld [vmem:[%s16166_s29 + $0x60] sm:$0xff]  }
  0x14   : > { %14486 = vmatprep.subr.bf16.mxu0 %v15868_v5  ;;  %v707_v25 = vld [vmem:[%s16166_s29] sm:$0xf]  ;;  %v708_v26 = vld [vmem:[%s16166_s29 + $0x4] sm:$0xf]  ;;  %v710_v27 = vld [vmem:[%s16166_s29 + $0xc] sm:$0xf] }
  0x15   : > { %v711_v28 = vld [vmem:[%s16166_s29 + $0x10] sm:$0xf]  ;;  %v713_v31 = vld [vmem:[%s16166_s29 + $0x18] sm:$0xf]  ;;  %v759_v32 = vshrl.u32 %v707_v25, 16  ;;  %v762_v33 = vshll.u32 %v707_v25, 16 }
  0x16   : > { %v15885_v30 = vld [vmem:[%s16166_s29 + $0x6c] sm:$0xff]   ;;  %v768_v34 = vshll.u32 %v708_v26, 16  ;;  %v772_v35 = vshrl.u32 %v708_v26, 16  ;;  %v714_v36 = vld [vmem:[%s16166_s29 + $0x1c] sm:$0xf]  ;;  %v783_v38 = vshrl.u32 %v710_v27, 16 }
  0x17   : > { %14487 = vmatpush3.bf16.msra.mxu0 %v15868_v5  ;;  %v15887_v37 = vld [vmem:[%s16166_s29 + $0x78] sm:$0xff]   ;;  %v786_v39 = vshll.u32 %v710_v27, 16  ;;  %v792_v40 = vshll.u32 %v711_v28, 16  ;;  %v796_v41 = vshrl.u32 %v711_v28, 16  ;;  %v807_v42 = vshrl.u32 %v713_v31, 16  ;;  %v15888_v58 = vld [vmem:[%s16166_s29 + $0x84] sm:$0xff]  }
  0x18   : > { %14488 = vmatprep.subr.bf16.mxu0 %v15869_v6  ;;  %v810_v43 = vshll.u32 %v713_v31, 16  ;;  %v816_v44 = vshll.u32 %v714_v36, 16  ;;  %v820_v45 = vshrl.u32 %v714_v36, 16  ;;  %v709_v46 = vld [vmem:[%s16166_s29 + $0x8] sm:$0x1]  ;;  %v761_v47 = vrot.slane %v759_v32, 4 }
  0x19   : > { %v764_v48 = vrot.slane %v762_v33, 5  ;;  %v16231_v49 = vrot.slane %v768_v34, 5  ;;  %v774_v50 = vrot.slane %v772_v35, 4  ;;  %v785_v51 = vrot.slane %v783_v38, 4  ;;  %v716_v57 = vld [vmem:[%s16166_s29 + $0x24] sm:$0xf] }
  0x1a   : > { %v788_v52 = vrot.slane %v786_v39, 5  ;;  %v16233_v53 = vrot.slane %v792_v40, 5  ;;  %v798_v54 = vrot.slane %v796_v41, 4  ;;  %v809_v55 = vrot.slane %v807_v42, 4  ;;  %v712_v59 = vld [vmem:[%s16166_s29 + $0x14] sm:$0x1] }
  0x1b   : > { %14489 = vmatpush3.bf16.msra.mxu0 %v15869_v6  ;;  %v812_v56 = vrot.slane %v810_v43, 5  ;;  %v16238_v60 = vrot.slane %v816_v44, 5  ;;  %v822_v61 = vrot.slane %v820_v45, 4  ;;  %v15890_v62 = vld [vmem:[%s16166_s29 + $0x90] sm:$0xff]   ;;  %v765_v63 = vor.u32 %v764_v48, %v761_v47  ;;  %v715_v2 = vld [vmem:[%s16166_s29 + $0x20] sm:$0x1] }
  0x1c   : > { %14490 = vmatprep.subr.bf16.mxu0 %v15870_v7  ;;  %v775_v0 = vor.u32 %v774_v50, %v16231_v49  ;;  %v778_v1 = vshll.u32 %v709_v46, 16  ;;  %v717_v3 = vld [vmem:[%s16166_s29 + $0x28] sm:$0xf]  ;;  %v831_v4 = vshrl.u32 %v716_v57, 16  ;;  %v834_v5 = vshll.u32 %v716_v57, 16  ;;  %v15891_v27 = vld [vmem:[%s16166_s29 + $0x9c] sm:$0xff]  }
  0x1d   : > { %v789_v6 = vor.u32 %v788_v52, %v785_v51  ;;  %v720_v26 = vld [vmem:[%s16166_s29 + $0x34] sm:$0xf]  ;;  %v722_v36 = vld [vmem:[%s16166_s29 + $0x3c] sm:$0xf]  ;;  %v15893_v38 = vld [vmem:[%s16166_s29 + $0xa8] sm:$0xff]  }
  0x1e   : > { %v864_v41 = vshll.u32 %v720_v26, 16  ;;  %v868_v42 = vshrl.u32 %v720_v26, 16  ;;  %v882_v50 = vshll.u32 %v722_v36, 16  ;;  %v725_v51 = vld [vmem:[%s16166_s29 + $0x48] sm:$0xf] }
  0x1f   : > { %14491 = vmatpush3.bf16.msra.mxu0 %v15870_v7  ;;  %v799_v7 = vor.u32 %v798_v54, %v16233_v53  ;;  %v726_v52 = vld [vmem:[%s16166_s29 + $0x4c] sm:$0xf] }
  0x20   : > { %14492 = vmatprep.subr.bf16.mxu0 %v15871_v8 }
  0x23   : > { %14493 = vmatpush3.bf16.msra.mxu0 %v15871_v8  ;;  %v802_v8 = vshll.u32 %v712_v59, 16 }
  0x24   : > { %14526 = vmatprep.subr.bf16.mxu0 %v15874_v9 }
  0x26   : > { %14495 = vmatmul.mubr.bf16.vlgmr.msra.gmra.mrb[0].mxu0 %v15873_v10  ;;  %v823_v10 = vor.u32 %v822_v61, %v16238_v60  ;;  %v870_v61 = vrot.slane %v868_v42, 4 }
  0x27   : > { %14527 = vmatpush3.bf16.msra.mxu0 %v15874_v9  ;;  %14498 = vmatprep.mubr.bf16.mxu0 %v15875_v11  ;;  %v813_v9 = vor.u32 %v812_v56, %v809_v55  ;;  %v826_v11 = vshll.u32 %v715_v2, 16  ;;  %v916_v2 = vshrl.u32 %v726_v52, 16 }
  0x28   : > { %14528 = vmatprep.subr.bf16.mxu0 %v15877_v12  ;;  %v824_v28 = vrot.slane %v823_v10, 4 }
  0x29   : > { %v814_v25 = vrot.slane %v813_v9, 4  ;;  %v724_v9 = vld [vmem:[%s16166_s29 + $0x44] sm:$0x1] }
  0x2b   : > { %14529 = vmatpush3.bf16.msra.mxu0 %v15877_v12  ;;  %v840_v12 = vshll.u32 %v717_v3, 16  ;;  %v819_v46 = vsel %vm16248_vm2, %v814_v25, %v16238_v60  ;;  %v16284_v60 = vrot.slane %v864_v41, 5 }
  0x2c   : > { %14530 = vmatprep.subr.bf16.mxu0 %v15880_v13 }
  0x2d   : > { %v16256_v31 = vrot.slane %v840_v12, 5 }
  0x2e   : > { %14499 = vmatmul.mubr.bf16.gmra.mrb[4].mxu0 %v15876_v14  ;;  %v766_v14 = vrot.slane %v765_v63, 4  ;;  %v903_v63 = vshrl.u32 %v725_v51, 16 }
  0x2f   : > { %14502 = vmatprep.mubr.bf16.mxu0 %v15878_v15  ;;  %14531 = vmatpush3.bf16.msra.mxu0 %v15880_v13  ;;  %v844_v13 = vshrl.u32 %v717_v3, 16  ;;  %v776_v15 = vrot.slane %v775_v0, 4  ;;  %v906_v0 = vshll.u32 %v725_v51, 16 }
  0x30   : > { %14532 = vmatprep.subr.bf16.mxu0 %v15883_v16  ;;  %v771_v33 = vsel %vm16248_vm2, %v766_v14, %v16231_v49  ;;  %v879_v49 = vshrl.u32 %v722_v36, 16 }
  0x31   : > { %v846_v32 = vrot.slane %v844_v13, 4 }
  0x33   : > { %14533 = vmatpush3.bf16.msra.mxu0 %v15883_v16  ;;  %v780_v16 = vrot.slane %v778_v1, 5  ;;  %v847_v48 = vor.u32 %v846_v32, %v16256_v31  ;;  %v912_v1 = vshll.u32 %v726_v52, 16 }
  0x34   : > { %14534 = vmatprep.subr.bf16.mxu0 %v15886_v17 }
  0x35   : > { %v781_v43 = vsel %vm16248_vm2, %v776_v15, %v780_v16  ;;  %v16287_v3 = vrot.slane %v847_v48, 4  ;;  %v871_v15 = vor.u32 %v870_v61, %v16284_v60  ;;  %v727_v16 = vld [vmem:[%s16166_s29 + $0x50] sm:$0x1]  ;;  %v734_v48 = vld [vmem:[%s16166_s29 + $0x6c] sm:$0xf] }
  0x36   : > { %14503 = vmatmul.mubr.bf16.gmra.mrb[8].mxu0 %v15879_v18  ;;  %v718_v18 = vld [vmem:[%s16166_s29 + $0x2c] sm:$0x1] }
  0x37   : > { %14506 = vmatprep.mubr.bf16.mxu0 %v15881_v19  ;;  %14535 = vmatpush3.bf16.msra.mxu0 %v15886_v17  ;;  %v833_v19 = vrot.slane %v831_v4, 4  ;;  %v850_v34 = vshll.u32 %v718_v18, 16  ;;  %v728_v18 = vld [vmem:[%s16166_s29 + $0x54] sm:$0xf] }
  0x38   : > { %14536 = vmatprep.subr.bf16.mxu0 %v15889_v20 }
  0x39   : > { %v16279_v54 = vrot.slane %v850_v34, 5  ;;  %v927_v34 = vshrl.u32 %v728_v18, 16 }
  0x3b   : > { %14537 = vmatpush3.bf16.msra.mxu0 %v15889_v20  ;;  %v836_v20 = vrot.slane %v834_v5, 5  ;;  %v881_v5 = vrot.slane %v879_v49, 4  ;;  %v853_v25 = vsel %vm16248_vm2, %v16287_v3, %v16279_v54  ;;  %v929_v51 = vrot.slane %v927_v34, 4 }
  0x3c   : > { %14538 = vmatprep.subr.bf16.mxu0 %v15892_v21 }
  0x3d   : > { %v837_v39 = vor.u32 %v836_v20, %v833_v19  ;;  %v729_v19 = vld [vmem:[%s16166_s29 + $0x58] sm:$0xf]  ;;  %v905_v20 = vrot.slane %v903_v63, 4 }
  0x3e   : > { %14507 = vmatmul.mubr.bf16.gmra.mrb[12].mxu0 %v15882_v22  ;;  %v790_v22 = vrot.slane %v789_v6, 4  ;;  %v884_v6 = vrot.slane %v882_v50, 5  ;;  %v936_v36 = vshll.u32 %v729_v19, 16 }
  0x3f   : > { %14510 = vmatprep.mubr.bf16.mxu0 %v15884_v23  ;;  %14539 = vmatpush3.bf16.msra.mxu0 %v15892_v21  ;;  %v719_v21 = vld [vmem:[%s16166_s29 + $0x30] sm:$0xf]  ;;  %v800_v23 = vrot.slane %v799_v7, 4  ;;  %v12929_v7 = vcombine.low %v771_v33, %v781_v43  ;;  %v922_v33 = vshll.u32 %v727_v16, 16 }
  0x40   : > { %14540 = vmatprep.subr.bf16.mxu0 %v15895_v24  ;;  %v855_v35 = vshrl.u32 %v719_v21, 16  ;;  %v858_v40 = vshll.u32 %v719_v21, 16  ;;  %v795_v44 = vsel %vm16248_vm2, %v790_v22, %v16233_v53  ;;  %v721_v53 = vld [vmem:[%s16166_s29 + $0x38] sm:$0x1]  ;;  %v908_v21 = vrot.slane %v906_v0, 5 }
  0x41   : > { %v874_v4 = vshll.u32 %v721_v53, 16  ;;  %v16300_v22 = vrot.slane %v912_v1, 5  ;;  %v924_v50 = vrot.slane %v922_v33, 5  ;;  %v735_v53 = vld [vmem:[%s16166_s29 + $0x70] sm:$0xf] }
  0x42   : > { %v857_v55 = vrot.slane %v855_v35, 4  ;;  %v860_v59 = vrot.slane %v858_v40, 5  ;;  %v930_v35 = vshll.u32 %v728_v18, 16  ;;  %v909_v40 = vor.u32 %v908_v21, %v905_v20  ;;  %v730_v0 = vld [vmem:[%s16166_s29 + $0x5c] sm:$0x1]  ;;  %v15898_v21 = vld [vmem:[%s18794_s1 + $0x90] sm:$0xff]  }
  0x43   : > { %14541 = vmatpush3.bf16.msra.mxu0 %v15895_v24  ;;  %v804_v24 = vrot.slane %v802_v8, 5  ;;  %v16307_v26 = vrot.slane %v874_v4, 5  ;;  %v733_v4 = vld [vmem:[%s16166_s29 + $0x68] sm:$0x1]  ;;  %v737_v20 = vld [vmem:[%s16166_s29 + $0x78] sm:$0xf] }
  0x44   : > { %14574 = vmatprep.subr.bf16.mxu0 %v16223_v29  ;;  %v861_v14 = vor.u32 %v860_v59, %v857_v55  ;;  %v932_v52 = vrot.slane %v930_v35, 5  ;;  %v15897_v55 = vld [vmem:[%s18794_s1 + $0x88] sm:$0xff]   ;;  %v738_v33 = vld [vmem:[%s16166_s29 + $0x7c] sm:$0xf]  ;;  %v999_v34 = vshrl.u32 %v737_v20, 16  ;;  %v1002_v35 = vshll.u32 %v737_v20, 16 }
  0x45   : > { %v805_v45 = vsel %vm16248_vm2, %v800_v23, %v804_v24  ;;  %v918_v23 = vrot.slane %v916_v2, 4  ;;  %v731_v24 = vld [vmem:[%s16166_s29 + $0x60] sm:$0xf] }
  0x46   : > { %14511 = vmatmul.mubr.bf16.gmra.mrb[16].mxu0 %v15885_v30  ;;  %v828_v30 = vrot.slane %v826_v11, 5  ;;  %v12930_v8 = vcombine.low %v795_v44, %v805_v45  ;;  %v862_v44 = vrot.slane %v861_v14, 4  ;;  %v872_v45 = vrot.slane %v871_v15, 4 }
  0x47   : > { %14514 = vmatprep.mubr.bf16.mxu0 %v15887_v37  ;;  %v723_v37 = vld [vmem:[%s16166_s29 + $0x40] sm:$0xf]  ;;  %v919_v41 = vor.u32 %v918_v23, %v16300_v22  ;;  %v933_v18 = vor.u32 %v932_v52, %v929_v51  ;;  %v970_v23 = vshll.u32 %v733_v4, 16 }
  0x48   : > { %v829_v47 = vsel %vm16248_vm2, %v824_v28, %v828_v30  ;;  %v888_v56 = vshll.u32 %v723_v37, 16  ;;  %v892_v57 = vshrl.u32 %v723_v37, 16  ;;  %v898_v28 = vshll.u32 %v724_v9, 16  ;;  %v732_v30 = vld [vmem:[%s16166_s29 + $0x64] sm:$0xf] }
  0x49   : > { %v12931_v12 = vcombine.low %v819_v46, %v829_v47  ;;  %v940_v37 = vshrl.u32 %v729_v19, 16  ;;  %v960_v42 = vshll.u32 %v732_v30, 16  ;;  %v964_v43 = vshrl.u32 %v732_v30, 16 }
  0x4a   : > { %v16290_v10 = vrot.slane %v888_v56, 5  ;;  %v894_v11 = vrot.slane %v892_v57, 4  ;;  %v900_v47 = vrot.slane %v898_v28, 5  ;;  %v16317_v56 = vrot.slane %v936_v36, 5 }
  0x4b   : > { %v942_v57 = vrot.slane %v940_v37, 4  ;;  %v920_v63 = vrot.slane %v919_v41, 4  ;;  %v16320_v1 = vrot.slane %v960_v42, 5  ;;  %v966_v2 = vrot.slane %v964_v43, 4  ;;  %v740_v42 = vld [vmem:[%s16166_s29 + $0x84] sm:$0xf] }
  0x4c   : > { %v895_v32 = vor.u32 %v894_v11, %v16290_v10  ;;  %v988_v9 = vshrl.u32 %v735_v53, 16  ;;  %v867_v11 = vsel %vm16248_vm2, %v862_v44, %v16284_v60  ;;  %v877_v14 = vsel %vm16248_vm2, %v872_v45, %v16307_v26  ;;  %v741_v43 = vld [vmem:[%s16166_s29 + $0x88] sm:$0xf]  ;;  %v15900_v44 = vld [vmem:[%s18794_s1 + $0xa0] sm:$0xff]  }
  0x4d   : > { %v946_v19 = vshll.u32 %v730_v0, 16  ;;  %v12933_v30 = vcombine.low %v867_v11, %v877_v14  ;;  %v934_v36 = vrot.slane %v933_v18, 4  ;;  %v16370_v45 = vld [vmem:[%s16166_s29 + $0x80] sm:$0x1]  ;;  %v742_v11 = vld [vmem:[%s16166_s29 + $0x8c] sm:$0x1] }
  0x4e   : > { %14515 = vmatmul.mubr.bf16.gmra.mrb[20].mxu0 %v15888_v58  ;;  %v16282_v58 = vrot.slane %v837_v39, 4  ;;  %v954_v39 = vshll.u32 %v731_v24, 16  ;;  %v896_v49 = vrot.slane %v895_v32, 4  ;;  %v990_v28 = vrot.slane %v988_v9, 4  ;;  %v736_v32 = vld [vmem:[%s16166_s29 + $0x74] sm:$0x1] }
  0x4f   : > { %14518 = vmatprep.mubr.bf16.mxu0 %v15890_v62  ;;  %v15894_v62 = vld [vmem:[%s16166_s29 + $0xb4] sm:$0xff]   ;;  %v994_v41 = vshll.u32 %v736_v32, 16  ;;  %v746_v9 = vld [vmem:[%s16166_s29 + $0x9c] sm:$0xf] }
  0x50   : > { %v843_v13 = vsel %vm16248_vm2, %v16282_v58, %v16256_v31  ;;  %v956_v61 = vrot.slane %v954_v39, 5  ;;  %v901_v16 = vsel %vm16248_vm2, %v896_v49, %v900_v47  ;;  %v15899_v31 = vld [vmem:[%s18794_s1 + $0x98] sm:$0xff]   ;;  %v972_v58 = vrot.slane %v970_v23, 5 }
  0x51   : > { %v1004_v47 = vrot.slane %v1002_v35, 5  ;;  %v1012_v49 = vshrl.u32 %v738_v33, 16  ;;  %v1071_v23 = vshrl.u32 %v746_v9, 16 }
  0x56   : > { %14519 = vmatmul.mubr.bf16.gmra.mrb[24].mxu0 %v15891_v27  ;;  %v885_v27 = vor.u32 %v884_v6, %v881_v5  ;;  %v975_v5 = vshrl.u32 %v734_v48, 16  ;;  %v978_v6 = vshll.u32 %v734_v48, 16  ;;  %v1008_v48 = vshll.u32 %v738_v33, 16 }
  0x57   : > { %14522 = vmatprep.mubr.bf16.mxu0 %v15893_v38  ;;  %v951_v38 = vshrl.u32 %v731_v24, 16 }
  0x58   : > { %v886_v46 = vrot.slane %v885_v27, 4  ;;  %v977_v24 = vrot.slane %v975_v5, 4  ;;  %v980_v26 = vrot.slane %v978_v6, 5  ;;  %v16390_v4 = vrot.slane %v1008_v48, 5 }
  0x59   : > { %v953_v59 = vrot.slane %v951_v38, 4  ;;  %v948_v38 = vrot.slane %v946_v19, 5  ;;  %v1014_v5 = vrot.slane %v1012_v49, 4  ;;  %v1018_v6 = vshll.u32 %v16370_v45, 16  ;;  %v751_v49 = vld [vmem:[%s16166_s29 + $0xb0] sm:$0x1] }
  0x5a   : > { %v891_v15 = vsel %vm16248_vm2, %v886_v46, %v16290_v10  ;;  %v1001_v46 = vrot.slane %v999_v34, 4 }
  0x5b   : > { %v957_v60 = vor.u32 %v956_v61, %v953_v59  ;;  %v12934_v54 = vcombine.low %v891_v15, %v901_v16  ;;  %v1026_v59 = vshll.u32 %v740_v42, 16  ;;  %v1032_v61 = vshll.u32 %v741_v43, 16 }
  0x5d   : > { %v958_v39 = vrot.slane %v957_v60, 4  ;;  %v1028_v60 = vrot.slane %v1026_v59, 5  ;;  %v16399_v20 = vrot.slane %v1032_v61, 5 }
  0x5e   : > { %14523 = vmatmul.mubr.bf16.gmra.mrb[28].mxu0 %v15894_v62  ;;  %v910_v62 = vrot.slane %v909_v40, 4 }
  0x5f   : > { %14542 = vmatprep.mubr.bf16.mxu0 %v12929_v7  ;;  %v984_v7 = vshll.u32 %v735_v53, 16  ;;  %v963_v52 = vsel %vm16248_vm2, %v958_v39, %v16320_v1  ;;  %v743_v53 = vld [vmem:[%s16166_s29 + $0x90] sm:$0xf] }
  0x60   : > { %v915_v10 = vsel %vm16248_vm2, %v910_v62, %v16300_v22  ;;  %v12932_v22 = vcombine.low %v843_v13, %v853_v25  ;;  %v981_v25 = vor.u32 %v980_v26, %v977_v24  ;;  %v1036_v62 = vshrl.u32 %v741_v43, 16  ;;  %v15902_v39 = vld [vmem:[%s18794_s1 + $0xb0] sm:$0xff]  }
  0x61   : > { %v16346_v27 = vrot.slane %v984_v7, 5  ;;  %v15901_v7 = vld [vmem:[%s18794_s1 + $0xa8] sm:$0xff]   ;;  %v1047_v14 = vshrl.u32 %v743_v53, 16  ;;  %v1050_v15 = vshll.u32 %v743_v53, 16  ;;  %v1074_v24 = vshll.u32 %v746_v9, 16 }
  0x62   : > { %v1114_v9 = vshll.u32 %v751_v49, 16 }
  0x63   : > { %v991_v40 = vor.u32 %v990_v28, %v16346_v27  ;;  %v1015_v28 = vor.u32 %v1014_v5, %v16390_v4  ;;  %v1049_v33 = vrot.slane %v1047_v14, 4  ;;  %v1052_v34 = vrot.slane %v1050_v15, 5  ;;  %v16439_v5 = vld [vmem:[%s18794_s1 + $0xc0] sm:$0xff]  }
  0x65   : > { %v16386_v0 = vrot.slane %v991_v40, 4  ;;  %v1076_v40 = vrot.slane %v1074_v24, 5  ;;  %v1116_v24 = vrot.slane %v1114_v9, 5  ;;  %v1538_v9 = vld [vmem:[%s16166_s29 + $0x28] sm:$0xf] }
  0x66   : > { %14543 = vmatmul.mubr.bf16.vlgmr.msra.gmra.mrb[0].mxu0 %v12930_v8  ;;  %v943_v8 = vor.u32 %v942_v57, %v16317_v56  ;;  %v1023_v57 = vshrl.u32 %v740_v42, 16 }
  0x67   : > { %14575 = vmatpush3.bf16.msra.mxu0 %v16223_v29  ;;  %14546 = vmatprep.mubr.bf16.mxu0 %v12931_v12  ;;  %v925_v29 = vsel %vm16248_vm2, %v920_v63, %v924_v50  ;;  %v967_v12 = vor.u32 %v966_v2, %v16320_v1  ;;  %v939_v50 = vsel %vm16248_vm2, %v934_v36, %v16317_v56  ;;  %v16384_v56 = vrot.slane %v981_v25, 4 }
  0x68   : > { %14576 = vmatprep.subr.bf16.mxu0 %v15897_v55  ;;  %v944_v37 = vrot.slane %v943_v8, 4  ;;  %v12935_v3 = vcombine.low %v915_v10, %v925_v29  ;;  %v16388_v2 = vrot.slane %v994_v41, 5  ;;  %v1005_v1 = vor.u32 %v1004_v47, %v1001_v46  ;;  %v747_v8 = vld [vmem:[%s16166_s29 + $0xa0] sm:$0xf]  ;;  %v749_v10 = vld [vmem:[%s16166_s29 + $0xa8] sm:$0xf] }
  0x69   : > { %v968_v13 = vrot.slane %v967_v12, 4  ;;  %v1025_v19 = vrot.slane %v1023_v57, 4  ;;  %v1084_v32 = vshrl.u32 %v747_v8, 16  ;;  %v1073_v25 = vrot.slane %v1071_v23, 4  ;;  %v752_v57 = vld [vmem:[%s16166_s29 + $0xb4] sm:$0xf] }
  0x6a   : > { %v949_v51 = vsel %vm16248_vm2, %v944_v37, %v948_v38  ;;  %v16402_v26 = vrot.slane %v1005_v1, 4  ;;  %v1042_v38 = vshll.u32 %v742_v11, 16  ;;  %v987_v41 = vsel %vm16248_vm2, %v16384_v56, %v16346_v27  ;;  %v750_v27 = vld [vmem:[%s16166_s29 + $0xac] sm:$0xf] }
  0x6b   : > { %14577 = vmatpush3.bf16.msra.mxu0 %v15897_v55  ;;  %v744_v55 = vld [vmem:[%s16166_s29 + $0x94] sm:$0xf]  ;;  %v973_v63 = vsel %vm16248_vm2, %v968_v13, %v972_v58  ;;  %v12936_v29 = vcombine.low %v939_v50, %v949_v51  ;;  %v1029_v37 = vor.u32 %v1028_v60, %v1025_v19  ;;  %v748_v13 = vld [vmem:[%s16166_s29 + $0xa4] sm:$0x1]  ;;  %v997_v42 = vsel %vm16248_vm2, %v16386_v0, %v16388_v2  ;;  %v15903_v50 = vld [vmem:[%s18794_s1 + $0xb8] sm:$0xff]  }
  0x6c   : > { %14578 = vmatprep.subr.bf16.mxu0 %v15898_v21  ;;  %v1056_v16 = vshll.u32 %v744_v55, 16  ;;  %v1060_v18 = vshrl.u32 %v744_v55, 16  ;;  %v12937_v12 = vcombine.low %v963_v52, %v973_v63  ;;  %v1011_v45 = vsel %vm16248_vm2, %v16402_v26, %v16390_v4  ;;  %v753_v4 = vld [vmem:[%s16166_s29 + $0xb8] sm:$0xf] }
  0x6d   : > { %v1020_v46 = vrot.slane %v1018_v6, 5  ;;  %v1053_v47 = vor.u32 %v1052_v34, %v1049_v33  ;;  %v1016_v51 = vrot.slane %v1015_v28, 4  ;;  %v1090_v52 = vshll.u32 %v748_v13, 16 }
  0x6e   : > { %14547 = vmatmul.mubr.bf16.gmra.mrb[4].mxu0 %v12932_v22  ;;  %v745_v22 = vld [vmem:[%s16166_s29 + $0x98] sm:$0x1]  ;;  %v16406_v35 = vrot.slane %v1056_v16, 5  ;;  %v1062_v36 = vrot.slane %v1060_v18, 4  ;;  %v1030_v59 = vrot.slane %v1029_v37, 4  ;;  %v1077_v56 = vor.u32 %v1076_v40, %v1073_v25 }
  0x6f   : > { %14550 = vmatprep.mubr.bf16.mxu0 %v12933_v30  ;;  %14579 = vmatpush3.bf16.msra.mxu0 %v15898_v21  ;;  %v1038_v21 = vrot.slane %v1036_v62, 4  ;;  %v1080_v30 = vshll.u32 %v747_v8, 16  ;;  %v1044_v62 = vrot.slane %v1042_v38, 5  ;;  %v1104_v2 = vshll.u32 %v750_v27, 16 }
  0x70   : > { %14580 = vmatprep.subr.bf16.mxu0 %v15899_v31  ;;  %v1063_v48 = vor.u32 %v1062_v36, %v16406_v35  ;;  %v1108_v1 = vshrl.u32 %v750_v27, 16  ;;  %v1054_v6 = vrot.slane %v1053_v47, 4  ;;  %v1119_v11 = vshrl.u32 %v752_v57, 16  ;;  %v754_v36 = vld [vmem:[%s16166_s29 + $0xbc] sm:$0x1] }
  0x71   : > { %v1039_v58 = vor.u32 %v1038_v21, %v16399_v20  ;;  %v16421_v43 = vrot.slane %v1080_v30, 5  ;;  %v1021_v14 = vsel %vm16248_vm2, %v1016_v51, %v1020_v46  ;;  %v1092_v15 = vrot.slane %v1090_v52, 5 }
  0x72   : > { %v1122_v18 = vshll.u32 %v752_v57, 16  ;;  %v12938_v8 = vcombine.low %v987_v41, %v997_v42  ;;  %v1128_v19 = vshll.u32 %v753_v4, 16  ;;  %v1132_v60 = vshrl.u32 %v753_v4, 16  ;;  %v1534_v4 = vld [vmem:[%s16166_s29 + $0x18] sm:$0xe] }
  0x73   : > { %14581 = vmatpush3.bf16.msra.mxu0 %v15899_v31  ;;  %v1098_v31 = vshll.u32 %v749_v10, 16  ;;  %v1040_v61 = vrot.slane %v1039_v58, 4  ;;  %v1078_v21 = vrot.slane %v1077_v56, 4  ;;  %v12939_v23 = vcombine.low %v1011_v45, %v1021_v14  ;;  %v1528_v58 = vld [vmem:[%s16166_s29] sm:$0xe] }
  0x74   : > { %14582 = vmatprep.subr.bf16.mxu0 %v15900_v44  ;;  %v1121_v26 = vrot.slane %v1119_v11, 4  ;;  %v1130_v30 = vrot.slane %v1128_v19, 5  ;;  %v1035_v33 = vsel %vm16248_vm2, %v1030_v59, %v16399_v20  ;;  %v1059_v37 = vsel %vm16248_vm2, %v1054_v6, %v16406_v35  ;;  %v1531_v59 = vld [vmem:[%s16166_s29 + $0xc] sm:$0xe]  ;;  %v1536_v6 = vld [vmem:[%s16166_s29 + $0x20] sm:$0x1] }
  0x75   : > { %v1100_v55 = vrot.slane %v1098_v31, 5  ;;  %v1045_v34 = vsel %vm16248_vm2, %v1040_v61, %v1044_v62  ;;  %v1138_v20 = vshll.u32 %v754_v36, 16  ;;  %v1083_v35 = vsel %vm16248_vm2, %v1078_v21, %v16421_v43  ;;  %v1533_v61 = vld [vmem:[%s16166_s29 + $0x14] sm:$0x1] }
  0x76   : > { %14551 = vmatmul.mubr.bf16.gmra.mrb[8].mxu0 %v12934_v54  ;;  %v1095_v54 = vshrl.u32 %v749_v10, 16  ;;  %v12940_v31 = vcombine.low %v1035_v33, %v1045_v34  ;;  %v12953_v45 = vrot.slane %v1528_v58, 9  ;;  %v12954_v14 = vrot.slane %v1531_v59, 9  ;;  %v1544_v34 = vld [vmem:[%s16166_s29 + $0x40] sm:$0xf] }
  0x77   : > { %14554 = vmatprep.mubr.bf16.mxu0 %v12935_v3  ;;  %14583 = vmatpush3.bf16.msra.mxu0 %v15900_v44  ;;  %v1066_v3 = vshll.u32 %v745_v22, 16  ;;  %v1086_v44 = vrot.slane %v1084_v32, 4  ;;  %v1124_v22 = vrot.slane %v1122_v18, 5  ;;  %v1134_v32 = vrot.slane %v1132_v60, 4  ;;  %v1541_v60 = vld [vmem:[%s16166_s29 + $0x34] sm:$0xf] }
  0x78   : > { %14584 = vmatprep.subr.bf16.mxu0 %v15901_v7  ;;  %v1097_v53 = vrot.slane %v1095_v54, 4  ;;  %v1529_v54 = vld [vmem:[%s16166_s29 + $0x4] sm:$0xf]  ;;  %v1140_v49 = vrot.slane %v1138_v20, 5  ;;  %v12955_v18 = vrot.slane %v1534_v4, 9  ;;  %v1646_v19 = vrot.slane %v1536_v6, 5 }
  0x79   : > { %v1068_v63 = vrot.slane %v1066_v3, 5  ;;  %v1087_v0 = vor.u32 %v1086_v44, %v16421_v43  ;;  %v1530_v3 = vld [vmem:[%s16166_s29 + $0x8] sm:$0x1]  ;;  %v1125_v40 = vor.u32 %v1124_v22, %v1121_v26  ;;  %v1135_v41 = vor.u32 %v1134_v32, %v1130_v30  ;;  %v1539_v26 = vld [vmem:[%s16166_s29 + $0x2c] sm:$0x1]  ;;  %v15908_v6 = vld [vmem:[%s18794_s1 + $0xe0] sm:$0xff]  }
  0x7a   : > { %v1101_v16 = vor.u32 %v1100_v55, %v1097_v53  ;;  %v1629_v42 = vrot.slane %v1529_v54, 5  ;;  %v1632_v46 = vrot.slane %v1530_v3, 5  ;;  %v1532_v53 = vld [vmem:[%s16166_s29 + $0x10] sm:$0xf]  ;;  %v1535_v55 = vld [vmem:[%s16166_s29 + $0x1c] sm:$0xf] }
  0x7b   : > { %14585 = vmatpush3.bf16.msra.mxu0 %v15901_v7  ;;  %v1064_v7 = vrot.slane %v1063_v48, 4  ;;  %v1088_v10 = vrot.slane %v1087_v0, 4  ;;  %v1126_v27 = vrot.slane %v1125_v40, 4  ;;  %v1636_v56 = vrot.slane %v1532_v53, 5  ;;  %v1540_v22 = vld [vmem:[%s16166_s29 + $0x30] sm:$0xe] }
  0x7c   : > { %14586 = vmatprep.subr.bf16.mxu0 %v15902_v39  ;;  %v1102_v28 = vrot.slane %v1101_v16, 4  ;;  %v1631_v43 = vrot.slane %v1629_v42, 4  ;;  %v1643_v0 = vrot.slane %v1535_v55, 5  ;;  %v1639_v16 = vrot.slane %v1533_v61, 5  ;;  %v1547_v3 = vld [vmem:[%s16166_s29 + $0x4c] sm:$0xf] }
  0x7d   : > { %v1069_v38 = vsel %vm16248_vm2, %v1064_v7, %v1068_v63  ;;  %v1093_v44 = vsel %vm16248_vm2, %v1088_v10, %v1092_v15  ;;  %v1131_v62 = vsel %vm16248_vm2, %v1126_v27, %v1130_v30  ;;  %v1638_v15 = vrot.slane %v1636_v56, 4  ;;  %v1542_v30 = vld [vmem:[%s16166_s29 + $0x38] sm:$0x1]  ;;  %v1543_v40 = vld [vmem:[%s16166_s29 + $0x3c] sm:$0xe] }
  0x7e   : > { %14555 = vmatmul.mubr.bf16.gmra.mrb[12].mxu0 %v12936_v29  ;;  %v1106_v29 = vrot.slane %v1104_v2, 5  ;;  %v12941_v13 = vcombine.low %v1059_v37, %v1069_v38  ;;  %v12942_v52 = vcombine.low %v1083_v35, %v1093_v44  ;;  %v1630_v2 = vsel %vm16467_vm5, %v12953_v45, %v1629_v42  ;;  %v1545_v35 = vld [vmem:[%s16166_s29 + $0x44] sm:$0x1]  ;;  %v1546_v45 = vld [vmem:[%s16166_s29 + $0x48] sm:$0xe] }
  0x7f   : > { %14558 = vmatprep.mubr.bf16.mxu0 %v12937_v12  ;;  %14587 = vmatpush3.bf16.msra.mxu0 %v15902_v39  ;;  %v1110_v12 = vrot.slane %v1108_v1, 4  ;;  %v1633_v1 = vsel %vm16467_vm5, %v1631_v43, %v1632_v46  ;;  %v1637_v21 = vsel %vm16467_vm5, %v12954_v14, %v1636_v56  ;;  %v1640_v10 = vsel %vm16467_vm5, %v1638_v15, %v1639_v16  ;;  %v1548_v46 = vld [vmem:[%s16166_s29 + $0x50] sm:$0x1]  ;;  %v1550_v43 = vld [vmem:[%s16166_s29 + $0x58] sm:$0xf] }
  0x80   : > { %14588 = vmatprep.subr.bf16.mxu0 %v15903_v50  ;;  %v1107_v47 = vsel %vm16248_vm2, %v1102_v28, %v1106_v29  ;;  %v12985_v11 = vcombine.low %v1630_v2, %v1633_v1  ;;  %v1657_v28 = vrot.slane %v1541_v60, 5  ;;  %v12986_v32 = vcombine.low %v1637_v21, %v1640_v10  ;;  %v1553_v59 = vld [vmem:[%s16166_s29 + $0x64] sm:$0xf]  ;;  %v1549_v61 = vld [vmem:[%s16166_s29 + $0x54] sm:$0xe]  ;;  %v15909_v10 = vld [vmem:[%s18794_s1 + $0xe8] sm:$0xff]  }
  0x81   : > { %v1111_v39 = vor.u32 %v1110_v12, %v1106_v29  ;;  %v1537_v29 = vld [vmem:[%s16166_s29 + $0x24] sm:$0xe]  ;;  %v1650_v12 = vrot.slane %v1538_v9, 5  ;;  %v1653_v38 = vrot.slane %v1539_v26, 5  ;;  %v12957_v54 = vrot.slane %v1540_v22, 9 }
  0x82   : > { %v12956_v33 = vrot.slane %v1537_v29, 9  ;;  %v1660_v58 = vrot.slane %v1542_v30, 5  ;;  %v1664_v20 = vrot.slane %v1544_v34, 5  ;;  %v1671_v44 = vrot.slane %v1547_v3, 5  ;;  %v1554_v9 = vld [vmem:[%s16166_s29 + $0x68] sm:$0x1] }
  0x83   : > { %14589 = vmatpush3.bf16.msra.mxu0 %v15903_v50  ;;  %v1112_v25 = vrot.slane %v1111_v39, 4  ;;  %v1136_v50 = vrot.slane %v1135_v41, 4  ;;  %v1652_v37 = vrot.slane %v1650_v12, 4  ;;  %v15905_v39 = vld [vmem:[%s18794_s1 + $0xc8] sm:$0xff]   ;;  %v1658_v41 = vsel %vm16467_vm5, %v12957_v54, %v1657_v28  ;;  %v1559_v29 = vld [vmem:[%s16166_s29 + $0x7c] sm:$0xf] }
  0x84   : > { %14622 = vmatprep.subr.bf16.mxu0 %v16439_v5  ;;  %v12958_v27 = vrot.slane %v1543_v40, 9  ;;  %v1673_v53 = vrot.slane %v1671_v44, 4  ;;  %v1674_v55 = vrot.slane %v1548_v46, 5  ;;  %v1685_v4 = vrot.slane %v1553_v59, 5  ;;  %v1557_v30 = vld [vmem:[%s16166_s29 + $0x74] sm:$0x1] }
  0x85   : > { %v1117_v48 = vsel %vm16248_vm2, %v1112_v25, %v1116_v24  ;;  %v1141_v63 = vsel %vm16248_vm2, %v1136_v50, %v1140_v49  ;;  %v1654_v25 = vsel %vm16467_vm5, %v1652_v37, %v1653_v38  ;;  %v1666_v49 = vrot.slane %v1664_v20, 4  ;;  %v1558_v34 = vld [vmem:[%s16166_s29 + $0x78] sm:$0xe]  ;;  %v1562_v38 = vld [vmem:[%s16166_s29 + $0x88] sm:$0xf] }
  0x86   : > { %14559 = vmatmul.mubr.bf16.gmra.mrb[16].mxu0 %v12938_v8  ;;  %v12943_v57 = vcombine.low %v1107_v47, %v1117_v48  ;;  %v12944_v7 = vcombine.low %v1131_v62, %v1141_v63  ;;  %v1645_v8 = vrot.slane %v1643_v0, 4  ;;  %v1667_v50 = vrot.slane %v1545_v35, 5  ;;  %v1551_v62 = vld [vmem:[%s16166_s29 + $0x5c] sm:$0x1] }
  0x87   : > { %14562 = vmatprep.mubr.bf16.mxu0 %v12939_v23  ;;  %v1644_v23 = vsel %vm16467_vm5, %v12955_v18, %v1643_v0  ;;  %v1665_v63 = vsel %vm16467_vm5, %v12958_v27, %v1664_v20  ;;  %v1678_v0 = vrot.slane %v1550_v43, 5  ;;  %v1675_v1 = vsel %vm16467_vm5, %v1673_v53, %v1674_v55  ;;  %v15911_v40 = vld [vmem:[%s18794_s1 + $0xf8] sm:$0xff]   ;;  %v1565_v20 = vld [vmem:[%s16166_s29 + $0x94] sm:$0xf]  ;;  %v1564_v27 = vld [vmem:[%s16166_s29 + $0x90] sm:$0xe] }
  0x88   : > { %v1647_v24 = vsel %vm16467_vm5, %v1645_v8, %v1646_v19  ;;  %v1668_v56 = vsel %vm16467_vm5, %v1666_v49, %v1667_v50  ;;  %v12960_v15 = vrot.slane %v1549_v61, 9  ;;  %v1681_v18 = vrot.slane %v1551_v62, 5  ;;  %v1556_v8 = vld [vmem:[%s16166_s29 + $0x70] sm:$0xf]  ;;  %v1566_v49 = vld [vmem:[%s16166_s29 + $0x98] sm:$0x1] }
  0x89   : > { %v12987_v36 = vcombine.low %v1644_v23, %v1647_v24  ;;  %v1680_v16 = vrot.slane %v1678_v0, 4  ;;  %v1687_v60 = vrot.slane %v1685_v4, 4  ;;  %v1688_v21 = vrot.slane %v1554_v9, 5  ;;  %v1555_v24 = vld [vmem:[%s16166_s29 + $0x6c] sm:$0xe] }
  0x8a   : > { %v1692_v26 = vrot.slane %v1556_v8, 5  ;;  %v12962_v54 = vrot.slane %v1555_v24, 9  ;;  %v12963_v3 = vrot.slane %v1558_v34, 9  ;;  %v12965_v59 = vrot.slane %v1564_v27, 9 }
  0x8b   : > { %v1682_v23 = vsel %vm16467_vm5, %v1680_v16, %v1681_v18  ;;  %v1689_v22 = vsel %vm16467_vm5, %v1687_v60, %v1688_v21  ;;  %v1716_v62 = vrot.slane %v1566_v49, 5  ;;  %v1574_v60 = vld [vmem:[%s16166_s29 + $0xb8] sm:$0xf] }
  0x8c   : > { %v1734_v24 = vrot.slane %v1574_v60, 5 }
  0x8e   : > { %14563 = vmatmul.mubr.bf16.gmra.mrb[20].mxu0 %v12940_v31  ;;  %v1659_v31 = vrot.slane %v1657_v28, 4 }
  0x8f   : > { %14566 = vmatprep.mubr.bf16.mxu0 %v12941_v13  ;;  %v1651_v13 = vsel %vm16467_vm5, %v12956_v33, %v1650_v12  ;;  %v1679_v12 = vsel %vm16467_vm5, %v12960_v15, %v1678_v0  ;;  %v15910_v33 = vld [vmem:[%s18794_s1 + $0xf0] sm:$0xff]  }
  0x90   : > { %v1661_v42 = vsel %vm16467_vm5, %v1659_v31, %v1660_v58  ;;  %v12988_v47 = vcombine.low %v1651_v13, %v1654_v25  ;;  %v12992_v37 = vcombine.low %v1679_v12, %v1682_v23  ;;  %v1694_v31 = vrot.slane %v1692_v26, 4 }
  0x91   : > { %v12989_v48 = vcombine.low %v1658_v41, %v1661_v42  ;;  %v1695_v58 = vrot.slane %v1557_v30, 5  ;;  %v1561_v41 = vld [vmem:[%s16166_s29 + $0x84] sm:$0xe]  ;;  %v1693_v42 = vsel %vm16467_vm5, %v12962_v54, %v1692_v26  ;;  %v1575_v30 = vld [vmem:[%s16166_s29 + $0xbc] sm:$0x1] }
  0x93   : > { %v1696_v35 = vsel %vm16467_vm5, %v1694_v31, %v1695_v58  ;;  %v13082_v31 = vld [vmem:[%s16166_s29 + $0x10] sm:$0xf] }
  0x94   : > { %v12994_v50 = vcombine.low %v1693_v42, %v1696_v35  ;;  %v15912_v42 = vld [vmem:[%s16166_s29 + $0xc] sm:$0xff]  }
  0x96   : > { %14567 = vmatmul.mubr.bf16.gmra.mrb[24].mxu0 %v12942_v52  ;;  %v12959_v52 = vrot.slane %v1546_v45, 9 }
  0x97   : > { %14570 = vmatprep.mubr.bf16.mxu0 %v12943_v57  ;;  %v15907_v57 = vld [vmem:[%s18794_s1 + $0xd8] sm:$0xff]  }
  0x98   : > { %v1672_v2 = vsel %vm16467_vm5, %v12959_v52, %v1671_v44  ;;  %v1706_v44 = vrot.slane %v1562_v38, 5  ;;  %v12964_v52 = vrot.slane %v1561_v41, 9  ;;  %v13081_v38 = vld [vmem:[%s16166_s29 + $0xc] sm:$0xf]  ;;  %v2638_v41 = vshrl.u32 %v13082_v31, 16 }
  0x99   : > { %v12991_v14 = vcombine.low %v1672_v2, %v1675_v1  ;;  %v1567_v2 = vld [vmem:[%s16166_s29 + $0x9c] sm:$0xe]  ;;  %v1569_v1 = vld [vmem:[%s16166_s29 + $0xa4] sm:$0x1]  ;;  %v2625_v58 = vshrl.u32 %v13081_v38, 16 }
  0x9a   : > { %v1708_v53 = vrot.slane %v1706_v44, 4  ;;  %v12966_v18 = vrot.slane %v1567_v2, 9 }
  0x9e   : > { %14571 = vmatmul.mubr.bf16.gmra.mrb[28].mxu0 %v12944_v7  ;;  %v1552_v7 = vld [vmem:[%s16166_s29 + $0x60] sm:$0xe] }
  0x9f   : > { %14590 = vmatprep.mubr.bf16.mxu0 %v12985_v11  ;;  %v12990_v11 = vcombine.low %v1665_v63, %v1668_v56  ;;  %v12961_v19 = vrot.slane %v1552_v7, 9  ;;  %v1571_v63 = vld [vmem:[%s16166_s29 + $0xac] sm:$0xf]  ;;  %v1707_v56 = vsel %vm16467_vm5, %v12964_v52, %v1706_v44  ;;  %v13083_v44 = vld [vmem:[%s16166_s29 + $0x14] sm:$0x1] }
  0xa0   : > { %v1727_v9 = vrot.slane %v1571_v63, 5 }
  0xa1   : > { %v1686_v28 = vsel %vm16467_vm5, %v12961_v19, %v1685_v4  ;;  %v1723_v19 = vrot.slane %v1569_v1, 5 }
  0xa6   : > { %14591 = vmatmul.mubr.bf16.vlgmr.msra.gmra.mrb[0].mxu0 %v12986_v32  ;;  %v1699_v32 = vrot.slane %v1559_v29, 5 }
  0xa7   : > { %14623 = vmatpush3.bf16.msra.mxu0 %v16439_v5  ;;  %14594 = vmatprep.mubr.bf16.mxu0 %v12987_v36  ;;  %v15906_v5 = vld [vmem:[%s18794_s1 + $0xd0] sm:$0xff]   ;;  %v1560_v36 = vld [vmem:[%s16166_s29 + $0x80] sm:$0x1] }
  0xa8   : > { %14624 = vmatprep.subr.bf16.mxu0 %v15905_v39  ;;  %v1701_v13 = vrot.slane %v1699_v32, 4  ;;  %v1702_v25 = vrot.slane %v1560_v36, 5  ;;  %v1700_v45 = vsel %vm16467_vm5, %v12963_v3, %v1699_v32  ;;  %v1736_v36 = vrot.slane %v1734_v24, 4 }
  0xa9   : > { %v2628_v3 = vshll.u32 %v13081_v38, 16 }
  0xaa   : > { %v1703_v46 = vsel %vm16467_vm5, %v1701_v13, %v1702_v25  ;;  %v13084_v13 = vld [vmem:[%s16166_s29 + $0x18] sm:$0xf]  ;;  %v13085_v25 = vld [vmem:[%s16166_s29 + $0x1c] sm:$0xf] }
  0xab   : > { %14625 = vmatpush3.bf16.msra.mxu0 %v15905_v39  ;;  %v12993_v39 = vcombine.low %v1686_v28, %v1689_v22  ;;  %v12995_v43 = vcombine.low %v1700_v45, %v1703_v46  ;;  %v1573_v22 = vld [vmem:[%s16166_s29 + $0xb4] sm:$0xe]  ;;  %v2649_v35 = vshrl.u32 %v13084_v13, 16  ;;  %v2658_v45 = vshll.u32 %v13085_v25, 16 }
  0xac   : > { %14626 = vmatprep.subr.bf16.mxu0 %v15906_v5  ;;  %v12968_v34 = vrot.slane %v1573_v22, 9  ;;  %v2662_v46 = vshrl.u32 %v13085_v25, 16  ;;  %v2630_v27 = vrot.slane %v2628_v3, 5 }
  0xad   : > { %v2651_v52 = vrot.slane %v2649_v35, 4 }
  0xae   : > { %14595 = vmatmul.mubr.bf16.gmra.mrb[4].mxu0 %v12988_v47  ;;  %v1713_v47 = vrot.slane %v1565_v20, 5  ;;  %v2634_v20 = vshll.u32 %v13082_v31, 16  ;;  %v2664_v63 = vrot.slane %v2662_v46, 4  ;;  %v13094_v31 = vld [vmem:[%s16166_s29 + $0x40] sm:$0xf] }
  0xaf   : > { %14598 = vmatprep.mubr.bf16.mxu0 %v12989_v48  ;;  %14627 = vmatpush3.bf16.msra.mxu0 %v15906_v5  ;;  %v1563_v5 = vld [vmem:[%s16166_s29 + $0x8c] sm:$0x1]  ;;  %v16578_v48 = vld [vmem:[%s18794_s1 + $0x100] sm:$0xff]   ;;  %v2730_v46 = vshll.u32 %v13094_v31, 16 }
  0xb0   : > { %14628 = vmatprep.subr.bf16.mxu0 %v15907_v57  ;;  %v1709_v55 = vrot.slane %v1563_v5, 5  ;;  %v1715_v61 = vrot.slane %v1713_v47, 4  ;;  %v2652_v5 = vshll.u32 %v13084_v13, 16  ;;  %v16618_v49 = vrot.slane %v2634_v20, 5  ;;  %v15919_v20 = vld [vmem:[%s16166_s29 + $0x48] sm:$0xff]  }
  0xb2   : > { %v1710_v0 = vsel %vm16467_vm5, %v1708_v53, %v1709_v55  ;;  %v1717_v7 = vsel %vm16467_vm5, %v1715_v61, %v1716_v62  ;;  %v2654_v53 = vrot.slane %v2652_v5, 5  ;;  %v15913_v55 = vld [vmem:[%s16166_s29 + $0x18] sm:$0xff]   ;;  %v13087_v61 = vld [vmem:[%s16166_s29 + $0x24] sm:$0xf] }
  0xb3   : > { %14629 = vmatpush3.bf16.msra.mxu0 %v15907_v57  ;;  %v1568_v57 = vld [vmem:[%s16166_s29 + $0xa0] sm:$0xf]  ;;  %v12996_v15 = vcombine.low %v1707_v56, %v1710_v0  ;;  %v15915_v62 = vld [vmem:[%s16166_s29 + $0x24] sm:$0xff]  }
  0xb4   : > { %14630 = vmatprep.subr.bf16.mxu0 %v15908_v6  ;;  %v1720_v4 = vrot.slane %v1568_v57, 5  ;;  %v2644_v57 = vshll.u32 %v13083_v44, 16  ;;  %v15917_v0 = vld [vmem:[%s18794_s1 + $0x108] sm:$0xff]  }
  0xb6   : > { %14599 = vmatmul.mubr.bf16.gmra.mrb[8].mxu0 %v12990_v11  ;;  %v1570_v11 = vld [vmem:[%s16166_s29 + $0xa8] sm:$0xe]  ;;  %v1722_v8 = vrot.slane %v1720_v4, 4  ;;  %v1721_v12 = vsel %vm16467_vm5, %v12966_v18, %v1720_v4  ;;  %v16638_v18 = vrot.slane %v2644_v57, 5 }
  0xb7   : > { %14602 = vmatprep.mubr.bf16.mxu0 %v12991_v14  ;;  %14631 = vmatpush3.bf16.msra.mxu0 %v15908_v6  ;;  %v1714_v6 = vsel %vm16467_vm5, %v12965_v59, %v1713_v47  ;;  %v1572_v14 = vld [vmem:[%s16166_s29 + $0xb0] sm:$0x1]  ;;  %v12967_v21 = vrot.slane %v1570_v11, 9  ;;  %v2627_v47 = vrot.slane %v2625_v58, 4  ;;  %v16622_v59 = vrot.slane %v2658_v45, 5  ;;  %v15921_v45 = vld [vmem:[%s16166_s29 + $0x54] sm:$0xff]  }
  0xb8   : > { %14632 = vmatprep.subr.bf16.mxu0 %v15909_v10  ;;  %v12997_v16 = vcombine.low %v1714_v6, %v1717_v7  ;;  %v1730_v29 = vrot.slane %v1572_v14, 5  ;;  %v1724_v23 = vsel %vm16467_vm5, %v1722_v8, %v1723_v19  ;;  %v13088_v4 = vld [vmem:[%s16166_s29 + $0x28] sm:$0xf]  ;;  %v2655_v6 = vor.u32 %v2654_v53, %v2651_v52  ;;  %v13090_v11 = vld [vmem:[%s16166_s29 + $0x30] sm:$0xf] }
  0xb9   : > { %v1728_v26 = vsel %vm16467_vm5, %v12967_v21, %v1727_v9  ;;  %v12998_v32 = vcombine.low %v1721_v12, %v1724_v23  ;;  %v2631_v2 = vor.u32 %v2630_v27, %v2627_v47  ;;  %v2673_v7 = vshrl.u32 %v13087_v61, 16  ;;  %v15916_v21 = vld [vmem:[%s16166_s29 + $0x30] sm:$0xff]   ;;  %v15929_v27 = vld [vmem:[%s18794_s1 + $0x128] sm:$0xff]  }
  0xba   : > { %v16640_v8 = vrot.slane %v2655_v6, 4  ;;  %v2682_v60 = vshll.u32 %v13088_v4, 16  ;;  %v2686_v23 = vshrl.u32 %v13088_v4, 16  ;;  %v2734_v47 = vshrl.u32 %v13094_v31, 16  ;;  %v13097_v53 = vld [vmem:[%s16166_s29 + $0x4c] sm:$0xf] }
  0xbb   : > { %14633 = vmatpush3.bf16.msra.mxu0 %v15909_v10  ;;  %v1729_v10 = vrot.slane %v1727_v9, 4  ;;  %v2676_v9 = vshll.u32 %v13087_v61, 16  ;;  %v16632_v14 = vrot.slane %v2631_v2, 4  ;;  %v13099_v6 = vld [vmem:[%s16166_s29 + $0x54] sm:$0xf] }
  0xbc   : > { %14634 = vmatprep.subr.bf16.mxu0 %v15910_v33  ;;  %v16658_v38 = vrot.slane %v2682_v60, 5  ;;  %v2736_v4 = vrot.slane %v2734_v47, 4  ;;  %v15927_v47 = vld [vmem:[%s16166_s29 + $0x84] sm:$0xff]  }
  0xbd   : > { %v1731_v28 = vsel %vm16467_vm5, %v1729_v10, %v1730_v29  ;;  %v15920_v10 = vld [vmem:[%s18794_s1 + $0x110] sm:$0xff]   ;;  %v2675_v29 = vrot.slane %v2673_v7, 4  ;;  %v2678_v12 = vrot.slane %v2676_v9, 5  ;;  %v15922_v7 = vld [vmem:[%s16166_s29 + $0x60] sm:$0xff]  }
  0xbe   : > { %14603 = vmatmul.mubr.bf16.gmra.mrb[12].mxu0 %v12992_v37  ;;  %v1737_v37 = vrot.slane %v1575_v30, 5  ;;  %v15923_v30 = vld [vmem:[%s18794_s1 + $0x118] sm:$0xff]   ;;  %v15932_v9 = vld [vmem:[%s18794_s1 + $0x130] sm:$0xff]  }
  0xbf   : > { %14606 = vmatprep.mubr.bf16.mxu0 %v12993_v39  ;;  %14635 = vmatpush3.bf16.msra.mxu0 %v15910_v33  ;;  %v12999_v33 = vcombine.low %v1728_v26, %v1731_v28  ;;  %v1735_v39 = vsel %vm16467_vm5, %v12968_v34, %v1734_v24  ;;  %v15918_v24 = vld [vmem:[%s16166_s29 + $0x3c] sm:$0xff]   ;;  %v13089_v26 = vld [vmem:[%s16166_s29 + $0x2c] sm:$0x1]  ;;  %v2700_v28 = vshll.u32 %v13090_v11, 16  ;;  %v2679_v34 = vor.u32 %v2678_v12, %v2675_v29 }
  0xc0   : > { %14636 = vmatprep.subr.bf16.mxu0 %v15911_v40  ;;  %v1738_v54 = vsel %vm16467_vm5, %v1736_v36, %v1737_v37  ;;  %v13093_v36 = vld [vmem:[%s16166_s29 + $0x3c] sm:$0xf]  ;;  %v2758_v29 = vshrl.u32 %v13097_v53, 16 }
  0xc1   : > { %v16663_v3 = vrot.slane %v2700_v28, 5  ;;  %v2721_v5 = vshrl.u32 %v13093_v36, 16  ;;  %v2724_v44 = vshll.u32 %v13093_v36, 16 }
  0xc2   : > { %v2760_v36 = vrot.slane %v2758_v29, 4  ;;  %v15928_v29 = vld [vmem:[%s16166_s29 + $0x90] sm:$0xff]  }
  0xc3   : > { %14637 = vmatpush3.bf16.msra.mxu0 %v15911_v40  ;;  %v13000_v40 = vcombine.low %v1735_v39, %v1738_v54  ;;  %v2688_v39 = vrot.slane %v2686_v23, 4  ;;  %v2692_v54 = vshll.u32 %v13089_v26, 16  ;;  %v2726_v2 = vrot.slane %v2724_v44, 5  ;;  %v15935_v23 = vld [vmem:[%s18794_s1 + $0x138] sm:$0xff]  }
  0xc4   : > { %14670 = vmatprep.subr.bf16.mxu0 %v16578_v48 }
  0xc5   : > { %v16683_v61 = vrot.slane %v2692_v54, 5 }
  0xc6   : > { %14607 = vmatmul.mubr.bf16.gmra.mrb[16].mxu0 %v12994_v50  ;;  %v2640_v50 = vrot.slane %v2638_v41, 4  ;;  %v15926_v41 = vld [vmem:[%s18794_s1 + $0x120] sm:$0xff]  }
  0xc7   : > { %14610 = vmatprep.mubr.bf16.mxu0 %v12995_v43  ;;  %v13086_v43 = vld [vmem:[%s16166_s29 + $0x20] sm:$0x1] }
  0xc8   : > { %v2668_v56 = vshll.u32 %v13086_v43, 16  ;;  %v2641_v1 = vor.u32 %v2640_v50, %v16618_v49  ;;  %v2689_v50 = vor.u32 %v2688_v39, %v16658_v38  ;;  %v13101_v39 = vld [vmem:[%s16166_s29 + $0x5c] sm:$0x1] }
  0xca   : > { %v16642_v19 = vrot.slane %v2668_v56, 5  ;;  %v16681_v57 = vrot.slane %v2689_v50, 4  ;;  %v13098_v56 = vld [vmem:[%s16166_s29 + $0x50] sm:$0x1]  ;;  %v2788_v50 = vshll.u32 %v13101_v39, 16 }
  0xcb   : > { %v2764_v12 = vshll.u32 %v13098_v56, 16  ;;  %v13104_v56 = vld [vmem:[%s16166_s29 + $0x68] sm:$0x1]  ;;  %v13107_v39 = vld [vmem:[%s16166_s29 + $0x74] sm:$0x1] }
  0xce   : > { %14611 = vmatmul.mubr.bf16.gmra.mrb[20].mxu0 %v12996_v15  ;;  %v16634_v15 = vrot.slane %v2641_v1, 4  ;;  %v16688_v1 = vrot.slane %v2730_v46, 5 }
  0xcf   : > { %14614 = vmatprep.mubr.bf16.mxu0 %v12997_v16  ;;  %v13091_v16 = vld [vmem:[%s16166_s29 + $0x34] sm:$0xf] }
  0xd0   : > { %v2706_v22 = vshll.u32 %v13091_v16, 16  ;;  %v2710_v25 = vshrl.u32 %v13091_v16, 16 }
  0xd2   : > { %v16665_v13 = vrot.slane %v2706_v22, 5 }
  0xd6   : > { %14615 = vmatmul.mubr.bf16.gmra.mrb[24].mxu0 %v12998_v32  ;;  %v2665_v32 = vor.u32 %v2664_v63, %v16622_v59 }
  0xd7   : > { %14618 = vmatprep.mubr.bf16.mxu0 %v12999_v33  ;;  %v13092_v33 = vld [vmem:[%s16166_s29 + $0x38] sm:$0x1] }
  0xd8   : > { %v16656_v37 = vrot.slane %v2665_v32, 4  ;;  %v2716_v35 = vshll.u32 %v13092_v33, 16  ;;  %v13100_v33 = vld [vmem:[%s16166_s29 + $0x58] sm:$0xf] }
  0xd9   : > { %v2778_v46 = vshll.u32 %v13100_v33, 16 }
  0xda   : > { %v16685_v63 = vrot.slane %v2716_v35, 5  ;;  %v16720_v35 = vld [vmem:[%s18794_s1 + $0x140] sm:$0xff]  }
  0xde   : > { %14619 = vmatmul.mubr.bf16.gmra.mrb[28].mxu0 %v13000_v40  ;;  %v13096_v40 = vld [vmem:[%s16166_s29 + $0x48] sm:$0xf] }
  0xdf   : > { %14638 = vmatprep.mubr.bf16.mxu0 %v15912_v42  ;;  %v16672_v42 = vrot.slane %v2679_v34, 4  ;;  %v2745_v43 = vshrl.u32 %v13096_v40, 16  ;;  %v2748_v52 = vshll.u32 %v13096_v40, 16 }
  0xe1   : > { %v2747_v16 = vrot.slane %v2745_v43, 4  ;;  %v2750_v60 = vrot.slane %v2748_v52, 5 }
  0xe3   : > { %v2751_v32 = vor.u32 %v2750_v60, %v2747_v16 }
  0xe5   : > { %v16724_v44 = vrot.slane %v2751_v32, 4 }
  0xe6   : > { %14639 = vmatmul.mubr.bf16.vlgmr.msra.gmra.mrb[0].mxu0 %v15913_v55  ;;  %v13095_v55 = vld [vmem:[%s16166_s29 + $0x44] sm:$0x1] }
  0xe7   : > { %14671 = vmatpush3.bf16.msra.mxu0 %v16578_v48  ;;  %14642 = vmatprep.mubr.bf16.mxu0 %v15915_v62  ;;  %v2697_v48 = vshrl.u32 %v13090_v11, 16  ;;  %v2712_v62 = vrot.slane %v2710_v25, 4  ;;  %v2740_v11 = vshll.u32 %v13095_v55, 16 }
  0xe8   : > { %14672 = vmatprep.subr.bf16.mxu0 %v15917_v0 }
  0xe9   : > { %v16661_v58 = vrot.slane %v2697_v48, 4  ;;  %v2769_v48 = vshrl.u32 %v13099_v6, 16  ;;  %v2713_v28 = vor.u32 %v2712_v62, %v16665_v13  ;;  %v16713_v40 = vrot.slane %v2740_v11, 5 }
  0xea   : > { %v16741_v11 = vrot.slane %v2788_v50, 5 }
  0xeb   : > { %14673 = vmatpush3.bf16.msra.mxu0 %v15917_v0  ;;  %v2723_v0 = vrot.slane %v2721_v5, 4  ;;  %v2703_v26 = vor.u32 %v16663_v3, %v16661_v58  ;;  %v2771_v54 = vrot.slane %v2769_v48, 4  ;;  %v16709_v3 = vrot.slane %v2713_v28, 4 }
  0xec   : > { %14674 = vmatprep.subr.bf16.mxu0 %v15920_v10 }
  0xed   : > { %v2727_v22 = vor.u32 %v2726_v2, %v2723_v0  ;;  %v16707_v58 = vrot.slane %v2703_v26, 4  ;;  %v13105_v0 = vld [vmem:[%s16166_s29 + $0x6c] sm:$0xf]  ;;  %v15930_v26 = vld [vmem:[%s16166_s29 + $0x9c] sm:$0xff]  }
  0xee   : > { %14643 = vmatmul.mubr.bf16.gmra.mrb[4].mxu0 %v15916_v21  ;;  %v2754_v21 = vshll.u32 %v13097_v53, 16  ;;  %v13103_v53 = vld [vmem:[%s16166_s29 + $0x64] sm:$0xf]  ;;  %v2817_v48 = vshrl.u32 %v13105_v0, 16 }
  0xef   : > { %14646 = vmatprep.mubr.bf16.mxu0 %v15918_v24  ;;  %14675 = vmatpush3.bf16.msra.mxu0 %v15920_v10  ;;  %v15924_v10 = vld [vmem:[%s16166_s29 + $0x6c] sm:$0xff]   ;;  %v2772_v24 = vshll.u32 %v13099_v6, 16  ;;  %v16711_v25 = vrot.slane %v2727_v22, 4  ;;  %v16738_v6 = vrot.slane %v2778_v46, 5  ;;  %v13110_v46 = vld [vmem:[%s16166_s29 + $0x80] sm:$0x1] }
  0xf0   : > { %14676 = vmatprep.subr.bf16.mxu0 %v15923_v30  ;;  %v16704_v34 = vrot.slane %v2754_v21, 5  ;;  %v2802_v21 = vshll.u32 %v13103_v53, 16 }
  0xf1   : > { %v2774_v31 = vrot.slane %v2772_v24, 5  ;;  %v2820_v24 = vshll.u32 %v13105_v0, 16 }
  0xf2   : > { %v2761_v43 = vor.u32 %v2760_v36, %v16704_v34  ;;  %v13109_v36 = vld [vmem:[%s16166_s29 + $0x7c] sm:$0xf] }
  0xf3   : > { %14677 = vmatpush3.bf16.msra.mxu0 %v15923_v30  ;;  %v2737_v30 = vor.u32 %v2736_v4, %v16688_v1  ;;  %v2775_v52 = vor.u32 %v2774_v31, %v2771_v54  ;;  %v16751_v31 = vrot.slane %v2802_v21, 5  ;;  %v2850_v0 = vshll.u32 %v13109_v36, 16 }
  0xf4   : > { %14678 = vmatprep.subr.bf16.mxu0 %v15926_v41  ;;  %v16734_v2 = vrot.slane %v2761_v43, 4  ;;  %v2860_v21 = vshll.u32 %v13110_v46, 16 }
  0xf5   : > { %v16722_v5 = vrot.slane %v2737_v30, 4  ;;  %v16736_v4 = vrot.slane %v2775_v52, 4  ;;  %v13111_v52 = vld [vmem:[%s16166_s29 + $0x84] sm:$0xf] }
  0xf6   : > { %14647 = vmatmul.mubr.bf16.gmra.mrb[8].mxu0 %v15919_v20  ;;  %v13102_v20 = vld [vmem:[%s16166_s29 + $0x60] sm:$0xf] }
  0xf7   : > { %14650 = vmatprep.mubr.bf16.mxu0 %v15921_v45  ;;  %14679 = vmatpush3.bf16.msra.mxu0 %v15926_v41  ;;  %v15925_v41 = vld [vmem:[%s16166_s29 + $0x78] sm:$0xff]   ;;  %v16726_v45 = vrot.slane %v2764_v12, 5  ;;  %v2793_v55 = vshrl.u32 %v13102_v20, 16  ;;  %v2796_v62 = vshll.u32 %v13102_v20, 16  ;;  %v2806_v12 = vshrl.u32 %v13103_v53, 16  ;;  %v15931_v53 = vld [vmem:[%s16166_s29 + $0xa8] sm:$0xff]  }
  0xf8   : > { %14680 = vmatprep.subr.bf16.mxu0 %v15929_v27 }
  0xf9   : > { %v2795_v16 = vrot.slane %v2793_v55, 4  ;;  %v2798_v60 = vrot.slane %v2796_v62, 5  ;;  %v2808_v20 = vrot.slane %v2806_v12, 4  ;;  %v2836_v55 = vshll.u32 %v13107_v39, 16 }
  0xfa   : > { %v2865_v12 = vshrl.u32 %v13111_v52, 16 }
  0xfb   : > { %14681 = vmatpush3.bf16.msra.mxu0 %v15929_v27  ;;  %v2782_v27 = vshrl.u32 %v13100_v33, 16 }
  0xfc   : > { %14682 = vmatprep.subr.bf16.mxu0 %v15932_v9 }
  0xfe   : > { %14651 = vmatmul.mubr.bf16.gmra.mrb[12].mxu0 %v15922_v7  ;;  %v2784_v7 = vrot.slane %v2782_v27, 4  ;;  %v2822_v27 = vrot.slane %v2820_v24, 5 }
  0xff   : > { %14654 = vmatprep.mubr.bf16.mxu0 %v15924_v10  ;;  %14683 = vmatpush3.bf16.msra.mxu0 %v15932_v9  ;;  %v13106_v9 = vld [vmem:[%s16166_s29 + $0x70] sm:$0xf]  ;;  %v13108_v10 = vld [vmem:[%s16166_s29 + $0x78] sm:$0xf] }
 0x100   : > { %14684 = vmatprep.subr.bf16.mxu0 %v15935_v23  ;;  %v2826_v28 = vshll.u32 %v13106_v9, 16  ;;  %v2830_v22 = vshrl.u32 %v13106_v9, 16  ;;  %v2785_v30 = vor.u32 %v2784_v7, %v16738_v6  ;;  %v2841_v32 = vshrl.u32 %v13108_v10, 16  ;;  %v15933_v7 = vld [vmem:[%s16166_s29 + $0xb4] sm:$0xff]  }
 0x101   : > { %v2844_v33 = vshll.u32 %v13108_v10, 16  ;;  %v2854_v9 = vshrl.u32 %v13109_v36, 16  ;;  %v2799_v10 = vor.u32 %v2798_v60, %v2795_v16  ;;  %v2647_v16 = vsel %vm16248_vm2, %v16634_v15, %v16638_v18  ;;  %v13112_v60 = vld [vmem:[%s16166_s29 + $0x88] sm:$0xf]  ;;  %v13113_v36 = vld [vmem:[%s16166_s29 + $0x8c] sm:$0x1] }
 0x102   : > { %v16749_v54 = vrot.slane %v2785_v30, 4  ;;  %v16756_v50 = vrot.slane %v2826_v28, 5  ;;  %v2832_v43 = vrot.slane %v2830_v22, 4  ;;  %v2843_v62 = vrot.slane %v2841_v32, 4  ;;  %v13114_v15 = vld [vmem:[%s16166_s29 + $0x90] sm:$0xf] }
 0x103   : > { %14685 = vmatpush3.bf16.msra.mxu0 %v15935_v23  ;;  %v2812_v23 = vshll.u32 %v13104_v56, 16  ;;  %v2846_v56 = vrot.slane %v2844_v33, 5  ;;  %v2637_v28 = vsel %vm16248_vm2, %v16632_v14, %v16618_v49  ;;  %v16772_v22 = vrot.slane %v2799_v10, 4  ;;  %v15934_v18 = vld [vmem:[%s16166_s29 + $0xc0] sm:$0xff]  }
 0x104   : > { %14718 = vmatprep.subr.bf16.mxu0 %v16720_v35  ;;  %v2833_v24 = vor.u32 %v2832_v43, %v16756_v50  ;;  %v16776_v32 = vrot.slane %v2850_v0, 5  ;;  %v2856_v33 = vrot.slane %v2854_v9, 4  ;;  %v16783_v49 = vrot.slane %v2836_v55, 5 }
 0x105   : > { %v16785_v14 = vrot.slane %v2860_v21, 5  ;;  %v2874_v43 = vshll.u32 %v13112_v60, 16  ;;  %v2892_v0 = vshll.u32 %v13114_v15, 16 }
 0x106   : > { %14655 = vmatmul.mubr.bf16.gmra.mrb[16].mxu0 %v15925_v41  ;;  %v16753_v41 = vrot.slane %v2812_v23, 5  ;;  %v2868_v23 = vshll.u32 %v13111_v52, 16  ;;  %v2878_v52 = vshrl.u32 %v13112_v60, 16 }
 0x107   : > { %14658 = vmatprep.mubr.bf16.mxu0 %v15927_v47  ;;  %v2819_v47 = vrot.slane %v2817_v48, 4  ;;  %v16794_v9 = vrot.slane %v2874_v43, 5 }
 0x108   : > { %v2880_v21 = vrot.slane %v2878_v52, 4 }
 0x109   : > { %v2823_v48 = vor.u32 %v2822_v27, %v2819_v47  ;;  %v2867_v47 = vrot.slane %v2865_v12, 4  ;;  %v2870_v27 = vrot.slane %v2868_v23, 5  ;;  %v2671_v12 = vsel %vm16248_vm2, %v16656_v37, %v16642_v19  ;;  %v15937_v19 = vld [vmem:[%s18794_s1 + $0x148] sm:$0xff]  }
 0x10b   : > { %v16779_v39 = vrot.slane %v2823_v48, 4  ;;  %v16808_v48 = vrot.slane %v2892_v0, 5  ;;  %v2871_v37 = vor.u32 %v2870_v27, %v2867_v47  ;;  %v13118_v27 = vld [vmem:[%s16166_s29 + $0xa0] sm:$0xf] }
 0x10c   : > { %v2926_v0 = vshrl.u32 %v13118_v27, 16 }
 0x10e   : > { %14659 = vmatmul.mubr.bf16.gmra.mrb[20].mxu0 %v15928_v29  ;;  %v2809_v29 = vor.u32 %v2808_v20, %v16751_v31  ;;  %v16781_v20 = vrot.slane %v2833_v24, 4  ;;  %v2685_v24 = vsel %vm16248_vm2, %v16672_v42, %v16658_v38  ;;  %v2709_v38 = vsel %vm16248_vm2, %v16707_v58, %v16665_v13 }
 0x10f   : > { %14662 = vmatprep.mubr.bf16.mxu0 %v15930_v26  ;;  %v2847_v26 = vor.u32 %v2846_v56, %v2843_v62  ;;  %v2857_v62 = vor.u32 %v2856_v33, %v16776_v32  ;;  %v2889_v56 = vshrl.u32 %v13114_v15, 16  ;;  %v2881_v33 = vor.u32 %v2880_v21, %v16794_v9 }
 0x110   : > { %v16774_v30 = vrot.slane %v2809_v29, 4  ;;  %v2661_v29 = vsel %vm16248_vm2, %v16640_v8, %v16622_v59  ;;  %v13115_v59 = vld [vmem:[%s16166_s29 + $0x94] sm:$0xf]  ;;  %v2719_v42 = vsel %vm16248_vm2, %v16709_v3, %v16685_v63  ;;  %v2733_v63 = vsel %vm16248_vm2, %v16711_v25, %v16688_v1  ;;  %v15940_v1 = vld [vmem:[%s18794_s1 + $0x160] sm:$0xff]  }
 0x111   : > { %v16789_v46 = vrot.slane %v2847_v26, 4  ;;  %v16792_v55 = vrot.slane %v2857_v62, 4  ;;  %v16806_v23 = vrot.slane %v2889_v56, 4  ;;  %v2695_v26 = vsel %vm16248_vm2, %v16681_v57, %v16683_v61  ;;  %v15938_v57 = vld [vmem:[%s18794_s1 + $0x150] sm:$0xff]  }
 0x112   : > { %v13146_v8 = vcombine.low %v2661_v29, %v2671_v12  ;;  %v13147_v60 = vcombine.low %v2685_v24, %v2695_v26  ;;  %v16838_v61 = vrot.slane %v2871_v37, 4  ;;  %v16841_v15 = vrot.slane %v2881_v33, 4  ;;  %v13124_v37 = vld [vmem:[%s16166_s29 + $0xb8] sm:$0xf] }
 0x113   : > { %v2743_v3 = vsel %vm16248_vm2, %v16722_v5, %v16713_v40  ;;  %v13148_v47 = vcombine.low %v2709_v38, %v2719_v42  ;;  %v2767_v62 = vsel %vm16248_vm2, %v16734_v2, %v16726_v45  ;;  %v2922_v56 = vshll.u32 %v13118_v27, 16  ;;  %v15941_v45 = vld [vmem:[%s18794_s1 + $0x168] sm:$0xff]  }
 0x114   : > { %v13149_v43 = vcombine.low %v2733_v63, %v2743_v3  ;;  %v2791_v21 = vsel %vm16248_vm2, %v16749_v54, %v16741_v11  ;;  %v13120_v2 = vld [vmem:[%s16166_s29 + $0xa8] sm:$0xf]  ;;  %v2805_v11 = vsel %vm16248_vm2, %v16772_v22, %v16751_v31  ;;  %v2815_v54 = vsel %vm16248_vm2, %v16774_v30, %v16753_v41  ;;  %v13121_v22 = vld [vmem:[%s16166_s29 + $0xac] sm:$0xf] }
 0x115   : > { %v2937_v26 = vshrl.u32 %v13120_v2, 16  ;;  %v2839_v31 = vsel %vm16248_vm2, %v16781_v20, %v16783_v49  ;;  %v13152_v41 = vcombine.low %v2805_v11, %v2815_v54  ;;  %v2853_v30 = vsel %vm16248_vm2, %v16789_v46, %v16776_v32  ;;  %v13123_v49 = vld [vmem:[%s16166_s29 + $0xb4] sm:$0xf] }
 0x116   : > { %14663 = vmatmul.mubr.bf16.gmra.mrb[24].mxu0 %v15931_v53  ;;  %v2884_v53 = vshll.u32 %v13113_v36, 16  ;;  %v2898_v36 = vshll.u32 %v13115_v59, 16  ;;  %v2895_v20 = vor.u32 %v16808_v48, %v16806_v23  ;;  %v2950_v33 = vshrl.u32 %v13121_v22, 16 }
 0x117   : > { %14666 = vmatprep.mubr.bf16.mxu0 %v15933_v7  ;;  %v13145_v7 = vcombine.low %v2637_v28, %v2647_v16  ;;  %v16823_v28 = vld [vmem:[%s16166_s29 + $0x98] sm:$0x1]  ;;  %v13117_v16 = vld [vmem:[%s16166_s29 + $0x9c] sm:$0xf]  ;;  %v2877_v23 = vsel %vm16248_vm2, %v16838_v61, %v16794_v9  ;;  %v16940_v9 = vld [vmem:[%s18794_s1 + $0x180] sm:$0xff]  }
 0x118   : > { %v16796_v10 = vrot.slane %v2884_v53, 5  ;;  %v2908_v13 = vshll.u32 %v16823_v28, 16  ;;  %v2913_v58 = vshrl.u32 %v13117_v16, 16  ;;  %v16859_v25 = vrot.slane %v2898_v36, 5  ;;  %v13122_v28 = vld [vmem:[%s16166_s29 + $0xb0] sm:$0x1] }
 0x119   : > { %v2916_v5 = vshll.u32 %v13117_v16, 16  ;;  %v2757_v53 = vsel %vm16248_vm2, %v16724_v44, %v16704_v34  ;;  %v13119_v34 = vld [vmem:[%s16166_s29 + $0xa4] sm:$0x1]  ;;  %v2896_v38 = vrot.slane %v2895_v20, 4  ;;  %v2964_v36 = vshll.u32 %v13123_v49, 16 }
 0x11a   : > { %v16863_v40 = vrot.slane %v2913_v58, 4  ;;  %v13150_v44 = vcombine.low %v2757_v53, %v2767_v62  ;;  %v2932_v24 = vshll.u32 %v13119_v34, 16  ;;  %v2887_v48 = vsel %vm16248_vm2, %v16841_v15, %v16796_v10  ;;  %v13127_v53 = vld [vmem:[%s16166_s29 + $0xc4] sm:$0xf]  ;;  %v13128_v20 = vld [vmem:[%s16166_s29 + $0xc8] sm:$0x1] }
 0x11b   : > { %v2918_v12 = vrot.slane %v2916_v5, 5  ;;  %v2910_v42 = vrot.slane %v2908_v13, 5  ;;  %v2974_v58 = vshrl.u32 %v13124_v37, 16  ;;  %v2939_v15 = vrot.slane %v2937_v26, 4 }
 0x11c   : > { %v2934_v10 = vrot.slane %v2932_v24, 5  ;;  %v13155_v27 = vcombine.low %v2877_v23, %v2887_v48  ;;  %v2901_v62 = vsel %vm16248_vm2, %v2896_v38, %v16859_v25  ;;  %v13169_v23 = vld [vmem:[%s16166_s29 + $0xc] sm:$0xe]  ;;  %v13171_v48 = vld [vmem:[%s16166_s29 + $0x14] sm:$0x1] }
 0x11d   : > { %v2919_v46 = vor.u32 %v2918_v12, %v16863_v40  ;;  %v2976_v5 = vrot.slane %v2974_v58, 4  ;;  %v2994_v12 = vshll.u32 %v13127_v53, 16  ;;  %v13217_v58 = vrot.slane %v13169_v23, 9  ;;  %v13187_v23 = vld [vmem:[%s16166_s29 + $0x54] sm:$0xe] }
 0x11e   : > { %14667 = vmatmul.mubr.bf16.gmra.mrb[28].mxu0 %v15934_v18  ;;  %v2902_v18 = vshrl.u32 %v13115_v59, 16  ;;  %v15942_v59 = vld [vmem:[%s18794_s1 + $0x170] sm:$0xff]  }
 0x11f   : > { %14686 = vmatprep.mubr.bf16.mxu0 %v13145_v7  ;;  %v2781_v7 = vsel %vm16248_vm2, %v16736_v4, %v16738_v6  ;;  %v16886_v4 = vrot.slane %v2922_v56, 5  ;;  %v2928_v6 = vrot.slane %v2926_v0, 4  ;;  %v2920_v63 = vrot.slane %v2919_v46, 4 }
 0x120   : > { %v16861_v52 = vrot.slane %v2902_v18, 4  ;;  %v13151_v29 = vcombine.low %v2781_v7, %v2791_v21  ;;  %v2970_v18 = vshll.u32 %v13124_v37, 16  ;;  %v2956_v0 = vshll.u32 %v13122_v28, 16  ;;  %v13125_v7 = vld [vmem:[%s16166_s29 + $0xbc] sm:$0x1] }
 0x121   : > { %v2925_v21 = vsel %vm16248_vm2, %v2920_v63, %v16886_v4  ;;  %v2980_v11 = vshll.u32 %v13125_v7, 16  ;;  %v3495_v63 = vrot.slane %v13171_v48, 5  ;;  %v13189_v48 = vld [vmem:[%s16166_s29 + $0x5c] sm:$0x1] }
 0x122   : > { %v2905_v32 = vor.u32 %v16861_v52, %v16859_v25  ;;  %v2966_v52 = vrot.slane %v2964_v36, 5  ;;  %v2972_v40 = vrot.slane %v2970_v18, 5  ;;  %v2998_v25 = vshrl.u32 %v13127_v53, 16 }
 0x124   : > { %v2906_v61 = vrot.slane %v2905_v32, 4  ;;  %v2977_v24 = vor.u32 %v2976_v5, %v2972_v40 }
 0x126   : > { %14687 = vmatmul.mubr.bf16.vlgmr.msra.gmra.mrb[0].mxu0 %v13146_v8  ;;  %v2829_v8 = vsel %vm16248_vm2, %v16779_v39, %v16756_v50  ;;  %v15943_v50 = vld [vmem:[%s18794_s1 + $0x178] sm:$0xff]   ;;  %v2911_v56 = vsel %vm16248_vm2, %v2906_v61, %v2910_v42 }
 0x127   : > { %14719 = vmatpush3.bf16.msra.mxu0 %v16720_v35  ;;  %14690 = vmatprep.mubr.bf16.mxu0 %v13147_v60  ;;  %v15939_v35 = vld [vmem:[%s18794_s1 + $0x158] sm:$0xff]   ;;  %v13153_v39 = vcombine.low %v2829_v8, %v2839_v31  ;;  %v2946_v60 = vshll.u32 %v13121_v22, 16  ;;  %v13156_v54 = vcombine.low %v2901_v62, %v2911_v56 }
 0x128   : > { %14720 = vmatprep.subr.bf16.mxu0 %v15937_v19 }
 0x12b   : > { %14721 = vmatpush3.bf16.msra.mxu0 %v15937_v19  ;;  %v2863_v19 = vsel %vm16248_vm2, %v16792_v55, %v16785_v14  ;;  %v2929_v14 = vor.u32 %v2928_v6, %v16886_v4  ;;  %v2940_v55 = vshll.u32 %v13120_v2, 16  ;;  %v2958_v4 = vrot.slane %v2956_v0, 5 }
 0x12c   : > { %14722 = vmatprep.subr.bf16.mxu0 %v15938_v57  ;;  %v13154_v16 = vcombine.low %v2853_v30, %v2863_v19  ;;  %v3000_v30 = vrot.slane %v2998_v25, 4 }
 0x12d   : > { %v2930_v3 = vrot.slane %v2929_v14, 4  ;;  %v2942_v13 = vrot.slane %v2940_v55, 5  ;;  %v3004_v14 = vshll.u32 %v13128_v20, 16  ;;  %v13185_v20 = vld [vmem:[%s16166_s29 + $0x4c] sm:$0xf] }
 0x12e   : > { %14691 = vmatmul.mubr.bf16.gmra.mrb[4].mxu0 %v13148_v47  ;;  %v2948_v47 = vrot.slane %v2946_v60, 5 }
 0x12f   : > { %14694 = vmatprep.mubr.bf16.mxu0 %v13149_v43  ;;  %14723 = vmatpush3.bf16.msra.mxu0 %v15938_v57  ;;  %v2961_v57 = vshrl.u32 %v13123_v49, 16  ;;  %v13126_v43 = vld [vmem:[%s16166_s29 + $0xc0] sm:$0xf]  ;;  %v2935_v34 = vsel %vm16248_vm2, %v2930_v3, %v2934_v10  ;;  %v13170_v49 = vld [vmem:[%s16166_s29 + $0x10] sm:$0xf]  ;;  %v3006_v18 = vrot.slane %v3004_v14, 5 }
 0x130   : > { %14724 = vmatprep.subr.bf16.mxu0 %v15939_v35  ;;  %v2985_v2 = vshrl.u32 %v13126_v43, 16  ;;  %v13157_v26 = vcombine.low %v2925_v21, %v2935_v34  ;;  %v13173_v10 = vld [vmem:[%s16166_s29 + $0x1c] sm:$0xf] }
 0x132   : > { %v2987_v31 = vrot.slane %v2985_v2, 4 }
 0x133   : > { %14725 = vmatpush3.bf16.msra.mxu0 %v15939_v35  ;;  %v2952_v35 = vrot.slane %v2950_v33, 4  ;;  %v3492_v33 = vrot.slane %v13170_v49, 5  ;;  %v13188_v49 = vld [vmem:[%s16166_s29 + $0x58] sm:$0xf] }
 0x134   : > { %14726 = vmatprep.subr.bf16.mxu0 %v15940_v1 }
 0x135   : > { %v3494_v61 = vrot.slane %v3492_v33, 4 }
 0x136   : > { %14695 = vmatmul.mubr.bf16.gmra.mrb[8].mxu0 %v13150_v44  ;;  %v2943_v44 = vor.u32 %v2942_v13, %v2939_v15  ;;  %v13176_v15 = vld [vmem:[%s16166_s29 + $0x28] sm:$0xf]  ;;  %v3499_v13 = vrot.slane %v13173_v10, 5  ;;  %v13191_v10 = vld [vmem:[%s16166_s29 + $0x64] sm:$0xf] }
 0x137   : > { %14698 = vmatprep.mubr.bf16.mxu0 %v13151_v29  ;;  %14727 = vmatpush3.bf16.msra.mxu0 %v15940_v1  ;;  %v2963_v1 = vrot.slane %v2961_v57, 4  ;;  %v2988_v29 = vshll.u32 %v13126_v43, 16  ;;  %v13174_v43 = vld [vmem:[%s16166_s29 + $0x20] sm:$0x1] }
 0x138   : > { %14728 = vmatprep.subr.bf16.mxu0 %v15941_v45  ;;  %v3501_v56 = vrot.slane %v3499_v13, 4  ;;  %v3502_v0 = vrot.slane %v13174_v43, 5  ;;  %v13190_v43 = vld [vmem:[%s16166_s29 + $0x60] sm:$0xe] }
 0x139   : > { %v2967_v6 = vor.u32 %v2966_v52, %v2963_v1  ;;  %v2990_v22 = vrot.slane %v2988_v29, 5  ;;  %v3506_v1 = vrot.slane %v13176_v15, 5  ;;  %v13175_v52 = vld [vmem:[%s16166_s29 + $0x24] sm:$0xe]  ;;  %v15947_v15 = vld [vmem:[%s18794_s1 + $0x198] sm:$0xff]  }
 0x13a   : > { %v13219_v7 = vrot.slane %v13175_v52, 9  ;;  %v3503_v29 = vsel %vm16467_vm5, %v3501_v56, %v3502_v0  ;;  %v13224_v0 = vrot.slane %v13190_v43, 9 }
 0x13b   : > { %14729 = vmatpush3.bf16.msra.mxu0 %v15941_v45  ;;  %v2953_v45 = vor.u32 %v2952_v35, %v2948_v47  ;;  %v2968_v19 = vrot.slane %v2967_v6, 4  ;;  %v2991_v32 = vor.u32 %v2990_v22, %v2987_v31  ;;  %v3496_v35 = vsel %vm16467_vm5, %v3494_v61, %v3495_v63 }
 0x13c   : > { %14730 = vmatprep.subr.bf16.mxu0 %v15942_v59  ;;  %v3508_v21 = vrot.slane %v3506_v1, 4  ;;  %v3507_v25 = vsel %vm16467_vm5, %v13219_v7, %v3506_v1  ;;  %v3537_v63 = vrot.slane %v13189_v48, 5  ;;  %v13192_v1 = vld [vmem:[%s16166_s29 + $0x68] sm:$0x1]  ;;  %v13204_v48 = vld [vmem:[%s16166_s29 + $0x98] sm:$0x1] }
 0x13d   : > { %v2954_v8 = vrot.slane %v2953_v45, 4  ;;  %v2973_v55 = vsel %vm16248_vm2, %v2968_v19, %v2972_v40  ;;  %v2992_v57 = vrot.slane %v2991_v32, 4  ;;  %v13177_v40 = vld [vmem:[%s16166_s29 + $0x2c] sm:$0x1]  ;;  %v13182_v45 = vld [vmem:[%s16166_s29 + $0x40] sm:$0xf] }
 0x13e   : > { %14699 = vmatmul.mubr.bf16.gmra.mrb[12].mxu0 %v13152_v41  ;;  %v2996_v41 = vrot.slane %v2994_v12, 5  ;;  %v3509_v34 = vrot.slane %v13177_v40, 5  ;;  %v3527_v32 = vrot.slane %v13185_v20, 5  ;;  %v15948_v40 = vld [vmem:[%s18794_s1 + $0x1a0] sm:$0xff]  }
 0x13f   : > { %14702 = vmatprep.mubr.bf16.mxu0 %v13153_v39  ;;  %14731 = vmatpush3.bf16.msra.mxu0 %v15942_v59  ;;  %v2944_v59 = vrot.slane %v2943_v44, 4  ;;  %v2982_v39 = vrot.slane %v2980_v11, 5  ;;  %v13179_v44 = vld [vmem:[%s16166_s29 + $0x34] sm:$0xf]  ;;  %v13180_v11 = vld [vmem:[%s16166_s29 + $0x38] sm:$0x1] }
 0x140   : > { %14732 = vmatprep.subr.bf16.mxu0 %v15943_v50  ;;  %v3001_v46 = vor.u32 %v3000_v30, %v2996_v41  ;;  %v2997_v3 = vsel %vm16248_vm2, %v2992_v57, %v2996_v41  ;;  %v3513_v12 = vrot.slane %v13179_v44, 5  ;;  %v3510_v6 = vsel %vm16467_vm5, %v3508_v21, %v3509_v34  ;;  %v15945_v30 = vld [vmem:[%s18794_s1 + $0x188] sm:$0xff]  }
 0x141   : > { %v2949_v37 = vsel %vm16248_vm2, %v2944_v59, %v2948_v47  ;;  %v3493_v47 = vsel %vm16467_vm5, %v13217_v58, %v3492_v33  ;;  %v13183_v59 = vld [vmem:[%s16166_s29 + $0x44] sm:$0x1]  ;;  %v3516_v41 = vrot.slane %v13180_v11, 5  ;;  %v3534_v33 = vrot.slane %v13188_v49, 5 }
 0x142   : > { %v3002_v36 = vrot.slane %v3001_v46, 4  ;;  %v13249_v53 = vcombine.low %v3493_v47, %v3496_v35  ;;  %v3515_v22 = vrot.slane %v3513_v12, 4  ;;  %v13223_v58 = vrot.slane %v13187_v23, 9  ;;  %v13202_v23 = vld [vmem:[%s16166_s29 + $0x90] sm:$0xe] }
 0x143   : > { %14733 = vmatpush3.bf16.msra.mxu0 %v15943_v50  ;;  %v2978_v50 = vrot.slane %v2977_v24, 4  ;;  %v13178_v24 = vld [vmem:[%s16166_s29 + $0x30] sm:$0xe]  ;;  %v3536_v61 = vrot.slane %v3534_v33, 4  ;;  %v3541_v47 = vrot.slane %v13191_v10, 5  ;;  %v3544_v21 = vrot.slane %v13192_v1, 5 }
 0x144   : > { %14766 = vmatprep.subr.bf16.mxu0 %v16940_v9  ;;  %v3007_v28 = vsel %vm16248_vm2, %v3002_v36, %v3006_v18  ;;  %v13220_v31 = vrot.slane %v13178_v24, 9  ;;  %v3529_v36 = vrot.slane %v3527_v32, 4  ;;  %v3535_v35 = vsel %vm16467_vm5, %v13223_v58, %v3534_v33 }
 0x145   : > { %v2983_v60 = vsel %vm16248_vm2, %v2978_v50, %v2982_v39  ;;  %v13160_v5 = vcombine.low %v2997_v3, %v3007_v28  ;;  %v3523_v39 = vrot.slane %v13183_v59, 5  ;;  %v13194_v3 = vld [vmem:[%s16166_s29 + $0x70] sm:$0xf]  ;;  %v3543_v7 = vrot.slane %v3541_v47, 4  ;;  %v13198_v59 = vld [vmem:[%s16166_s29 + $0x80] sm:$0x1] }
 0x146   : > { %14703 = vmatmul.mubr.bf16.gmra.mrb[16].mxu0 %v13154_v16  ;;  %v2959_v16 = vsel %vm16248_vm2, %v2954_v8, %v2958_v4  ;;  %v13159_v42 = vcombine.low %v2973_v55, %v2983_v60  ;;  %v13251_v4 = vcombine.low %v3507_v25, %v3510_v6  ;;  %v13184_v55 = vld [vmem:[%s16166_s29 + $0x48] sm:$0xe]  ;;  %v13186_v60 = vld [vmem:[%s16166_s29 + $0x50] sm:$0x1]  ;;  %v3548_v52 = vrot.slane %v13194_v3, 5 }
 0x147   : > { %14706 = vmatprep.mubr.bf16.mxu0 %v13155_v27  ;;  %v13158_v38 = vcombine.low %v2949_v37, %v2959_v16  ;;  %v13172_v27 = vld [vmem:[%s16166_s29 + $0x18] sm:$0xe]  ;;  %v3514_v37 = vsel %vm16467_vm5, %v13220_v31, %v3513_v12  ;;  %v3517_v16 = vsel %vm16467_vm5, %v3515_v22, %v3516_v41  ;;  %v13222_v57 = vrot.slane %v13184_v55, 9  ;;  %v13200_v12 = vld [vmem:[%s16166_s29 + $0x88] sm:$0xf] }
 0x148   : > { %v13218_v62 = vrot.slane %v13172_v27, 9  ;;  %v3530_v18 = vrot.slane %v13186_v60, 5  ;;  %v3538_v27 = vsel %vm16467_vm5, %v3536_v61, %v3537_v63  ;;  %v3550_v44 = vrot.slane %v3548_v52, 4  ;;  %v13199_v31 = vld [vmem:[%s16166_s29 + $0x84] sm:$0xe] }
 0x149   : > { %v3528_v28 = vsel %vm16467_vm5, %v13222_v57, %v3527_v32  ;;  %v13255_v56 = vcombine.low %v3535_v35, %v3538_v27  ;;  %v3542_v25 = vsel %vm16467_vm5, %v13224_v0, %v3541_v47  ;;  %v3545_v6 = vsel %vm16467_vm5, %v3543_v7, %v3544_v21  ;;  %v13201_v22 = vld [vmem:[%s16166_s29 + $0x8c] sm:$0x1]  ;;  %v15951_v32 = vld [vmem:[%s18794_s1 + $0x1b8] sm:$0xff]  }
 0x14a   : > { %v3500_v2 = vsel %vm16467_vm5, %v13218_v62, %v3499_v13  ;;  %v3531_v13 = vsel %vm16467_vm5, %v3529_v36, %v3530_v18  ;;  %v13256_v41 = vcombine.low %v3542_v25, %v3545_v6  ;;  %v13227_v20 = vrot.slane %v13199_v31, 9  ;;  %v13205_v57 = vld [vmem:[%s16166_s29 + $0x9c] sm:$0xe]  ;;  %v13207_v36 = vld [vmem:[%s16166_s29 + $0xa4] sm:$0x1] }
 0x14b   : > { %v13250_v8 = vcombine.low %v3500_v2, %v3503_v29  ;;  %v13254_v62 = vcombine.low %v3528_v28, %v3531_v13  ;;  %v13197_v2 = vld [vmem:[%s16166_s29 + $0x7c] sm:$0xf]  ;;  %v15949_v29 = vld [vmem:[%s18794_s1 + $0x1a8] sm:$0xff]   ;;  %v13228_v61 = vrot.slane %v13202_v23, 9  ;;  %v3572_v10 = vrot.slane %v13204_v48, 5  ;;  %v15972_v23 = vld [vmem:[%s18794_s1 + $0x1f0] sm:$0xff]  }
 0x14c   : > { %v3555_v24 = vrot.slane %v13197_v2, 5  ;;  %v3579_v28 = vrot.slane %v13207_v36, 5  ;;  %v13209_v13 = vld [vmem:[%s16166_s29 + $0xac] sm:$0xf]  ;;  %v13212_v47 = vld [vmem:[%s16166_s29 + $0xb8] sm:$0xf] }
 0x14d   : > { %v3583_v43 = vrot.slane %v13209_v13, 5  ;;  %v15962_v48 = vld [vmem:[%s16166_s29 + $0x6c] sm:$0xff]   ;;  %v13346_v36 = vld [vmem:[%s16166_s29 + $0x1c] sm:$0xf] }
 0x14e   : > { %14707 = vmatmul.mubr.bf16.gmra.mrb[20].mxu0 %v13156_v54  ;;  %v3520_v54 = vrot.slane %v13182_v45, 5 }
 0x14f   : > { %14710 = vmatprep.mubr.bf16.mxu0 %v13157_v26  ;;  %v13181_v26 = vld [vmem:[%s16166_s29 + $0x3c] sm:$0xe] }
 0x150   : > { %v13221_v19 = vrot.slane %v13181_v26, 9  ;;  %v3522_v50 = vrot.slane %v3520_v54, 4  ;;  %v13196_v26 = vld [vmem:[%s16166_s29 + $0x78] sm:$0xe] }
 0x152   : > { %v3521_v46 = vsel %vm16467_vm5, %v13221_v19, %v3520_v54  ;;  %v3524_v14 = vsel %vm16467_vm5, %v3522_v50, %v3523_v39  ;;  %v13226_v19 = vrot.slane %v13196_v26, 9  ;;  %v3557_v50 = vrot.slane %v3555_v24, 4  ;;  %v13214_v26 = vld [vmem:[%s16166_s29 + $0xc0] sm:$0xe] }
 0x153   : > { %v3558_v39 = vrot.slane %v13198_v59, 5  ;;  %v13216_v59 = vld [vmem:[%s16166_s29 + $0xc8] sm:$0x1]  ;;  %v13232_v31 = vrot.slane %v13214_v26, 9 }
 0x155   : > { %v3559_v55 = vsel %vm16467_vm5, %v3557_v50, %v3558_v39  ;;  %v15952_v39 = vld [vmem:[%s16166_s29 + $0x18] sm:$0xff]  }
 0x156   : > { %14711 = vmatmul.mubr.bf16.gmra.mrb[24].mxu0 %v13158_v38  ;;  %v13252_v38 = vcombine.low %v3514_v37, %v3517_v16  ;;  %v3565_v37 = vrot.slane %v13201_v22, 5  ;;  %v13203_v16 = vld [vmem:[%s16166_s29 + $0x94] sm:$0xf] }
 0x157   : > { %14714 = vmatprep.mubr.bf16.mxu0 %v13159_v42  ;;  %v13253_v42 = vcombine.low %v3521_v46, %v3524_v14  ;;  %v13206_v46 = vld [vmem:[%s16166_s29 + $0xa0] sm:$0xf]  ;;  %v3556_v14 = vsel %vm16467_vm5, %v13226_v19, %v3555_v24  ;;  %v3569_v60 = vrot.slane %v13203_v16, 5  ;;  %v15960_v16 = vld [vmem:[%s18794_s1 + $0x1d0] sm:$0xff]  }
 0x158   : > { %v13258_v18 = vcombine.low %v3556_v14, %v3559_v55  ;;  %v15963_v14 = vld [vmem:[%s18794_s1 + $0x1d8] sm:$0xff]   ;;  %v15966_v55 = vld [vmem:[%s18794_s1 + $0x1e0] sm:$0xff]  }
 0x159   : > { %v3571_v63 = vrot.slane %v3569_v60, 4  ;;  %v3570_v35 = vsel %vm16467_vm5, %v13228_v61, %v3569_v60  ;;  %v15959_v60 = vld [vmem:[%s16166_s29 + $0x54] sm:$0xff]   ;;  %v15965_v61 = vld [vmem:[%s16166_s29 + $0x84] sm:$0xff]  }
 0x15b   : > { %v3573_v27 = vsel %vm16467_vm5, %v3571_v63, %v3572_v10  ;;  %v15967_v63 = vld [vmem:[%s16166_s29 + $0x90] sm:$0xff]  }
 0x15c   : > { %v13260_v0 = vcombine.low %v3570_v35, %v3573_v27  ;;  %v13349_v35 = vld [vmem:[%s16166_s29 + $0x28] sm:$0xf] }
 0x15e   : > { %14715 = vmatmul.mubr.bf16.gmra.mrb[28].mxu0 %v13160_v5  ;;  %v13193_v5 = vld [vmem:[%s16166_s29 + $0x6c] sm:$0xe] }
 0x15f   : > { %14734 = vmatprep.mubr.bf16.mxu0 %v13249_v53  ;;  %v13195_v53 = vld [vmem:[%s16166_s29 + $0x74] sm:$0x1]  ;;  %v13225_v34 = vrot.slane %v13193_v5, 9  ;;  %v13210_v5 = vld [vmem:[%s16166_s29 + $0xb0] sm:$0x1] }
 0x160   : > { %v3551_v45 = vrot.slane %v13195_v53, 5  ;;  %v3590_v53 = vrot.slane %v13212_v47, 5 }
 0x161   : > { %v3549_v11 = vsel %vm16467_vm5, %v13225_v34, %v3548_v52  ;;  %v3585_v34 = vrot.slane %v3583_v43, 4 }
 0x162   : > { %v3552_v54 = vsel %vm16467_vm5, %v3550_v44, %v3551_v45  ;;  %v3586_v44 = vrot.slane %v13210_v5, 5  ;;  %v3592_v2 = vrot.slane %v3590_v53, 4 }
 0x164   : > { %v3587_v6 = vsel %vm16467_vm5, %v3585_v34, %v3586_v44 }
 0x166   : > { %14735 = vmatmul.mubr.bf16.vlgmr.msra.gmra.mrb[0].mxu0 %v13250_v8  ;;  %v3562_v8 = vrot.slane %v13200_v12, 5  ;;  %v13215_v12 = vld [vmem:[%s16166_s29 + $0xc4] sm:$0xf] }
 0x167   : > { %14767 = vmatpush3.bf16.msra.mxu0 %v16940_v9  ;;  %14738 = vmatprep.mubr.bf16.mxu0 %v13251_v4  ;;  %v15946_v9 = vld [vmem:[%s18794_s1 + $0x190] sm:$0xff]   ;;  %v3597_v24 = vrot.slane %v13215_v12, 5 }
 0x168   : > { %14768 = vmatprep.subr.bf16.mxu0 %v15945_v30  ;;  %v15950_v4 = vld [vmem:[%s18794_s1 + $0x1b0] sm:$0xff]   ;;  %v3564_v49 = vrot.slane %v3562_v8, 4 }
 0x169   : > { %v3599_v22 = vrot.slane %v3597_v24, 4 }
 0x16a   : > { %v3566_v33 = vsel %vm16467_vm5, %v3564_v49, %v3565_v37  ;;  %v15955_v49 = vld [vmem:[%s16166_s29 + $0x30] sm:$0xff]   ;;  %v15957_v37 = vld [vmem:[%s18794_s1 + $0x1c8] sm:$0xff]  }
 0x16b   : > { %14769 = vmatpush3.bf16.msra.mxu0 %v15945_v30  ;;  %v13257_v30 = vcombine.low %v3549_v11, %v3552_v54 }
 0x16c   : > { %14770 = vmatprep.subr.bf16.mxu0 %v15946_v9 }
 0x16e   : > { %14739 = vmatmul.mubr.bf16.gmra.mrb[4].mxu0 %v13252_v38  ;;  %v3576_v38 = vrot.slane %v13206_v46, 5  ;;  %v15958_v46 = vld [vmem:[%s16166_s29 + $0x48] sm:$0xff]  }
 0x16f   : > { %14742 = vmatprep.mubr.bf16.mxu0 %v13253_v42  ;;  %14771 = vmatpush3.bf16.msra.mxu0 %v15946_v9  ;;  %v3563_v9 = vsel %vm16467_vm5, %v13227_v20, %v3562_v8  ;;  %v15954_v42 = vld [vmem:[%s18794_s1 + $0x1c0] sm:$0xff]  }
 0x170   : > { %14772 = vmatprep.subr.bf16.mxu0 %v15947_v15  ;;  %v13259_v58 = vcombine.low %v3563_v9, %v3566_v33  ;;  %v3578_v3 = vrot.slane %v3576_v38, 4  ;;  %v15953_v20 = vld [vmem:[%s16166_s29 + $0x24] sm:$0xff]  }
 0x171   : > { %v15961_v9 = vld [vmem:[%s16166_s29 + $0x60] sm:$0xff]   ;;  %v15969_v33 = vld [vmem:[%s18794_s1 + $0x1e8] sm:$0xff]  }
 0x172   : > { %v3580_v52 = vsel %vm16467_vm5, %v3578_v3, %v3579_v28  ;;  %v4497_v3 = vshll.u32 %v13346_v36, 16  ;;  %v4501_v28 = vshrl.u32 %v13346_v36, 16 }
 0x173   : > { %14773 = vmatpush3.bf16.msra.mxu0 %v15947_v15  ;;  %v13229_v15 = vrot.slane %v13205_v57, 9  ;;  %v13345_v57 = vld [vmem:[%s16166_s29 + $0x18] sm:$0xf] }
 0x174   : > { %14774 = vmatprep.subr.bf16.mxu0 %v15948_v40  ;;  %v4488_v10 = vshrl.u32 %v13345_v57, 16 }
 0x175   : > { %v3577_v1 = vsel %vm16467_vm5, %v13229_v15, %v3576_v38  ;;  %v15964_v38 = vld [vmem:[%s16166_s29 + $0x78] sm:$0xff]   ;;  %v4491_v15 = vshll.u32 %v13345_v57, 16 }
 0x176   : > { %14743 = vmatmul.mubr.bf16.gmra.mrb[8].mxu0 %v13254_v62  ;;  %v13211_v62 = vld [vmem:[%s16166_s29 + $0xb4] sm:$0xe]  ;;  %v13261_v7 = vcombine.low %v3577_v1, %v3580_v52  ;;  %v4490_v27 = vrot.slane %v4488_v10, 4  ;;  %v17149_v1 = vrot.slane %v4497_v3, 5  ;;  %v4503_v52 = vrot.slane %v4501_v28, 4 }
 0x177   : > { %14746 = vmatprep.mubr.bf16.mxu0 %v13255_v56  ;;  %14775 = vmatpush3.bf16.msra.mxu0 %v15948_v40  ;;  %v13208_v40 = vld [vmem:[%s16166_s29 + $0xa8] sm:$0xe]  ;;  %v13213_v56 = vld [vmem:[%s16166_s29 + $0xbc] sm:$0x1]  ;;  %v13231_v45 = vrot.slane %v13211_v62, 9  ;;  %v4525_v62 = vshrl.u32 %v13349_v35, 16 }
 0x178   : > { %14776 = vmatprep.subr.bf16.mxu0 %v15949_v29  ;;  %v13230_v21 = vrot.slane %v13208_v40, 9  ;;  %v4504_v44 = vor.u32 %v4503_v52, %v17149_v1 }
 0x179   : > { %v3591_v11 = vsel %vm16467_vm5, %v13231_v45, %v3590_v53  ;;  %v4521_v53 = vshll.u32 %v13349_v35, 16  ;;  %v13352_v45 = vld [vmem:[%s16166_s29 + $0x34] sm:$0xf]  ;;  %v13361_v35 = vld [vmem:[%s16166_s29 + $0x58] sm:$0xf] }
 0x17a   : > { %v3584_v25 = vsel %vm16467_vm5, %v13230_v21, %v3583_v43  ;;  %v4493_v43 = vrot.slane %v4491_v15, 5  ;;  %v15970_v21 = vld [vmem:[%s16166_s29 + $0xa8] sm:$0xff]   ;;  %v4549_v26 = vshrl.u32 %v13352_v45, 16 }
 0x17b   : > { %14777 = vmatpush3.bf16.msra.mxu0 %v15949_v29  ;;  %v3593_v29 = vrot.slane %v13213_v56, 5  ;;  %v13262_v8 = vcombine.low %v3584_v25, %v3587_v6  ;;  %v13351_v56 = vld [vmem:[%s16166_s29 + $0x30] sm:$0xf]  ;;  %v13350_v25 = vld [vmem:[%s16166_s29 + $0x2c] sm:$0x1] }
 0x17c   : > { %14778 = vmatprep.subr.bf16.mxu0 %v15950_v4  ;;  %v4494_v34 = vor.u32 %v4493_v43, %v4490_v27  ;;  %v13356_v43 = vld [vmem:[%s16166_s29 + $0x44] sm:$0x1] }
 0x17d   : > { %v3594_v54 = vsel %vm16467_vm5, %v3592_v2, %v3593_v29  ;;  %v4536_v2 = vshrl.u32 %v13351_v56, 16  ;;  %v4539_v29 = vshll.u32 %v13351_v56, 16 }
 0x17e   : > { %14747 = vmatmul.mubr.bf16.gmra.mrb[12].mxu0 %v13256_v41  ;;  %v3600_v41 = vrot.slane %v13216_v59, 5  ;;  %v13354_v59 = vld [vmem:[%s16166_s29 + $0x3c] sm:$0xf] }
 0x17f   : > { %14750 = vmatprep.mubr.bf16.mxu0 %v13257_v30  ;;  %14779 = vmatpush3.bf16.msra.mxu0 %v15950_v4  ;;  %v13263_v4 = vcombine.low %v3591_v11, %v3594_v54  ;;  %v3598_v30 = vsel %vm16467_vm5, %v13232_v31, %v3597_v24  ;;  %v17158_v24 = vrot.slane %v4521_v53, 5  ;;  %v4527_v11 = vrot.slane %v4525_v62, 4  ;;  %v13359_v53 = vld [vmem:[%s16166_s29 + $0x50] sm:$0x1] }
 0x180   : > { %14780 = vmatprep.subr.bf16.mxu0 %v15951_v32  ;;  %v3601_v19 = vsel %vm16467_vm5, %v3599_v22, %v3600_v41  ;;  %v4545_v54 = vshll.u32 %v13352_v45, 16  ;;  %v4531_v31 = vshll.u32 %v13350_v25, 16  ;;  %v4538_v22 = vrot.slane %v4536_v2, 4  ;;  %v13363_v45 = vld [vmem:[%s16166_s29 + $0x60] sm:$0xf] }
 0x181   : > { %v13264_v50 = vcombine.low %v3598_v30, %v3601_v19  ;;  %v4541_v41 = vrot.slane %v4539_v29, 5  ;;  %v13357_v30 = vld [vmem:[%s16166_s29 + $0x48] sm:$0xf]  ;;  %v4505_v19 = vrot.slane %v4504_v44, 4  ;;  %v4621_v44 = vshrl.u32 %v13361_v35, 16 }
 0x182   : > { %v13364_v2 = vld [vmem:[%s16166_s29 + $0x64] sm:$0xf] }
 0x183   : > { %14781 = vmatpush3.bf16.msra.mxu0 %v15951_v32  ;;  %v15956_v32 = vld [vmem:[%s16166_s29 + $0x3c] sm:$0xff]  }
 0x184   : > { %14814 = vmatprep.subr.bf16.mxu0 %v15954_v42 }
 0x186   : > { %14751 = vmatmul.mubr.bf16.gmra.mrb[16].mxu0 %v13258_v18  ;;  %v17142_v18 = vld [vmem:[%s18794_s1 + $0x200] sm:$0xff]  }
 0x187   : > { %14754 = vmatprep.mubr.bf16.mxu0 %v13259_v58  ;;  %v13348_v58 = vld [vmem:[%s16166_s29 + $0x24] sm:$0xf] }
 0x188   : > { %v4512_v13 = vshrl.u32 %v13348_v58, 16  ;;  %v4515_v47 = vshll.u32 %v13348_v58, 16  ;;  %v13360_v58 = vld [vmem:[%s16166_s29 + $0x54] sm:$0xf] }
 0x18a   : > { %v4514_v40 = vrot.slane %v4512_v13, 4  ;;  %v4517_v5 = vrot.slane %v4515_v47, 5 }
 0x18c   : > { %v4518_v6 = vor.u32 %v4517_v5, %v4514_v40  ;;  %v4608_v40 = vshrl.u32 %v13360_v58, 16 }
 0x18e   : > { %14755 = vmatmul.mubr.bf16.gmra.mrb[20].mxu0 %v13260_v0  ;;  %v13347_v0 = vld [vmem:[%s16166_s29 + $0x20] sm:$0x1] }
 0x18f   : > { %14758 = vmatprep.mubr.bf16.mxu0 %v13261_v7  ;;  %v15968_v7 = vld [vmem:[%s16166_s29 + $0x9c] sm:$0xff]   ;;  %v4507_v12 = vshll.u32 %v13347_v0, 16  ;;  %v4611_v0 = vshll.u32 %v13360_v58, 16 }
 0x196   : > { %14759 = vmatmul.mubr.bf16.gmra.mrb[24].mxu0 %v13262_v8  ;;  %v13355_v8 = vld [vmem:[%s16166_s29 + $0x40] sm:$0xf] }
 0x197   : > { %14762 = vmatprep.mubr.bf16.mxu0 %v13263_v4  ;;  %v4495_v4 = vrot.slane %v4494_v34, 4  ;;  %v4617_v34 = vshll.u32 %v13361_v35, 16 }
 0x19e   : > { %14763 = vmatmul.mubr.bf16.gmra.mrb[28].mxu0 %v13264_v50  ;;  %v4509_v50 = vrot.slane %v4507_v12, 5 }
 0x19f   : > { %14782 = vmatprep.mubr.bf16.mxu0 %v15952_v39  ;;  %v17163_v39 = vrot.slane %v4518_v6, 4  ;;  %v4579_v6 = vshll.u32 %v13356_v43, 16 }
 0x1a6   : > { %14783 = vmatmul.mubr.bf16.vlgmr.msra.gmra.mrb[0].mxu0 %v15953_v20  ;;  %v4528_v20 = vor.u32 %v4527_v11, %v17158_v24  ;;  %v15974_v11 = vld [vmem:[%s16166_s29 + $0xcc] sm:$0xff]  }
 0x1a7   : > { %14815 = vmatpush3.bf16.msra.mxu0 %v15954_v42  ;;  %14786 = vmatprep.mubr.bf16.mxu0 %v15955_v49  ;;  %v15975_v42 = vld [vmem:[%s18794_s1 + $0x1f8] sm:$0xff]   ;;  %v13358_v49 = vld [vmem:[%s16166_s29 + $0x4c] sm:$0xf] }
 0x1a8   : > { %14816 = vmatprep.subr.bf16.mxu0 %v15957_v37  ;;  %v4593_v57 = vshll.u32 %v13358_v49, 16  ;;  %v4597_v36 = vshrl.u32 %v13358_v49, 16  ;;  %v17180_v10 = vrot.slane %v4528_v20, 4 }
 0x1aa   : > { %v17188_v62 = vrot.slane %v4593_v57, 5  ;;  %v4599_v56 = vrot.slane %v4597_v36, 4  ;;  %v13367_v57 = vld [vmem:[%s16166_s29 + $0x70] sm:$0xf] }
 0x1ab   : > { %14817 = vmatpush3.bf16.msra.mxu0 %v15957_v37  ;;  %v13353_v37 = vld [vmem:[%s16166_s29 + $0x38] sm:$0x1]  ;;  %v4665_v43 = vshll.u32 %v13367_v57, 16 }
 0x1ac   : > { %14818 = vmatprep.subr.bf16.mxu0 %v15960_v16  ;;  %v4555_v15 = vshll.u32 %v13353_v37, 16 }
 0x1ae   : > { %14787 = vmatmul.mubr.bf16.gmra.mrb[4].mxu0 %v15956_v32  ;;  %v4563_v32 = vshll.u32 %v13354_v59, 16  ;;  %v4557_v29 = vrot.slane %v4555_v15, 5 }
 0x1af   : > { %14790 = vmatprep.mubr.bf16.mxu0 %v15958_v46  ;;  %14819 = vmatpush3.bf16.msra.mxu0 %v15960_v16  ;;  %v4560_v16 = vshrl.u32 %v13354_v59, 16  ;;  %v4569_v46 = vshll.u32 %v13355_v8, 16  ;;  %v4603_v59 = vshll.u32 %v13359_v53, 16 }
 0x1b0   : > { %14820 = vmatprep.subr.bf16.mxu0 %v15963_v14  ;;  %v4565_v28 = vrot.slane %v4563_v32, 5 }
 0x1b1   : > { %v4562_v3 = vrot.slane %v4560_v16, 4  ;;  %v17182_v13 = vrot.slane %v4569_v46, 5  ;;  %v17210_v16 = vrot.slane %v4579_v6, 5 }
 0x1b3   : > { %14821 = vmatpush3.bf16.msra.mxu0 %v15963_v14  ;;  %v4573_v14 = vshrl.u32 %v13355_v8, 16  ;;  %v4566_v12 = vor.u32 %v4565_v28, %v4562_v3  ;;  %v4610_v8 = vrot.slane %v4608_v40, 4  ;;  %v13370_v40 = vld [vmem:[%s16166_s29 + $0x7c] sm:$0xf] }
 0x1b4   : > { %14822 = vmatprep.subr.bf16.mxu0 %v15966_v55  ;;  %v4693_v6 = vshrl.u32 %v13370_v40, 16 }
 0x1b5   : > { %v4575_v47 = vrot.slane %v4573_v14, 4  ;;  %v17206_v49 = vrot.slane %v4566_v12, 4  ;;  %v17217_v14 = vrot.slane %v4603_v59, 5 }
 0x1b6   : > { %14791 = vmatmul.mubr.bf16.gmra.mrb[8].mxu0 %v15959_v60  ;;  %v17169_v60 = vrot.slane %v4545_v54, 5 }
 0x1b7   : > { %14794 = vmatprep.mubr.bf16.mxu0 %v15961_v9  ;;  %14823 = vmatpush3.bf16.msra.mxu0 %v15966_v55  ;;  %v15971_v55 = vld [vmem:[%s16166_s29 + $0xb4] sm:$0xff]   ;;  %v4551_v9 = vrot.slane %v4549_v26, 4  ;;  %v4576_v25 = vor.u32 %v4575_v47, %v17182_v13  ;;  %v4572_v35 = vsel %vm16248_vm2, %v17206_v49, %v17182_v13 }
 0x1b8   : > { %14824 = vmatprep.subr.bf16.mxu0 %v15969_v33 }
 0x1b9   : > { %v4552_v27 = vor.u32 %v4551_v9, %v17169_v60  ;;  %v17208_v37 = vrot.slane %v4576_v25, 4  ;;  %v13366_v9 = vld [vmem:[%s16166_s29 + $0x6c] sm:$0xf]  ;;  %v4689_v25 = vshll.u32 %v13370_v40, 16 }
 0x1ba   : > { %v4656_v28 = vshrl.u32 %v13366_v9, 16  ;;  %v4659_v47 = vshll.u32 %v13366_v9, 16 }
 0x1bb   : > { %14825 = vmatpush3.bf16.msra.mxu0 %v15969_v33  ;;  %v4584_v33 = vshrl.u32 %v13357_v30, 16  ;;  %v4553_v54 = vrot.slane %v4552_v27, 4  ;;  %v4582_v27 = vsel %vm16248_vm2, %v17208_v37, %v17210_v16  ;;  %v17266_v37 = vrot.slane %v4689_v25, 5  ;;  %v13379_v25 = vld [vmem:[%s16166_s29 + $0xa0] sm:$0xf] }
 0x1bc   : > { %14826 = vmatprep.subr.bf16.mxu0 %v15972_v23  ;;  %v13412_v16 = vcombine.low %v4572_v35, %v4582_v27 }
 0x1bd   : > { %v4558_v46 = vsel %vm16248_vm2, %v4553_v54, %v4557_v29  ;;  %v4658_v54 = vrot.slane %v4656_v28, 4 }
 0x1be   : > { %14795 = vmatmul.mubr.bf16.gmra.mrb[12].mxu0 %v15962_v48  ;;  %v15973_v48 = vld [vmem:[%s16166_s29 + $0xc0] sm:$0xff]  }
 0x1bf   : > { %14798 = vmatprep.mubr.bf16.mxu0 %v15964_v38  ;;  %14827 = vmatpush3.bf16.msra.mxu0 %v15972_v23  ;;  %v4587_v23 = vshll.u32 %v13357_v30, 16  ;;  %v17172_v38 = vrot.slane %v4531_v31, 5  ;;  %v4632_v31 = vshrl.u32 %v13363_v45, 16  ;;  %v4600_v30 = vor.u32 %v4599_v56, %v17188_v62 }
 0x1c0   : > { %14828 = vmatprep.subr.bf16.mxu0 %v15975_v42 }
 0x1c1   : > { %v4589_v52 = vrot.slane %v4587_v23, 5  ;;  %v4534_v20 = vsel %vm16248_vm2, %v17180_v10, %v17172_v38  ;;  %v15985_v23 = vld [vmem:[%s18796_s3 + $0x8] sm:$0xff]   ;;  %v4601_v58 = vrot.slane %v4600_v30, 4 }
 0x1c2   : > { %v13365_v10 = vld [vmem:[%s16166_s29 + $0x68] sm:$0x1] }
 0x1c3   : > { %14829 = vmatpush3.bf16.msra.mxu0 %v15975_v42  ;;  %v4542_v42 = vor.u32 %v4541_v41, %v4538_v22  ;;  %v4635_v22 = vshll.u32 %v13363_v45, 16  ;;  %v4641_v41 = vshll.u32 %v13364_v2, 16  ;;  %v13368_v45 = vld [vmem:[%s16166_s29 + $0x74] sm:$0x1] }
 0x1c4   : > { %14862 = vmatprep.subr.bf16.mxu0 %v17142_v18 }
 0x1c5   : > { %v4543_v5 = vrot.slane %v4542_v42, 4  ;;  %v4637_v38 = vrot.slane %v4635_v22, 5  ;;  %v4675_v22 = vshll.u32 %v13368_v45, 16 }
 0x1c6   : > { %14799 = vmatmul.mubr.bf16.gmra.mrb[16].mxu0 %v15965_v61  ;;  %v4500_v61 = vsel %vm16248_vm2, %v4495_v4, %v17149_v1  ;;  %v4586_v1 = vrot.slane %v4584_v33, 4  ;;  %v13362_v4 = vld [vmem:[%s16166_s29 + $0x5c] sm:$0x1]  ;;  %v15984_v33 = vld [vmem:[%s18796_s3] sm:$0xff]  }
 0x1c7   : > { %14802 = vmatprep.mubr.bf16.mxu0 %v15967_v63  ;;  %v4510_v63 = vsel %vm16248_vm2, %v4505_v19, %v4509_v50  ;;  %v4613_v19 = vrot.slane %v4611_v0, 5  ;;  %v17200_v50 = vrot.slane %v4617_v34, 5  ;;  %v4548_v32 = vsel %vm16248_vm2, %v4543_v5, %v17169_v60  ;;  %14910 = vmatprep.subr.bf16.mxu1 %v15984_v33  ;;  %v15977_v5 = vld [vmem:[%s18794_s1 + $0x208] sm:$0xff]  }
 0x1c8   : > { %v4590_v26 = vor.u32 %v4589_v52, %v4586_v1  ;;  %v17226_v60 = vrot.slane %v4641_v41, 5  ;;  %v13411_v3 = vcombine.low %v4548_v32, %v4558_v46  ;;  %14911 = vmatpush3.bf16.msra.mxu1 %v15984_v33  ;;  %v4669_v1 = vshrl.u32 %v13367_v57, 16  ;;  %v13369_v52 = vld [vmem:[%s16166_s29 + $0x78] sm:$0xf]  ;;  %v15978_v41 = vld [vmem:[%s18794_s1 + $0x210] sm:$0xff]  }
 0x1c9   : > { %14912 = vmatprep.subr.bf16.mxu1 %v15985_v23  ;;  %v4651_v0 = vshll.u32 %v13365_v10, 16  ;;  %v4680_v29 = vshrl.u32 %v13369_v52, 16  ;;  %v4683_v12 = vshll.u32 %v13369_v52, 16 }
 0x1ca   : > { %v4591_v36 = vrot.slane %v4590_v26, 4  ;;  %v4661_v26 = vrot.slane %v4659_v47, 5  ;;  %v4671_v59 = vrot.slane %v4669_v1, 4 }
 0x1cb   : > { %v4685_v49 = vrot.slane %v4683_v12, 5 }
 0x1cc   : > { %14913 = vmatpush3.bf16.msra.mxu1 %v15985_v23  ;;  %v4662_v46 = vor.u32 %v4661_v26, %v4658_v54 }
 0x1ce   : > { %14803 = vmatmul.mubr.bf16.gmra.mrb[20].mxu0 %v15968_v7  ;;  %v13409_v7 = vcombine.low %v4500_v61, %v4510_v63  ;;  %v4614_v61 = vor.u32 %v4613_v19, %v4610_v8  ;;  %v17294_v28 = vrot.slane %v4662_v46, 4 }
 0x1cf   : > { %14806 = vmatprep.mubr.bf16.mxu0 %v15970_v21  ;;  %v4524_v21 = vsel %vm16248_vm2, %v17163_v39, %v17158_v24  ;;  %v4645_v24 = vshrl.u32 %v13364_v2, 16  ;;  %v4623_v39 = vrot.slane %v4621_v44, 4  ;;  %v13372_v2 = vld [vmem:[%s16166_s29 + $0x84] sm:$0xf] }
 0x1d0   : > { %v13410_v15 = vcombine.low %v4524_v21, %v4534_v20  ;;  %v4606_v21 = vsel %vm16248_vm2, %v4601_v58, %v17217_v14  ;;  %v17253_v34 = vrot.slane %v4614_v61, 4  ;;  %v4707_v30 = vshll.u32 %v13372_v2, 16  ;;  %v13376_v61 = vld [vmem:[%s16166_s29 + $0x94] sm:$0xf] }
 0x1d1   : > { %v4647_v42 = vrot.slane %v4645_v24, 4  ;;  %v4624_v63 = vor.u32 %v4623_v39, %v17200_v50  ;;  %v4704_v24 = vshrl.u32 %v13372_v2, 16  ;;  %v4682_v20 = vrot.slane %v4680_v29, 4 }
 0x1d2   : > { %v4620_v9 = vsel %vm16248_vm2, %v17253_v34, %v17200_v50  ;;  %v4709_v50 = vrot.slane %v4707_v30, 5  ;;  %v4741_v1 = vshrl.u32 %v13376_v61, 16  ;;  %v4765_v30 = vshrl.u32 %v13379_v25, 16 }
 0x1d3   : > { %v4648_v56 = vor.u32 %v4647_v42, %v17226_v60  ;;  %v17255_v44 = vrot.slane %v4624_v63, 4  ;;  %v13375_v42 = vld [vmem:[%s16166_s29 + $0x90] sm:$0xf]  ;;  %v4706_v57 = vrot.slane %v4704_v24, 4  ;;  %v4686_v10 = vor.u32 %v4685_v49, %v4682_v20 }
 0x1d4   : > { %v4728_v35 = vshrl.u32 %v13375_v42, 16  ;;  %v4731_v27 = vshll.u32 %v13375_v42, 16  ;;  %v4743_v54 = vrot.slane %v4741_v1, 4  ;;  %v4761_v24 = vshll.u32 %v13379_v25, 16 }
 0x1d5   : > { %v4710_v40 = vor.u32 %v4709_v50, %v4706_v57  ;;  %v4767_v42 = vrot.slane %v4765_v30, 4 }
 0x1d6   : > { %14807 = vmatmul.mubr.bf16.gmra.mrb[24].mxu0 %v15971_v55  ;;  %v4627_v55 = vshll.u32 %v13362_v4, 16  ;;  %v4649_v4 = vrot.slane %v4648_v56, 4  ;;  %v13378_v56 = vld [vmem:[%s16166_s29 + $0x9c] sm:$0xf]  ;;  %v4730_v29 = vrot.slane %v4728_v35, 4  ;;  %v4733_v12 = vrot.slane %v4731_v27, 5 }
 0x1d7   : > { %14810 = vmatprep.mubr.bf16.mxu0 %v15973_v48  ;;  %v4634_v48 = vrot.slane %v4632_v31, 4  ;;  %v4653_v31 = vrot.slane %v4651_v0, 5  ;;  %v4752_v26 = vshrl.u32 %v13378_v56, 16  ;;  %v13385_v35 = vld [vmem:[%s16166_s29 + $0xb8] sm:$0xf] }
 0x1d8   : > { %v17244_v53 = vrot.slane %v4627_v55, 5  ;;  %v13371_v55 = vld [vmem:[%s16166_s29 + $0x80] sm:$0x1] }
 0x1d9   : > { %v4638_v13 = vor.u32 %v4637_v38, %v4634_v48  ;;  %v17281_v48 = vrot.slane %v4675_v22, 5  ;;  %v15979_v38 = vld [vmem:[%s18794_s1 + $0x218] sm:$0xff]   ;;  %v4654_v63 = vsel %vm16248_vm2, %v4649_v4, %v4653_v31  ;;  %v4711_v4 = vrot.slane %v4710_v40, 4 }
 0x1da   : > { %v4630_v33 = vsel %vm16248_vm2, %v17255_v44, %v17244_v53  ;;  %v13377_v44 = vld [vmem:[%s16166_s29 + $0x98] sm:$0x1] }
 0x1db   : > { %v4639_v8 = vrot.slane %v4638_v13, 4  ;;  %v13414_v52 = vcombine.low %v4620_v9, %v4630_v33  ;;  %v15980_v13 = vld [vmem:[%s18794_s1 + $0x220] sm:$0xff]  }
 0x1dd   : > { %v4644_v23 = vsel %vm16248_vm2, %v4639_v8, %v17226_v60  ;;  %v13382_v8 = vld [vmem:[%s16166_s29 + $0xac] sm:$0xf] }
 0x1de   : > { %14811 = vmatmul.mubr.bf16.gmra.mrb[28].mxu0 %v15974_v11  ;;  %v13373_v11 = vld [vmem:[%s16166_s29 + $0x88] sm:$0xf]  ;;  %v13415_v0 = vcombine.low %v4644_v23, %v4654_v63  ;;  %v13380_v23 = vld [vmem:[%s16166_s29 + $0xa4] sm:$0x1]  ;;  %v13383_v63 = vld [vmem:[%s16166_s29 + $0xb0] sm:$0x1] }
 0x1df   : > { %14830 = vmatprep.mubr.bf16.mxu0 %v13409_v7  ;;  %v4596_v7 = vsel %vm16248_vm2, %v4591_v36, %v17188_v62  ;;  %v17260_v62 = vrot.slane %v4665_v43, 5  ;;  %v4713_v19 = vshll.u32 %v13373_v11, 16  ;;  %v4717_v39 = vshrl.u32 %v13373_v11, 16 }
 0x1e0   : > { %v13413_v32 = vcombine.low %v4596_v7, %v4606_v21  ;;  %v4737_v43 = vshll.u32 %v13376_v61, 16  ;;  %v4687_v7 = vrot.slane %v4686_v10, 4  ;;  %v4795_v40 = vshll.u32 %v13383_v63, 16 }
 0x1e1   : > { %v4672_v14 = vor.u32 %v4671_v59, %v17260_v62  ;;  %v17287_v36 = vrot.slane %v4713_v19, 5  ;;  %v4719_v58 = vrot.slane %v4717_v39, 4  ;;  %v4668_v45 = vsel %vm16248_vm2, %v17294_v28, %v17260_v62 }
 0x1e2   : > { %v17314_v11 = vrot.slane %v4737_v43, 5  ;;  %v4755_v59 = vshll.u32 %v13378_v56, 16  ;;  %v4747_v62 = vshll.u32 %v13377_v44, 16  ;;  %v4692_v20 = vsel %vm16248_vm2, %v4687_v7, %v17266_v37  ;;  %v15983_v43 = vld [vmem:[%s18794_s1 + $0x238] sm:$0xff]  }
 0x1e3   : > { %v17296_v47 = vrot.slane %v4672_v14, 4  ;;  %v4754_v14 = vrot.slane %v4752_v26, 4  ;;  %v4716_v9 = vsel %vm16248_vm2, %v4711_v4, %v17287_v36  ;;  %v4809_v7 = vshll.u32 %v13385_v35, 16 }
 0x1e4   : > { %v4744_v46 = vor.u32 %v4743_v54, %v17314_v11  ;;  %v4749_v33 = vrot.slane %v4747_v62, 5 }
 0x1e5   : > { %v4678_v2 = vsel %vm16248_vm2, %v17296_v47, %v17281_v48  ;;  %v15982_v48 = vld [vmem:[%s18794_s1 + $0x230] sm:$0xff]   ;;  %v4771_v47 = vshll.u32 %v13380_v23, 16 }
 0x1e6   : > { %14831 = vmatmul.mubr.bf16.vlgmr.msra.gmra.mrb[0].mxu0 %v13410_v15  ;;  %v4699_v15 = vshll.u32 %v13371_v55, 16  ;;  %v4757_v55 = vrot.slane %v4755_v59, 5  ;;  %v4797_v59 = vrot.slane %v4795_v40, 5 }
 0x1e7   : > { %14863 = vmatpush3.bf16.msra.mxu0 %v17142_v18  ;;  %14834 = vmatprep.mubr.bf16.mxu0 %v13411_v3  ;;  %v4695_v18 = vrot.slane %v4693_v6, 4  ;;  %v13374_v3 = vld [vmem:[%s16166_s29 + $0x8c] sm:$0x1]  ;;  %v13381_v6 = vld [vmem:[%s16166_s29 + $0xa8] sm:$0xf] }
 0x1e8   : > { %14864 = vmatprep.subr.bf16.mxu0 %v15977_v5  ;;  %v4723_v53 = vshll.u32 %v13374_v3, 16  ;;  %v4701_v34 = vrot.slane %v4699_v15, 5  ;;  %v4776_v19 = vshrl.u32 %v13381_v6, 16  ;;  %v4779_v39 = vshll.u32 %v13381_v6, 16 }
 0x1e9   : > { %v4696_v60 = vor.u32 %v4695_v18, %v17266_v37  ;;  %v4785_v18 = vshll.u32 %v13382_v8, 16  ;;  %v4745_v3 = vrot.slane %v4744_v46, 4  ;;  %v4758_v28 = vor.u32 %v4757_v55, %v4754_v14  ;;  %v13389_v46 = vld [vmem:[%s16166_s29 + $0xc8] sm:$0x1] }
 0x1ea   : > { %v4725_v22 = vrot.slane %v4723_v53, 5  ;;  %v4778_v57 = vrot.slane %v4776_v19, 4  ;;  %v4781_v50 = vrot.slane %v4779_v39, 5  ;;  %v13387_v53 = vld [vmem:[%s16166_s29 + $0xc0] sm:$0xf] }
 0x1eb   : > { %14865 = vmatpush3.bf16.msra.mxu0 %v15977_v5  ;;  %v4720_v5 = vor.u32 %v4719_v58, %v17287_v36  ;;  %v4697_v21 = vrot.slane %v4696_v60, 4  ;;  %v13416_v58 = vcombine.low %v4668_v45, %v4678_v2  ;;  %v17338_v36 = vrot.slane %v4785_v18, 5  ;;  %v13384_v60 = vld [vmem:[%s16166_s29 + $0xb4] sm:$0xf] }
 0x1ec   : > { %14866 = vmatprep.subr.bf16.mxu0 %v15978_v41  ;;  %v4750_v44 = vsel %vm16248_vm2, %v4745_v3, %v4749_v33  ;;  %v4759_v45 = vrot.slane %v4758_v28, 4  ;;  %v4773_v2 = vrot.slane %v4771_v47, 5 }
 0x1ed   : > { %v4721_v31 = vrot.slane %v4720_v5, 4  ;;  %v4702_v49 = vsel %vm16248_vm2, %v4697_v21, %v4701_v34  ;;  %v4800_v5 = vshrl.u32 %v13384_v60, 16  ;;  %v4813_v21 = vshrl.u32 %v13385_v35, 16 }
 0x1ee   : > { %14835 = vmatmul.mubr.bf16.gmra.mrb[4].mxu0 %v13412_v16  ;;  %v4789_v16 = vshrl.u32 %v13382_v8, 16  ;;  %v13417_v61 = vcombine.low %v4692_v20, %v4702_v49  ;;  %v13391_v49 = vld [vmem:[%s16166_s29 + $0xd0] sm:$0xf] }
 0x1ef   : > { %14838 = vmatprep.mubr.bf16.mxu0 %v13413_v32  ;;  %14867 = vmatpush3.bf16.msra.mxu0 %v15978_v41  ;;  %v15981_v41 = vld [vmem:[%s18794_s1 + $0x228] sm:$0xff]   ;;  %v4734_v32 = vor.u32 %v4733_v12, %v4730_v29  ;;  %v4726_v37 = vsel %vm16248_vm2, %v4721_v31, %v4725_v22  ;;  %v4824_v29 = vshrl.u32 %v13387_v53, 16  ;;  %v4827_v12 = vshll.u32 %v13387_v53, 16 }
 0x1f0   : > { %14868 = vmatprep.subr.bf16.mxu0 %v15979_v38  ;;  %v4791_v10 = vrot.slane %v4789_v16, 4  ;;  %v13418_v27 = vcombine.low %v4716_v9, %v4726_v37  ;;  %v4802_v8 = vrot.slane %v4800_v5, 4  ;;  %v4811_v22 = vrot.slane %v4809_v7, 5 }
 0x1f1   : > { %v4735_v15 = vrot.slane %v4734_v32, 4  ;;  %v4815_v62 = vrot.slane %v4813_v21, 4  ;;  %v4826_v30 = vrot.slane %v4824_v29, 4  ;;  %v4829_v19 = vrot.slane %v4827_v12, 5  ;;  %v13433_v21 = vld [vmem:[%s16166_s29 + $0x18] sm:$0xe] }
 0x1f2   : > { %v4792_v56 = vor.u32 %v4791_v10, %v17338_v36 }
 0x1f3   : > { %14869 = vmatpush3.bf16.msra.mxu0 %v15979_v38  ;;  %v17335_v38 = vrot.slane %v4761_v24, 5  ;;  %v4740_v34 = vsel %vm16248_vm2, %v4735_v15, %v17314_v11  ;;  %v13386_v11 = vld [vmem:[%s16166_s29 + $0xbc] sm:$0x1]  ;;  %v13390_v24 = vld [vmem:[%s16166_s29 + $0xcc] sm:$0xf]  ;;  %v4816_v37 = vor.u32 %v4815_v62, %v4811_v22 }
 0x1f4   : > { %14870 = vmatprep.subr.bf16.mxu0 %v15980_v13  ;;  %v4793_v4 = vrot.slane %v4792_v56, 4  ;;  %v4819_v32 = vshll.u32 %v13386_v11, 16  ;;  %v4848_v33 = vshrl.u32 %v13390_v24, 16  ;;  %v4851_v23 = vshll.u32 %v13390_v24, 16  ;;  %v13436_v62 = vld [vmem:[%s16166_s29 + $0x24] sm:$0xe] }
 0x1f5   : > { %v4768_v1 = vor.u32 %v4767_v42, %v17335_v38  ;;  %v4764_v18 = vsel %vm16248_vm2, %v4759_v45, %v17335_v38  ;;  %v4861_v38 = vshrl.u32 %v13391_v49, 16  ;;  %v4830_v42 = vor.u32 %v4829_v19, %v4826_v30  ;;  %v13439_v30 = vld [vmem:[%s16166_s29 + $0x30] sm:$0xe]  ;;  %v13441_v19 = vld [vmem:[%s16166_s29 + $0x38] sm:$0x1] }
 0x1f6   : > { %14839 = vmatmul.mubr.bf16.gmra.mrb[8].mxu0 %v13414_v52  ;;  %v4782_v52 = vor.u32 %v4781_v50, %v4778_v57  ;;  %v4798_v55 = vsel %vm16248_vm2, %v4793_v4, %v4797_v59  ;;  %v4843_v50 = vshll.u32 %v13389_v46, 16  ;;  %v4817_v10 = vrot.slane %v4816_v37, 4  ;;  %v13440_v59 = vld [vmem:[%s16166_s29 + $0x34] sm:$0xf] }
 0x1f7   : > { %14842 = vmatprep.mubr.bf16.mxu0 %v13415_v0  ;;  %14871 = vmatpush3.bf16.msra.mxu0 %v15980_v13  ;;  %v13388_v13 = vld [vmem:[%s16166_s29 + $0xc4] sm:$0xf]  ;;  %v4803_v0 = vshll.u32 %v13384_v60, 16  ;;  %v4769_v54 = vrot.slane %v4768_v1, 4  ;;  %v4850_v60 = vrot.slane %v4848_v33, 4  ;;  %v4853_v15 = vrot.slane %v4851_v23, 5 }
 0x1f8   : > { %14872 = vmatprep.subr.bf16.mxu0 %v15981_v41  ;;  %v4833_v25 = vshll.u32 %v13388_v13, 16  ;;  %v4837_v6 = vshrl.u32 %v13388_v13, 16  ;;  %v4783_v26 = vrot.slane %v4782_v52, 4  ;;  %v4863_v28 = vrot.slane %v4861_v38, 4  ;;  %v13434_v1 = vld [vmem:[%s16166_s29 + $0x1c] sm:$0xf] }
 0x1f9   : > { %v4805_v31 = vrot.slane %v4803_v0, 5  ;;  %v4774_v16 = vsel %vm16248_vm2, %v4769_v54, %v4773_v2  ;;  %v4831_v47 = vrot.slane %v4830_v42, 4  ;;  %v4854_v5 = vor.u32 %v4853_v15, %v4850_v60  ;;  %v13442_v42 = vld [vmem:[%s16166_s29 + $0x3c] sm:$0xe] }
 0x1fa   : > { %v4835_v39 = vrot.slane %v4833_v25, 5  ;;  %v4839_v20 = vrot.slane %v4837_v6, 4  ;;  %v4788_v14 = vsel %vm16248_vm2, %v4783_v26, %v17338_v36  ;;  %v4821_v36 = vrot.slane %v4819_v32, 5  ;;  %v13437_v26 = vld [vmem:[%s16166_s29 + $0x28] sm:$0xf] }
 0x1fb   : > { %14873 = vmatpush3.bf16.msra.mxu0 %v15981_v41  ;;  %v13419_v41 = vcombine.low %v4740_v34, %v4750_v44  ;;  %v4806_v9 = vor.u32 %v4805_v31, %v4802_v8  ;;  %v5355_v7 = vrot.slane %v13434_v1, 5  ;;  %v13435_v34 = vld [vmem:[%s16166_s29 + $0x20] sm:$0x1]  ;;  %v4855_v2 = vrot.slane %v4854_v5, 4 }
 0x1fc   : > { %14874 = vmatprep.subr.bf16.mxu0 %v15982_v48  ;;  %v4840_v57 = vor.u32 %v4839_v20, %v4835_v39  ;;  %v4822_v40 = vsel %vm16248_vm2, %v4817_v10, %v4821_v36  ;;  %v4836_v56 = vsel %vm16248_vm2, %v4831_v47, %v4835_v39  ;;  %v13481_v25 = vrot.slane %v13433_v21, 9 }
 0x1fd   : > { %v4807_v63 = vrot.slane %v4806_v9, 4  ;;  %v5357_v6 = vrot.slane %v5355_v7, 4  ;;  %v5358_v54 = vrot.slane %v13435_v34, 5  ;;  %v5362_v11 = vrot.slane %v13437_v26, 5  ;;  %v13446_v9 = vld [vmem:[%s16166_s29 + $0x4c] sm:$0xf] }
 0x1fe   : > { %14843 = vmatmul.mubr.bf16.gmra.mrb[12].mxu0 %v13416_v58  ;;  %v13420_v58 = vcombine.low %v4764_v18, %v4774_v16  ;;  %v4841_v35 = vrot.slane %v4840_v57, 4  ;;  %v5356_v31 = vsel %vm16467_vm5, %v13481_v25, %v5355_v7  ;;  %v5369_v24 = vrot.slane %v13440_v59, 5  ;;  %v13444_v57 = vld [vmem:[%s16166_s29 + $0x44] sm:$0x1]  ;;  %v13453_v7 = vld [vmem:[%s16166_s29 + $0x68] sm:$0x1] }
 0x1ff   : > { %14846 = vmatprep.mubr.bf16.mxu0 %v13417_v61  ;;  %14875 = vmatpush3.bf16.msra.mxu0 %v15982_v48  ;;  %v4857_v48 = vshll.u32 %v13391_v49, 16  ;;  %v13421_v61 = vcombine.low %v4788_v14, %v4798_v55  ;;  %v4812_v52 = vsel %vm16248_vm2, %v4807_v63, %v4811_v22  ;;  %v5359_v22 = vsel %vm16467_vm5, %v5357_v6, %v5358_v54  ;;  %v13443_v55 = vld [vmem:[%s16166_s29 + $0x40] sm:$0xf]  ;;  %v13455_v6 = vld [vmem:[%s16166_s29 + $0x70] sm:$0xf] }
 0x200   : > { %14876 = vmatprep.subr.bf16.mxu0 %v15983_v43  ;;  %v13422_v44 = vcombine.low %v4812_v52, %v4822_v40  ;;  %v13513_v20 = vcombine.low %v5356_v31, %v5359_v22  ;;  %v13482_v49 = vrot.slane %v13436_v62, 9  ;;  %v5364_v18 = vrot.slane %v5362_v11, 4  ;;  %v13458_v54 = vld [vmem:[%s16166_s29 + $0x7c] sm:$0xf]  ;;  %v13454_v31 = vld [vmem:[%s16166_s29 + $0x6c] sm:$0xe] }
 0x201   : > { %v4859_v3 = vrot.slane %v4857_v48, 5  ;;  %v13483_v32 = vrot.slane %v13439_v30, 9  ;;  %v5371_v46 = vrot.slane %v5369_v24, 4  ;;  %v5372_v14 = vrot.slane %v13441_v19, 5  ;;  %v13456_v22 = vld [vmem:[%s16166_s29 + $0x74] sm:$0x1] }
 0x202   : > { %v5363_v37 = vsel %vm16467_vm5, %v13482_v49, %v5362_v11  ;;  %v5376_v23 = vrot.slane %v13443_v55, 5  ;;  %v13484_v36 = vrot.slane %v13442_v42, 9  ;;  %v5379_v15 = vrot.slane %v13444_v57, 5  ;;  %v13463_v57 = vld [vmem:[%s16166_s29 + $0x90] sm:$0xe] }
 0x203   : > { %14877 = vmatpush3.bf16.msra.mxu0 %v15983_v43  ;;  %v13392_v43 = vld [vmem:[%s16166_s29 + $0xd4] sm:$0x1]  ;;  %v4864_v53 = vor.u32 %v4863_v28, %v4859_v3  ;;  %v4860_v8 = vsel %vm16248_vm2, %v4855_v2, %v4859_v3  ;;  %v5370_v48 = vsel %vm16467_vm5, %v13483_v32, %v5369_v24  ;;  %v5373_v38 = vsel %vm16467_vm5, %v5371_v46, %v5372_v14  ;;  %v13459_v24 = vld [vmem:[%s16166_s29 + $0x80] sm:$0x1]  ;;  %v13461_v46 = vld [vmem:[%s16166_s29 + $0x88] sm:$0xf] }
 0x204   : > { %v4867_v13 = vshll.u32 %v13392_v43, 16  ;;  %v13515_v10 = vcombine.low %v5370_v48, %v5373_v38  ;;  %v5378_v60 = vrot.slane %v5376_v23, 4  ;;  %v5377_v43 = vsel %vm16467_vm5, %v13484_v36, %v5376_v23  ;;  %v13464_v14 = vld [vmem:[%s16166_s29 + $0x94] sm:$0xf]  ;;  %v13460_v48 = vld [vmem:[%s16166_s29 + $0x84] sm:$0xe] }
 0x205   : > { %v4865_v29 = vrot.slane %v4864_v53, 4  ;;  %v13448_v53 = vld [vmem:[%s16166_s29 + $0x54] sm:$0xe]  ;;  %v5400_v25 = vrot.slane %v13453_v7, 5  ;;  %v5411_v62 = vrot.slane %v13458_v54, 5  ;;  %v5407_v49 = vrot.slane %v13456_v22, 5 }
 0x206   : > { %14847 = vmatmul.mubr.bf16.gmra.mrb[16].mxu0 %v13418_v27  ;;  %v4845_v27 = vrot.slane %v4843_v50, 5  ;;  %v4869_v12 = vrot.slane %v4867_v13, 5  ;;  %v5383_v50 = vrot.slane %v13446_v9, 5  ;;  %v5380_v1 = vsel %vm16467_vm5, %v5378_v60, %v5379_v15  ;;  %v13450_v13 = vld [vmem:[%s16166_s29 + $0x5c] sm:$0x1] }
 0x207   : > { %14850 = vmatprep.mubr.bf16.mxu0 %v13419_v41  ;;  %v13438_v41 = vld [vmem:[%s16166_s29 + $0x2c] sm:$0x1]  ;;  %v13516_v21 = vcombine.low %v5377_v43, %v5380_v1  ;;  %v5393_v2 = vrot.slane %v13450_v13, 5  ;;  %v5414_v32 = vrot.slane %v13459_v24, 5  ;;  %v5425_v42 = vrot.slane %v13464_v14, 5 }
 0x208   : > { %v4846_v0 = vsel %vm16248_vm2, %v4841_v35, %v4845_v27  ;;  %v4870_v4 = vsel %vm16248_vm2, %v4865_v29, %v4869_v12  ;;  %v5365_v16 = vrot.slane %v13438_v41, 5  ;;  %v5385_v28 = vrot.slane %v5383_v50, 4  ;;  %v13449_v35 = vld [vmem:[%s16166_s29 + $0x58] sm:$0xf]  ;;  %v13452_v27 = vld [vmem:[%s16166_s29 + $0x64] sm:$0xf] }
 0x209   : > { %v13423_v45 = vcombine.low %v4836_v56, %v4846_v0  ;;  %v13424_v39 = vcombine.low %v4860_v8, %v4870_v4  ;;  %v5390_v52 = vrot.slane %v13449_v35, 5  ;;  %v5397_v56 = vrot.slane %v13452_v27, 5  ;;  %v13451_v0 = vld [vmem:[%s16166_s29 + $0x60] sm:$0xe]  ;;  %v13457_v41 = vld [vmem:[%s16166_s29 + $0x78] sm:$0xe] }
 0x20a   : > { %v5366_v33 = vsel %vm16467_vm5, %v5364_v18, %v5365_v16  ;;  %v13487_v29 = vrot.slane %v13451_v0, 9  ;;  %v5404_v8 = vrot.slane %v13455_v6, 5  ;;  %v13489_v18 = vrot.slane %v13457_v41, 9  ;;  %v13462_v38 = vld [vmem:[%s16166_s29 + $0x8c] sm:$0x1] }
 0x20b   : > { %v13514_v63 = vcombine.low %v5363_v37, %v5366_v33  ;;  %v5399_v12 = vrot.slane %v5397_v56, 4  ;;  %v5413_v16 = vrot.slane %v5411_v62, 4  ;;  %v5418_v37 = vrot.slane %v13461_v46, 5  ;;  %v13469_v13 = vld [vmem:[%s16166_s29 + $0xa8] sm:$0xe] }
 0x20c   : > { %v5398_v4 = vsel %vm16467_vm5, %v13487_v29, %v5397_v56  ;;  %v5412_v33 = vsel %vm16467_vm5, %v13489_v18, %v5411_v62  ;;  %v5421_v36 = vrot.slane %v13462_v38, 5  ;;  %v13491_v60 = vrot.slane %v13463_v57, 9  ;;  %v13471_v56 = vld [vmem:[%s16166_s29 + $0xb0] sm:$0x1]  ;;  %v13475_v22 = vld [vmem:[%s16166_s29 + $0xc0] sm:$0xe] }
 0x20d   : > { %v5401_v11 = vsel %vm16467_vm5, %v5399_v12, %v5400_v25  ;;  %v5415_v23 = vsel %vm16467_vm5, %v5413_v16, %v5414_v32  ;;  %v5427_v15 = vrot.slane %v5425_v42, 4  ;;  %v5442_v29 = vrot.slane %v13471_v56, 5  ;;  %v13473_v12 = vld [vmem:[%s16166_s29 + $0xb8] sm:$0xf]  ;;  %v13476_v25 = vld [vmem:[%s16166_s29 + $0xc4] sm:$0xf] }
 0x20e   : > { %14851 = vmatmul.mubr.bf16.gmra.mrb[20].mxu0 %v13420_v58  ;;  %v13445_v58 = vld [vmem:[%s16166_s29 + $0x48] sm:$0xe]  ;;  %v13519_v19 = vcombine.low %v5398_v4, %v5401_v11  ;;  %v5426_v1 = vsel %vm16467_vm5, %v13491_v60, %v5425_v42  ;;  %v13472_v4 = vld [vmem:[%s16166_s29 + $0xb4] sm:$0xe]  ;;  %v13474_v11 = vld [vmem:[%s16166_s29 + $0xbc] sm:$0x1] }
 0x20f   : > { %14854 = vmatprep.mubr.bf16.mxu0 %v13421_v61  ;;  %v13447_v61 = vld [vmem:[%s16166_s29 + $0x50] sm:$0x1]  ;;  %v13485_v3 = vrot.slane %v13445_v58, 9  ;;  %v13477_v62 = vld [vmem:[%s16166_s29 + $0xc8] sm:$0x1]  ;;  %v15988_v60 = vld [vmem:[%s18796_s3 + $0x20] sm:$0xff]  }
 0x210   : > { %v5386_v47 = vrot.slane %v13447_v61, 5  ;;  %v13521_v61 = vcombine.low %v5412_v33, %v5415_v23  ;;  %v5456_v18 = vrot.slane %v13477_v62, 5  ;;  %v13479_v16 = vld [vmem:[%s16166_s29 + $0xd0] sm:$0xf]  ;;  %v13480_v33 = vld [vmem:[%s16166_s29 + $0xd4] sm:$0x1] }
 0x211   : > { %v5384_v40 = vsel %vm16467_vm5, %v13485_v3, %v5383_v50  ;;  %v13465_v50 = vld [vmem:[%s16166_s29 + $0x98] sm:$0x1]  ;;  %v5460_v14 = vrot.slane %v13479_v16, 5  ;;  %v5463_v57 = vrot.slane %v13480_v33, 5 }
 0x212   : > { %v5387_v5 = vsel %vm16467_vm5, %v5385_v28, %v5386_v47  ;;  %v5428_v3 = vrot.slane %v13465_v50, 5  ;;  %v13467_v28 = vld [vmem:[%s16166_s29 + $0xa0] sm:$0xf]  ;;  %v13470_v47 = vld [vmem:[%s16166_s29 + $0xac] sm:$0xf] }
 0x213   : > { %v13517_v34 = vcombine.low %v5384_v40, %v5387_v5  ;;  %v5432_v43 = vrot.slane %v13467_v28, 5  ;;  %v13466_v40 = vld [vmem:[%s16166_s29 + $0x9c] sm:$0xe]  ;;  %v13468_v5 = vld [vmem:[%s16166_s29 + $0xa4] sm:$0x1]  ;;  %v5462_v42 = vrot.slane %v5460_v14, 4 }
 0x214   : > { %v15991_v28 = vld [vmem:[%s18796_s3 + $0x38] sm:$0xff]  }
 0x216   : > { %14855 = vmatmul.mubr.bf16.gmra.mrb[24].mxu0 %v13422_v44  ;;  %v13486_v44 = vrot.slane %v13448_v53, 9  ;;  %v5439_v53 = vrot.slane %v13470_v47, 5 }
 0x217   : > { %14858 = vmatprep.mubr.bf16.mxu0 %v13423_v45  ;;  %v5392_v45 = vrot.slane %v5390_v52, 4 }
 0x218   : > { %v5391_v26 = vsel %vm16467_vm5, %v13486_v44, %v5390_v52  ;;  %v5429_v52 = vsel %vm16467_vm5, %v5427_v15, %v5428_v3  ;;  %v5435_v44 = vrot.slane %v13468_v5, 5  ;;  %v15989_v15 = vld [vmem:[%s18796_s3 + $0x28] sm:$0xff]   ;;  %v15990_v3 = vld [vmem:[%s18796_s3 + $0x30] sm:$0xff]  }
 0x219   : > { %v5394_v59 = vsel %vm16467_vm5, %v5392_v45, %v5393_v2  ;;  %v13523_v7 = vcombine.low %v5426_v1, %v5429_v52  ;;  %v13493_v45 = vrot.slane %v13469_v13, 9  ;;  %v5441_v2 = vrot.slane %v5439_v53, 4 }
 0x21a   : > { %v13518_v30 = vcombine.low %v5391_v26, %v5394_v59  ;;  %v5446_v26 = vrot.slane %v13473_v12, 5 }
 0x21b   : > { %v5440_v59 = vsel %vm16467_vm5, %v13493_v45, %v5439_v53 }
 0x21e   : > { %14859 = vmatmul.mubr.bf16.gmra.mrb[28].mxu0 %v13424_v39  ;;  %v13488_v39 = vrot.slane %v13454_v31, 9  ;;  %v5453_v31 = vrot.slane %v13476_v25, 5 }
 0x21f   : > { %14878 = vmatprep.mubr.bf16.mxu0 %v13513_v20  ;;  %v5406_v20 = vrot.slane %v5404_v8, 4 }
 0x220   : > { %v5405_v55 = vsel %vm16467_vm5, %v13488_v39, %v5404_v8  ;;  %v5443_v8 = vsel %vm16467_vm5, %v5441_v2, %v5442_v29  ;;  %v5449_v39 = vrot.slane %v13474_v11, 5 }
 0x221   : > { %v5408_v9 = vsel %vm16467_vm5, %v5406_v20, %v5407_v49  ;;  %v13525_v24 = vcombine.low %v5440_v59, %v5443_v8  ;;  %v13495_v20 = vrot.slane %v13475_v22, 9  ;;  %v5455_v49 = vrot.slane %v5453_v31, 4 }
 0x222   : > { %v13520_v58 = vcombine.low %v5405_v55, %v5408_v9 }
 0x223   : > { %v5454_v55 = vsel %vm16467_vm5, %v13495_v20, %v5453_v31  ;;  %v5457_v9 = vsel %vm16467_vm5, %v5455_v49, %v5456_v18 }
 0x226   : > { %14879 = vmatmul.mubr.bf16.vlgmr.msra.gmra.mrb[0].mxu0 %v13514_v63  ;;  %v13490_v63 = vrot.slane %v13460_v48, 9  ;;  %v13527_v48 = vcombine.low %v5454_v55, %v5457_v9 }
 0x227   : > { %14882 = vmatprep.mubr.bf16.mxu0 %v13515_v10  ;;  %v5420_v10 = vrot.slane %v5418_v37, 4 }
 0x228   : > { %v5419_v35 = vsel %vm16467_vm5, %v13490_v63, %v5418_v37  ;;  %v13478_v37 = vld [vmem:[%s16166_s29 + $0xcc] sm:$0xe]  ;;  %v15986_v63 = vld [vmem:[%s18796_s3 + $0x10] sm:$0xff]  }
 0x229   : > { %v5422_v27 = vsel %vm16467_vm5, %v5420_v10, %v5421_v36  ;;  %v13496_v38 = vrot.slane %v13478_v37, 9  ;;  %14914 = vmatprep.subr.bf16.mxu1 %v15986_v63  ;;  %v16112_v10 = vmov 0   ;;  %v15987_v36 = vld [vmem:[%s18796_s3 + $0x18] sm:$0xff]  }
 0x22a   : > { %v13522_v0 = vcombine.low %v5419_v35, %v5422_v27  ;;  %14915 = vmatpush3.bf16.msra.mxu1 %v15986_v63  ;;  %5960 = vst [vmem:[#allocation2 + $0x18] sm:$0xf] %v16112_v10  ;;  %5954 = vst [vmem:[#allocation2] sm:$0xf] %v16112_v10  ;;  %v17514_v35 = vld [vmem:[%s18796_s3 + $0x40] sm:$0xff]  }
 0x22b   : > { %v5461_v50 = vsel %vm16467_vm5, %v13496_v38, %v5460_v14  ;;  %5955 = vst [vmem:[#allocation2 + $0x4] sm:$0xf] %v16112_v10  ;;  %5956 = vst [vmem:[#allocation2 + $0x8] sm:$0x1] %v16112_v10  ;;  %14916 = vmatprep.subr.bf16.mxu1 %v15987_v36 }
 0x22c   : > { %5957 = vst [vmem:[#allocation2 + $0xc] sm:$0xf] %v16112_v10  ;;  %5958 = vst [vmem:[#allocation2 + $0x10] sm:$0xf] %v16112_v10 }
 0x22d   : > { %5959 = vst [vmem:[#allocation2 + $0x14] sm:$0x1] %v16112_v10  ;;  %5961 = vst [vmem:[#allocation2 + $0x1c] sm:$0xf] %v16112_v10 }
 0x22e   : > { %14883 = vmatmul.mubr.bf16.gmra.mrb[4].mxu0 %v13516_v21  ;;  %v13492_v21 = vrot.slane %v13466_v40, 9  ;;  %5962 = vst [vmem:[#allocation2 + $0x20] sm:$0x1] %v16112_v10  ;;  %5963 = vst [vmem:[#allocation2 + $0x24] sm:$0xf] %v16112_v10  ;;  %14917 = vmatpush3.bf16.msra.mxu1 %v15987_v36 }
 0x22f   : > { %14886 = vmatprep.mubr.bf16.mxu0 %v13517_v34  ;;  %v5434_v34 = vrot.slane %v5432_v43, 4  ;;  %5964 = vst [vmem:[#allocation2 + $0x28] sm:$0xf] %v16112_v10  ;;  %5965 = vst [vmem:[#allocation2 + $0x2c] sm:$0x1] %v16112_v10  ;;  %14918 = vmatprep.subr.bf16.mxu1 %v15988_v60 }
 0x230   : > { %v5433_v6 = vsel %vm16467_vm5, %v13492_v21, %v5432_v43  ;;  %5966 = vst [vmem:[#allocation2 + $0x30] sm:$0xf] %v16112_v10  ;;  %5967 = vst [vmem:[#allocation2 + $0x34] sm:$0xf] %v16112_v10  ;;  %v17520_v43 = vld [vmem:[%s18795_s2] ss:$0 sm:$0xff] }
 0x231   : > { %v5436_v54 = vsel %vm16467_vm5, %v5434_v34, %v5435_v44  ;;  %5968 = vst [vmem:[#allocation2 + $0x38] sm:$0x1] %v16112_v10  ;;  %5969 = vst [vmem:[#allocation2 + $0x3c] sm:$0xf] %v16112_v10  ;;  %v7026_v27 = vld [vmem:[#allocation2] sm:$0xf] }
 0x232   : > { %v13524_v41 = vcombine.low %v5433_v6, %v5436_v54  ;;  %5970 = vst [vmem:[#allocation2 + $0x40] sm:$0xf] %v16112_v10  ;;  %5971 = vst [vmem:[#allocation2 + $0x44] sm:$0x1] %v16112_v10  ;;  %14919 = vmatpush3.bf16.msra.mxu1 %v15988_v60  ;;  %v15992_v47 = vld [vmem:[#allocation2] sm:$0xff]   ;;  %v7075_v52 = vshrl.u32 %v7026_v27, 16 }
 0x233   : > { %5972 = vst [vmem:[#allocation2 + $0x48] sm:$0xf] %v16112_v10  ;;  %5973 = vst [vmem:[#allocation2 + $0x4c] sm:$0xf] %v16112_v10  ;;  %14920 = vmatprep.subr.bf16.mxu1 %v15989_v15  ;;  %14926 = vmatprep.mubr.bf16.mxu1 %v15992_v47  ;;  %v7027_v1 = vld [vmem:[#allocation2 + $0x4] sm:$0xf] }
 0x234   : > { %5974 = vst [vmem:[#allocation2 + $0x50] sm:$0x1] %v16112_v10  ;;  %5975 = vst [vmem:[#allocation2 + $0x54] sm:$0xf] %v16112_v10  ;;  %v7078_v40 = vshll.u32 %v7026_v27, 16  ;;  %v7088_v21 = vshrl.u32 %v7027_v1, 16 }
 0x235   : > { %5976 = vst [vmem:[#allocation2 + $0x58] sm:$0xf] %v16112_v10  ;;  %5977 = vst [vmem:[#allocation2 + $0x5c] sm:$0x1] %v16112_v10  ;;  %v17525_v2 = vrot.slane %v7075_v52, 4 }
 0x236   : > { %14887 = vmatmul.mubr.bf16.gmra.mrb[8].mxu0 %v13518_v30  ;;  %v13494_v30 = vrot.slane %v13472_v4, 9  ;;  %5978 = vst [vmem:[#allocation2 + $0x60] sm:$0xf] %v16112_v10  ;;  %5979 = vst [vmem:[#allocation2 + $0x64] sm:$0xf] %v16112_v10  ;;  %14921 = vmatpush3.bf16.msra.mxu1 %v15989_v15  ;;  %v17527_v29 = vrot.slane %v7078_v40, 5 }
 0x237   : > { %14890 = vmatprep.mubr.bf16.mxu0 %v13519_v19  ;;  %v5448_v19 = vrot.slane %v5446_v26, 4  ;;  %5980 = vst [vmem:[#allocation2 + $0x68] sm:$0x1] %v16112_v10  ;;  %5981 = vst [vmem:[#allocation2 + $0x6c] sm:$0xf] %v16112_v10  ;;  %14922 = vmatprep.subr.bf16.mxu1 %v15990_v3  ;;  %v17534_v22 = vrot.slane %v7088_v21, 4 }
 0x238   : > { %v5447_v32 = vsel %vm16467_vm5, %v13494_v30, %v5446_v26  ;;  %5982 = vst [vmem:[#allocation2 + $0x70] sm:$0xf] %v16112_v10  ;;  %5983 = vst [vmem:[#allocation2 + $0x74] sm:$0x1] %v16112_v10  ;;  %v7081_v31 = vor.u32 %v17527_v29, %v17525_v2  ;;  %v6431_v38 = vld [vmem:[#allocation2 + $0xc] sm:$0xf] }
 0x239   : > { %v5450_v46 = vsel %vm16467_vm5, %v5448_v19, %v5449_v39  ;;  %5984 = vst [vmem:[#allocation2 + $0x78] sm:$0xf] %v16112_v10  ;;  %5985 = vst [vmem:[#allocation2 + $0x7c] sm:$0xf] %v16112_v10  ;;  %v6444_v36 = vld [vmem:[#allocation2 + $0x20] sm:$0x1] }
 0x23a   : > { %v13526_v23 = vcombine.low %v5447_v32, %v5450_v46  ;;  %5986 = vst [vmem:[#allocation2 + $0x80] sm:$0x1] %v16112_v10  ;;  %5987 = vst [vmem:[#allocation2 + $0x84] sm:$0xf] %v16112_v10  ;;  %14923 = vmatpush3.bf16.msra.mxu1 %v15990_v3  ;;  %v6440_v46 = vld [vmem:[#allocation2 + $0x18] sm:$0xf] }
 0x23b   : > { %5988 = vst [vmem:[#allocation2 + $0x88] sm:$0xf] %v16112_v10  ;;  %5989 = vst [vmem:[#allocation2 + $0x8c] sm:$0x1] %v16112_v10  ;;  %14924 = vmatprep.subr.bf16.mxu1 %v15991_v28  ;;  %v6437_v27 = vld [vmem:[#allocation2 + $0x14] sm:$0x1] }
 0x23c   : > { %5990 = vst [vmem:[#allocation2 + $0x90] sm:$0xf] %v16112_v10  ;;  %5991 = vst [vmem:[#allocation2 + $0x94] sm:$0xf] %v16112_v10 }
 0x23d   : > { %5992 = vst [vmem:[#allocation2 + $0x98] sm:$0x1] %v16112_v10  ;;  %5993 = vst [vmem:[#allocation2 + $0x9c] sm:$0xf] %v16112_v10 }
 0x23e   : > { %14891 = vmatmul.mubr.bf16.gmra.mrb[12].mxu0 %v13520_v58  ;;  %v5464_v58 = vsel %vm16467_vm5, %v5462_v42, %v5463_v57  ;;  %5994 = vst [vmem:[#allocation2 + $0xa0] sm:$0xf] %v16112_v10  ;;  %5995 = vst [vmem:[#allocation2 + $0xa4] sm:$0x1] %v16112_v10  ;;  %14925 = vmatpush3.bf16.msra.mxu1 %v15991_v28 }
 0x23f   : > { %14894 = vmatprep.mubr.bf16.mxu0 %v13521_v61  ;;  %v13528_v61 = vcombine.low %v5461_v50, %v5464_v58  ;;  %5996 = vst [vmem:[#allocation2 + $0xa8] sm:$0xf] %v16112_v10  ;;  %5997 = vst [vmem:[#allocation2 + $0xac] sm:$0xf] %v16112_v10  ;;  %14958 = vmatprep.subr.bf16.mxu1 %v17514_v35 }
 0x240   : > { %5998 = vst [vmem:[#allocation2 + $0xb0] sm:$0x1] %v16112_v10  ;;  %5999 = vst [vmem:[#allocation2 + $0xb4] sm:$0xf] %v16112_v10 }
 0x241   : > { %6000 = vst [vmem:[#allocation2 + $0xb8] sm:$0xf] %v16112_v10  ;;  %6001 = vst [vmem:[#allocation2 + $0xbc] sm:$0x1] %v16112_v10 }
 0x242   : > { %6002 = vst [vmem:[#allocation2 + $0xc0] sm:$0xf] %v16112_v10  ;;  %6003 = vst [vmem:[#allocation2 + $0xc4] sm:$0xf] %v16112_v10 }
 0x243   : > { %6004 = vst [vmem:[#allocation2 + $0xc8] sm:$0x1] %v16112_v10  ;;  %6005 = vst [vmem:[#allocation2 + $0xcc] sm:$0xf] %v16112_v10 }
 0x244   : > { %6006 = vst [vmem:[#allocation2 + $0xd0] sm:$0xf] %v16112_v10  ;;  %6007 = vst [vmem:[#allocation2 + $0xd4] sm:$0x1] %v16112_v10 }
 0x246   : > { %14895 = vmatmul.mubr.bf16.gmra.mrb[16].mxu0 %v13522_v0 }
 0x247   : > { %14898 = vmatprep.mubr.bf16.mxu0 %v13523_v7  ;;  %v7084_v7 = vshll.u32 %v7027_v1, 16 }
 0x249   : > { %v17530_v8 = vrot.slane %v7084_v7, 5  ;;  %v17564_v7 = vld [vmem:[#allocation2 + $0x8] sm:$0x1] }
 0x24b   : > { %v7091_v21 = vor.u32 %v17534_v22, %v17530_v8 }
 0x24e   : > { %14899 = vmatmul.mubr.bf16.gmra.mrb[20].mxu0 %v13524_v41 }
 0x24f   : > { %14902 = vmatprep.mubr.bf16.mxu0 %v13525_v24 }
 0x256   : > { %14903 = vmatmul.mubr.bf16.gmra.mrb[24].mxu0 %v13526_v23 }
 0x257   : > { %14906 = vmatprep.mubr.bf16.mxu0 %v13527_v48 }
 0x25e   : > { %14907 = vmatmul.mubr.bf16.gmra.mrb[28].mxu0 %v13528_v61 }
 0x2f9   : > { %v14880_v5 = vpop.f32.mrb[0].mxu0 }
 0x2fa   : > { %v5892_v53 = vadd.f32 %v14880_v5, %v17520_v43  ;;  %v5660_v13 = vpop.f32.mrb[1].mxu0 }
 0x2fb   : > { %v5890_v56 = vadd.f32 %v17520_v43, %v5660_v13  ;;  %v14881_v0 = vpop.f32.mrb[2].mxu0 }
 0x2fc   : > { %v5924_v34 = vmax.f32 %v5892_v53, 0.0  ;;  %v5893_v44 = vadd.f32 %v14881_v0, %v17520_v43  ;;  %v5663_v45 = vpop.f32.mrb[3].mxu0 }
 0x2fd   : > { %v5922_v12 = vmax.f32 %v5890_v56, 0.0  ;;  %v5891_v25 = vadd.f32 %v17520_v43, %v5663_v45 }
 0x2fe   : > { %v14016_v6 = vpack.c.bf16 %v5924_v34, %v5924_v34  ;;  %v5925_v54 = vmax.f32 %v5893_v44, 0.0 }
 0x2ff   : > { %v14014_v26 = vpack.c.bf16 %v5922_v12, %v5922_v12  ;;  %v5923_v59 = vmax.f32 %v5891_v25, 0.0 }
 0x300   : > { %v6125_v4 = vshrl.u32 %v14016_v6, 16  ;;  %v14017_v11 = vpack.c.bf16 %v5925_v54, %v5925_v54  ;;  %v6128_v62 = vshll.u32 %v14016_v6, 16 }
 0x301   : > { %v6108_v41 = vshrl.u32 %v14014_v26, 16  ;;  %v6111_v24 = vshll.u32 %v14014_v26, 16  ;;  %v14015_v30 = vpack.c.bf16 %v5923_v59, %v5923_v59  ;;  %v14884_v19 = vpop.f32.mrb[4].mxu0 }
 0x302   : > { %v6127_v39 = vrot.slane %v6125_v4, 7  ;;  %v6133_v20 = vshrl.u32 %v14017_v11, 16  ;;  %v6136_v49 = vshll.u32 %v14017_v11, 16  ;;  %v5896_v18 = vadd.f32 %v14884_v19, %v17520_v43  ;;  %v5676_v16 = vpop.f32.mrb[5].mxu0  ;;  %v6454_v11 = vld [vmem:[#allocation2 + $0x30] sm:$0xf] }
 0x303   : > { %v6110_v14 = vrot.slane %v6108_v41, 7  ;;  %v6116_v55 = vshrl.u32 %v14015_v30, 16  ;;  %v6119_v9 = vshll.u32 %v14015_v30, 16  ;;  %v5894_v37 = vadd.f32 %v17520_v43, %v5676_v16  ;;  %v14885_v33 = vpop.f32.mrb[6].mxu0 }
 0x304   : > { %v6130_v23 = vor.u32 %v6128_v62, %v6127_v39  ;;  %v6131_v48 = vrot.slane %v6127_v39, 4  ;;  %v6135_v57 = vrot.slane %v6133_v20, 7  ;;  %v5928_v50 = vmax.f32 %v5896_v18, 0.0  ;;  %v5679_v58 = vpop.f32.mrb[7].mxu0 }
 0x305   : > { %v6113_v61 = vor.u32 %v6111_v24, %v6110_v14  ;;  %v6114_v63 = vrot.slane %v6110_v14, 4  ;;  %v6118_v60 = vrot.slane %v6116_v55, 7  ;;  %v5926_v15 = vmax.f32 %v5894_v37, 0.0 }
 0x306   : > { %v6441_v3 = vsel %vm17539_vm11, %v6130_v23, %v6440_v46  ;;  %v6138_v28 = vor.u32 %v6136_v49, %v6135_v57  ;;  %v6140_v47 = vrot.slane %v6135_v57, 4  ;;  %v14020_v1 = vpack.c.bf16 %v5928_v50, %v5928_v50  ;;  %v6447_v49 = vld [vmem:[#allocation2 + $0x24] sm:$0xf] }
 0x307   : > { %6442 = vst [vmem:[#allocation2 + $0x18] sm:$0xf] %v6441_v3  ;;  %v6432_v52 = vsel %vm17539_vm11, %v6113_v61, %v6431_v38  ;;  %v6121_v40 = vor.u32 %v6119_v9, %v6118_v60  ;;  %v6123_v5 = vrot.slane %v6118_v60, 4  ;;  %v14018_v53 = vpack.c.bf16 %v5926_v15, %v5926_v15 }
 0x308   : > { %6433 = vst [vmem:[#allocation2 + $0xc] sm:$0xf] %v6432_v52  ;;  %v6139_v13 = vsel %vm17546_vm12, %v6131_v48, %v6138_v28  ;;  %v6445_v56 = vsel %vm17552_vm13, %v6140_v47, %v6444_v36  ;;  %v6159_v0 = vshrl.u32 %v14020_v1, 16  ;;  %v6162_v45 = vshll.u32 %v14020_v1, 16  ;;  %v6458_v28 = vld [vmem:[#allocation2 + $0x38] sm:$0x1] }
 0x309   : > { %6443 = vst [vmem:[#allocation2 + $0x1c] sm:$0xf] %v6139_v13  ;;  %6446 = vst [vmem:[#allocation2 + $0x20] sm:$0x1] %v6445_v56  ;;  %v6122_v34 = vsel %vm17546_vm12, %v6114_v63, %v6121_v40  ;;  %v6438_v44 = vsel %vm17552_vm13, %v6123_v5, %v6437_v27  ;;  %v6142_v12 = vshrl.u32 %v14018_v53, 16  ;;  %v14888_v25 = vpop.f32.mrb[8].mxu0  ;;  %v5897_v54 = vadd.f32 %v14885_v33, %v17520_v43 }
 0x30a   : > { %6434 = vst [vmem:[#allocation2 + $0x10] sm:$0xf] %v6122_v34  ;;  %6439 = vst [vmem:[#allocation2 + $0x14] sm:$0x1] %v6438_v44  ;;  %v17572_v6 = vrot.slane %v6159_v0, 7  ;;  %v5895_v26 = vadd.f32 %v17520_v43, %v5679_v58  ;;  %v5900_v59 = vadd.f32 %v14888_v25, %v17520_v43  ;;  %v5692_v4 = vpop.f32.mrb[9].mxu0 }
 0x30b   : > { %v17577_v62 = vrot.slane %v6142_v12, 7  ;;  %v6145_v41 = vshll.u32 %v14018_v53, 16  ;;  %v5898_v24 = vadd.f32 %v17520_v43, %v5692_v4  ;;  %v14889_v30 = vpop.f32.mrb[10].mxu0  ;;  %v7094_v19 = vshll.u32 %v17564_v7, 16  ;;  %v15997_v63 = vld [vmem:[%s18796_s3 + $0x48] sm:$0xff]  }
 0x30c   : > { %v6164_v39 = vor.u32 %v6162_v45, %v17572_v6  ;;  %v6165_v20 = vrot.slane %v17572_v6, 4  ;;  %v5929_v18 = vmax.f32 %v5897_v54, 0.0  ;;  %v5927_v16 = vmax.f32 %v5895_v26, 0.0  ;;  %v5695_v46 = vpop.f32.mrb[11].mxu0  ;;  %v6451_v47 = vld [vmem:[#allocation2 + $0x2c] sm:$0x1] }
 0x30d   : > { %v6147_v14 = vor.u32 %v6145_v41, %v17577_v62  ;;  %v6148_v55 = vrot.slane %v17577_v62, 4  ;;  %v5932_v9 = vmax.f32 %v5900_v59, 0.0  ;;  %v5930_v37 = vmax.f32 %v5898_v24, 0.0  ;;  %v6468_v0 = vld [vmem:[#allocation2 + $0x48] sm:$0xf] }
 0x30e   : > { %v6455_v33 = vsel %vm17539_vm11, %v6164_v39, %v6454_v11  ;;  %v14021_v23 = vpack.c.bf16 %v5929_v18, %v5929_v18  ;;  %v14019_v48 = vpack.c.bf16 %v5927_v16, %v5927_v16  ;;  %v5901_v38 = vadd.f32 %v14889_v30, %v17520_v43  ;;  %v6461_v24 = vld [vmem:[#allocation2 + $0x3c] sm:$0xf]  ;;  %v7032_v29 = vld [vmem:[#allocation2 + $0x18] sm:$0xf] }
 0x30f   : > { %6456 = vst [vmem:[#allocation2 + $0x30] sm:$0xf] %v6455_v33  ;;  %v6448_v57 = vsel %vm17539_vm11, %v6147_v14, %v6447_v49  ;;  %v14024_v50 = vpack.c.bf16 %v5932_v9, %v5932_v9  ;;  %v14022_v58 = vpack.c.bf16 %v5930_v37, %v5930_v37  ;;  %v5899_v61 = vadd.f32 %v17520_v43, %v5695_v46  ;;  %v16000_v46 = vld [vmem:[%s18796_s3 + $0x50] sm:$0xff]  }
 0x310   : > { %6449 = vst [vmem:[#allocation2 + $0x24] sm:$0xf] %v6448_v57  ;;  %v6167_v36 = vshrl.u32 %v14021_v23, 16  ;;  %v6170_v60 = vshll.u32 %v14021_v23, 16  ;;  %v6150_v15 = vshrl.u32 %v14019_v48, 16  ;;  %v6153_v3 = vshll.u32 %v14019_v48, 16 }
 0x311   : > { %v6193_v27 = vshrl.u32 %v14024_v50, 16  ;;  %v6196_v1 = vshll.u32 %v14024_v50, 16  ;;  %v6176_v52 = vshrl.u32 %v14022_v58, 16  ;;  %v6179_v40 = vshll.u32 %v14022_v58, 16  ;;  %v14892_v5 = vpop.f32.mrb[12].mxu0  ;;  %v15993_v53 = vld [vmem:[#allocation2 + $0xc] sm:$0xff]  }
 0x312   : > { %v6169_v13 = vrot.slane %v6167_v36, 7  ;;  %v6152_v56 = vrot.slane %v6150_v15, 7  ;;  %v5933_v34 = vmax.f32 %v5901_v38, 0.0  ;;  %v5931_v44 = vmax.f32 %v5899_v61, 0.0  ;;  %v5708_v45 = vpop.f32.mrb[13].mxu0  ;;  %v15995_v12 = vld [vmem:[#allocation2 + $0x18] sm:$0xff]   ;;  %14927 = vmatmul.mubr.bf16.vlgmr.msra.gmra.mrb[0].mxu1 %v15993_v53 }
 0x313   : > { %v17594_v25 = vrot.slane %v6193_v27, 7  ;;  %v17596_v6 = vrot.slane %v6176_v52, 7  ;;  %v5904_v54 = vadd.f32 %v14892_v5, %v17520_v43  ;;  %v5902_v26 = vadd.f32 %v17520_v43, %v5708_v45  ;;  %v14893_v59 = vpop.f32.mrb[14].mxu0  ;;  %14930 = vmatprep.mubr.bf16.mxu1 %v15995_v12  ;;  %14959 = vmatpush3.bf16.msra.mxu1 %v17514_v35 }
 0x314   : > { %v6172_v4 = vor.u32 %v6170_v60, %v6169_v13  ;;  %v6174_v11 = vrot.slane %v6169_v13, 4  ;;  %v6155_v62 = vor.u32 %v6153_v3, %v6152_v56  ;;  %v6157_v41 = vrot.slane %v6152_v56, 4  ;;  %v5711_v30 = vpop.f32.mrb[15].mxu0  ;;  %14960 = vmatprep.subr.bf16.mxu1 %v15997_v63  ;;  %v16003_v3 = vld [vmem:[%s18796_s3 + $0x58] sm:$0xff]   ;;  %v6465_v13 = vld [vmem:[#allocation2 + $0x44] sm:$0x1] }
 0x315   : > { %v6198_v39 = vor.u32 %v6196_v1, %v17594_v25  ;;  %v6199_v49 = vrot.slane %v17594_v25, 4  ;;  %v6181_v18 = vor.u32 %v6179_v40, %v17596_v6  ;;  %v6182_v16 = vrot.slane %v17596_v6, 4 }
 0x316   : > { %v6173_v14 = vsel %vm17546_vm12, %v6165_v20, %v6172_v4  ;;  %v6459_v9 = vsel %vm17552_vm13, %v6174_v11, %v6458_v28  ;;  %v6156_v35 = vsel %vm17546_vm12, %v6148_v55, %v6155_v62  ;;  %v6452_v37 = vsel %vm17552_vm13, %v6157_v41, %v6451_v47  ;;  %v6472_v28 = vld [vmem:[#allocation2 + $0x50] sm:$0x1]  ;;  %v6482_v62 = vld [vmem:[#allocation2 + $0x60] sm:$0xf]  ;;  %v6475_v41 = vld [vmem:[#allocation2 + $0x54] sm:$0xf] }
 0x317   : > { %6457 = vst [vmem:[#allocation2 + $0x34] sm:$0xf] %v6173_v14  ;;  %6460 = vst [vmem:[#allocation2 + $0x38] sm:$0x1] %v6459_v9  ;;  %v6469_v33 = vsel %vm17539_vm11, %v6198_v39, %v6468_v0  ;;  %v6462_v23 = vsel %vm17539_vm11, %v6181_v18, %v6461_v24  ;;  %v14025_v20 = vpack.c.bf16 %v5933_v34, %v5933_v34  ;;  %v5936_v38 = vmax.f32 %v5904_v54, 0.0  ;;  %v16006_v24 = vld [vmem:[%s18796_s3 + $0x60] sm:$0xff]  }
 0x318   : > { %6450 = vst [vmem:[#allocation2 + $0x28] sm:$0xf] %v6156_v35  ;;  %6453 = vst [vmem:[#allocation2 + $0x2c] sm:$0x1] %v6452_v37  ;;  %v14023_v48 = vpack.c.bf16 %v5931_v44, %v5931_v44  ;;  %v5934_v57 = vmax.f32 %v5902_v26, 0.0  ;;  %v5905_v55 = vadd.f32 %v14893_v59, %v17520_v43  ;;  %v5903_v50 = vadd.f32 %v17520_v43, %v5711_v30 }
 0x319   : > { %6470 = vst [vmem:[#allocation2 + $0x48] sm:$0xf] %v6469_v33  ;;  %6463 = vst [vmem:[#allocation2 + $0x3c] sm:$0xf] %v6462_v23  ;;  %14961 = vmatpush3.bf16.msra.mxu1 %v15997_v63  ;;  %v6201_v58 = vshrl.u32 %v14025_v20, 16  ;;  %v6204_v61 = vshll.u32 %v14025_v20, 16  ;;  %v14028_v47 = vpack.c.bf16 %v5936_v38, %v5936_v38 }
 0x31a   : > { %v6184_v36 = vshrl.u32 %v14023_v48, 16  ;;  %v6187_v60 = vshll.u32 %v14023_v48, 16  ;;  %v14896_v15 = vpop.f32.mrb[16].mxu0  ;;  %14962 = vmatprep.subr.bf16.mxu1 %v16000_v46  ;;  %v14026_v27 = vpack.c.bf16 %v5934_v57, %v5934_v57  ;;  %v5937_v1 = vmax.f32 %v5905_v55, 0.0 }
 0x31b   : > { %v5935_v52 = vmax.f32 %v5903_v50, 0.0  ;;  %v5724_v40 = vpop.f32.mrb[17].mxu0  ;;  %v6203_v5 = vrot.slane %v6201_v58, 7  ;;  %v5908_v63 = vadd.f32 %v14896_v15, %v17520_v43  ;;  %v6227_v34 = vshrl.u32 %v14028_v47, 16  ;;  %v16009_v15 = vld [vmem:[%s18796_s3 + $0x68] sm:$0xff]  }
 0x31c   : > { %v6186_v53 = vrot.slane %v6184_v36, 7  ;;  %v5906_v56 = vadd.f32 %v17520_v43, %v5724_v40  ;;  %v14897_v0 = vpop.f32.mrb[18].mxu0  ;;  %v6230_v44 = vshll.u32 %v14028_v47, 16  ;;  %v6210_v45 = vshrl.u32 %v14026_v27, 16  ;;  %v6479_v40 = vld [vmem:[#allocation2 + $0x5c] sm:$0x1] }
 0x31d   : > { %v6213_v12 = vshll.u32 %v14026_v27, 16  ;;  %v5727_v54 = vpop.f32.mrb[19].mxu0  ;;  %14963 = vmatpush3.bf16.msra.mxu1 %v16000_v46  ;;  %v6206_v26 = vor.u32 %v6204_v61, %v6203_v5  ;;  %v6208_v59 = vrot.slane %v6203_v5, 4  ;;  %v6229_v30 = vrot.slane %v6227_v34, 7 }
 0x31e   : > { %v6189_v4 = vor.u32 %v6187_v60, %v6186_v53  ;;  %v6191_v11 = vrot.slane %v6186_v53, 4  ;;  %14964 = vmatprep.subr.bf16.mxu1 %v16003_v3  ;;  %v6212_v39 = vrot.slane %v6210_v45, 7  ;;  %v14029_v18 = vpack.c.bf16 %v5937_v1, %v5937_v1  ;;  %v15998_v35 = vld [vmem:[#allocation2 + $0x30] sm:$0xff]  }
 0x31f   : > { %v14027_v14 = vpack.c.bf16 %v5935_v52, %v5935_v52  ;;  %v15996_v9 = vld [vmem:[#allocation2 + $0x24] sm:$0xff]   ;;  %v6207_v46 = vsel %vm17546_vm12, %v6199_v49, %v6206_v26  ;;  %v6473_v37 = vsel %vm17552_vm13, %v6208_v59, %v6472_v28  ;;  %v6232_v20 = vor.u32 %v6230_v44, %v6229_v30 }
 0x320   : > { %v6190_v33 = vsel %vm17546_vm12, %v6182_v16, %v6189_v4  ;;  %v6466_v23 = vsel %vm17552_vm13, %v6191_v11, %v6465_v13  ;;  %6471 = vst [vmem:[#allocation2 + $0x4c] sm:$0xf] %v6207_v46  ;;  %6474 = vst [vmem:[#allocation2 + $0x50] sm:$0x1] %v6473_v37  ;;  %v6233_v25 = vrot.slane %v6229_v30, 4  ;;  %v6215_v48 = vor.u32 %v6213_v12, %v6212_v39 }
 0x321   : > { %6464 = vst [vmem:[#allocation2 + $0x40] sm:$0xf] %v6190_v33  ;;  %6467 = vst [vmem:[#allocation2 + $0x44] sm:$0x1] %v6466_v23  ;;  %v6216_v38 = vrot.slane %v6212_v39, 4  ;;  %14931 = vmatmul.mubr.bf16.gmra.mrb[4].mxu1 %v15996_v9  ;;  %v6235_v49 = vshrl.u32 %v14029_v18, 16  ;;  %v6483_v16 = vsel %vm17539_vm11, %v6232_v20, %v6482_v62  ;;  %v5907_v27 = vadd.f32 %v17520_v43, %v5727_v54 }
 0x322   : > { %v6238_v57 = vshll.u32 %v14029_v18, 16  ;;  %v6218_v55 = vshrl.u32 %v14027_v14, 16  ;;  %v6221_v50 = vshll.u32 %v14027_v14, 16  ;;  %14934 = vmatprep.mubr.bf16.mxu1 %v15998_v35  ;;  %v14900_v6 = vpop.f32.mrb[20].mxu0  ;;  %14965 = vmatpush3.bf16.msra.mxu1 %v16003_v3  ;;  %v6476_v58 = vsel %vm17539_vm11, %v6215_v48, %v6475_v41  ;;  %6484 = vst [vmem:[#allocation2 + $0x60] sm:$0xf] %v6483_v16 }
 0x323   : > { %v5940_v61 = vmax.f32 %v5908_v63, 0.0  ;;  %v5938_v36 = vmax.f32 %v5906_v56, 0.0  ;;  %v5740_v60 = vpop.f32.mrb[21].mxu0  ;;  %14966 = vmatprep.subr.bf16.mxu1 %v16006_v24  ;;  %6477 = vst [vmem:[#allocation2 + $0x54] sm:$0xf] %v6476_v58  ;;  %v6237_v28 = vrot.slane %v6235_v49, 7  ;;  %v5909_v3 = vadd.f32 %v14897_v0, %v17520_v43 }
 0x324   : > { %v6220_v47 = vrot.slane %v6218_v55, 7  ;;  %v14901_v1 = vpop.f32.mrb[22].mxu0  ;;  %v6486_v52 = vld [vmem:[#allocation2 + $0x68] sm:$0x1]  ;;  %v5912_v13 = vadd.f32 %v14900_v6, %v17520_v43  ;;  %v5910_v63 = vadd.f32 %v17520_v43, %v5740_v60  ;;  %v16012_v54 = vld [vmem:[%s18796_s3 + $0x70] sm:$0xff]   ;;  %v5939_v35 = vmax.f32 %v5907_v27, 0.0 }
 0x325   : > { %v14032_v5 = vpack.c.bf16 %v5940_v61, %v5940_v61  ;;  %v14030_v53 = vpack.c.bf16 %v5938_v36, %v5938_v36  ;;  %v5743_v56 = vpop.f32.mrb[23].mxu0  ;;  %v6240_v34 = vor.u32 %v6238_v57, %v6237_v28  ;;  %v6242_v44 = vrot.slane %v6237_v28, 4  ;;  %v6496_v30 = vld [vmem:[#allocation2 + $0x78] sm:$0xf]  ;;  %v6489_v37 = vld [vmem:[#allocation2 + $0x6c] sm:$0xf] }
 0x326   : > { %v6223_v45 = vor.u32 %v6221_v50, %v6220_v47  ;;  %v6225_v12 = vrot.slane %v6220_v47, 4  ;;  %14967 = vmatpush3.bf16.msra.mxu1 %v16006_v24  ;;  %v5941_v9 = vmax.f32 %v5909_v3, 0.0  ;;  %v5944_v33 = vmax.f32 %v5912_v13, 0.0  ;;  %v16015_v60 = vld [vmem:[%s18796_s3 + $0x78] sm:$0xff]   ;;  %v6493_v13 = vld [vmem:[#allocation2 + $0x74] sm:$0x1] }
 0x327   : > { %v6261_v26 = vshrl.u32 %v14032_v5, 16  ;;  %v6264_v59 = vshll.u32 %v14032_v5, 16  ;;  %v6244_v0 = vshrl.u32 %v14030_v53, 16  ;;  %v6247_v4 = vshll.u32 %v14030_v53, 16  ;;  %14968 = vmatprep.subr.bf16.mxu1 %v16009_v15  ;;  %v16001_v46 = vld [vmem:[#allocation2 + $0x48] sm:$0xff]  }
 0x328   : > { %v6241_v11 = vsel %vm17546_vm12, %v6233_v25, %v6240_v34  ;;  %v6487_v62 = vsel %vm17552_vm13, %v6242_v44, %v6486_v52  ;;  %v6224_v41 = vsel %vm17546_vm12, %v6216_v38, %v6223_v45  ;;  %v6480_v24 = vsel %vm17552_vm13, %v6225_v12, %v6479_v40  ;;  %v15999_v39 = vld [vmem:[#allocation2 + $0x3c] sm:$0xff]  }
 0x329   : > { %6485 = vst [vmem:[#allocation2 + $0x64] sm:$0xf] %v6241_v11  ;;  %6488 = vst [vmem:[#allocation2 + $0x68] sm:$0x1] %v6487_v62  ;;  %v17664_v18 = vrot.slane %v6261_v26, 7  ;;  %v17666_v14 = vrot.slane %v6244_v0, 7  ;;  %v5913_v20 = vadd.f32 %v14901_v1, %v17520_v43  ;;  %v5911_v25 = vadd.f32 %v17520_v43, %v5743_v56  ;;  %14935 = vmatmul.mubr.bf16.gmra.mrb[8].mxu1 %v15999_v39 }
 0x32a   : > { %6478 = vst [vmem:[#allocation2 + $0x58] sm:$0xf] %v6224_v41  ;;  %6481 = vst [vmem:[#allocation2 + $0x5c] sm:$0x1] %v6480_v24  ;;  %v5942_v23 = vmax.f32 %v5910_v63, 0.0  ;;  %v14904_v48 = vpop.f32.mrb[24].mxu0  ;;  %14938 = vmatprep.mubr.bf16.mxu1 %v16001_v46  ;;  %14969 = vmatpush3.bf16.msra.mxu1 %v16009_v15  ;;  %v14033_v6 = vpack.c.bf16 %v5941_v9, %v5941_v9  ;;  %v14031_v16 = vpack.c.bf16 %v5939_v35, %v5939_v35 }
 0x32b   : > { %v6266_v38 = vor.u32 %v6264_v59, %v17664_v18  ;;  %v6267_v49 = vrot.slane %v17664_v18, 4  ;;  %v6249_v57 = vor.u32 %v6247_v4, %v17666_v14  ;;  %v6250_v55 = vrot.slane %v17666_v14, 4  ;;  %v5756_v50 = vpop.f32.mrb[25].mxu0  ;;  %14970 = vmatprep.subr.bf16.mxu1 %v16012_v54  ;;  %v6500_v53 = vld [vmem:[#allocation2 + $0x80] sm:$0x1] }
 0x32c   : > { %v14036_v58 = vpack.c.bf16 %v5944_v33, %v5944_v33  ;;  %v14034_v61 = vpack.c.bf16 %v5942_v23, %v5942_v23  ;;  %v17674_v36 = vpop.f32.mrb[26].mxu0  ;;  %v5945_v3 = vmax.f32 %v5913_v20, 0.0  ;;  %v5943_v27 = vmax.f32 %v5911_v25, 0.0  ;;  %v6510_v26 = vld [vmem:[#allocation2 + $0x90] sm:$0xf]  ;;  %v17688_v11 = vld [vmem:[%s18796_s3 + $0x80] sm:$0xff]  }
 0x32d   : > { %v6497_v28 = vsel %vm17539_vm11, %v6266_v38, %v6496_v30  ;;  %v6490_v47 = vsel %vm17539_vm11, %v6249_v57, %v6489_v37  ;;  %v17683_v15 = vpop.f32.mrb[27].mxu0  ;;  %v6269_v1 = vshrl.u32 %v14033_v6, 16  ;;  %v6272_v52 = vshll.u32 %v14033_v6, 16  ;;  %v6503_v35 = vld [vmem:[#allocation2 + $0x84] sm:$0xf] }
 0x32e   : > { %6498 = vst [vmem:[#allocation2 + $0x78] sm:$0xf] %v6497_v28  ;;  %6491 = vst [vmem:[#allocation2 + $0x6c] sm:$0xf] %v6490_v47  ;;  %v6252_v40 = vshrl.u32 %v14031_v16, 16  ;;  %v6255_v5 = vshll.u32 %v14031_v16, 16  ;;  %14971 = vmatpush3.bf16.msra.mxu1 %v16012_v54  ;;  %v14037_v59 = vpack.c.bf16 %v5945_v3, %v5945_v3  ;;  %v14035_v0 = vpack.c.bf16 %v5943_v27, %v5943_v27 }
 0x32f   : > { %v6295_v63 = vshrl.u32 %v14036_v58, 16  ;;  %v6298_v56 = vshll.u32 %v14036_v58, 16  ;;  %v6278_v34 = vshrl.u32 %v14034_v61, 16  ;;  %v6281_v44 = vshll.u32 %v14034_v61, 16  ;;  %14972 = vmatprep.subr.bf16.mxu1 %v16015_v60 }
 0x330   : > { %v6271_v45 = vrot.slane %v6269_v1, 7  ;;  %v6254_v12 = vrot.slane %v6252_v40, 7  ;;  %v5916_v24 = vadd.f32 %v14904_v48, %v17520_v43  ;;  %v5914_v30 = vadd.f32 %v17520_v43, %v5756_v50  ;;  %v16004_v54 = vld [vmem:[#allocation2 + $0x60] sm:$0xff]  }
 0x331   : > { %v16002_v4 = vld [vmem:[#allocation2 + $0x54] sm:$0xff]   ;;  %v6297_v62 = vrot.slane %v6295_v63, 7  ;;  %v17690_v41 = vrot.slane %v6278_v34, 7  ;;  %v14908_v46 = vpop.f32.mrb[28].mxu0  ;;  %v6303_v58 = vshrl.u32 %v14037_v59, 16  ;;  %v6306_v61 = vshll.u32 %v14037_v59, 16 }
 0x332   : > { %v6274_v39 = vor.u32 %v6272_v52, %v6271_v45  ;;  %v6276_v18 = vrot.slane %v6271_v45, 4  ;;  %v6257_v14 = vor.u32 %v6255_v5, %v6254_v12  ;;  %v6259_v9 = vrot.slane %v6254_v12, 4  ;;  %14939 = vmatmul.mubr.bf16.gmra.mrb[12].mxu1 %v16002_v4  ;;  %v5772_v25 = vpop.f32.mrb[29].mxu0  ;;  %v6514_v5 = vld [vmem:[#allocation2 + $0x98] sm:$0x1] }
 0x333   : > { %v6300_v37 = vor.u32 %v6298_v56, %v6297_v62  ;;  %v6301_v33 = vrot.slane %v6297_v62, 4  ;;  %v6283_v23 = vor.u32 %v6281_v44, %v17690_v41  ;;  %v6284_v20 = vrot.slane %v17690_v41, 4  ;;  %14942 = vmatprep.mubr.bf16.mxu1 %v16004_v54  ;;  %14973 = vmatpush3.bf16.msra.mxu1 %v16015_v60  ;;  %v17704_v6 = vpop.f32.mrb[30].mxu0  ;;  %v6507_v45 = vld [vmem:[#allocation2 + $0x8c] sm:$0x1] }
 0x334   : > { %v6275_v48 = vsel %vm17546_vm12, %v6267_v49, %v6274_v39  ;;  %v6501_v38 = vsel %vm17552_vm13, %v6276_v18, %v6500_v53  ;;  %v6258_v57 = vsel %vm17546_vm12, %v6250_v55, %v6257_v14  ;;  %v6494_v50 = vsel %vm17552_vm13, %v6259_v9, %v6493_v13  ;;  %15006 = vmatprep.subr.bf16.mxu1 %v17688_v11  ;;  %v17711_v55 = vpop.f32.mrb[31].mxu0  ;;  %v6524_v41 = vld [vmem:[#allocation2 + $0xa8] sm:$0xf]  ;;  %v6517_v14 = vld [vmem:[#allocation2 + $0x9c] sm:$0xf] }
 0x335   : > { %6499 = vst [vmem:[#allocation2 + $0x7c] sm:$0xf] %v6275_v48  ;;  %6502 = vst [vmem:[#allocation2 + $0x80] sm:$0x1] %v6501_v38  ;;  %v6511_v49 = vsel %vm17539_vm11, %v6300_v37, %v6510_v26  ;;  %v6504_v16 = vsel %vm17539_vm11, %v6283_v23, %v6503_v35  ;;  %v6286_v60 = vshrl.u32 %v14035_v0, 16  ;;  %v6289_v28 = vshll.u32 %v14035_v0, 16 }
 0x336   : > { %6492 = vst [vmem:[#allocation2 + $0x70] sm:$0xf] %v6258_v57  ;;  %6495 = vst [vmem:[#allocation2 + $0x74] sm:$0x1] %v6494_v50  ;;  %v5948_v47 = vmax.f32 %v5916_v24, 0.0  ;;  %v5946_v3 = vmax.f32 %v5914_v30, 0.0  ;;  %v5917_v1 = vadd.f32 %v17674_v36, %v17520_v43  ;;  %v5915_v52 = vadd.f32 %v17520_v43, %v17683_v15 }
 0x337   : > { %6512 = vst [vmem:[#allocation2 + $0x90] sm:$0xf] %v6511_v49  ;;  %6505 = vst [vmem:[#allocation2 + $0x84] sm:$0xf] %v6504_v16  ;;  %v6305_v27 = vrot.slane %v6303_v58, 7  ;;  %v5920_v40 = vadd.f32 %v14908_v46, %v17520_v43  ;;  %v6288_v53 = vrot.slane %v6286_v60, 7  ;;  %v5918_v56 = vadd.f32 %v17520_v43, %v5772_v25 }
 0x338   : > { %v14040_v13 = vpack.c.bf16 %v5948_v47, %v5948_v47  ;;  %v14038_v63 = vpack.c.bf16 %v5946_v3, %v5946_v3  ;;  %v5949_v12 = vmax.f32 %v5917_v1, 0.0  ;;  %v5947_v26 = vmax.f32 %v5915_v52, 0.0  ;;  %v6521_v52 = vld [vmem:[#allocation2 + $0xa4] sm:$0x1] }
 0x339   : > { %v6308_v34 = vor.u32 %v6306_v61, %v6305_v27  ;;  %v6310_v44 = vrot.slane %v6305_v27, 4  ;;  %v6291_v59 = vor.u32 %v6289_v28, %v6288_v53  ;;  %v6293_v0 = vrot.slane %v6288_v53, 4  ;;  %v6528_v27 = vld [vmem:[#allocation2 + $0xb0] sm:$0x1] }
 0x33a   : > { %v6329_v4 = vshrl.u32 %v14040_v13, 16  ;;  %v6332_v36 = vshll.u32 %v14040_v13, 16  ;;  %v6312_v24 = vshrl.u32 %v14038_v63, 16  ;;  %v6315_v30 = vshll.u32 %v14038_v63, 16 }
 0x33b   : > { %v6309_v15 = vsel %vm17546_vm12, %v6301_v33, %v6308_v34  ;;  %v6515_v62 = vsel %vm17552_vm13, %v6310_v44, %v6514_v5  ;;  %v6292_v54 = vsel %vm17546_vm12, %v6284_v20, %v6291_v59  ;;  %v6508_v39 = vsel %vm17552_vm13, %v6293_v0, %v6507_v45  ;;  %v7029_v34 = vld [vmem:[#allocation2 + $0xc] sm:$0xf] }
 0x33c   : > { %6513 = vst [vmem:[#allocation2 + $0x94] sm:$0xf] %v6309_v15  ;;  %6516 = vst [vmem:[#allocation2 + $0x98] sm:$0x1] %v6515_v62  ;;  %v6331_v18 = vrot.slane %v6329_v4, 7  ;;  %v14041_v9 = vpack.c.bf16 %v5949_v12, %v5949_v12  ;;  %v6314_v46 = vrot.slane %v6312_v24, 7  ;;  %v14039_v37 = vpack.c.bf16 %v5947_v26, %v5947_v26 }
 0x33d   : > { %v16005_v35 = vld [vmem:[#allocation2 + $0x6c] sm:$0xff]   ;;  %6506 = vst [vmem:[#allocation2 + $0x88] sm:$0xf] %v6292_v54  ;;  %6509 = vst [vmem:[#allocation2 + $0x8c] sm:$0x1] %v6508_v39  ;;  %v5952_v33 = vmax.f32 %v5920_v40, 0.0  ;;  %v5921_v40 = vadd.f32 %v17704_v6, %v17520_v43  ;;  %v5919_v5 = vadd.f32 %v17520_v43, %v17711_v55 }
 0x33e   : > { %v5950_v23 = vmax.f32 %v5918_v56, 0.0  ;;  %v16007_v25 = vld [vmem:[#allocation2 + $0x78] sm:$0xff]   ;;  %v6334_v48 = vor.u32 %v6332_v36, %v6331_v18  ;;  %v6335_v38 = vrot.slane %v6331_v18, 4  ;;  %v6337_v57 = vshrl.u32 %v14041_v9, 16  ;;  %14943 = vmatmul.mubr.bf16.gmra.mrb[16].mxu1 %v16005_v35  ;;  %v6538_v15 = vld [vmem:[#allocation2 + $0xc0] sm:$0xf] }
 0x33f   : > { %v6340_v50 = vshll.u32 %v14041_v9, 16  ;;  %v6317_v20 = vor.u32 %v6315_v30, %v6314_v46  ;;  %v6318_v49 = vrot.slane %v6314_v46, 4  ;;  %v6320_v16 = vshrl.u32 %v14039_v37, 16  ;;  %14946 = vmatprep.mubr.bf16.mxu1 %v16007_v25  ;;  %v6531_v54 = vld [vmem:[#allocation2 + $0xb4] sm:$0xf] }
 0x340   : > { %v6323_v58 = vshll.u32 %v14039_v37, 16  ;;  %v6525_v61 = vsel %vm17539_vm11, %v6334_v48, %v6524_v41  ;;  %v6339_v60 = vrot.slane %v6337_v57, 7  ;;  %v14044_v28 = vpack.c.bf16 %v5952_v33, %v5952_v33  ;;  %v7030_v37 = vld [vmem:[#allocation2 + $0x10] sm:$0xf]  ;;  %v6542_v57 = vld [vmem:[#allocation2 + $0xc8] sm:$0x1] }
 0x341   : > { %v14042_v47 = vpack.c.bf16 %v5950_v23, %v5950_v23  ;;  %6526 = vst [vmem:[#allocation2 + $0xa8] sm:$0xf] %v6525_v61  ;;  %v6518_v3 = vsel %vm17539_vm11, %v6317_v20, %v6517_v14  ;;  %v6322_v1 = vrot.slane %v6320_v16, 7  ;;  %v5953_v4 = vmax.f32 %v5921_v40, 0.0  ;;  %v7031_v20 = vld [vmem:[#allocation2 + $0x14] sm:$0x1] }
 0x342   : > { %6519 = vst [vmem:[#allocation2 + $0x9c] sm:$0xf] %v6518_v3  ;;  %v6342_v53 = vor.u32 %v6340_v50, %v6339_v60  ;;  %v6344_v13 = vrot.slane %v6339_v60, 4  ;;  %v6363_v63 = vshrl.u32 %v14044_v28, 16  ;;  %v6366_v56 = vshll.u32 %v14044_v28, 16 }
 0x343   : > { %v6325_v44 = vor.u32 %v6323_v58, %v6322_v1  ;;  %v6327_v45 = vrot.slane %v6322_v1, 4  ;;  %v6346_v12 = vshrl.u32 %v14042_v47, 16  ;;  %v6349_v26 = vshll.u32 %v14042_v47, 16  ;;  %v16010_v24 = vld [vmem:[#allocation2 + $0x90] sm:$0xff]   ;;  %v6535_v50 = vld [vmem:[#allocation2 + $0xbc] sm:$0x1] }
 0x344   : > { %v6343_v59 = vsel %vm17546_vm12, %v6335_v38, %v6342_v53  ;;  %v6529_v0 = vsel %vm17552_vm13, %v6344_v13, %v6528_v27  ;;  %v6365_v6 = vrot.slane %v6363_v63, 7  ;;  %v16008_v36 = vld [vmem:[#allocation2 + $0x84] sm:$0xff]   ;;  %v5951_v41 = vmax.f32 %v5919_v5, 0.0 }
 0x345   : > { %6527 = vst [vmem:[#allocation2 + $0xac] sm:$0xf] %v6343_v59  ;;  %6530 = vst [vmem:[#allocation2 + $0xb0] sm:$0x1] %v6529_v0  ;;  %v6326_v43 = vsel %vm17546_vm12, %v6318_v49, %v6325_v44  ;;  %v6522_v55 = vsel %vm17552_vm13, %v6327_v45, %v6521_v52  ;;  %v6348_v62 = vrot.slane %v6346_v12, 7  ;;  %v14045_v39 = vpack.c.bf16 %v5953_v4, %v5953_v4 }
 0x346   : > { %6520 = vst [vmem:[#allocation2 + $0xa0] sm:$0xf] %v6326_v43  ;;  %6523 = vst [vmem:[#allocation2 + $0xa4] sm:$0x1] %v6522_v55  ;;  %v6368_v30 = vor.u32 %v6366_v56, %v6365_v6  ;;  %14947 = vmatmul.mubr.bf16.gmra.mrb[20].mxu1 %v16008_v36  ;;  %v17746_v18 = vrot.slane %v7081_v31, 4  ;;  %v7099_v14 = vshrl.u32 %v7029_v34, 16  ;;  %v14043_v35 = vpack.c.bf16 %v5951_v41, %v5951_v41 }
 0x347   : > { %v6351_v9 = vor.u32 %v6349_v26, %v6348_v62  ;;  %14950 = vmatprep.mubr.bf16.mxu1 %v16010_v24  ;;  %v17751_v46 = vrot.slane %v7091_v21, 4  ;;  %v7102_v33 = vshll.u32 %v7029_v34, 16  ;;  %v6371_v25 = vshrl.u32 %v14045_v39, 16  ;;  %v7035_v45 = vld [vmem:[#allocation2 + $0x24] sm:$0xf] }
 0x348   : > { %v6539_v23 = vsel %vm17539_vm11, %v6368_v30, %v6538_v15  ;;  %v7096_v2 = vrot.slane %v7094_v19, 5  ;;  %v6369_v31 = vrot.slane %v6365_v6, 4  ;;  %v6374_v38 = vshll.u32 %v14045_v39, 16  ;;  %v7033_v19 = vld [vmem:[#allocation2 + $0x1c] sm:$0xf] }
 0x349   : > { %6540 = vst [vmem:[#allocation2 + $0xc0] sm:$0xf] %v6539_v23  ;;  %v6532_v48 = vsel %vm17539_vm11, %v6351_v9, %v6531_v54  ;;  %v6354_v22 = vshrl.u32 %v14043_v35, 16  ;;  %v6373_v21 = vrot.slane %v6371_v25, 7  ;;  %v7101_v49 = vrot.slane %v7099_v14, 4 }
 0x34a   : > { %6533 = vst [vmem:[#allocation2 + $0xb4] sm:$0xf] %v6532_v48  ;;  %v7108_v16 = vshll.u32 %v7030_v37, 16  ;;  %v7112_v58 = vshrl.u32 %v7030_v37, 16  ;;  %v6357_v60 = vshll.u32 %v14043_v35, 16  ;;  %v7104_v7 = vrot.slane %v7102_v33, 5 }
 0x34b   : > { %v6356_v61 = vrot.slane %v6354_v22, 7  ;;  %v7123_v28 = vshrl.u32 %v7032_v29, 16  ;;  %v6376_v47 = vor.u32 %v6374_v38, %v6373_v21  ;;  %v6378_v3 = vrot.slane %v6373_v21, 4  ;;  %v7036_v12 = vld [vmem:[#allocation2 + $0x28] sm:$0xf] }
 0x34c   : > { %v17759_v27 = vrot.slane %v7108_v16, 5  ;;  %v7114_v32 = vrot.slane %v7112_v58, 4  ;;  %v6352_v1 = vrot.slane %v6348_v62, 4  ;;  %v7126_v53 = vshll.u32 %v7032_v29, 16  ;;  %v16013_v56 = vld [vmem:[#allocation2 + $0xa8] sm:$0xff]  }
 0x34d   : > { %v6359_v52 = vor.u32 %v6357_v60, %v6356_v61  ;;  %v6361_v40 = vrot.slane %v6356_v61, 4  ;;  %v16011_v5 = vld [vmem:[#allocation2 + $0x9c] sm:$0xff]   ;;  %v6377_v13 = vsel %vm17546_vm12, %v6369_v31, %v6376_v47  ;;  %v6543_v63 = vsel %vm17552_vm13, %v6378_v3, %v6542_v57  ;;  %v7038_v15 = vld [vmem:[#allocation2 + $0x30] sm:$0xf]  ;;  %v7037_v39 = vld [vmem:[#allocation2 + $0x2c] sm:$0x1] }
 0x34e   : > { %v7087_v34 = vsel %vm16248_vm2, %v17746_v18, %v17530_v8  ;;  %v7115_v44 = vor.u32 %v7114_v32, %v17759_v27  ;;  %6541 = vst [vmem:[#allocation2 + $0xc4] sm:$0xf] %v6377_v13  ;;  %6544 = vst [vmem:[#allocation2 + $0xc8] sm:$0x1] %v6543_v63  ;;  %14951 = vmatmul.mubr.bf16.gmra.mrb[24].mxu1 %v16011_v5  ;;  %v7105_v0 = vor.u32 %v7104_v7, %v7101_v49  ;;  %v7034_v4 = vld [vmem:[#allocation2 + $0x20] sm:$0x1] }
 0x34f   : > { %v6360_v26 = vsel %vm17546_vm12, %v6352_v1, %v6359_v52  ;;  %v6536_v59 = vsel %vm17552_vm13, %v6361_v40, %v6535_v50  ;;  %v7118_v6 = vshll.u32 %v7031_v20, 16  ;;  %14954 = vmatprep.mubr.bf16.mxu1 %v16013_v56  ;;  %v7097_v8 = vsel %vm16248_vm2, %v17751_v46, %v7096_v2  ;;  %v7039_v37 = vld [vmem:[#allocation2 + $0x34] sm:$0xf]  ;;  %v7041_v50 = vld [vmem:[#allocation2 + $0x3c] sm:$0xf] }
 0x350   : > { %6534 = vst [vmem:[#allocation2 + $0xb8] sm:$0xf] %v6360_v26  ;;  %6537 = vst [vmem:[#allocation2 + $0xbc] sm:$0x1] %v6536_v59  ;;  %v7125_v36 = vrot.slane %v7123_v28, 4  ;;  %v7132_v43 = vshll.u32 %v7033_v19, 16  ;;  %v13610_v18 = vcombine.low %v7087_v34, %v7097_v8 }
 0x351   : > { %v7136_v55 = vshrl.u32 %v7033_v19, 16  ;;  %v7128_v42 = vrot.slane %v7126_v53, 5  ;;  %v7147_v62 = vshrl.u32 %v7035_v45, 16  ;;  %v7150_v41 = vshll.u32 %v7035_v45, 16  ;;  %v7042_v47 = vld [vmem:[#allocation2 + $0x40] sm:$0xf] }
 0x352   : > { %v7156_v10 = vshll.u32 %v7036_v12, 16  ;;  %v7116_v24 = vrot.slane %v7115_v44, 4  ;;  %v7134_v30 = vrot.slane %v7132_v43, 5  ;;  %v7106_v14 = vrot.slane %v7105_v0, 4  ;;  %v7040_v5 = vld [vmem:[#allocation2 + $0x38] sm:$0x1] }
 0x353   : > { %v7138_v54 = vrot.slane %v7136_v55, 4  ;;  %v7120_v9 = vrot.slane %v7118_v6, 5  ;;  %v7149_v35 = vrot.slane %v7147_v62, 4  ;;  %v7152_v46 = vrot.slane %v7150_v41, 5  ;;  %v7044_v45 = vld [vmem:[#allocation2 + $0x48] sm:$0xf] }
 0x354   : > { %v17777_v23 = vrot.slane %v7156_v10, 5  ;;  %v7160_v25 = vshrl.u32 %v7036_v12, 16  ;;  %v7129_v2 = vor.u32 %v7128_v42, %v7125_v36  ;;  %v7142_v29 = vshll.u32 %v7034_v4, 16  ;;  %v7045_v6 = vld [vmem:[#allocation2 + $0x4c] sm:$0xf] }
 0x355   : > { %v7139_v33 = vor.u32 %v7138_v54, %v7134_v30  ;;  %v7171_v31 = vshrl.u32 %v7038_v15, 16  ;;  %v7174_v48 = vshll.u32 %v7038_v15, 16  ;;  %v7121_v38 = vsel %vm16248_vm2, %v7116_v24, %v7120_v9  ;;  %v16017_v42 = vld [vmem:[%s18796_s3 + $0x88] sm:$0xff]   ;;  %v7043_v41 = vld [vmem:[#allocation2 + $0x44] sm:$0x1] }
 0x356   : > { %v7162_v57 = vrot.slane %v7160_v25, 4  ;;  %v7166_v22 = vshll.u32 %v7037_v39, 16  ;;  %v7180_v21 = vshll.u32 %v7039_v37, 16  ;;  %v7111_v49 = vsel %vm16248_vm2, %v7106_v14, %v17759_v27 }
 0x357   : > { %v16014_v20 = vld [vmem:[#allocation2 + $0xb4] sm:$0xff]   ;;  %v7140_v16 = vrot.slane %v7139_v33, 4  ;;  %v7173_v58 = vrot.slane %v7171_v31, 4  ;;  %v7176_v61 = vrot.slane %v7174_v48, 5  ;;  %v7153_v60 = vor.u32 %v7152_v46, %v7149_v35 }
 0x358   : > { %v7163_v7 = vor.u32 %v7162_v57, %v17777_v23  ;;  %v17785_v19 = vrot.slane %v7180_v21, 5  ;;  %v7184_v28 = vshrl.u32 %v7039_v37, 16  ;;  %14955 = vmatmul.mubr.bf16.gmra.mrb[28].mxu1 %v16014_v20  ;;  %v13611_v3 = vcombine.low %v7111_v49, %v7121_v38  ;;  %v7048_v33 = vld [vmem:[#allocation2 + $0x58] sm:$0xf]  ;;  %v16018_v21 = vld [vmem:[%s18796_s3 + $0x90] sm:$0xff]  }
 0x359   : > { %v7130_v32 = vrot.slane %v7129_v2, 4  ;;  %v7144_v1 = vrot.slane %v7142_v29, 5  ;;  %v7177_v52 = vor.u32 %v7176_v61, %v7173_v58  ;;  %14974 = vmatprep.mubr.bf16.mxu1 %v13610_v18  ;;  %v7195_v27 = vshrl.u32 %v7041_v50, 16 }
 0x35a   : > { %v7164_v40 = vrot.slane %v7163_v7, 4  ;;  %v7186_v53 = vrot.slane %v7184_v28, 4  ;;  %v7198_v13 = vshll.u32 %v7041_v50, 16  ;;  %v7168_v56 = vrot.slane %v7166_v22, 5  ;;  %v7051_v7 = vld [vmem:[#allocation2 + $0x64] sm:$0xf] }
 0x35b   : > { %v7145_v63 = vsel %vm16248_vm2, %v7140_v16, %v7144_v1  ;;  %v7204_v34 = vshll.u32 %v7042_v47, 16  ;;  %v7208_v44 = vshrl.u32 %v7042_v47, 16  ;;  %v7154_v12 = vrot.slane %v7153_v60, 4 }
 0x35c   : > { %v7187_v26 = vor.u32 %v7186_v53, %v17785_v19  ;;  %v7197_v59 = vrot.slane %v7195_v27, 4  ;;  %v7200_v0 = vrot.slane %v7198_v13, 5  ;;  %v7135_v8 = vsel %vm16248_vm2, %v7130_v32, %v7134_v30  ;;  %v7047_v30 = vld [vmem:[#allocation2 + $0x54] sm:$0xf] }
 0x35d   : > { %v7190_v4 = vshll.u32 %v7040_v5, 16  ;;  %v17792_v36 = vrot.slane %v7204_v34, 5  ;;  %v7210_v43 = vrot.slane %v7208_v44, 4  ;;  %v13612_v55 = vcombine.low %v7135_v8, %v7145_v63  ;;  %v16019_v63 = vld [vmem:[%s18796_s3 + $0x98] sm:$0xff]   ;;  %v7053_v34 = vld [vmem:[#allocation2 + $0x6c] sm:$0xf] }
 0x35e   : > { %v7169_v15 = vsel %vm16248_vm2, %v7164_v40, %v7168_v56  ;;  %v7178_v62 = vrot.slane %v7177_v52, 4  ;;  %v7219_v10 = vshrl.u32 %v7044_v45, 16  ;;  %v7188_v24 = vrot.slane %v7187_v26, 4  ;;  %v7049_v52 = vld [vmem:[#allocation2 + $0x5c] sm:$0x1] }
 0x35f   : > { %v7222_v54 = vshll.u32 %v7044_v45, 16  ;;  %v7228_v39 = vshll.u32 %v7045_v6, 16  ;;  %v7232_v18 = vshrl.u32 %v7045_v6, 16  ;;  %v7159_v14 = vsel %vm16248_vm2, %v7154_v12, %v17777_v23  ;;  %v7046_v23 = vld [vmem:[#allocation2 + $0x50] sm:$0x1] }
 0x360   : > { %v7201_v9 = vor.u32 %v7200_v0, %v7197_v59  ;;  %v7211_v35 = vor.u32 %v7210_v43, %v17792_v36  ;;  %v7221_v37 = vrot.slane %v7219_v10, 4  ;;  %14975 = vmatmul.mubr.bf16.vlgmr.msra.gmra.mrb[0].mxu1 %v13611_v3  ;;  %v13613_v46 = vcombine.low %v7159_v14, %v7169_v15  ;;  %v7054_v59 = vld [vmem:[#allocation2 + $0x70] sm:$0xf]  ;;  %v7052_v43 = vld [vmem:[#allocation2 + $0x68] sm:$0x1] }
 0x361   : > { %v7192_v25 = vrot.slane %v7190_v4, 5  ;;  %v7224_v2 = vrot.slane %v7222_v54, 5  ;;  %v17803_v29 = vrot.slane %v7228_v39, 5  ;;  %14978 = vmatprep.mubr.bf16.mxu1 %v13612_v55  ;;  %15007 = vmatpush3.bf16.msra.mxu1 %v17688_v11  ;;  %v7183_v31 = vsel %vm16248_vm2, %v7178_v62, %v17785_v19  ;;  %v7050_v11 = vld [vmem:[#allocation2 + $0x60] sm:$0xf] }
 0x362   : > { %v7214_v48 = vshll.u32 %v7043_v41, 16  ;;  %v7234_v38 = vrot.slane %v7232_v18, 4  ;;  %v7243_v57 = vshrl.u32 %v7047_v30, 16  ;;  %15008 = vmatprep.subr.bf16.mxu1 %v16017_v42  ;;  %v7246_v20 = vshll.u32 %v7047_v30, 16  ;;  %v7056_v62 = vld [vmem:[#allocation2 + $0x78] sm:$0xf] }
 0x363   : > { %v7193_v22 = vsel %vm16248_vm2, %v7188_v24, %v7192_v25  ;;  %v7225_v50 = vor.u32 %v7224_v2, %v7221_v37  ;;  %v7252_v49 = vshll.u32 %v7048_v33, 16  ;;  %v7202_v16 = vrot.slane %v7201_v9, 4  ;;  %v16020_v39 = vld [vmem:[%s18796_s3 + $0xa0] sm:$0xff]   ;;  %v7057_v18 = vld [vmem:[#allocation2 + $0x7c] sm:$0xf] }
 0x364   : > { %v7212_v58 = vrot.slane %v7211_v35, 4  ;;  %v7235_v61 = vor.u32 %v7234_v38, %v17803_v29  ;;  %v7245_v60 = vrot.slane %v7243_v57, 4  ;;  %v7238_v19 = vshll.u32 %v7046_v23, 16 }
 0x365   : > { %v7248_v28 = vrot.slane %v7246_v20, 5  ;;  %v17815_v47 = vrot.slane %v7252_v49, 5  ;;  %v7256_v3 = vshrl.u32 %v7048_v33, 16  ;;  %15009 = vmatpush3.bf16.msra.mxu1 %v16017_v42  ;;  %v7216_v32 = vrot.slane %v7214_v48, 5  ;;  %v7055_v33 = vld [vmem:[#allocation2 + $0x74] sm:$0x1] }
 0x366   : > { %v7226_v1 = vrot.slane %v7225_v50, 4  ;;  %v7267_v40 = vshrl.u32 %v7050_v11, 16  ;;  %v7270_v5 = vshll.u32 %v7050_v11, 16  ;;  %15010 = vmatprep.subr.bf16.mxu1 %v16018_v21  ;;  %v7236_v53 = vrot.slane %v7235_v61, 4  ;;  %v7059_v50 = vld [vmem:[#allocation2 + $0x84] sm:$0xf] }
 0x367   : > { %v7249_v27 = vor.u32 %v7248_v28, %v7245_v60  ;;  %v7258_v13 = vrot.slane %v7256_v3, 4  ;;  %v7276_v56 = vshll.u32 %v7051_v7, 16  ;;  %v13614_v44 = vcombine.low %v7183_v31, %v7193_v22  ;;  %v16021_v20 = vld [vmem:[%s18796_s3 + $0xa8] sm:$0xff]   ;;  %v7058_v28 = vld [vmem:[#allocation2 + $0x80] sm:$0x1] }
 0x368   : > { %v7207_v45 = vsel %vm16248_vm2, %v7202_v16, %v17792_v36  ;;  %v7269_v12 = vrot.slane %v7267_v40, 4  ;;  %v7272_v26 = vrot.slane %v7270_v5, 5  ;;  %14979 = vmatmul.mubr.bf16.gmra.mrb[4].mxu1 %v13613_v46  ;;  %v7217_v0 = vsel %vm16248_vm2, %v7212_v58, %v7216_v32  ;;  %v7060_v3 = vld [vmem:[#allocation2 + $0x88] sm:$0xf]  ;;  %v16022_v32 = vld [vmem:[%s18796_s3 + $0xb0] sm:$0xff]  }
 0x369   : > { %v7240_v6 = vrot.slane %v7238_v19, 5  ;;  %v7259_v8 = vor.u32 %v7258_v13, %v17815_v47  ;;  %v7262_v4 = vshll.u32 %v7049_v52, 16  ;;  %14982 = vmatprep.mubr.bf16.mxu1 %v13614_v44  ;;  %v7231_v55 = vsel %vm16248_vm2, %v7226_v1, %v17803_v29  ;;  %15011 = vmatpush3.bf16.msra.mxu1 %v16018_v21  ;;  %v7062_v13 = vld [vmem:[#allocation2 + $0x90] sm:$0xf] }
 0x36a   : > { %v17829_v15 = vrot.slane %v7276_v56, 5  ;;  %v7280_v36 = vshrl.u32 %v7051_v7, 16  ;;  %v7291_v42 = vshrl.u32 %v7053_v34, 16  ;;  %v7250_v10 = vrot.slane %v7249_v27, 4  ;;  %15012 = vmatprep.subr.bf16.mxu1 %v16019_v63 }
 0x36b   : > { %v7241_v41 = vsel %vm16248_vm2, %v7236_v53, %v7240_v6  ;;  %v7294_v24 = vshll.u32 %v7053_v34, 16  ;;  %v7300_v54 = vshll.u32 %v7054_v59, 16  ;;  %v7260_v30 = vrot.slane %v7259_v8, 4  ;;  %v7061_v34 = vld [vmem:[#allocation2 + $0x8c] sm:$0x1]  ;;  %v16023_v8 = vld [vmem:[%s18796_s3 + $0xb8] sm:$0xff]  }
 0x36c   : > { %v7273_v14 = vor.u32 %v7272_v26, %v7269_v12  ;;  %v7282_v9 = vrot.slane %v7280_v36, 4  ;;  %v7293_v35 = vrot.slane %v7291_v42, 4  ;;  %v7286_v37 = vshll.u32 %v7052_v43, 16  ;;  %v7063_v6 = vld [vmem:[#allocation2 + $0x94] sm:$0xf] }
 0x36d   : > { %v7296_v46 = vrot.slane %v7294_v24, 5  ;;  %v17836_v25 = vrot.slane %v7300_v54, 5  ;;  %v7304_v2 = vshrl.u32 %v7054_v59, 16  ;;  %v13615_v29 = vcombine.low %v7207_v45, %v7217_v0  ;;  %15013 = vmatpush3.bf16.msra.mxu1 %v16019_v63 }
 0x36e   : > { %v13616_v31 = vcombine.low %v7231_v55, %v7241_v41  ;;  %v7264_v48 = vrot.slane %v7262_v4, 5  ;;  %v7283_v23 = vor.u32 %v7282_v9, %v17829_v15  ;;  %15014 = vmatprep.subr.bf16.mxu1 %v16020_v39  ;;  %v7315_v22 = vshrl.u32 %v7056_v62, 16 }
 0x36f   : > { %v7297_v38 = vor.u32 %v7296_v46, %v7293_v35  ;;  %v7306_v57 = vrot.slane %v7304_v2, 4  ;;  %v7318_v21 = vshll.u32 %v7056_v62, 16  ;;  %v7324_v16 = vshll.u32 %v7057_v18, 16 }
 0x370   : > { %v7265_v49 = vsel %vm16248_vm2, %v7260_v30, %v7264_v48  ;;  %v7284_v11 = vrot.slane %v7283_v23, 4  ;;  %v7328_v58 = vshrl.u32 %v7057_v18, 16  ;;  %14983 = vmatmul.mubr.bf16.gmra.mrb[8].mxu1 %v13615_v29  ;;  %v7255_v61 = vsel %vm16248_vm2, %v7250_v10, %v17815_v47  ;;  %v7066_v30 = vld [vmem:[#allocation2 + $0xa0] sm:$0xf]  ;;  %v7068_v48 = vld [vmem:[#allocation2 + $0xa8] sm:$0xf] }
 0x371   : > { %v7274_v60 = vrot.slane %v7273_v14, 4  ;;  %v7288_v7 = vrot.slane %v7286_v37, 5  ;;  %v7307_v19 = vor.u32 %v7306_v57, %v17836_v25  ;;  %14986 = vmatprep.mubr.bf16.mxu1 %v13616_v31  ;;  %v7298_v1 = vrot.slane %v7297_v38, 4  ;;  %15015 = vmatpush3.bf16.msra.mxu1 %v16020_v39  ;;  %v7064_v37 = vld [vmem:[#allocation2 + $0x98] sm:$0x1] }
 0x372   : > { %v7310_v52 = vshll.u32 %v7055_v33, 16  ;;  %v17851_v40 = vrot.slane %v7324_v16, 5  ;;  %v7330_v5 = vrot.slane %v7328_v58, 4  ;;  %v13617_v53 = vcombine.low %v7255_v61, %v7265_v49  ;;  %15016 = vmatprep.subr.bf16.mxu1 %v16021_v20  ;;  %v7069_v49 = vld [vmem:[#allocation2 + $0xac] sm:$0xf] }
 0x373   : > { %v7317_v27 = vrot.slane %v7315_v22, 4  ;;  %v7320_v47 = vrot.slane %v7318_v21, 5  ;;  %v7289_v63 = vsel %vm16248_vm2, %v7284_v11, %v7288_v7  ;;  %v7308_v56 = vrot.slane %v7307_v19, 4 }
 0x374   : > { %v7339_v44 = vshrl.u32 %v7059_v50, 16  ;;  %v7342_v45 = vshll.u32 %v7059_v50, 16  ;;  %v7279_v12 = vsel %vm16248_vm2, %v7274_v60, %v17829_v15  ;;  %v7331_v26 = vor.u32 %v7330_v5, %v17851_v40  ;;  %v7065_v15 = vld [vmem:[#allocation2 + $0x9c] sm:$0xf] }
 0x375   : > { %v7348_v59 = vshll.u32 %v7060_v3, 16  ;;  %v7352_v0 = vshrl.u32 %v7060_v3, 16  ;;  %v7312_v4 = vrot.slane %v7310_v52, 5  ;;  %v7334_v43 = vshll.u32 %v7058_v28, 16  ;;  %15017 = vmatpush3.bf16.msra.mxu1 %v16021_v20 }
 0x376   : > { %v7341_v55 = vrot.slane %v7339_v44, 4  ;;  %v7344_v36 = vrot.slane %v7342_v45, 5  ;;  %v13618_v42 = vcombine.low %v7279_v12, %v7289_v63  ;;  %v7321_v62 = vor.u32 %v7320_v47, %v7317_v27  ;;  %15018 = vmatprep.subr.bf16.mxu1 %v16022_v32  ;;  %v7067_v27 = vld [vmem:[#allocation2 + $0xa4] sm:$0x1]  ;;  %v7071_v45 = vld [vmem:[#allocation2 + $0xb4] sm:$0xf] }
 0x377   : > { %v17862_v41 = vrot.slane %v7348_v59, 5  ;;  %v7354_v10 = vrot.slane %v7352_v0, 4  ;;  %v7303_v24 = vsel %vm16248_vm2, %v7298_v1, %v17836_v25  ;;  %v7313_v54 = vsel %vm16248_vm2, %v7308_v56, %v7312_v4  ;;  %v17873_v25 = vld [vmem:[%s18796_s3 + $0xc0] sm:$0xff]   ;;  %v7072_v12 = vld [vmem:[#allocation2 + $0xb8] sm:$0xf] }
 0x378   : > { %v7363_v39 = vshrl.u32 %v7062_v13, 16  ;;  %v7366_v18 = vshll.u32 %v7062_v13, 16  ;;  %14987 = vmatmul.mubr.bf16.gmra.mrb[12].mxu1 %v13617_v53  ;;  %v7332_v14 = vrot.slane %v7331_v26, 4  ;;  %v7358_v35 = vshll.u32 %v7061_v34, 16 }
 0x379   : > { %v7355_v9 = vor.u32 %v7354_v10, %v17862_v41  ;;  %v7372_v33 = vshll.u32 %v7063_v6, 16  ;;  %14990 = vmatprep.mubr.bf16.mxu1 %v13618_v42  ;;  %v7345_v46 = vor.u32 %v7344_v36, %v7341_v55  ;;  %v7376_v31 = vshrl.u32 %v7063_v6, 16  ;;  %15019 = vmatpush3.bf16.msra.mxu1 %v16022_v32  ;;  %v7070_v36 = vld [vmem:[#allocation2 + $0xb0] sm:$0x1] }
 0x37a   : > { %v7365_v2 = vrot.slane %v7363_v39, 4  ;;  %v7368_v29 = vrot.slane %v7366_v18, 5  ;;  %v7322_v23 = vrot.slane %v7321_v62, 4  ;;  %v7336_v38 = vrot.slane %v7334_v43, 5  ;;  %15020 = vmatprep.subr.bf16.mxu1 %v16023_v8 }
 0x37b   : > { %v7356_v57 = vrot.slane %v7355_v9, 4  ;;  %v7374_v22 = vrot.slane %v7372_v33, 5  ;;  %v13619_v21 = vcombine.low %v7303_v24, %v7313_v54  ;;  %v7378_v50 = vrot.slane %v7376_v31, 4 }
 0x37c   : > { %v7387_v20 = vshrl.u32 %v7065_v15, 16  ;;  %v7337_v11 = vsel %vm16248_vm2, %v7332_v14, %v7336_v38  ;;  %v7360_v16 = vrot.slane %v7358_v35, 5  ;;  %v7390_v58 = vshll.u32 %v7065_v15, 16 }
 0x37d   : > { %v7396_v61 = vshll.u32 %v7066_v30, 16  ;;  %v7346_v60 = vrot.slane %v7345_v46, 4  ;;  %v7369_v7 = vor.u32 %v7368_v29, %v7365_v2  ;;  %v7379_v19 = vor.u32 %v7378_v50, %v7374_v22  ;;  %15021 = vmatpush3.bf16.msra.mxu1 %v16023_v8  ;;  %v7845_v2 = vld [vmem:[#allocation2 + $0x4] sm:$0xf] }
 0x37e   : > { %v7382_v28 = vshll.u32 %v7064_v37, 16  ;;  %v7327_v3 = vsel %vm16248_vm2, %v7322_v23, %v17851_v40  ;;  %v7400_v1 = vshrl.u32 %v7066_v30, 16  ;;  %v7411_v52 = vshrl.u32 %v7068_v48, 16  ;;  %15054 = vmatprep.subr.bf16.mxu1 %v17873_v25 }
 0x37f   : > { %v7398_v32 = vrot.slane %v7396_v61, 5  ;;  %v13620_v5 = vcombine.low %v7327_v3, %v7337_v11  ;;  %v7361_v53 = vsel %vm16248_vm2, %v7356_v57, %v7360_v16  ;;  %v7389_v47 = vrot.slane %v7387_v20, 4  ;;  %v7844_v11 = vld [vmem:[#allocation2] sm:$0xe]  ;;  %v7846_v16 = vld [vmem:[#allocation2 + $0x8] sm:$0x1] }
 0x380   : > { %v7414_v13 = vshll.u32 %v7068_v48, 16  ;;  %14991 = vmatmul.mubr.bf16.gmra.mrb[16].mxu1 %v13619_v21  ;;  %v7380_v63 = vrot.slane %v7379_v19, 4  ;;  %v7392_v56 = vrot.slane %v7390_v58, 5  ;;  %v7402_v34 = vrot.slane %v7400_v1, 4 }
 0x381   : > { %v7420_v44 = vshll.u32 %v7069_v49, 16  ;;  %14994 = vmatprep.mubr.bf16.mxu1 %v13620_v5  ;;  %v7351_v40 = vsel %vm16248_vm2, %v7346_v60, %v17862_v41  ;;  %v7370_v26 = vrot.slane %v7369_v7, 4  ;;  %v7384_v59 = vrot.slane %v7382_v28, 5 }
 0x382   : > { %v7424_v0 = vshrl.u32 %v7069_v49, 16  ;;  %v7403_v6 = vor.u32 %v7402_v34, %v7398_v32  ;;  %v7413_v8 = vrot.slane %v7411_v52, 4  ;;  %v7416_v4 = vrot.slane %v7414_v13, 5 }
 0x383   : > { %v7422_v43 = vrot.slane %v7420_v44, 5  ;;  %v13621_v55 = vcombine.low %v7351_v40, %v7361_v53  ;;  %v7385_v62 = vsel %vm16248_vm2, %v7380_v63, %v7384_v59  ;;  %v7393_v10 = vor.u32 %v7392_v56, %v7389_v47  ;;  %v7849_v59 = vld [vmem:[#allocation2 + $0x14] sm:$0x1] }
 0x384   : > { %v7426_v42 = vrot.slane %v7424_v0, 4  ;;  %v7406_v15 = vshll.u32 %v7067_v27, 16  ;;  %v7444_v24 = vshll.u32 %v7072_v12, 16  ;;  %v7435_v39 = vshrl.u32 %v7071_v45, 16  ;;  %v7848_v27 = vld [vmem:[#allocation2 + $0x10] sm:$0xf] }
 0x385   : > { %v7438_v18 = vshll.u32 %v7071_v45, 16  ;;  %v7448_v41 = vshrl.u32 %v7072_v12, 16  ;;  %v7375_v30 = vsel %vm16248_vm2, %v7370_v26, %v7374_v22  ;;  %v7404_v14 = vrot.slane %v7403_v6, 4  ;;  %v7073_v22 = vld [vmem:[#allocation2 + $0xbc] sm:$0x1] }
 0x386   : > { %v7427_v54 = vor.u32 %v7426_v42, %v7422_v43  ;;  %v7417_v9 = vor.u32 %v7416_v4, %v7413_v8  ;;  %v7430_v35 = vshll.u32 %v7070_v36, 16  ;;  %v13622_v37 = vcombine.low %v7375_v30, %v7385_v62  ;;  %v7852_v6 = vld [vmem:[#allocation2 + $0x20] sm:$0x1]  ;;  %v7847_v8 = vld [vmem:[#allocation2 + $0xc] sm:$0xe] }
 0x387   : > { %v7446_v33 = vrot.slane %v7444_v24, 5  ;;  %v7450_v46 = vrot.slane %v7448_v41, 4  ;;  %v7394_v29 = vrot.slane %v7393_v10, 4  ;;  %v7408_v31 = vrot.slane %v7406_v15, 5  ;;  %v7850_v36 = vld [vmem:[#allocation2 + $0x18] sm:$0xe] }
 0x388   : > { %14995 = vmatmul.mubr.bf16.gmra.mrb[20].mxu1 %v13621_v55  ;;  %v7428_v48 = vrot.slane %v7427_v54, 4  ;;  %v7437_v23 = vrot.slane %v7435_v39, 4  ;;  %v7440_v38 = vrot.slane %v7438_v18, 5  ;;  %v7418_v21 = vrot.slane %v7417_v9, 4  ;;  %v7857_v42 = vld [vmem:[#allocation2 + $0x34] sm:$0xf] }
 0x389   : > { %14998 = vmatprep.mubr.bf16.mxu1 %v13622_v37  ;;  %v7409_v57 = vsel %vm16248_vm2, %v7404_v14, %v7408_v31  ;;  %v7432_v50 = vrot.slane %v7430_v35, 5  ;;  %v7942_v20 = vrot.slane %v7845_v2, 5  ;;  %v7451_v49 = vor.u32 %v7450_v46, %v7446_v33  ;;  %v7855_v9 = vld [vmem:[#allocation2 + $0x2c] sm:$0x1]  ;;  %v7858_v46 = vld [vmem:[#allocation2 + $0x38] sm:$0x1] }
 0x38a   : > { %v7399_v58 = vsel %vm16248_vm2, %v7394_v29, %v7398_v32  ;;  %v7441_v7 = vor.u32 %v7440_v38, %v7437_v23  ;;  %v7454_v19 = vshll.u32 %v7073_v22, 16  ;;  %v7423_v28 = vsel %vm16248_vm2, %v7418_v21, %v7422_v43  ;;  %v7851_v32 = vld [vmem:[#allocation2 + $0x1c] sm:$0xf]  ;;  %v7854_v43 = vld [vmem:[#allocation2 + $0x28] sm:$0xf]  ;;  %v16026_v21 = vld [vmem:[%s18796_s3 + $0xd0] sm:$0xff]  }
 0x38b   : > { %v7433_v61 = vsel %vm16248_vm2, %v7428_v48, %v7432_v50  ;;  %v13623_v60 = vcombine.low %v7399_v58, %v7409_v57  ;;  %v13634_v3 = vrot.slane %v7844_v11, 9  ;;  %v7944_v1 = vrot.slane %v7942_v20, 4  ;;  %v16025_v35 = vld [vmem:[%s18796_s3 + $0xc8] sm:$0xff]   ;;  %v7853_v2 = vld [vmem:[#allocation2 + $0x24] sm:$0xe] }
 0x38c   : > { %v7945_v52 = vrot.slane %v7846_v16, 5  ;;  %v13624_v5 = vcombine.low %v7423_v28, %v7433_v61  ;;  %v7452_v53 = vrot.slane %v7451_v49, 4  ;;  %v7442_v47 = vrot.slane %v7441_v7, 4  ;;  %v7860_v31 = vld [vmem:[#allocation2 + $0x40] sm:$0xf]  ;;  %v16027_v7 = vld [vmem:[%s18796_s3 + $0xd8] sm:$0xff]  }
 0x38d   : > { %v7456_v13 = vrot.slane %v7454_v19, 5  ;;  %v7943_v63 = vsel %vm16467_vm5, %v13634_v3, %v7942_v20  ;;  %v7949_v44 = vrot.slane %v7848_v27, 5  ;;  %v7956_v45 = vrot.slane %v7851_v32, 5  ;;  %v7856_v23 = vld [vmem:[#allocation2 + $0x30] sm:$0xe]  ;;  %v16028_v32 = vld [vmem:[%s18796_s3 + $0xe0] sm:$0xff]  }
 0x38e   : > { %v7946_v56 = vsel %vm16467_vm5, %v7944_v1, %v7945_v52  ;;  %v7447_v12 = vsel %vm16248_vm2, %v7442_v47, %v7446_v33  ;;  %v7952_v55 = vrot.slane %v7849_v59, 5  ;;  %v7959_v62 = vrot.slane %v7852_v6, 5  ;;  %v7863_v38 = vld [vmem:[#allocation2 + $0x4c] sm:$0xf]  ;;  %v7864_v3 = vld [vmem:[#allocation2 + $0x50] sm:$0x1] }
 0x38f   : > { %v7457_v34 = vsel %vm16248_vm2, %v7452_v53, %v7456_v13  ;;  %v13666_v40 = vcombine.low %v7943_v63, %v7946_v56  ;;  %v7951_v0 = vrot.slane %v7949_v44, 4  ;;  %v7958_v4 = vrot.slane %v7956_v45, 4  ;;  %v7859_v1 = vld [vmem:[#allocation2 + $0x3c] sm:$0xe]  ;;  %v7862_v27 = vld [vmem:[#allocation2 + $0x48] sm:$0xe] }
 0x390   : > { %14999 = vmatmul.mubr.bf16.gmra.mrb[24].mxu1 %v13623_v60  ;;  %v13625_v26 = vcombine.low %v7447_v12, %v7457_v34  ;;  %v13635_v10 = vrot.slane %v7847_v8, 9  ;;  %v7963_v24 = vrot.slane %v7854_v43, 5  ;;  %v13636_v54 = vrot.slane %v7850_v36, 9  ;;  %v7861_v60 = vld [vmem:[#allocation2 + $0x44] sm:$0x1]  ;;  %v16029_v6 = vld [vmem:[%s18796_s3 + $0xe8] sm:$0xff]  }
 0x391   : > { %15002 = vmatprep.mubr.bf16.mxu1 %v13624_v5  ;;  %v7953_v15 = vsel %vm16467_vm5, %v7951_v0, %v7952_v55  ;;  %v7960_v39 = vsel %vm16467_vm5, %v7958_v4, %v7959_v62  ;;  %v7970_v18 = vrot.slane %v7857_v42, 5  ;;  %v7966_v48 = vrot.slane %v7855_v9, 5  ;;  %v7866_v5 = vld [vmem:[#allocation2 + $0x58] sm:$0xf]  ;;  %v7869_v47 = vld [vmem:[#allocation2 + $0x64] sm:$0xf] }
 0x392   : > { %v7950_v41 = vsel %vm16467_vm5, %v13635_v10, %v7949_v44  ;;  %v7957_v14 = vsel %vm16467_vm5, %v13636_v54, %v7956_v45  ;;  %v7965_v33 = vrot.slane %v7963_v24, 4  ;;  %v7973_v57 = vrot.slane %v7858_v46, 5  ;;  %v7867_v0 = vld [vmem:[#allocation2 + $0x5c] sm:$0x1]  ;;  %v7870_v43 = vld [vmem:[#allocation2 + $0x68] sm:$0x1] }
 0x393   : > { %v13667_v30 = vcombine.low %v7950_v41, %v7953_v15  ;;  %v13668_v37 = vcombine.low %v7957_v14, %v7960_v39  ;;  %v7972_v29 = vrot.slane %v7970_v18, 4  ;;  %v13637_v50 = vrot.slane %v7853_v2, 9  ;;  %v7865_v55 = vld [vmem:[#allocation2 + $0x54] sm:$0xe]  ;;  %v7872_v42 = vld [vmem:[#allocation2 + $0x70] sm:$0xf] }
 0x394   : > { %v7967_v22 = vsel %vm16467_vm5, %v7965_v33, %v7966_v48  ;;  %v7977_v20 = vrot.slane %v7860_v31, 5  ;;  %v13638_v49 = vrot.slane %v7856_v23, 9  ;;  %v7984_v16 = vrot.slane %v7863_v38, 5  ;;  %v7868_v10 = vld [vmem:[#allocation2 + $0x60] sm:$0xe]  ;;  %v16030_v54 = vld [vmem:[%s18796_s3 + $0xf0] sm:$0xff]  }
 0x395   : > { %v7974_v11 = vsel %vm16467_vm5, %v7972_v29, %v7973_v57  ;;  %v7980_v53 = vrot.slane %v7861_v60, 5  ;;  %v7987_v13 = vrot.slane %v7864_v3, 5  ;;  %v13639_v63 = vrot.slane %v7859_v1, 9  ;;  %v7875_v15 = vld [vmem:[#allocation2 + $0x7c] sm:$0xf] }
 0x396   : > { %v7971_v61 = vsel %vm16467_vm5, %v13638_v49, %v7970_v18  ;;  %v7979_v28 = vrot.slane %v7977_v20, 4  ;;  %v7986_v52 = vrot.slane %v7984_v16, 4  ;;  %v7991_v34 = vrot.slane %v7866_v5, 5  ;;  %v7873_v46 = vld [vmem:[#allocation2 + $0x74] sm:$0x1]  ;;  %v16031_v2 = vld [vmem:[%s18796_s3 + $0xf8] sm:$0xff]  }
 0x397   : > { %v13670_v19 = vcombine.low %v7971_v61, %v7974_v11  ;;  %v13640_v44 = vrot.slane %v7862_v27, 9  ;;  %v7998_v12 = vrot.slane %v7869_v47, 5  ;;  %v7994_v62 = vrot.slane %v7867_v0, 5  ;;  %v7876_v48 = vld [vmem:[#allocation2 + $0x80] sm:$0x1] }
 0x398   : > { %15003 = vmatmul.mubr.bf16.gmra.mrb[28].mxu1 %v13625_v26  ;;  %v7981_v56 = vsel %vm16467_vm5, %v7979_v28, %v7980_v53  ;;  %v7988_v45 = vsel %vm16467_vm5, %v7986_v52, %v7987_v13  ;;  %v7993_v4 = vrot.slane %v7991_v34, 4  ;;  %v13641_v39 = vrot.slane %v7865_v55, 9  ;;  %v7871_v23 = vld [vmem:[#allocation2 + $0x6c] sm:$0xe]  ;;  %v7878_v57 = vld [vmem:[#allocation2 + $0x88] sm:$0xf] }
 0x399   : > { %15022 = vmatprep.mubr.bf16.mxu1 %v13666_v40  ;;  %v7978_v40 = vsel %vm16467_vm5, %v13639_v63, %v7977_v20  ;;  %v7985_v59 = vsel %vm16467_vm5, %v13640_v44, %v7984_v16  ;;  %v8000_v36 = vrot.slane %v7998_v12, 4  ;;  %v8005_v41 = vrot.slane %v7872_v42, 5  ;;  %v17963_v49 = vld [vmem:[%s18796_s3 + $0x100] sm:$0xff]   ;;  %v7879_v3 = vld [vmem:[#allocation2 + $0x8c] sm:$0x1] }
 0x39a   : > { %v13671_v26 = vcombine.low %v7978_v40, %v7981_v56  ;;  %v13672_v8 = vcombine.low %v7985_v59, %v7988_v45  ;;  %v7995_v18 = vsel %vm16467_vm5, %v7993_v4, %v7994_v62  ;;  %v8012_v9 = vrot.slane %v7875_v15, 5  ;;  %v7882_v5 = vld [vmem:[#allocation2 + $0x98] sm:$0x1]  ;;  %v7877_v53 = vld [vmem:[#allocation2 + $0x84] sm:$0xe] }
 0x39b   : > { %v8007_v31 = vrot.slane %v8005_v41, 4  ;;  %v8015_v20 = vrot.slane %v7876_v48, 5  ;;  %v13643_v11 = vrot.slane %v7871_v23, 9  ;;  %v7884_v47 = vld [vmem:[#allocation2 + $0xa0] sm:$0xf]  ;;  %v8022_v13 = vrot.slane %v7879_v3, 5 }
 0x39c   : > { %v8014_v38 = vrot.slane %v8012_v9, 4  ;;  %v7887_v63 = vld [vmem:[#allocation2 + $0xac] sm:$0xf]  ;;  %v8029_v56 = vrot.slane %v7882_v5, 5  ;;  %v8033_v45 = vrot.slane %v7884_v47, 5  ;;  %v16047_v5 = vld [vmem:[#allocation2 + $0x84] sm:$0xff]  }
 0x39d   : > { %v7885_v4 = vld [vmem:[#allocation2 + $0xa4] sm:$0x1]  ;;  %v7888_v42 = vld [vmem:[#allocation2 + $0xb0] sm:$0x1] }
 0x39e   : > { %v8016_v61 = vsel %vm16467_vm5, %v8014_v38, %v8015_v20  ;;  %v8035_v55 = vrot.slane %v8033_v45, 4  ;;  %v8036_v15 = vrot.slane %v7885_v4, 5  ;;  %v16040_v20 = vld [vmem:[%s18796_s3 + $0x110] sm:$0xff]  }
 0x39f   : > { %v16044_v3 = vld [vmem:[#allocation2 + $0x6c] sm:$0xff]  }
 0x3a0   : > { %15023 = vmatmul.mubr.bf16.vlgmr.msra.gmra.mrb[0].mxu1 %v13667_v30  ;;  %v13642_v30 = vrot.slane %v7868_v10, 9  ;;  %v7890_v10 = vld [vmem:[#allocation2 + $0xb8] sm:$0xf] }
 0x3a1   : > { %15026 = vmatprep.mubr.bf16.mxu1 %v13668_v37  ;;  %15055 = vmatpush3.bf16.msra.mxu1 %v17873_v25  ;;  %v7964_v25 = vsel %vm16467_vm5, %v13637_v50, %v7963_v24  ;;  %v8001_v24 = vrot.slane %v7870_v43, 5  ;;  %v7874_v50 = vld [vmem:[#allocation2 + $0x78] sm:$0xe] }
 0x3a2   : > { %15056 = vmatprep.subr.bf16.mxu1 %v16025_v35  ;;  %v13669_v58 = vcombine.low %v7964_v25, %v7967_v22  ;;  %v7999_v33 = vsel %vm16467_vm5, %v13642_v30, %v7998_v12  ;;  %v7881_v22 = vld [vmem:[#allocation2 + $0x94] sm:$0xf]  ;;  %v8019_v25 = vrot.slane %v7878_v57, 5  ;;  %v16032_v57 = vld [vmem:[#allocation2 + $0xc] sm:$0xff]  }
 0x3a3   : > { %v8002_v14 = vsel %vm16467_vm5, %v8000_v36, %v8001_v24  ;;  %v8026_v60 = vrot.slane %v7881_v22, 5  ;;  %v7886_v36 = vld [vmem:[#allocation2 + $0xa8] sm:$0xe]  ;;  %v8043_v24 = vrot.slane %v7888_v42, 5 }
 0x3a4   : > { %v13674_v29 = vcombine.low %v7999_v33, %v8002_v14  ;;  %v8021_v52 = vrot.slane %v8019_v25, 4  ;;  %v16035_v22 = vld [vmem:[#allocation2 + $0x24] sm:$0xff]  }
 0x3a5   : > { %15057 = vmatpush3.bf16.msra.mxu1 %v16025_v35  ;;  %v7992_v35 = vsel %vm16467_vm5, %v13641_v39, %v7991_v34  ;;  %v8028_v27 = vrot.slane %v8026_v60, 4  ;;  %v13645_v34 = vrot.slane %v7877_v53, 9  ;;  %v8037_v39 = vsel %vm16467_vm5, %v8035_v55, %v8036_v15  ;;  %v8888_v53 = vld [vmem:[#allocation2 + $0xc] sm:$0xf]  ;;  %v8898_v55 = vld [vmem:[#allocation2 + $0x34] sm:$0xf] }
 0x3a6   : > { %15058 = vmatprep.subr.bf16.mxu1 %v16026_v21  ;;  %v13673_v37 = vcombine.low %v7992_v35, %v7995_v18  ;;  %v8023_v44 = vsel %vm16467_vm5, %v8021_v52, %v8022_v13  ;;  %v8047_v18 = vrot.slane %v7890_v10, 5  ;;  %v16045_v52 = vld [vmem:[#allocation2 + $0x78] sm:$0xff]   ;;  %v8937_v47 = vshrl.u32 %v8888_v53, 16 }
 0x3a7   : > { %v8030_v40 = vsel %vm16467_vm5, %v8028_v27, %v8029_v56  ;;  %v8020_v59 = vsel %vm16467_vm5, %v13645_v34, %v8019_v25  ;;  %v16038_v25 = vld [vmem:[#allocation2 + $0x3c] sm:$0xff]   ;;  %v8889_v27 = vld [vmem:[#allocation2 + $0x10] sm:$0xf]  ;;  %v8940_v13 = vshll.u32 %v8888_v53, 16  ;;  %v8891_v56 = vld [vmem:[#allocation2 + $0x18] sm:$0xf] }
 0x3a8   : > { %15027 = vmatmul.mubr.bf16.gmra.mrb[4].mxu1 %v13669_v58  ;;  %v13644_v58 = vrot.slane %v7874_v50, 9  ;;  %v13677_v0 = vcombine.low %v8020_v59, %v8023_v44  ;;  %v16037_v50 = vld [vmem:[%s18796_s3 + $0x108] sm:$0xff]   ;;  %v8892_v34 = vld [vmem:[#allocation2 + $0x1c] sm:$0xf]  ;;  %v16048_v44 = vld [vmem:[#allocation2 + $0x90] sm:$0xff]   ;;  %v8964_v4 = vshll.u32 %v8891_v56, 16 }
 0x3a9   : > { %15030 = vmatprep.mubr.bf16.mxu1 %v13670_v19  ;;  %15059 = vmatpush3.bf16.msra.mxu1 %v16026_v21  ;;  %v8008_v21 = vrot.slane %v7873_v46, 5  ;;  %v8049_v46 = vrot.slane %v8047_v18, 4  ;;  %v8942_v59 = vrot.slane %v8940_v13, 5  ;;  %v8974_v42 = vshrl.u32 %v8892_v34, 16 }
 0x3aa   : > { %15060 = vmatprep.subr.bf16.mxu1 %v16027_v7  ;;  %v8013_v28 = vsel %vm16467_vm5, %v13644_v58, %v8012_v9  ;;  %v16039_v58 = vld [vmem:[#allocation2 + $0x48] sm:$0xff]  }
 0x3ab   : > { %v8009_v16 = vsel %vm16467_vm5, %v8007_v31, %v8008_v21  ;;  %v13676_v1 = vcombine.low %v8013_v28, %v8016_v61  ;;  %v16033_v21 = vld [vmem:[#allocation2 + $0x18] sm:$0xff]   ;;  %v16049_v61 = vld [vmem:[%s18796_s3 + $0x128] sm:$0xff]  }
 0x3ac   : > { %v16055_v28 = vld [vmem:[%s18796_s3 + $0x138] sm:$0xff]  }
 0x3ad   : > { %15061 = vmatpush3.bf16.msra.mxu1 %v16027_v7  ;;  %v8006_v7 = vsel %vm16467_vm5, %v13643_v11, %v8005_v41  ;;  %v13648_v41 = vrot.slane %v7886_v36, 9  ;;  %v16036_v11 = vld [vmem:[#allocation2 + $0x30] sm:$0xff]  }
 0x3ae   : > { %15062 = vmatprep.subr.bf16.mxu1 %v16028_v32  ;;  %v13675_v19 = vcombine.low %v8006_v7, %v8009_v16  ;;  %v16043_v16 = vld [vmem:[%s18796_s3 + $0x118] sm:$0xff]   ;;  %v16052_v7 = vld [vmem:[%s18796_s3 + $0x130] sm:$0xff]  }
 0x3b0   : > { %15031 = vmatmul.mubr.bf16.gmra.mrb[8].mxu1 %v13671_v26  ;;  %v8040_v26 = vrot.slane %v7887_v63, 5  ;;  %v8950_v63 = vshrl.u32 %v8889_v27, 16 }
 0x3b1   : > { %15034 = vmatprep.mubr.bf16.mxu1 %v13672_v8  ;;  %15063 = vmatpush3.bf16.msra.mxu1 %v16028_v32  ;;  %v7880_v32 = vld [vmem:[#allocation2 + $0x90] sm:$0xe]  ;;  %v7883_v8 = vld [vmem:[#allocation2 + $0x9c] sm:$0xe] }
 0x3b2   : > { %15064 = vmatprep.subr.bf16.mxu1 %v16029_v6  ;;  %v13646_v12 = vrot.slane %v7880_v32, 9  ;;  %v8042_v62 = vrot.slane %v8040_v26, 4  ;;  %v8041_v35 = vsel %vm16467_vm5, %v13648_v41, %v8040_v26  ;;  %v8946_v32 = vshll.u32 %v8889_v27, 16 }
 0x3b3   : > { %v8939_v26 = vrot.slane %v8937_v47, 4  ;;  %v8952_v36 = vrot.slane %v8950_v63, 4  ;;  %v9022_v41 = vshrl.u32 %v8898_v55, 16 }
 0x3b4   : > { %v8044_v30 = vsel %vm16467_vm5, %v8042_v62, %v8043_v24 }
 0x3b5   : > { %15065 = vmatpush3.bf16.msra.mxu1 %v16029_v6  ;;  %v8027_v6 = vsel %vm16467_vm5, %v13646_v12, %v8026_v60  ;;  %v13680_v33 = vcombine.low %v8041_v35, %v8044_v30  ;;  %v16041_v60 = vld [vmem:[#allocation2 + $0x54] sm:$0xff]   ;;  %v8894_v12 = vld [vmem:[#allocation2 + $0x24] sm:$0xf]  ;;  %v8943_v30 = vor.u32 %v8942_v59, %v8939_v26  ;;  %v8903_v26 = vld [vmem:[#allocation2 + $0x48] sm:$0xf] }
 0x3b6   : > { %15066 = vmatprep.subr.bf16.mxu1 %v16030_v54  ;;  %v13678_v43 = vcombine.low %v8027_v6, %v8030_v40  ;;  %v8890_v40 = vld [vmem:[#allocation2 + $0x14] sm:$0x1]  ;;  %v18022_v6 = vrot.slane %v8946_v32, 5  ;;  %v8985_v62 = vshrl.u32 %v8894_v12, 16  ;;  %v8988_v10 = vshll.u32 %v8894_v12, 16  ;;  %v16054_v59 = vld [vmem:[#allocation2 + $0xc0] sm:$0xff]  }
 0x3b8   : > { %15035 = vmatmul.mubr.bf16.gmra.mrb[12].mxu1 %v13673_v37  ;;  %v7891_v37 = vld [vmem:[#allocation2 + $0xbc] sm:$0x1] }
 0x3b9   : > { %15038 = vmatprep.mubr.bf16.mxu1 %v13674_v29  ;;  %15067 = vmatpush3.bf16.msra.mxu1 %v16030_v54  ;;  %v13647_v54 = vrot.slane %v7883_v8, 9  ;;  %v8050_v29 = vrot.slane %v7891_v37, 5  ;;  %v8961_v8 = vshrl.u32 %v8891_v56, 16  ;;  %v8953_v37 = vor.u32 %v8952_v36, %v18022_v6 }
 0x3ba   : > { %15068 = vmatprep.subr.bf16.mxu1 %v16031_v2 }
 0x3bb   : > { %v8034_v14 = vsel %vm16467_vm5, %v13647_v54, %v8033_v45  ;;  %v8051_v48 = vsel %vm16467_vm5, %v8049_v46, %v8050_v29  ;;  %v16050_v45 = vld [vmem:[#allocation2 + $0x9c] sm:$0xff]   ;;  %v8956_v54 = vshll.u32 %v8890_v40, 16  ;;  %v8976_v46 = vrot.slane %v8974_v42, 4  ;;  %v8902_v42 = vld [vmem:[#allocation2 + $0x44] sm:$0x1] }
 0x3bc   : > { %v13679_v9 = vcombine.low %v8034_v14, %v8037_v39  ;;  %v8897_v39 = vld [vmem:[#allocation2 + $0x30] sm:$0xf]  ;;  %v8963_v14 = vrot.slane %v8961_v8, 4  ;;  %v8990_v29 = vrot.slane %v8988_v10, 5 }
 0x3bd   : > { %15069 = vmatpush3.bf16.msra.mxu1 %v16031_v2  ;;  %v7889_v2 = vld [vmem:[#allocation2 + $0xb4] sm:$0xe] }
 0x3be   : > { %15102 = vmatprep.subr.bf16.mxu1 %v17963_v49  ;;  %v13649_v31 = vrot.slane %v7889_v2, 9  ;;  %v8987_v2 = vrot.slane %v8985_v62, 4 }
 0x3c0   : > { %15039 = vmatmul.mubr.bf16.gmra.mrb[16].mxu1 %v13675_v19  ;;  %v8048_v23 = vsel %vm16467_vm5, %v13649_v31, %v8047_v18  ;;  %v16042_v19 = vld [vmem:[#allocation2 + $0x60] sm:$0xff]   ;;  %v9018_v18 = vshll.u32 %v8898_v55, 16  ;;  %v8904_v55 = vld [vmem:[#allocation2 + $0x4c] sm:$0xf] }
 0x3c1   : > { %15042 = vmatprep.mubr.bf16.mxu1 %v13676_v1  ;;  %v13681_v38 = vcombine.low %v8048_v23, %v8051_v48  ;;  %v18019_v1 = vld [vmem:[%s18796_s3 + $0x140] sm:$0xff]   ;;  %v9009_v23 = vshrl.u32 %v8897_v39, 16 }
 0x3c8   : > { %15043 = vmatmul.mubr.bf16.gmra.mrb[20].mxu1 %v13677_v0  ;;  %v8895_v0 = vld [vmem:[#allocation2 + $0x28] sm:$0xf] }
 0x3c9   : > { %15046 = vmatprep.mubr.bf16.mxu1 %v13678_v43  ;;  %v8970_v43 = vshll.u32 %v8892_v34, 16  ;;  %v8994_v15 = vshll.u32 %v8895_v0, 16  ;;  %v8998_v24 = vshrl.u32 %v8895_v0, 16 }
 0x3cb   : > { %v18024_v35 = vrot.slane %v8970_v43, 5  ;;  %v18027_v31 = vrot.slane %v8994_v15, 5  ;;  %v9000_v48 = vrot.slane %v8998_v24, 4 }
 0x3d0   : > { %15047 = vmatmul.mubr.bf16.gmra.mrb[24].mxu1 %v13679_v9  ;;  %v8966_v9 = vrot.slane %v8964_v4, 5 }
 0x3d1   : > { %15050 = vmatprep.mubr.bf16.mxu1 %v13680_v33  ;;  %v8893_v33 = vld [vmem:[#allocation2 + $0x20] sm:$0x1] }
 0x3d8   : > { %15051 = vmatmul.mubr.bf16.gmra.mrb[28].mxu1 %v13681_v38  ;;  %v9012_v38 = vshll.u32 %v8897_v39, 16  ;;  %v9060_v39 = vshll.u32 %v8903_v26, 16 }
 0x3d9   : > { %15070 = vmatprep.mubr.bf16.mxu1 %v16032_v57  ;;  %v16051_v57 = vld [vmem:[#allocation2 + $0xa8] sm:$0xff]  }
 0x3e0   : > { %15071 = vmatmul.mubr.bf16.vlgmr.msra.gmra.mrb[0].mxu1 %v16033_v21  ;;  %v18029_v21 = vrot.slane %v9018_v18, 5 }
 0x3e1   : > { %15074 = vmatprep.mubr.bf16.mxu1 %v16035_v22  ;;  %15103 = vmatpush3.bf16.msra.mxu1 %v17963_v49  ;;  %v16046_v49 = vld [vmem:[%s18796_s3 + $0x120] sm:$0xff]   ;;  %v8900_v22 = vld [vmem:[#allocation2 + $0x3c] sm:$0xf] }
 0x3e2   : > { %15104 = vmatprep.subr.bf16.mxu1 %v16037_v50  ;;  %v9033_v53 = vshrl.u32 %v8900_v22, 16  ;;  %v9036_v47 = vshll.u32 %v8900_v22, 16  ;;  %v9062_v22 = vrot.slane %v9060_v39, 5 }
 0x3e4   : > { %v9035_v43 = vrot.slane %v9033_v53, 4  ;;  %v9038_v62 = vrot.slane %v9036_v47, 5  ;;  %v8912_v47 = vld [vmem:[#allocation2 + $0x6c] sm:$0xf] }
 0x3e5   : > { %15105 = vmatpush3.bf16.msra.mxu1 %v16037_v50  ;;  %v9024_v50 = vrot.slane %v9022_v41, 4 }
 0x3e6   : > { %15106 = vmatprep.subr.bf16.mxu1 %v16040_v20 }
 0x3e7   : > { %v9025_v27 = vor.u32 %v9024_v50, %v18029_v21 }
 0x3e8   : > { %15075 = vmatmul.mubr.bf16.gmra.mrb[4].mxu1 %v16036_v11  ;;  %v8944_v11 = vrot.slane %v8943_v30, 4  ;;  %v9066_v30 = vshll.u32 %v8904_v55, 16 }
 0x3e9   : > { %15078 = vmatprep.mubr.bf16.mxu1 %v16038_v25  ;;  %15107 = vmatpush3.bf16.msra.mxu1 %v16040_v20  ;;  %v16053_v20 = vld [vmem:[#allocation2 + $0xb4] sm:$0xff]   ;;  %v8980_v25 = vshll.u32 %v8893_v33, 16  ;;  %v9026_v36 = vrot.slane %v9025_v27, 4 }
 0x3ea   : > { %15108 = vmatprep.subr.bf16.mxu1 %v16043_v16  ;;  %v8949_v63 = vsel %vm16248_vm2, %v8944_v11, %v18022_v6 }
 0x3eb   : > { %v8982_v34 = vrot.slane %v8980_v25, 5 }
 0x3ed   : > { %15109 = vmatpush3.bf16.msra.mxu1 %v16043_v16  ;;  %v8967_v16 = vor.u32 %v8966_v9, %v8963_v14  ;;  %v9070_v14 = vshrl.u32 %v8904_v55, 16  ;;  %v8906_v9 = vld [vmem:[#allocation2 + $0x54] sm:$0xf] }
 0x3ee   : > { %15110 = vmatprep.subr.bf16.mxu1 %v16046_v49  ;;  %v9084_v11 = vshll.u32 %v8906_v9, 16  ;;  %v16058_v55 = vld [vmem:[%s18796_s3 + $0x150] sm:$0xff]  }
 0x3ef   : > { %v8968_v56 = vrot.slane %v8967_v16, 4  ;;  %v18054_v16 = vrot.slane %v9066_v30, 5 }
 0x3f0   : > { %15079 = vmatmul.mubr.bf16.gmra.mrb[8].mxu1 %v16039_v58  ;;  %v8954_v58 = vrot.slane %v8953_v37, 4 }
 0x3f1   : > { %15082 = vmatprep.mubr.bf16.mxu1 %v16041_v60  ;;  %15111 = vmatpush3.bf16.msra.mxu1 %v16046_v49  ;;  %v8901_v49 = vld [vmem:[#allocation2 + $0x40] sm:$0xf]  ;;  %v8977_v60 = vor.u32 %v8976_v46, %v18024_v35  ;;  %v8973_v24 = vsel %vm16248_vm2, %v8968_v56, %v18024_v35 }
 0x3f2   : > { %15112 = vmatprep.subr.bf16.mxu1 %v16049_v61  ;;  %v9042_v13 = vshll.u32 %v8901_v49, 16  ;;  %v9046_v32 = vshrl.u32 %v8901_v49, 16 }
 0x3f4   : > { %v18039_v10 = vrot.slane %v9042_v13, 5  ;;  %v9048_v6 = vrot.slane %v9046_v32, 4  ;;  %v9086_v32 = vrot.slane %v9084_v11, 5  ;;  %v8914_v11 = vld [vmem:[#allocation2 + $0x74] sm:$0x1] }
 0x3f5   : > { %15113 = vmatpush3.bf16.msra.mxu1 %v16049_v61  ;;  %v8958_v61 = vrot.slane %v8956_v54, 5  ;;  %v9057_v54 = vshrl.u32 %v8903_v26, 16 }
 0x3f6   : > { %15114 = vmatprep.subr.bf16.mxu1 %v16052_v7 }
 0x3f7   : > { %v9059_v50 = vrot.slane %v9057_v54, 4 }
 0x3f8   : > { %15083 = vmatmul.mubr.bf16.gmra.mrb[12].mxu1 %v16042_v19  ;;  %v8991_v19 = vor.u32 %v8990_v29, %v8987_v2  ;;  %v9052_v2 = vshll.u32 %v8902_v42, 16  ;;  %v8907_v29 = vld [vmem:[#allocation2 + $0x58] sm:$0xf] }
 0x3f9   : > { %15086 = vmatprep.mubr.bf16.mxu1 %v16044_v3  ;;  %15115 = vmatpush3.bf16.msra.mxu1 %v16052_v7  ;;  %v8896_v7 = vld [vmem:[#allocation2 + $0x2c] sm:$0x1]  ;;  %v8899_v3 = vld [vmem:[#allocation2 + $0x38] sm:$0x1]  ;;  %v9090_v25 = vshll.u32 %v8907_v29, 16  ;;  %v9094_v49 = vshrl.u32 %v8907_v29, 16 }
 0x3fa   : > { %15116 = vmatprep.subr.bf16.mxu1 %v16055_v28  ;;  %v9004_v12 = vshll.u32 %v8896_v7, 16  ;;  %v9028_v40 = vshll.u32 %v8899_v3, 16  ;;  %v8992_v0 = vrot.slane %v8991_v19, 4  ;;  %v9054_v19 = vrot.slane %v9052_v2, 5 }
 0x3fc   : > { %v9006_v18 = vrot.slane %v9004_v12, 5  ;;  %v9030_v41 = vrot.slane %v9028_v40, 5  ;;  %v8997_v33 = vsel %vm16248_vm2, %v8992_v0, %v18027_v31  ;;  %v9096_v12 = vrot.slane %v9094_v49, 4  ;;  %v8908_v40 = vld [vmem:[#allocation2 + $0x5c] sm:$0x1] }
 0x3fd   : > { %15117 = vmatpush3.bf16.msra.mxu1 %v16055_v28  ;;  %v9001_v28 = vor.u32 %v9000_v48, %v18027_v31  ;;  %v9072_v31 = vrot.slane %v9070_v14, 4  ;;  %v9129_v0 = vshrl.u32 %v8912_v47, 16 }
 0x3fe   : > { %15150 = vmatprep.subr.bf16.mxu1 %v18019_v1  ;;  %v9031_v48 = vsel %vm16248_vm2, %v9026_v36, %v9030_v41  ;;  %v9100_v41 = vshll.u32 %v8908_v40, 16 }
 0x3ff   : > { %v9002_v8 = vrot.slane %v9001_v28, 4  ;;  %v8910_v28 = vld [vmem:[#allocation2 + $0x64] sm:$0xf]  ;;  %v9131_v14 = vrot.slane %v9129_v0, 4 }
 0x400   : > { %15087 = vmatmul.mubr.bf16.gmra.mrb[16].mxu1 %v16045_v52  ;;  %v9011_v52 = vrot.slane %v9009_v23, 4  ;;  %v9039_v23 = vor.u32 %v9038_v62, %v9035_v43  ;;  %v9114_v26 = vshll.u32 %v8910_v28, 16 }
 0x401   : > { %15090 = vmatprep.mubr.bf16.mxu1 %v16047_v5  ;;  %v9014_v5 = vrot.slane %v9012_v38, 5  ;;  %v9007_v35 = vsel %vm16248_vm2, %v9002_v8, %v9006_v18  ;;  %v9049_v38 = vor.u32 %v9048_v6, %v18039_v10  ;;  %v9132_v8 = vshll.u32 %v8912_v47, 16 }
 0x403   : > { %v9015_v4 = vor.u32 %v9014_v5, %v9011_v52  ;;  %v16057_v52 = vld [vmem:[%s18796_s3 + $0x148] sm:$0xff]   ;;  %v9040_v5 = vrot.slane %v9039_v23, 4  ;;  %v9050_v53 = vrot.slane %v9049_v38, 4 }
 0x405   : > { %v9016_v46 = vrot.slane %v9015_v4, 4  ;;  %v9045_v4 = vsel %vm16248_vm2, %v9040_v5, %v18039_v10  ;;  %v9055_v43 = vsel %vm16248_vm2, %v9050_v53, %v9054_v19  ;;  %v18075_v10 = vrot.slane %v9114_v26, 5 }
 0x407   : > { %v9021_v7 = vsel %vm16248_vm2, %v9016_v46, %v18029_v21  ;;  %v9073_v21 = vor.u32 %v9072_v31, %v18054_v16  ;;  %v9102_v31 = vrot.slane %v9100_v41, 5 }
 0x408   : > { %15091 = vmatmul.mubr.bf16.gmra.mrb[20].mxu1 %v16048_v44  ;;  %v8959_v44 = vsel %vm16248_vm2, %v8954_v58, %v8958_v61  ;;  %v8909_v58 = vld [vmem:[#allocation2 + $0x60] sm:$0xf]  ;;  %v13749_v3 = vcombine.low %v9021_v7, %v9031_v48  ;;  %v13750_v48 = vcombine.low %v9045_v4, %v9055_v43  ;;  %v8921_v43 = vld [vmem:[#allocation2 + $0x90] sm:$0xf] }
 0x409   : > { %15094 = vmatprep.mubr.bf16.mxu1 %v16050_v45  ;;  %v8978_v45 = vrot.slane %v8977_v60, 4  ;;  %v13746_v15 = vcombine.low %v8949_v63, %v8959_v44  ;;  %v13748_v60 = vcombine.low %v8997_v33, %v9007_v35  ;;  %v9105_v63 = vshrl.u32 %v8909_v58, 16  ;;  %v16059_v33 = vld [vmem:[%s18796_s3 + $0x158] sm:$0xff]  }
 0x40a   : > { %v9108_v56 = vshll.u32 %v8909_v58, 16  ;;  %v9063_v44 = vor.u32 %v9062_v22, %v9059_v50  ;;  %v9074_v39 = vrot.slane %v9073_v21, 4 }
 0x40b   : > { %v8983_v37 = vsel %vm16248_vm2, %v8978_v45, %v8982_v34  ;;  %v8913_v34 = vld [vmem:[#allocation2 + $0x70] sm:$0xf]  ;;  %v18063_v45 = vrot.slane %v9090_v25, 5  ;;  %v9107_v6 = vrot.slane %v9105_v63, 4 }
 0x40c   : > { %v13747_v61 = vcombine.low %v8973_v24, %v8983_v37  ;;  %v9138_v36 = vshll.u32 %v8913_v34, 16  ;;  %v9142_v42 = vshrl.u32 %v8913_v34, 16  ;;  %v8916_v24 = vld [vmem:[#allocation2 + $0x7c] sm:$0xf]  ;;  %v9064_v54 = vrot.slane %v9063_v44, 4 }
 0x40d   : > { %v9097_v18 = vor.u32 %v9096_v12, %v18063_v45  ;;  %v8915_v37 = vld [vmem:[#allocation2 + $0x78] sm:$0xf]  ;;  %v9162_v29 = vshll.u32 %v8916_v24, 16  ;;  %v9166_v35 = vshrl.u32 %v8916_v24, 16 }
 0x40e   : > { %v18080_v46 = vrot.slane %v9138_v36, 5  ;;  %v9144_v2 = vrot.slane %v9142_v42, 4  ;;  %v9153_v49 = vshrl.u32 %v8915_v37, 16  ;;  %v9156_v58 = vshll.u32 %v8915_v37, 16 }
 0x40f   : > { %v9098_v22 = vrot.slane %v9097_v18, 4  ;;  %v18089_v19 = vrot.slane %v9162_v29, 5  ;;  %v9201_v37 = vshrl.u32 %v8921_v43, 16 }
 0x410   : > { %15095 = vmatmul.mubr.bf16.gmra.mrb[24].mxu1 %v16051_v57  ;;  %v8905_v57 = vld [vmem:[#allocation2 + $0x50] sm:$0x1]  ;;  %v9145_v7 = vor.u32 %v9144_v2, %v18080_v46  ;;  %v9155_v34 = vrot.slane %v9153_v49, 4  ;;  %v9158_v44 = vrot.slane %v9156_v58, 5  ;;  %v16063_v58 = vld [vmem:[%s18796_s3 + $0x178] sm:$0xff]  }
 0x411   : > { %15098 = vmatprep.mubr.bf16.mxu1 %v16053_v20  ;;  %v9081_v20 = vshrl.u32 %v8906_v9, 16  ;;  %v9076_v27 = vshll.u32 %v8905_v57, 16  ;;  %v9134_v9 = vrot.slane %v9132_v8, 5  ;;  %v9069_v57 = vsel %vm16248_vm2, %v9064_v54, %v18054_v16 }
 0x412   : > { %v9168_v16 = vrot.slane %v9166_v35, 4  ;;  %v9103_v47 = vsel %vm16248_vm2, %v9098_v22, %v9102_v31  ;;  %v8924_v35 = vld [vmem:[#allocation2 + $0x9c] sm:$0xf] }
 0x413   : > { %v9083_v13 = vrot.slane %v9081_v20, 4  ;;  %v8911_v20 = vld [vmem:[#allocation2 + $0x68] sm:$0x1]  ;;  %v9228_v49 = vshll.u32 %v8924_v35, 16 }
 0x414   : > { %v9169_v0 = vor.u32 %v9168_v16, %v18089_v19 }
 0x415   : > { %v9087_v62 = vor.u32 %v9086_v32, %v9083_v13  ;;  %v9148_v13 = vshll.u32 %v8914_v11, 16 }
 0x417   : > { %v9088_v23 = vrot.slane %v9087_v62, 4  ;;  %v8922_v62 = vld [vmem:[#allocation2 + $0x94] sm:$0xf] }
 0x418   : > { %15099 = vmatmul.mubr.bf16.gmra.mrb[28].mxu1 %v16054_v59  ;;  %v9118_v59 = vshrl.u32 %v8910_v28, 16  ;;  %v16060_v28 = vld [vmem:[%s18796_s3 + $0x160] sm:$0xff]   ;;  %v9210_v2 = vshll.u32 %v8922_v62, 16  ;;  %v9214_v29 = vshrl.u32 %v8922_v62, 16 }
 0x419   : > { %15118 = vmatprep.mubr.bf16.mxu1 %v13746_v15  ;;  %v9110_v15 = vrot.slane %v9108_v56, 5  ;;  %v9093_v5 = vsel %vm16248_vm2, %v9088_v23, %v18063_v45  ;;  %v8917_v56 = vld [vmem:[#allocation2 + $0x80] sm:$0x1]  ;;  %v16061_v45 = vld [vmem:[%s18796_s3 + $0x168] sm:$0xff]  }
 0x41a   : > { %v9120_v30 = vrot.slane %v9118_v59, 4  ;;  %v9146_v59 = vrot.slane %v9145_v7, 4  ;;  %v13752_v8 = vcombine.low %v9093_v5, %v9103_v47  ;;  %v9172_v36 = vshll.u32 %v8917_v56, 16  ;;  %v8928_v5 = vld [vmem:[#allocation2 + $0xac] sm:$0xf] }
 0x41b   : > { %v9111_v38 = vor.u32 %v9110_v15, %v9107_v6  ;;  %v9159_v15 = vor.u32 %v9158_v44, %v9155_v34  ;;  %v18124_v7 = vrot.slane %v9210_v2, 5  ;;  %v9216_v16 = vrot.slane %v9214_v29, 4  ;;  %v8923_v47 = vld [vmem:[#allocation2 + $0x98] sm:$0x1]  ;;  %v8927_v44 = vld [vmem:[#allocation2 + $0xa8] sm:$0xf] }
 0x41c   : > { %v9121_v25 = vor.u32 %v9120_v30, %v18075_v10  ;;  %v9230_v34 = vrot.slane %v9228_v49, 5  ;;  %v9252_v62 = vshll.u32 %v8927_v44, 16  ;;  %v8929_v2 = vld [vmem:[#allocation2 + $0xb0] sm:$0x1] }
 0x41d   : > { %v9112_v53 = vrot.slane %v9111_v38, 4  ;;  %v9160_v22 = vrot.slane %v9159_v15, 4 }
 0x41e   : > { %v9122_v40 = vrot.slane %v9121_v25, 4  ;;  %v9225_v25 = vshrl.u32 %v8924_v35, 16  ;;  %v9254_v35 = vrot.slane %v9252_v62, 5 }
 0x41f   : > { %v9117_v6 = vsel %vm16248_vm2, %v9112_v53, %v18075_v10  ;;  %v16062_v10 = vld [vmem:[%s18796_s3 + $0x170] sm:$0xff]   ;;  %v9165_v53 = vsel %vm16248_vm2, %v9160_v22, %v18089_v19  ;;  %v9258_v19 = vshll.u32 %v8928_v5, 16 }
 0x420   : > { %15119 = vmatmul.mubr.bf16.vlgmr.msra.gmra.mrb[0].mxu1 %v13747_v61  ;;  %v8919_v61 = vld [vmem:[#allocation2 + $0x88] sm:$0xf]  ;;  %v9227_v56 = vrot.slane %v9225_v25, 4 }
 0x421   : > { %15122 = vmatprep.mubr.bf16.mxu1 %v13748_v60  ;;  %15151 = vmatpush3.bf16.msra.mxu1 %v18019_v1  ;;  %v9078_v1 = vrot.slane %v9076_v27, 5  ;;  %v9135_v60 = vor.u32 %v9134_v9, %v9131_v14  ;;  %v9124_v27 = vshll.u32 %v8911_v20, 16  ;;  %v9186_v32 = vshll.u32 %v8919_v61, 16  ;;  %v8920_v9 = vld [vmem:[#allocation2 + $0x8c] sm:$0x1] }
 0x422   : > { %15152 = vmatprep.subr.bf16.mxu1 %v16057_v52  ;;  %v9190_v63 = vshrl.u32 %v8919_v61, 16  ;;  %v9170_v14 = vrot.slane %v9169_v0, 4  ;;  %v9196_v31 = vshll.u32 %v8920_v9, 16  ;;  %v9203_v61 = vrot.slane %v9201_v37, 4  ;;  %v8930_v0 = vld [vmem:[#allocation2 + $0xb4] sm:$0xf] }
 0x423   : > { %v9079_v50 = vsel %vm16248_vm2, %v9074_v39, %v9078_v1  ;;  %v9136_v26 = vrot.slane %v9135_v60, 4  ;;  %v9126_v4 = vrot.slane %v9124_v27, 5  ;;  %v18103_v42 = vrot.slane %v9186_v32, 5  ;;  %v8925_v39 = vld [vmem:[#allocation2 + $0xa0] sm:$0xf] }
 0x424   : > { %v9192_v1 = vrot.slane %v9190_v63, 4  ;;  %v9234_v38 = vshll.u32 %v8925_v39, 16  ;;  %v9198_v63 = vrot.slane %v9196_v31, 5 }
 0x425   : > { %15153 = vmatpush3.bf16.msra.mxu1 %v16057_v52  ;;  %v13751_v52 = vcombine.low %v9069_v57, %v9079_v50  ;;  %v9127_v18 = vsel %vm16248_vm2, %v9122_v40, %v9126_v4  ;;  %v9141_v41 = vsel %vm16248_vm2, %v9136_v26, %v18080_v46  ;;  %v9238_v46 = vshrl.u32 %v8925_v39, 16  ;;  %v8926_v26 = vld [vmem:[#allocation2 + $0xa4] sm:$0x1] }
 0x426   : > { %15154 = vmatprep.subr.bf16.mxu1 %v16058_v55  ;;  %v9193_v23 = vor.u32 %v9192_v1, %v18103_v42  ;;  %v13753_v57 = vcombine.low %v9117_v6, %v9127_v18  ;;  %v9217_v40 = vor.u32 %v9216_v16, %v18124_v7  ;;  %v9249_v1 = vshrl.u32 %v8927_v44, 16 }
 0x427   : > { %v9231_v6 = vor.u32 %v9230_v34, %v9227_v56  ;;  %v9244_v15 = vshll.u32 %v8926_v26, 16 }
 0x428   : > { %15123 = vmatmul.mubr.bf16.gmra.mrb[4].mxu1 %v13749_v3  ;;  %v8918_v3 = vld [vmem:[#allocation2 + $0x84] sm:$0xf]  ;;  %v9218_v18 = vrot.slane %v9217_v40, 4  ;;  %v9251_v29 = vrot.slane %v9249_v1, 4  ;;  %v9707_v40 = vld [vmem:[#allocation2 + $0x10] sm:$0xf] }
 0x429   : > { %15126 = vmatprep.mubr.bf16.mxu1 %v13750_v48  ;;  %15155 = vmatpush3.bf16.msra.mxu1 %v16058_v55  ;;  %v9177_v21 = vshrl.u32 %v8918_v3, 16  ;;  %v9180_v12 = vshll.u32 %v8918_v3, 16  ;;  %v9150_v55 = vrot.slane %v9148_v13, 5  ;;  %v9174_v48 = vrot.slane %v9172_v36, 5  ;;  %v8931_v13 = vld [vmem:[#allocation2 + $0xb8] sm:$0xf] }
 0x42a   : > { %15156 = vmatprep.subr.bf16.mxu1 %v16059_v33  ;;  %v18126_v3 = vrot.slane %v9234_v38, 5  ;;  %v9282_v4 = vshll.u32 %v8931_v13, 16  ;;  %v9220_v36 = vshll.u32 %v8923_v47, 16 }
 0x42b   : > { %v9179_v24 = vrot.slane %v9177_v21, 4  ;;  %v9182_v54 = vrot.slane %v9180_v12, 5  ;;  %v9151_v30 = vsel %vm16248_vm2, %v9146_v59, %v9150_v55  ;;  %v9175_v11 = vsel %vm16248_vm2, %v9170_v14, %v9174_v48  ;;  %v18134_v21 = vld [vmem:[%s18796_s3 + $0x180] sm:$0xff]  }
 0x42c   : > { %v13754_v50 = vcombine.low %v9141_v41, %v9151_v30  ;;  %v13755_v32 = vcombine.low %v9165_v53, %v9175_v11  ;;  %v9262_v59 = vshrl.u32 %v8928_v5, 16  ;;  %v9260_v41 = vrot.slane %v9258_v19, 5 }
 0x42d   : > { %15157 = vmatpush3.bf16.msra.mxu1 %v16059_v33  ;;  %v9204_v33 = vshll.u32 %v8921_v43, 16  ;;  %v9183_v20 = vor.u32 %v9182_v54, %v9179_v24  ;;  %v9286_v43 = vshrl.u32 %v8931_v13, 16  ;;  %v9273_v24 = vshrl.u32 %v8930_v0, 16 }
 0x42e   : > { %15158 = vmatprep.subr.bf16.mxu1 %v16060_v28  ;;  %v9276_v54 = vshll.u32 %v8930_v0, 16  ;;  %v9264_v30 = vrot.slane %v9262_v59, 4  ;;  %v9232_v48 = vrot.slane %v9231_v6, 4  ;;  %v8935_v59 = vld [vmem:[#allocation2 + $0xc8] sm:$0x1] }
 0x42f   : > { %v9206_v60 = vrot.slane %v9204_v33, 5  ;;  %v9184_v27 = vrot.slane %v9183_v20, 4  ;;  %v9288_v37 = vrot.slane %v9286_v43, 4  ;;  %v9222_v33 = vrot.slane %v9220_v36, 5  ;;  %v8932_v20 = vld [vmem:[#allocation2 + $0xbc] sm:$0x1] }
 0x430   : > { %15127 = vmatmul.mubr.bf16.gmra.mrb[8].mxu1 %v13751_v52  ;;  %v9240_v52 = vrot.slane %v9238_v46, 4  ;;  %v9275_v38 = vrot.slane %v9273_v24, 4  ;;  %v9278_v46 = vrot.slane %v9276_v54, 5  ;;  %v9265_v22 = vor.u32 %v9264_v30, %v9260_v41  ;;  %v9710_v54 = vld [vmem:[#allocation2 + $0x1c] sm:$0xf] }
 0x431   : > { %15130 = vmatprep.mubr.bf16.mxu1 %v13752_v8  ;;  %15159 = vmatpush3.bf16.msra.mxu1 %v16060_v28  ;;  %v9194_v28 = vrot.slane %v9193_v23, 4  ;;  %v9207_v12 = vor.u32 %v9206_v60, %v9203_v61  ;;  %v9189_v55 = vsel %vm16248_vm2, %v9184_v27, %v18103_v42  ;;  %v8934_v42 = vld [vmem:[#allocation2 + $0xc4] sm:$0xf]  ;;  %v9246_v23 = vrot.slane %v9244_v15, 5  ;;  %v9708_v15 = vld [vmem:[#allocation2 + $0x14] sm:$0x1] }
 0x432   : > { %15160 = vmatprep.subr.bf16.mxu1 %v16061_v45  ;;  %v9241_v8 = vor.u32 %v9240_v52, %v18126_v3  ;;  %v9306_v11 = vshll.u32 %v8934_v42, 16  ;;  %v9310_v31 = vshrl.u32 %v8934_v42, 16  ;;  %v9255_v61 = vor.u32 %v9254_v35, %v9251_v29  ;;  %v9706_v30 = vld [vmem:[#allocation2 + $0xc] sm:$0xe] }
 0x433   : > { %v9208_v14 = vrot.slane %v9207_v12, 4  ;;  %v9268_v60 = vshll.u32 %v8929_v2, 16  ;;  %v9237_v5 = vsel %vm16248_vm2, %v9232_v48, %v18126_v3  ;;  %v9279_v53 = vor.u32 %v9278_v46, %v9275_v38  ;;  %v9711_v48 = vld [vmem:[#allocation2 + $0x20] sm:$0x1]  ;;  %v9714_v46 = vld [vmem:[#allocation2 + $0x2c] sm:$0x1] }
 0x434   : > { %v9242_v9 = vrot.slane %v9241_v8, 4  ;;  %v9292_v27 = vshll.u32 %v8932_v20, 16  ;;  %v9266_v13 = vrot.slane %v9265_v22, 4  ;;  %v9256_v56 = vrot.slane %v9255_v61, 4  ;;  %v9716_v22 = vld [vmem:[#allocation2 + $0x34] sm:$0xf] }
 0x435   : > { %15161 = vmatpush3.bf16.msra.mxu1 %v16061_v45  ;;  %v9199_v45 = vsel %vm16248_vm2, %v9194_v28, %v9198_v63  ;;  %v9213_v25 = vsel %vm16248_vm2, %v9208_v14, %v18124_v7  ;;  %v9312_v63 = vrot.slane %v9310_v31, 4  ;;  %v9270_v34 = vrot.slane %v9268_v60, 5  ;;  %v9713_v14 = vld [vmem:[#allocation2 + $0x28] sm:$0xf]  ;;  %v9719_v31 = vld [vmem:[#allocation2 + $0x40] sm:$0xf] }
 0x436   : > { %15162 = vmatprep.subr.bf16.mxu1 %v16062_v10  ;;  %v13756_v39 = vcombine.low %v9189_v55, %v9199_v45  ;;  %v9247_v49 = vsel %vm16248_vm2, %v9242_v9, %v9246_v23  ;;  %v9280_v26 = vrot.slane %v9279_v53, 4  ;;  %v9294_v19 = vrot.slane %v9292_v27, 5  ;;  %v9717_v27 = vld [vmem:[#allocation2 + $0x38] sm:$0x1] }
 0x437   : > { %v13758_v47 = vcombine.low %v9237_v5, %v9247_v49  ;;  %v9271_v3 = vsel %vm16248_vm2, %v9266_v13, %v9270_v34  ;;  %v9804_v8 = vrot.slane %v9707_v40, 5  ;;  %v9316_v55 = vshll.u32 %v8935_v59, 16  ;;  %v9722_v34 = vld [vmem:[#allocation2 + $0x4c] sm:$0xf]  ;;  %v9725_v40 = vld [vmem:[#allocation2 + $0x58] sm:$0xf] }
 0x438   : > { %15131 = vmatmul.mubr.bf16.gmra.mrb[12].mxu1 %v13753_v57  ;;  %v8933_v57 = vld [vmem:[#allocation2 + $0xc0] sm:$0xf]  ;;  %v9807_v9 = vrot.slane %v9708_v15, 5  ;;  %v13770_v42 = vrot.slane %v9706_v30, 9  ;;  %v9814_v20 = vrot.slane %v9711_v48, 5  ;;  %v9825_v61 = vrot.slane %v9716_v22, 5 }
 0x439   : > { %15134 = vmatprep.mubr.bf16.mxu1 %v13754_v50  ;;  %15163 = vmatpush3.bf16.msra.mxu1 %v16062_v10  ;;  %v9284_v10 = vrot.slane %v9282_v4, 5  ;;  %v9223_v50 = vsel %vm16248_vm2, %v9218_v18, %v9222_v33  ;;  %v9297_v16 = vshrl.u32 %v8933_v57, 16  ;;  %v9300_v28 = vshll.u32 %v8933_v57, 16  ;;  %v9709_v57 = vld [vmem:[#allocation2 + $0x18] sm:$0xe] }
 0x43a   : > { %15164 = vmatprep.subr.bf16.mxu1 %v16063_v58  ;;  %v13757_v52 = vcombine.low %v9213_v25, %v9223_v50  ;;  %v9261_v4 = vsel %vm16248_vm2, %v9256_v56, %v9260_v41  ;;  %v9806_v24 = vrot.slane %v9804_v8, 4  ;;  %v9318_v18 = vrot.slane %v9316_v55, 5  ;;  %v9726_v15 = vld [vmem:[#allocation2 + $0x5c] sm:$0x1]  ;;  %v9724_v30 = vld [vmem:[#allocation2 + $0x54] sm:$0xe] }
 0x43b   : > { %v9299_v44 = vrot.slane %v9297_v16, 4  ;;  %v9302_v12 = vrot.slane %v9300_v28, 5  ;;  %v13759_v36 = vcombine.low %v9261_v4, %v9271_v3  ;;  %v9285_v1 = vsel %vm16248_vm2, %v9280_v26, %v9284_v10  ;;  %v9732_v22 = vld [vmem:[#allocation2 + $0x74] sm:$0x1] }
 0x43c   : > { %v9818_v33 = vrot.slane %v9713_v14, 5  ;;  %v9805_v35 = vsel %vm16467_vm5, %v13770_v42, %v9804_v8  ;;  %v9821_v25 = vrot.slane %v9714_v46, 5  ;;  %v13771_v49 = vrot.slane %v9709_v57, 9  ;;  %v9731_v14 = vld [vmem:[#allocation2 + $0x70] sm:$0xf]  ;;  %v16069_v46 = vld [vmem:[%s18796_s3 + $0x1a8] sm:$0xff]  }
 0x43d   : > { %15165 = vmatpush3.bf16.msra.mxu1 %v16063_v58  ;;  %v9289_v58 = vor.u32 %v9288_v37, %v9284_v10  ;;  %v9303_v43 = vor.u32 %v9302_v12, %v9299_v44  ;;  %v9811_v37 = vrot.slane %v9710_v54, 5  ;;  %v9808_v10 = vsel %vm16467_vm5, %v9806_v24, %v9807_v9  ;;  %v9718_v12 = vld [vmem:[#allocation2 + $0x3c] sm:$0xe]  ;;  %v9721_v24 = vld [vmem:[#allocation2 + $0x48] sm:$0xe] }
 0x43e   : > { %15198 = vmatprep.subr.bf16.mxu1 %v18134_v21  ;;  %v13802_v23 = vcombine.low %v9805_v35, %v9808_v10  ;;  %v9820_v50 = vrot.slane %v9818_v33, 4  ;;  %v9832_v28 = vrot.slane %v9719_v31, 5  ;;  %v9828_v44 = vrot.slane %v9717_v27, 5  ;;  %v9734_v31 = vld [vmem:[#allocation2 + $0x7c] sm:$0xf] }
 0x43f   : > { %v9290_v7 = vrot.slane %v9289_v58, 4  ;;  %v9813_v38 = vrot.slane %v9811_v37, 4  ;;  %v9846_v4 = vrot.slane %v9725_v40, 5  ;;  %v9849_v9 = vrot.slane %v9726_v15, 5  ;;  %v9741_v15 = vld [vmem:[#allocation2 + $0x98] sm:$0x1] }
 0x440   : > { %15135 = vmatmul.mubr.bf16.gmra.mrb[16].mxu1 %v13755_v32  ;;  %v9308_v32 = vrot.slane %v9306_v11, 5  ;;  %v9712_v11 = vld [vmem:[#allocation2 + $0x24] sm:$0xe]  ;;  %v9822_v16 = vsel %vm16467_vm5, %v9820_v50, %v9821_v25  ;;  %v9834_v56 = vrot.slane %v9832_v28, 4 }
 0x441   : > { %15138 = vmatprep.mubr.bf16.mxu1 %v13756_v39  ;;  %v9295_v45 = vsel %vm16248_vm2, %v9290_v7, %v9294_v19  ;;  %v9304_v39 = vrot.slane %v9303_v43, 4  ;;  %v9815_v58 = vsel %vm16467_vm5, %v9813_v38, %v9814_v20  ;;  %v13772_v60 = vrot.slane %v9712_v11, 9  ;;  %v9715_v7 = vld [vmem:[#allocation2 + $0x30] sm:$0xe]  ;;  %v9729_v38 = vld [vmem:[#allocation2 + $0x68] sm:$0x1] }
 0x442   : > { %v9313_v0 = vor.u32 %v9312_v63, %v9308_v32  ;;  %v13760_v62 = vcombine.low %v9285_v1, %v9295_v45  ;;  %v9720_v63 = vld [vmem:[#allocation2 + $0x44] sm:$0x1]  ;;  %v16066_v19 = vld [vmem:[%s18796_s3 + $0x190] sm:$0xff]   ;;  %v13773_v59 = vrot.slane %v9715_v7, 9  ;;  %v13774_v45 = vrot.slane %v9718_v12, 9  ;;  %v16067_v1 = vld [vmem:[%s18796_s3 + $0x198] sm:$0xff]  }
 0x443   : > { %v9309_v2 = vsel %vm16248_vm2, %v9304_v39, %v9308_v32  ;;  %v9819_v53 = vsel %vm16467_vm5, %v13772_v60, %v9818_v33  ;;  %v9827_v32 = vrot.slane %v9825_v61, 4  ;;  %v9835_v26 = vrot.slane %v9720_v63, 5  ;;  %v9728_v39 = vld [vmem:[#allocation2 + $0x64] sm:$0xf]  ;;  %v9727_v20 = vld [vmem:[#allocation2 + $0x60] sm:$0xe] }
 0x444   : > { %v9314_v6 = vrot.slane %v9313_v0, 4  ;;  %v13804_v13 = vcombine.low %v9819_v53, %v9822_v16  ;;  %v9839_v0 = vrot.slane %v9722_v34, 5  ;;  %v9833_v55 = vsel %vm16467_vm5, %v13774_v45, %v9832_v28  ;;  %v16070_v60 = vld [vmem:[%s18796_s3 + $0x1b0] sm:$0xff]   ;;  %v9735_v63 = vld [vmem:[#allocation2 + $0x80] sm:$0x1]  ;;  %v16071_v7 = vld [vmem:[%s18796_s3 + $0x1b8] sm:$0xff]  }
 0x445   : > { %v9829_v3 = vsel %vm16467_vm5, %v9827_v32, %v9828_v44  ;;  %v9836_v8 = vsel %vm16467_vm5, %v9834_v56, %v9835_v26  ;;  %v9848_v54 = vrot.slane %v9846_v4, 4  ;;  %v9853_v10 = vrot.slane %v9728_v39, 5  ;;  %v9738_v44 = vld [vmem:[#allocation2 + $0x8c] sm:$0x1]  ;;  %v9733_v12 = vld [vmem:[#allocation2 + $0x78] sm:$0xe] }
 0x446   : > { %v9319_v41 = vsel %vm16248_vm2, %v9314_v6, %v9318_v18  ;;  %v9841_v6 = vrot.slane %v9839_v0, 4  ;;  %v13776_v33 = vrot.slane %v9724_v30, 9  ;;  %v9856_v25 = vrot.slane %v9729_v38, 5  ;;  %v9740_v26 = vld [vmem:[#allocation2 + $0x94] sm:$0xf]  ;;  %v18227_v45 = vld [vmem:[%s18796_s3 + $0x1c0] sm:$0xff]  }
 0x447   : > { %v13761_v29 = vcombine.low %v9309_v2, %v9319_v41  ;;  %v16068_v41 = vld [vmem:[%s18796_s3 + $0x1a0] sm:$0xff]   ;;  %v9850_v2 = vsel %vm16467_vm5, %v9848_v54, %v9849_v9  ;;  %v9855_v50 = vrot.slane %v9853_v10, 4  ;;  %v13777_v16 = vrot.slane %v9727_v20, 9  ;;  %v9750_v20 = vld [vmem:[#allocation2 + $0xbc] sm:$0x1] }
 0x448   : > { %15139 = vmatmul.mubr.bf16.gmra.mrb[20].mxu1 %v13757_v52  ;;  %v9812_v52 = vsel %vm16467_vm5, %v13771_v49, %v9811_v37  ;;  %v13775_v37 = vrot.slane %v9721_v24, 9  ;;  %v9730_v49 = vld [vmem:[#allocation2 + $0x6c] sm:$0xe]  ;;  %v9744_v39 = vld [vmem:[#allocation2 + $0xa4] sm:$0x1]  ;;  %v9884_v9 = vrot.slane %v9741_v15, 5 }
 0x449   : > { %15142 = vmatprep.mubr.bf16.mxu1 %v13758_v47  ;;  %v13803_v5 = vcombine.low %v9812_v52, %v9815_v58  ;;  %v16065_v47 = vld [vmem:[%s18796_s3 + $0x188] sm:$0xff]   ;;  %v9857_v28 = vsel %vm16467_vm5, %v9855_v50, %v9856_v25  ;;  %v9867_v52 = vrot.slane %v9734_v31, 5  ;;  %v9752_v25 = vld [vmem:[#allocation2 + $0xc4] sm:$0xf]  ;;  %v16084_v15 = vld [vmem:[#allocation2 + $0x78] sm:$0xff]  }
 0x44a   : > { %v9840_v35 = vsel %vm16467_vm5, %v13775_v37, %v9839_v0  ;;  %v9737_v58 = vld [vmem:[#allocation2 + $0x88] sm:$0xf]  ;;  %v9877_v0 = vrot.slane %v9738_v44, 5  ;;  %v9749_v37 = vld [vmem:[#allocation2 + $0xb8] sm:$0xf] }
 0x44b   : > { %v9874_v27 = vrot.slane %v9737_v58, 5  ;;  %v9869_v34 = vrot.slane %v9867_v52, 4  ;;  %v9748_v58 = vld [vmem:[#allocation2 + $0xb4] sm:$0xe] }
 0x44d   : > { %v9876_v40 = vrot.slane %v9874_v27, 4 }
 0x450   : > { %15143 = vmatmul.mubr.bf16.gmra.mrb[24].mxu1 %v13759_v36  ;;  %v9723_v36 = vld [vmem:[#allocation2 + $0x50] sm:$0x1] }
 0x451   : > { %15146 = vmatprep.mubr.bf16.mxu1 %v13760_v62  ;;  %v13806_v62 = vcombine.low %v9833_v55, %v9836_v8  ;;  %v9842_v18 = vrot.slane %v9723_v36, 5  ;;  %v13779_v8 = vrot.slane %v9733_v12, 9  ;;  %v9878_v55 = vsel %vm16467_vm5, %v9876_v40, %v9877_v0  ;;  %v16080_v0 = vld [vmem:[%s18796_s3 + $0x1d0] sm:$0xff]  }
 0x453   : > { %v9843_v42 = vsel %vm16467_vm5, %v9841_v6, %v9842_v18  ;;  %v9739_v18 = vld [vmem:[#allocation2 + $0x90] sm:$0xe] }
 0x454   : > { %v13807_v48 = vcombine.low %v9840_v35, %v9843_v42  ;;  %v9891_v42 = vrot.slane %v9744_v39, 5  ;;  %v16085_v39 = vld [vmem:[#allocation2 + $0x84] sm:$0xff]  }
 0x458   : > { %15147 = vmatmul.mubr.bf16.gmra.mrb[28].mxu1 %v13761_v29  ;;  %v9860_v29 = vrot.slane %v9731_v14, 5  ;;  %v9746_v14 = vld [vmem:[#allocation2 + $0xac] sm:$0xf] }
 0x459   : > { %15166 = vmatprep.mubr.bf16.mxu1 %v13802_v23  ;;  %v9847_v23 = vsel %vm16467_vm5, %v13776_v33, %v9846_v4 }
 0x45a   : > { %v13808_v57 = vcombine.low %v9847_v23, %v9850_v2  ;;  %v9862_v11 = vrot.slane %v9860_v29, 4  ;;  %v9895_v2 = vrot.slane %v9746_v14, 5 }
 0x460   : > { %15167 = vmatmul.mubr.bf16.vlgmr.msra.gmra.mrb[0].mxu1 %v13803_v5  ;;  %v13778_v5 = vrot.slane %v9730_v49, 9 }
 0x461   : > { %15170 = vmatprep.mubr.bf16.mxu1 %v13804_v13  ;;  %15199 = vmatpush3.bf16.msra.mxu1 %v18134_v21  ;;  %v9826_v21 = vsel %vm16467_vm5, %v13773_v59, %v9825_v61  ;;  %v9863_v61 = vrot.slane %v9732_v22, 5  ;;  %v9736_v59 = vld [vmem:[#allocation2 + $0x84] sm:$0xe]  ;;  %v9897_v22 = vrot.slane %v9895_v2, 4 }
 0x462   : > { %15200 = vmatprep.subr.bf16.mxu1 %v16065_v47  ;;  %v13805_v43 = vcombine.low %v9826_v21, %v9829_v3  ;;  %v9861_v32 = vsel %vm16467_vm5, %v13778_v5, %v9860_v29  ;;  %v9743_v3 = vld [vmem:[#allocation2 + $0xa0] sm:$0xf]  ;;  %v9881_v21 = vrot.slane %v9740_v26, 5  ;;  %v16072_v26 = vld [vmem:[#allocation2 + $0x18] sm:$0xff]  }
 0x463   : > { %v9864_v53 = vsel %vm16467_vm5, %v9862_v11, %v9863_v61  ;;  %v9888_v36 = vrot.slane %v9743_v3, 5  ;;  %v9745_v11 = vld [vmem:[#allocation2 + $0xa8] sm:$0xe]  ;;  %v9905_v61 = vrot.slane %v9750_v20, 5  ;;  %v16075_v3 = vld [vmem:[#allocation2 + $0x30] sm:$0xff]  }
 0x464   : > { %v13810_v56 = vcombine.low %v9861_v32, %v9864_v53  ;;  %v9883_v54 = vrot.slane %v9881_v21, 4 }
 0x465   : > { %15201 = vmatpush3.bf16.msra.mxu1 %v16065_v47  ;;  %v9854_v47 = vsel %vm16467_vm5, %v13777_v16, %v9853_v10  ;;  %v9890_v30 = vrot.slane %v9888_v36, 4  ;;  %v13781_v10 = vrot.slane %v9739_v18, 9  ;;  %v10751_v18 = vld [vmem:[#allocation2 + $0x18] sm:$0xf] }
 0x466   : > { %15202 = vmatprep.subr.bf16.mxu1 %v16066_v19  ;;  %v13809_v13 = vcombine.low %v9854_v47, %v9857_v28  ;;  %v9885_v33 = vsel %vm16467_vm5, %v9883_v54, %v9884_v9  ;;  %v9909_v28 = vrot.slane %v9752_v25, 5  ;;  %v10752_v54 = vld [vmem:[#allocation2 + $0x1c] sm:$0xf] }
 0x467   : > { %v9892_v35 = vsel %vm16467_vm5, %v9890_v30, %v9891_v42  ;;  %v9882_v23 = vsel %vm16467_vm5, %v13781_v10, %v9881_v21  ;;  %v16078_v21 = vld [vmem:[#allocation2 + $0x48] sm:$0xff]   ;;  %v16087_v30 = vld [vmem:[#allocation2 + $0x90] sm:$0xff]   ;;  %v10809_v14 = vshll.u32 %v10752_v54, 16  ;;  %v10813_v9 = vshrl.u32 %v10752_v54, 16  ;;  %v10754_v42 = vld [vmem:[#allocation2 + $0x24] sm:$0xf] }
 0x468   : > { %15171 = vmatmul.mubr.bf16.gmra.mrb[4].mxu1 %v13805_v43  ;;  %v13780_v43 = vrot.slane %v9736_v59, 9  ;;  %v13813_v38 = vcombine.low %v9882_v23, %v9885_v33  ;;  %v16077_v59 = vld [vmem:[%s18796_s3 + $0x1c8] sm:$0xff]   ;;  %v10753_v23 = vld [vmem:[#allocation2 + $0x20] sm:$0x1] }
 0x469   : > { %15174 = vmatprep.mubr.bf16.mxu1 %v13806_v62  ;;  %15203 = vmatpush3.bf16.msra.mxu1 %v16066_v19  ;;  %v9870_v19 = vrot.slane %v9735_v63, 5  ;;  %v9911_v63 = vrot.slane %v9909_v28, 4  ;;  %v10811_v10 = vrot.slane %v10809_v14, 5  ;;  %v10815_v33 = vrot.slane %v10813_v9, 4  ;;  %v10766_v14 = vld [vmem:[#allocation2 + $0x54] sm:$0xf] }
 0x46a   : > { %15204 = vmatprep.subr.bf16.mxu1 %v16067_v1  ;;  %v9875_v6 = vsel %vm16467_vm5, %v13780_v43, %v9874_v27  ;;  %v16079_v43 = vld [vmem:[#allocation2 + $0x54] sm:$0xff]  }
 0x46b   : > { %v9871_v4 = vsel %vm16467_vm5, %v9869_v34, %v9870_v19  ;;  %v13812_v24 = vcombine.low %v9875_v6, %v9878_v55  ;;  %v16073_v19 = vld [vmem:[#allocation2 + $0x24] sm:$0xff]   ;;  %v16095_v6 = vld [vmem:[%s18796_s3 + $0x1f8] sm:$0xff]  }
 0x46c   : > { %v16089_v55 = vld [vmem:[%s18796_s3 + $0x1e8] sm:$0xff]  }
 0x46d   : > { %15205 = vmatpush3.bf16.msra.mxu1 %v16067_v1  ;;  %v9868_v1 = vsel %vm16467_vm5, %v13779_v8, %v9867_v52  ;;  %v13784_v52 = vrot.slane %v9748_v58, 9  ;;  %v16076_v8 = vld [vmem:[#allocation2 + $0x3c] sm:$0xff]  }
 0x46e   : > { %15206 = vmatprep.subr.bf16.mxu1 %v16068_v41  ;;  %v13811_v62 = vcombine.low %v9868_v1, %v9871_v4  ;;  %v16083_v4 = vld [vmem:[%s18796_s3 + $0x1d8] sm:$0xff]   ;;  %v16092_v1 = vld [vmem:[%s18796_s3 + $0x1f0] sm:$0xff]  }
 0x470   : > { %15175 = vmatmul.mubr.bf16.gmra.mrb[8].mxu1 %v13807_v48  ;;  %v9902_v48 = vrot.slane %v9749_v37, 5  ;;  %v10803_v37 = vshll.u32 %v10751_v18, 16 }
 0x471   : > { %15178 = vmatprep.mubr.bf16.mxu1 %v13808_v57  ;;  %15207 = vmatpush3.bf16.msra.mxu1 %v16068_v41  ;;  %v9742_v41 = vld [vmem:[#allocation2 + $0x9c] sm:$0xe]  ;;  %v9747_v57 = vld [vmem:[#allocation2 + $0xb0] sm:$0x1] }
 0x472   : > { %15208 = vmatprep.subr.bf16.mxu1 %v16069_v46  ;;  %v13782_v29 = vrot.slane %v9742_v41, 9  ;;  %v9904_v31 = vrot.slane %v9902_v48, 4  ;;  %v9898_v49 = vrot.slane %v9747_v57, 5  ;;  %v9903_v47 = vsel %vm16467_vm5, %v13784_v52, %v9902_v48  ;;  %v10758_v57 = vld [vmem:[#allocation2 + $0x34] sm:$0xf] }
 0x473   : > { %v10800_v41 = vshrl.u32 %v10751_v18, 16  ;;  %v10805_v48 = vrot.slane %v10803_v37, 5  ;;  %v10857_v58 = vshll.u32 %v10758_v57, 16 }
 0x474   : > { %v9899_v16 = vsel %vm16467_vm5, %v9897_v22, %v9898_v49  ;;  %v9906_v5 = vsel %vm16467_vm5, %v9904_v31, %v9905_v61  ;;  %v10816_v31 = vor.u32 %v10815_v33, %v10811_v10  ;;  %v10819_v49 = vshll.u32 %v10753_v23, 16  ;;  %v10767_v33 = vld [vmem:[#allocation2 + $0x58] sm:$0xf] }
 0x475   : > { %15209 = vmatpush3.bf16.msra.mxu1 %v16069_v46  ;;  %v9889_v46 = vsel %vm16467_vm5, %v13782_v29, %v9888_v36  ;;  %v13816_v32 = vcombine.low %v9903_v47, %v9906_v5  ;;  %v16081_v36 = vld [vmem:[#allocation2 + $0x60] sm:$0xff]   ;;  %v10861_v61 = vshrl.u32 %v10758_v57, 16  ;;  %v10923_v57 = vshll.u32 %v10766_v14, 16 }
 0x476   : > { %15210 = vmatprep.subr.bf16.mxu1 %v16070_v60  ;;  %v13814_v50 = vcombine.low %v9889_v46, %v9892_v35  ;;  %v16088_v29 = vld [vmem:[#allocation2 + $0x9c] sm:$0xff]   ;;  %v10802_v35 = vrot.slane %v10800_v41, 4  ;;  %v10827_v46 = vshll.u32 %v10754_v42, 16  ;;  %v10817_v47 = vrot.slane %v10816_v31, 4 }
 0x478   : > { %15179 = vmatmul.mubr.bf16.gmra.mrb[12].mxu1 %v13809_v13  ;;  %v9753_v13 = vld [vmem:[#allocation2 + $0xc8] sm:$0x1]  ;;  %v10806_v25 = vor.u32 %v10805_v48, %v10802_v35 }
 0x479   : > { %15182 = vmatprep.mubr.bf16.mxu1 %v13810_v56  ;;  %15211 = vmatpush3.bf16.msra.mxu1 %v16070_v60  ;;  %v13783_v60 = vrot.slane %v9745_v11, 9  ;;  %v9912_v56 = vrot.slane %v9753_v13, 5  ;;  %v10757_v11 = vld [vmem:[#allocation2 + $0x30] sm:$0xf]  ;;  %v10760_v13 = vld [vmem:[#allocation2 + $0x3c] sm:$0xf] }
 0x47a   : > { %15212 = vmatprep.subr.bf16.mxu1 %v16071_v7  ;;  %v10848_v52 = vshrl.u32 %v10757_v11, 16  ;;  %v10851_v5 = vshll.u32 %v10757_v11, 16  ;;  %v10933_v11 = vshrl.u32 %v10767_v33, 16 }
 0x47b   : > { %v9896_v53 = vsel %vm16467_vm5, %v13783_v60, %v9895_v2  ;;  %v9913_v44 = vsel %vm16467_vm5, %v9911_v63, %v9912_v56  ;;  %v10755_v2 = vld [vmem:[#allocation2 + $0x28] sm:$0xf]  ;;  %v10756_v60 = vld [vmem:[#allocation2 + $0x2c] sm:$0x1]  ;;  %v10863_v56 = vrot.slane %v10861_v61, 4 }
 0x47c   : > { %v13815_v27 = vcombine.low %v9896_v53, %v9899_v16  ;;  %v10833_v22 = vshll.u32 %v10755_v2, 16  ;;  %v10837_v20 = vshrl.u32 %v10755_v2, 16  ;;  %v10843_v63 = vshll.u32 %v10756_v60, 16  ;;  %v16094_v2 = vld [vmem:[#allocation2 + $0xcc] sm:$0xff]  }
 0x47d   : > { %15213 = vmatpush3.bf16.msra.mxu1 %v16071_v7  ;;  %v9751_v7 = vld [vmem:[#allocation2 + $0xc0] sm:$0xe] }
 0x47e   : > { %15246 = vmatprep.subr.bf16.mxu1 %v18227_v45  ;;  %v13785_v34 = vrot.slane %v9751_v7, 9  ;;  %v18286_v53 = vrot.slane %v10833_v22, 5  ;;  %v18288_v7 = vrot.slane %v10857_v58, 5 }
 0x480   : > { %15183 = vmatmul.mubr.bf16.gmra.mrb[16].mxu1 %v13811_v62  ;;  %v9910_v12 = vsel %vm16467_vm5, %v13785_v34, %v9909_v28  ;;  %v16082_v62 = vld [vmem:[#allocation2 + $0x6c] sm:$0xff]   ;;  %v10829_v28 = vrot.slane %v10827_v46, 5  ;;  %v10761_v34 = vld [vmem:[#allocation2 + $0x40] sm:$0xf]  ;;  %v10920_v46 = vshrl.u32 %v10766_v14, 16 }
 0x481   : > { %15186 = vmatprep.mubr.bf16.mxu1 %v13812_v24  ;;  %v13817_v40 = vcombine.low %v9910_v12, %v9913_v44  ;;  %v18283_v24 = vld [vmem:[%s18796_s3 + $0x200] sm:$0xff]   ;;  %v16091_v44 = vld [vmem:[#allocation2 + $0xb4] sm:$0xff]   ;;  %v10821_v12 = vrot.slane %v10819_v49, 5 }
 0x488   : > { %15187 = vmatmul.mubr.bf16.gmra.mrb[20].mxu1 %v13813_v38  ;;  %v10824_v38 = vshrl.u32 %v10754_v42, 16 }
 0x489   : > { %15190 = vmatprep.mubr.bf16.mxu1 %v13814_v50  ;;  %v16090_v50 = vld [vmem:[#allocation2 + $0xa8] sm:$0xff]  }
 0x48a   : > { %v10826_v16 = vrot.slane %v10824_v38, 4 }
 0x490   : > { %15191 = vmatmul.mubr.bf16.gmra.mrb[24].mxu1 %v13815_v27  ;;  %v10839_v27 = vrot.slane %v10837_v20, 4  ;;  %v10929_v20 = vshll.u32 %v10767_v33, 16 }
 0x491   : > { %15194 = vmatprep.mubr.bf16.mxu1 %v13816_v32  ;;  %v10807_v32 = vrot.slane %v10806_v25, 4 }
 0x498   : > { %15195 = vmatmul.mubr.bf16.gmra.mrb[28].mxu1 %v13817_v40  ;;  %v10830_v40 = vor.u32 %v10829_v28, %v10826_v16 }
 0x499   : > { %15214 = vmatprep.mubr.bf16.mxu1 %v16072_v26  ;;  %v10850_v26 = vrot.slane %v10848_v52, 4  ;;  %v10770_v52 = vld [vmem:[#allocation2 + $0x64] sm:$0xf] }
 0x4a0   : > { %15215 = vmatmul.mubr.bf16.vlgmr.msra.gmra.mrb[0].mxu1 %v16073_v19  ;;  %v10853_v19 = vrot.slane %v10851_v5, 5 }
 0x4a1   : > { %15218 = vmatprep.mubr.bf16.mxu1 %v16075_v3  ;;  %15247 = vmatpush3.bf16.msra.mxu1 %v18227_v45  ;;  %v16086_v45 = vld [vmem:[%s18796_s3 + $0x1e0] sm:$0xff]   ;;  %v10840_v3 = vor.u32 %v10839_v27, %v18286_v53 }
 0x4a2   : > { %15248 = vmatprep.subr.bf16.mxu1 %v16077_v59  ;;  %v10854_v54 = vor.u32 %v10853_v19, %v10850_v26  ;;  %v10953_v26 = vshll.u32 %v10770_v52, 16  ;;  %v10957_v19 = vshrl.u32 %v10770_v52, 16 }
 0x4a3   : > { %v10841_v41 = vrot.slane %v10840_v3, 4 }
 0x4a4   : > { %v10855_v25 = vrot.slane %v10854_v54, 4 }
 0x4a5   : > { %15249 = vmatpush3.bf16.msra.mxu1 %v16077_v59  ;;  %v16093_v59 = vld [vmem:[#allocation2 + $0xc0] sm:$0xff]  }
 0x4a6   : > { %15250 = vmatprep.subr.bf16.mxu1 %v16080_v0 }
 0x4a8   : > { %15219 = vmatmul.mubr.bf16.gmra.mrb[4].mxu1 %v16076_v8  ;;  %v10764_v8 = vld [vmem:[#allocation2 + $0x4c] sm:$0xf] }
 0x4a9   : > { %15222 = vmatprep.mubr.bf16.mxu1 %v16078_v21  ;;  %15251 = vmatpush3.bf16.msra.mxu1 %v16080_v0  ;;  %v10872_v0 = vshrl.u32 %v10760_v13, 16  ;;  %v10759_v21 = vld [vmem:[#allocation2 + $0x38] sm:$0x1]  ;;  %v10905_v18 = vshll.u32 %v10764_v8, 16 }
 0x4aa   : > { %15252 = vmatprep.subr.bf16.mxu1 %v16083_v4  ;;  %v10867_v37 = vshll.u32 %v10759_v21, 16  ;;  %v10773_v21 = vld [vmem:[#allocation2 + $0x70] sm:$0xf] }
 0x4ab   : > { %v10874_v42 = vrot.slane %v10872_v0, 4  ;;  %v10981_v14 = vshrl.u32 %v10773_v21, 16 }
 0x4ac   : > { %v10869_v49 = vrot.slane %v10867_v37, 5 }
 0x4ad   : > { %15253 = vmatpush3.bf16.msra.mxu1 %v16083_v4  ;;  %v10822_v4 = vsel %vm16248_vm2, %v10817_v47, %v10821_v12  ;;  %v10765_v47 = vld [vmem:[#allocation2 + $0x50] sm:$0x1]  ;;  %v10860_v12 = vsel %vm16248_vm2, %v10855_v25, %v18288_v7  ;;  %v10775_v25 = vld [vmem:[#allocation2 + $0x78] sm:$0xf] }
 0x4ae   : > { %15254 = vmatprep.subr.bf16.mxu1 %v16086_v45 }
 0x4b0   : > { %15223 = vmatmul.mubr.bf16.gmra.mrb[8].mxu1 %v16079_v43  ;;  %v10885_v43 = vshrl.u32 %v10761_v34, 16 }
 0x4b1   : > { %15226 = vmatprep.mubr.bf16.mxu1 %v16081_v36  ;;  %15255 = vmatpush3.bf16.msra.mxu1 %v16086_v45  ;;  %v10881_v45 = vshll.u32 %v10761_v34, 16  ;;  %v10845_v36 = vrot.slane %v10843_v63, 5  ;;  %v18309_v34 = vrot.slane %v10929_v20, 5 }
 0x4b2   : > { %15256 = vmatprep.subr.bf16.mxu1 %v16089_v55 }
 0x4b3   : > { %v10846_v31 = vsel %vm16248_vm2, %v10841_v41, %v10845_v36 }
 0x4b5   : > { %15257 = vmatpush3.bf16.msra.mxu1 %v16089_v55  ;;  %v10812_v55 = vsel %vm16248_vm2, %v10807_v32, %v10811_v10  ;;  %v10887_v10 = vrot.slane %v10885_v43, 4  ;;  %v10925_v32 = vrot.slane %v10923_v57, 5  ;;  %v10768_v43 = vld [vmem:[#allocation2 + $0x5c] sm:$0x1]  ;;  %v10771_v57 = vld [vmem:[#allocation2 + $0x68] sm:$0x1] }
 0x4b6   : > { %15258 = vmatprep.subr.bf16.mxu1 %v16092_v1  ;;  %v13882_v9 = vcombine.low %v10812_v55, %v10822_v4  ;;  %v10915_v4 = vshll.u32 %v10765_v47, 16  ;;  %v10778_v47 = vld [vmem:[#allocation2 + $0x84] sm:$0xf] }
 0x4b8   : > { %15227 = vmatmul.mubr.bf16.gmra.mrb[12].mxu1 %v16082_v62  ;;  %v10875_v62 = vshll.u32 %v10760_v13, 16  ;;  %v10922_v13 = vrot.slane %v10920_v46, 4  ;;  %v10917_v37 = vrot.slane %v10915_v4, 5  ;;  %v16098_v46 = vld [vmem:[%s18796_s3 + $0x210] sm:$0xff]  }
 0x4b9   : > { %15230 = vmatprep.mubr.bf16.mxu1 %v16084_v15  ;;  %15259 = vmatpush3.bf16.msra.mxu1 %v16092_v1  ;;  %v10864_v1 = vor.u32 %v10863_v56, %v18288_v7  ;;  %v10831_v15 = vrot.slane %v10830_v40, 4 }
 0x4ba   : > { %15260 = vmatprep.subr.bf16.mxu1 %v16095_v6  ;;  %v10877_v38 = vrot.slane %v10875_v62, 5  ;;  %v10926_v55 = vor.u32 %v10925_v32, %v10922_v13  ;;  %v16097_v62 = vld [vmem:[%s18796_s3 + $0x208] sm:$0xff]   ;;  %v10774_v32 = vld [vmem:[#allocation2 + $0x74] sm:$0x1] }
 0x4bb   : > { %v10865_v23 = vrot.slane %v10864_v1, 4  ;;  %v10836_v61 = vsel %vm16248_vm2, %v10831_v15, %v18286_v53  ;;  %v10769_v53 = vld [vmem:[#allocation2 + $0x60] sm:$0xf] }
 0x4bc   : > { %v10878_v27 = vor.u32 %v10877_v38, %v10874_v42  ;;  %v13883_v63 = vcombine.low %v10836_v61, %v10846_v31  ;;  %v10944_v36 = vshrl.u32 %v10769_v53, 16  ;;  %v10947_v1 = vshll.u32 %v10769_v53, 16 }
 0x4bd   : > { %15261 = vmatpush3.bf16.msra.mxu1 %v16095_v6  ;;  %v10763_v6 = vld [vmem:[#allocation2 + $0x48] sm:$0xf]  ;;  %v10870_v5 = vsel %vm16248_vm2, %v10865_v23, %v10869_v49  ;;  %v10939_v42 = vshll.u32 %v10768_v43, 16  ;;  %v10983_v31 = vrot.slane %v10981_v14, 4  ;;  %v10781_v43 = vld [vmem:[#allocation2 + $0x90] sm:$0xf] }
 0x4be   : > { %15294 = vmatprep.subr.bf16.mxu1 %v18283_v24  ;;  %v10896_v35 = vshrl.u32 %v10763_v6, 16  ;;  %v10899_v48 = vshll.u32 %v10763_v6, 16  ;;  %v13884_v3 = vcombine.low %v10860_v12, %v10870_v5 }
 0x4c0   : > { %15231 = vmatmul.mubr.bf16.gmra.mrb[16].mxu1 %v16085_v39  ;;  %v10762_v39 = vld [vmem:[#allocation2 + $0x44] sm:$0x1]  ;;  %v10898_v16 = vrot.slane %v10896_v35, 4  ;;  %v10901_v28 = vrot.slane %v10899_v48, 5  ;;  %v10949_v35 = vrot.slane %v10947_v1, 5 }
 0x4c1   : > { %15234 = vmatprep.mubr.bf16.mxu1 %v16087_v30  ;;  %v10909_v30 = vshrl.u32 %v10764_v8, 16  ;;  %v10891_v58 = vshll.u32 %v10762_v39, 16  ;;  %v18318_v39 = vrot.slane %v10953_v26, 5  ;;  %v10776_v48 = vld [vmem:[#allocation2 + $0x7c] sm:$0xf]  ;;  %v16100_v1 = vld [vmem:[%s18796_s3 + $0x220] sm:$0xff]  }
 0x4c2   : > { %v10902_v8 = vor.u32 %v10901_v28, %v10898_v16  ;;  %v11001_v61 = vshll.u32 %v10776_v48, 16  ;;  %v10779_v16 = vld [vmem:[#allocation2 + $0x88] sm:$0xf]  ;;  %v10782_v26 = vld [vmem:[#allocation2 + $0x94] sm:$0xf] }
 0x4c3   : > { %v10911_v22 = vrot.slane %v10909_v30, 4  ;;  %v10893_v40 = vrot.slane %v10891_v58, 5  ;;  %v10977_v30 = vshll.u32 %v10773_v21, 16  ;;  %v10941_v58 = vrot.slane %v10939_v42, 5 }
 0x4c4   : > { %v10903_v41 = vrot.slane %v10902_v8, 4 }
 0x4c8   : > { %15235 = vmatmul.mubr.bf16.gmra.mrb[20].mxu1 %v16088_v29  ;;  %v18296_v29 = vrot.slane %v10881_v45, 5  ;;  %v10879_v45 = vrot.slane %v10878_v27, 4  ;;  %v10963_v27 = vshll.u32 %v10771_v57, 16  ;;  %v10784_v57 = vld [vmem:[#allocation2 + $0x9c] sm:$0xf] }
 0x4c9   : > { %15238 = vmatprep.mubr.bf16.mxu1 %v16090_v50  ;;  %v18298_v50 = vrot.slane %v10905_v18, 5  ;;  %v10959_v18 = vrot.slane %v10957_v19, 4  ;;  %v18346_v19 = vrot.slane %v11001_v61, 5  ;;  %v10785_v61 = vld [vmem:[#allocation2 + $0xa0] sm:$0xf] }
 0x4ca   : > { %v10888_v60 = vor.u32 %v10887_v10, %v18296_v29  ;;  %v10884_v33 = vsel %vm16248_vm2, %v10879_v45, %v18296_v29  ;;  %v10946_v10 = vrot.slane %v10944_v36, 4  ;;  %v18332_v29 = vrot.slane %v10977_v30, 5 }
 0x4cb   : > { %v10912_v56 = vor.u32 %v10911_v22, %v18298_v50  ;;  %v10908_v49 = vsel %vm16248_vm2, %v10903_v41, %v18298_v50  ;;  %v16099_v50 = vld [vmem:[%s18796_s3 + $0x218] sm:$0xff]   ;;  %v10965_v21 = vrot.slane %v10963_v27, 5  ;;  %v10987_v45 = vshll.u32 %v10774_v32, 16  ;;  %v10780_v41 = vld [vmem:[#allocation2 + $0x8c] sm:$0x1] }
 0x4cc   : > { %v10889_v0 = vrot.slane %v10888_v60, 4  ;;  %v11005_v60 = vshrl.u32 %v10776_v48, 16  ;;  %v10950_v5 = vor.u32 %v10949_v35, %v10946_v10  ;;  %v10984_v12 = vor.u32 %v10983_v31, %v18332_v29 }
 0x4cd   : > { %v10913_v6 = vrot.slane %v10912_v56, 4  ;;  %v10992_v56 = vshrl.u32 %v10775_v25, 16  ;;  %v11040_v10 = vshrl.u32 %v10781_v43, 16  ;;  %v11043_v35 = vshll.u32 %v10781_v43, 16 }
 0x4ce   : > { %v10951_v4 = vrot.slane %v10950_v5, 4  ;;  %v10788_v5 = vld [vmem:[#allocation2 + $0xac] sm:$0xf] }
 0x4cf   : > { %v10918_v23 = vsel %vm16248_vm2, %v10913_v6, %v10917_v37  ;;  %v11053_v6 = vshrl.u32 %v10782_v26, 16 }
 0x4d0   : > { %15239 = vmatmul.mubr.bf16.gmra.mrb[24].mxu1 %v16091_v44  ;;  %v10935_v44 = vrot.slane %v10933_v11, 4  ;;  %v10960_v11 = vor.u32 %v10959_v18, %v18318_v39  ;;  %v13886_v28 = vcombine.low %v10908_v49, %v10918_v23 }
 0x4d1   : > { %15242 = vmatprep.mubr.bf16.mxu1 %v16093_v59  ;;  %v10772_v59 = vld [vmem:[#allocation2 + $0x6c] sm:$0xf] }
 0x4d2   : > { %v10936_v7 = vor.u32 %v10935_v44, %v18309_v34  ;;  %v10968_v15 = vshrl.u32 %v10772_v59, 16  ;;  %v10971_v54 = vshll.u32 %v10772_v59, 16  ;;  %v10995_v44 = vshll.u32 %v10775_v25, 16 }
 0x4d3   : > { %v10961_v53 = vrot.slane %v10960_v11, 4  ;;  %v11007_v59 = vrot.slane %v11005_v60, 4  ;;  %v11035_v11 = vshll.u32 %v10780_v41, 16  ;;  %v11042_v60 = vrot.slane %v11040_v10, 4 }
 0x4d4   : > { %v10937_v38 = vrot.slane %v10936_v7, 4  ;;  %v10970_v22 = vrot.slane %v10968_v15, 4  ;;  %v10997_v36 = vrot.slane %v10995_v44, 5  ;;  %v10985_v15 = vrot.slane %v10984_v12, 4 }
 0x4d5   : > { %v10966_v14 = vsel %vm16248_vm2, %v10961_v53, %v10965_v21  ;;  %v11077_v44 = vshrl.u32 %v10785_v61, 16  ;;  %v10787_v53 = vld [vmem:[#allocation2 + $0xa8] sm:$0xf] }
 0x4d6   : > { %v10942_v13 = vsel %vm16248_vm2, %v10937_v38, %v10941_v58  ;;  %v10783_v58 = vld [vmem:[#allocation2 + $0x98] sm:$0x1]  ;;  %v11088_v43 = vshrl.u32 %v10787_v53, 16 }
 0x4d8   : > { %15243 = vmatmul.mubr.bf16.gmra.mrb[28].mxu1 %v16094_v2  ;;  %v10927_v2 = vrot.slane %v10926_v55, 4  ;;  %v10994_v55 = vrot.slane %v10992_v56, 4  ;;  %v11073_v56 = vshll.u32 %v10785_v61, 16 }
 0x4d9   : > { %15262 = vmatprep.mubr.bf16.mxu1 %v13882_v9  ;;  %v10894_v9 = vsel %vm16248_vm2, %v10889_v0, %v10893_v40  ;;  %v11025_v40 = vshll.u32 %v10779_v16, 16  ;;  %v11019_v0 = vshll.u32 %v10778_v47, 16 }
 0x4da   : > { %v13885_v20 = vcombine.low %v10884_v33, %v10894_v9  ;;  %v10932_v52 = vsel %vm16248_vm2, %v10927_v2, %v18309_v34  ;;  %v11029_v34 = vshrl.u32 %v10779_v16, 16  ;;  %v11008_v9 = vor.u32 %v11007_v59, %v18346_v19 }
 0x4db   : > { %v13887_v8 = vcombine.low %v10932_v52, %v10942_v13  ;;  %v18351_v18 = vrot.slane %v11025_v40, 5  ;;  %v11021_v42 = vrot.slane %v11019_v0, 5  ;;  %v10956_v33 = vsel %vm16248_vm2, %v10951_v4, %v18318_v39 }
 0x4dc   : > { %v11031_v30 = vrot.slane %v11029_v34, 4  ;;  %v10989_v2 = vrot.slane %v10987_v45, 5  ;;  %v10998_v48 = vor.u32 %v10997_v36, %v10994_v55  ;;  %v11009_v25 = vrot.slane %v11008_v9, 4  ;;  %v10786_v45 = vld [vmem:[#allocation2 + $0xa4] sm:$0x1]  ;;  %v16103_v36 = vld [vmem:[%s18796_s3 + $0x238] sm:$0xff]  }
 0x4dd   : > { %v11045_v16 = vrot.slane %v11043_v35, 5  ;;  %v11067_v52 = vshll.u32 %v10784_v57, 16  ;;  %v11059_v40 = vshll.u32 %v10783_v58, 16  ;;  %v11097_v34 = vshll.u32 %v10788_v5, 16  ;;  %v10789_v35 = vld [vmem:[#allocation2 + $0xb0] sm:$0x1] }
 0x4de   : > { %v11032_v39 = vor.u32 %v11031_v30, %v18351_v18  ;;  %v11091_v55 = vshll.u32 %v10787_v53, 16  ;;  %v11107_v61 = vshll.u32 %v10789_v35, 16 }
 0x4e0   : > { %15263 = vmatmul.mubr.bf16.vlgmr.msra.gmra.mrb[0].mxu1 %v13883_v63 }
 0x4e1   : > { %15266 = vmatprep.mubr.bf16.mxu1 %v13884_v3  ;;  %15295 = vmatpush3.bf16.msra.mxu1 %v18283_v24  ;;  %v10973_v24 = vrot.slane %v10971_v54, 5  ;;  %v11016_v3 = vshrl.u32 %v10778_v47, 16  ;;  %v10777_v54 = vld [vmem:[#allocation2 + $0x80] sm:$0x1]  ;;  %v10999_v47 = vrot.slane %v10998_v48, 4  ;;  %v11090_v48 = vrot.slane %v11088_v43, 4 }
 0x4e2   : > { %15296 = vmatprep.subr.bf16.mxu1 %v16097_v62  ;;  %v11011_v23 = vshll.u32 %v10777_v54, 16  ;;  %v11061_v54 = vrot.slane %v11059_v40, 5 }
 0x4e3   : > { %v10974_v63 = vor.u32 %v10973_v24, %v10970_v22  ;;  %v11018_v37 = vrot.slane %v11016_v3, 4  ;;  %v16101_v22 = vld [vmem:[%s18796_s3 + $0x228] sm:$0xff]   ;;  %v13888_v24 = vcombine.low %v10956_v33, %v10966_v14  ;;  %v11046_v3 = vor.u32 %v11045_v16, %v11042_v60  ;;  %v10791_v14 = vld [vmem:[#allocation2 + $0xb8] sm:$0xf]  ;;  %v10794_v33 = vld [vmem:[#allocation2 + $0xc4] sm:$0xf] }
 0x4e4   : > { %v11013_v13 = vrot.slane %v11011_v23, 5  ;;  %v11004_v4 = vsel %vm16248_vm2, %v10999_v47, %v18346_v19  ;;  %v18386_v19 = vrot.slane %v11097_v34, 5  ;;  %v11093_v23 = vrot.slane %v11091_v55, 5 }
 0x4e5   : > { %15297 = vmatpush3.bf16.msra.mxu1 %v16097_v62  ;;  %v11049_v62 = vshll.u32 %v10782_v26, 16  ;;  %v10975_v7 = vrot.slane %v10974_v63, 4  ;;  %v11022_v49 = vor.u32 %v11021_v42, %v11018_v37  ;;  %v11033_v63 = vrot.slane %v11032_v39, 4 }
 0x4e6   : > { %15298 = vmatprep.subr.bf16.mxu1 %v16098_v46  ;;  %v11014_v12 = vsel %vm16248_vm2, %v11009_v25, %v11013_v13  ;;  %v11101_v26 = vshrl.u32 %v10788_v5, 16  ;;  %v11047_v41 = vrot.slane %v11046_v3, 4  ;;  %v11083_v42 = vshll.u32 %v10786_v45, 16  ;;  %v10796_v5 = vld [vmem:[#allocation2 + $0xcc] sm:$0xf] }
 0x4e7   : > { %v18359_v38 = vrot.slane %v11049_v62, 5  ;;  %v10980_v31 = vsel %vm16248_vm2, %v10975_v7, %v18332_v29  ;;  %v16102_v29 = vld [vmem:[%s18796_s3 + $0x230] sm:$0xff]   ;;  %v11023_v59 = vrot.slane %v11022_v49, 4  ;;  %v11079_v7 = vrot.slane %v11077_v44, 4  ;;  %v10795_v45 = vld [vmem:[#allocation2 + $0xc8] sm:$0x1] }
 0x4e8   : > { %15267 = vmatmul.mubr.bf16.gmra.mrb[4].mxu1 %v13885_v20  ;;  %v10990_v20 = vsel %vm16248_vm2, %v10985_v15, %v10989_v2  ;;  %v10790_v15 = vld [vmem:[#allocation2 + $0xb4] sm:$0xf]  ;;  %v11103_v30 = vrot.slane %v11101_v26, 4  ;;  %v11085_v58 = vrot.slane %v11083_v42, 5  ;;  %v11094_v16 = vor.u32 %v11093_v23, %v11090_v48 }
 0x4e9   : > { %15270 = vmatprep.mubr.bf16.mxu1 %v13886_v28  ;;  %15299 = vmatpush3.bf16.msra.mxu1 %v16098_v46  ;;  %v11055_v46 = vrot.slane %v11053_v6, 4  ;;  %v11064_v28 = vshrl.u32 %v10784_v57, 16  ;;  %v13889_v27 = vcombine.low %v10980_v31, %v10990_v20  ;;  %v18384_v6 = vrot.slane %v11073_v56, 5  ;;  %v10793_v20 = vld [vmem:[#allocation2 + $0xc0] sm:$0xf] }
 0x4ea   : > { %15300 = vmatprep.subr.bf16.mxu1 %v16099_v50  ;;  %v11028_v9 = vsel %vm16248_vm2, %v11023_v59, %v18351_v18  ;;  %v11112_v57 = vshrl.u32 %v10790_v15, 16  ;;  %v11104_v18 = vor.u32 %v11103_v30, %v18386_v19  ;;  %v11115_v39 = vshll.u32 %v10790_v15, 16 }
 0x4eb   : > { %v11056_v32 = vor.u32 %v11055_v46, %v18359_v38  ;;  %v11066_v0 = vrot.slane %v11064_v28, 4  ;;  %v11080_v46 = vor.u32 %v11079_v7, %v18384_v6  ;;  %v11149_v31 = vshrl.u32 %v10794_v33, 16 }
 0x4ec   : > { %v11052_v25 = vsel %vm16248_vm2, %v11047_v41, %v18359_v38  ;;  %v11136_v28 = vshrl.u32 %v10793_v20, 16  ;;  %v11114_v13 = vrot.slane %v11112_v57, 4  ;;  %v10792_v38 = vld [vmem:[#allocation2 + $0xbc] sm:$0x1]  ;;  %v11160_v53 = vshrl.u32 %v10796_v5, 16 }
 0x4ed   : > { %15301 = vmatpush3.bf16.msra.mxu1 %v16099_v50  ;;  %v11037_v50 = vrot.slane %v11035_v11, 5  ;;  %v11057_v21 = vrot.slane %v11056_v32, 4  ;;  %v11145_v11 = vshll.u32 %v10794_v33, 16  ;;  %v11081_v47 = vrot.slane %v11080_v46, 4  ;;  %v10798_v41 = vld [vmem:[#allocation2 + $0xd4] sm:$0x1] }
 0x4ee   : > { %15302 = vmatprep.subr.bf16.mxu1 %v16100_v1  ;;  %v11151_v44 = vrot.slane %v11149_v31, 4  ;;  %v11095_v26 = vrot.slane %v11094_v16, 4  ;;  %v11109_v59 = vrot.slane %v11107_v61, 5  ;;  %v11138_v3 = vrot.slane %v11136_v28, 4  ;;  %v11570_v46 = vld [vmem:[#allocation2 + $0x1c] sm:$0xf] }
 0x4ef   : > { %v11038_v62 = vsel %vm16248_vm2, %v11033_v63, %v11037_v50  ;;  %v11062_v10 = vsel %vm16248_vm2, %v11057_v21, %v11061_v54  ;;  %v11105_v63 = vrot.slane %v11104_v18, 4  ;;  %v11117_v50 = vrot.slane %v11115_v39, 5  ;;  %v11571_v61 = vld [vmem:[#allocation2 + $0x20] sm:$0x1]  ;;  %v11573_v16 = vld [vmem:[#allocation2 + $0x28] sm:$0xf] }
 0x4f0   : > { %15271 = vmatmul.mubr.bf16.gmra.mrb[8].mxu1 %v13887_v8  ;;  %v11069_v8 = vrot.slane %v11067_v52, 5  ;;  %v13891_v2 = vcombine.low %v11028_v9, %v11038_v62  ;;  %v13892_v60 = vcombine.low %v11052_v25, %v11062_v10  ;;  %v11139_v52 = vshll.u32 %v10793_v20, 16 }
 0x4f1   : > { %15274 = vmatprep.mubr.bf16.mxu1 %v13888_v24  ;;  %15303 = vmatpush3.bf16.msra.mxu1 %v16100_v1  ;;  %v13890_v1 = vcombine.low %v11004_v4, %v11014_v12  ;;  %v11125_v24 = vshrl.u32 %v10791_v14, 16  ;;  %v11147_v56 = vrot.slane %v11145_v11, 5  ;;  %v11163_v12 = vshll.u32 %v10796_v5, 16  ;;  %v11569_v5 = vld [vmem:[#allocation2 + $0x18] sm:$0xe] }
 0x4f2   : > { %15304 = vmatprep.subr.bf16.mxu1 %v16101_v22  ;;  %v11070_v37 = vor.u32 %v11069_v8, %v11066_v0  ;;  %v11141_v0 = vrot.slane %v11139_v52, 5  ;;  %v11086_v4 = vsel %vm16248_vm2, %v11081_v47, %v11085_v58  ;;  %v11110_v43 = vsel %vm16248_vm2, %v11105_v63, %v11109_v59 }
 0x4f3   : > { %v11118_v55 = vor.u32 %v11117_v50, %v11114_v13  ;;  %v11162_v62 = vrot.slane %v11160_v53, 4  ;;  %v11165_v7 = vrot.slane %v11163_v12, 5  ;;  %v11155_v9 = vshll.u32 %v10795_v45, 16  ;;  %v11577_v12 = vld [vmem:[#allocation2 + $0x38] sm:$0x1] }
 0x4f4   : > { %v11071_v49 = vrot.slane %v11070_v37, 4  ;;  %v11179_v23 = vshll.u32 %v10798_v41, 16  ;;  %v11667_v20 = vrot.slane %v11570_v46, 5  ;;  %v11670_v47 = vrot.slane %v11571_v61, 5  ;;  %v11585_v41 = vld [vmem:[#allocation2 + $0x58] sm:$0xf] }
 0x4f5   : > { %15305 = vmatpush3.bf16.msra.mxu1 %v16101_v22  ;;  %v11121_v22 = vshll.u32 %v10791_v14, 16  ;;  %v11142_v14 = vor.u32 %v11141_v0, %v11138_v3  ;;  %v11119_v10 = vrot.slane %v11118_v55, 4  ;;  %v11166_v35 = vor.u32 %v11165_v7, %v11162_v62  ;;  %v11575_v3 = vld [vmem:[#allocation2 + $0x30] sm:$0xe]  ;;  %v11582_v0 = vld [vmem:[#allocation2 + $0x4c] sm:$0xf] }
 0x4f6   : > { %15306 = vmatprep.subr.bf16.mxu1 %v16102_v29  ;;  %v11076_v8 = vsel %vm16248_vm2, %v11071_v49, %v18384_v6  ;;  %v11100_v6 = vsel %vm16248_vm2, %v11095_v26, %v18386_v19  ;;  %v11181_v31 = vrot.slane %v11179_v23, 5  ;;  %v11674_v13 = vrot.slane %v11573_v16, 5  ;;  %v11579_v26 = vld [vmem:[#allocation2 + $0x40] sm:$0xf] }
 0x4f7   : > { %v11123_v32 = vrot.slane %v11121_v22, 5  ;;  %v13893_v30 = vcombine.low %v11076_v8, %v11086_v4  ;;  %v13894_v37 = vcombine.low %v11100_v6, %v11110_v43  ;;  %v11143_v57 = vrot.slane %v11142_v14, 4  ;;  %v11583_v6 = vld [vmem:[#allocation2 + $0x50] sm:$0x1]  ;;  %v11578_v14 = vld [vmem:[#allocation2 + $0x3c] sm:$0xe] }
 0x4f8   : > { %15275 = vmatmul.mubr.bf16.gmra.mrb[12].mxu1 %v13889_v27  ;;  %v10797_v27 = vld [vmem:[#allocation2 + $0xd0] sm:$0xf]  ;;  %v11157_v22 = vrot.slane %v11155_v9, 5  ;;  %v11167_v39 = vrot.slane %v11166_v35, 4  ;;  %v11676_v53 = vrot.slane %v11674_v13, 4  ;;  %v11684_v8 = vrot.slane %v11577_v12, 5 }
 0x4f9   : > { %15278 = vmatprep.mubr.bf16.mxu1 %v13890_v1  ;;  %15307 = vmatpush3.bf16.msra.mxu1 %v16102_v29  ;;  %v11127_v29 = vrot.slane %v11125_v24, 4  ;;  %v11169_v40 = vshll.u32 %v10797_v27, 16  ;;  %v11173_v34 = vshrl.u32 %v10797_v27, 16  ;;  %v11152_v1 = vor.u32 %v11151_v44, %v11147_v56  ;;  %v11576_v27 = vld [vmem:[#allocation2 + $0x34] sm:$0xf] }
 0x4fa   : > { %15308 = vmatprep.subr.bf16.mxu1 %v16103_v36  ;;  %v11124_v18 = vsel %vm16248_vm2, %v11119_v10, %v11123_v32  ;;  %v11148_v49 = vsel %vm16248_vm2, %v11143_v57, %v11147_v56  ;;  %v11681_v50 = vrot.slane %v11576_v27, 5  ;;  %v11574_v44 = vld [vmem:[#allocation2 + $0x2c] sm:$0x1]  ;;  %v11688_v45 = vrot.slane %v11579_v26, 5  ;;  %v11587_v61 = vld [vmem:[#allocation2 + $0x60] sm:$0xe] }
 0x4fb   : > { %v11128_v21 = vor.u32 %v11127_v29, %v11123_v32  ;;  %v11171_v15 = vrot.slane %v11169_v40, 5  ;;  %v11175_v54 = vrot.slane %v11173_v34, 4  ;;  %v13906_v29 = vrot.slane %v11569_v5, 9  ;;  %v11572_v40 = vld [vmem:[#allocation2 + $0x24] sm:$0xe] }
 0x4fc   : > { %v11683_v34 = vrot.slane %v11681_v50, 4  ;;  %v11677_v59 = vrot.slane %v11574_v44, 5  ;;  %v13907_v4 = vrot.slane %v11572_v40, 9  ;;  %v13908_v43 = vrot.slane %v11575_v3, 9  ;;  %v11597_v40 = vld [vmem:[#allocation2 + $0x88] sm:$0xf] }
 0x4fd   : > { %15309 = vmatpush3.bf16.msra.mxu1 %v16103_v36  ;;  %v11131_v36 = vshll.u32 %v10792_v38, 16  ;;  %v11129_v42 = vrot.slane %v11128_v21, 4  ;;  %v11176_v48 = vor.u32 %v11175_v54, %v11171_v15  ;;  %v11172_v28 = vsel %vm16248_vm2, %v11167_v39, %v11171_v15  ;;  %v11580_v15 = vld [vmem:[#allocation2 + $0x44] sm:$0x1]  ;;  %v11593_v26 = vld [vmem:[#allocation2 + $0x78] sm:$0xe] }
 0x4fe   : > { %v11668_v56 = vsel %vm16467_vm5, %v13906_v29, %v11667_v20  ;;  %v11678_v21 = vsel %vm16467_vm5, %v11676_v53, %v11677_v59  ;;  %v11685_v55 = vsel %vm16467_vm5, %v11683_v34, %v11684_v8  ;;  %v11682_v7 = vsel %vm16467_vm5, %v13908_v43, %v11681_v50  ;;  %v11592_v50 = vld [vmem:[#allocation2 + $0x74] sm:$0x1]  ;;  %v11590_v53 = vld [vmem:[#allocation2 + $0x6c] sm:$0xe] }
 0x4ff   : > { %v11133_v33 = vrot.slane %v11131_v36, 5  ;;  %v11177_v11 = vrot.slane %v11176_v48, 4  ;;  %v11695_v36 = vrot.slane %v11582_v0, 5  ;;  %v13940_v54 = vcombine.low %v11682_v7, %v11685_v55  ;;  %v11600_v59 = vld [vmem:[#allocation2 + $0x94] sm:$0xf] }
 0x500   : > { %15279 = vmatmul.mubr.bf16.gmra.mrb[16].mxu1 %v13891_v2  ;;  %v11153_v2 = vrot.slane %v11152_v1, 4  ;;  %v11675_v1 = vsel %vm16467_vm5, %v13907_v4, %v11674_v13  ;;  %v13909_v10 = vrot.slane %v11578_v14, 9  ;;  %v11702_v48 = vrot.slane %v11585_v41, 5  ;;  %v11603_v14 = vld [vmem:[#allocation2 + $0xa0] sm:$0xf] }
 0x501   : > { %15282 = vmatprep.mubr.bf16.mxu1 %v13892_v60  ;;  %v11134_v24 = vsel %vm16248_vm2, %v11129_v42, %v11133_v33  ;;  %v11669_v60 = vrot.slane %v11667_v20, 4  ;;  %v11182_v52 = vsel %vm16248_vm2, %v11177_v11, %v11181_v31  ;;  %v13939_v62 = vcombine.low %v11675_v1, %v11678_v21  ;;  %v11581_v42 = vld [vmem:[#allocation2 + $0x48] sm:$0xe]  ;;  %v11588_v33 = vld [vmem:[#allocation2 + $0x64] sm:$0xf] }
 0x502   : > { %v11158_v19 = vsel %vm16248_vm2, %v11153_v2, %v11157_v22  ;;  %v13895_v25 = vcombine.low %v11124_v18, %v11134_v24  ;;  %v13897_v32 = vcombine.low %v11172_v28, %v11182_v52  ;;  %v11697_v9 = vrot.slane %v11695_v36, 4  ;;  %v11586_v20 = vld [vmem:[#allocation2 + $0x5c] sm:$0x1]  ;;  %v11589_v11 = vld [vmem:[#allocation2 + $0x68] sm:$0x1] }
 0x503   : > { %v13896_v58 = vcombine.low %v11148_v49, %v11158_v19  ;;  %v11671_v63 = vsel %vm16467_vm5, %v11669_v60, %v11670_v47  ;;  %v11698_v2 = vrot.slane %v11583_v6, 5  ;;  %v13910_v23 = vrot.slane %v11581_v42, 9  ;;  %v11584_v31 = vld [vmem:[#allocation2 + $0x54] sm:$0xe]  ;;  %v11591_v49 = vld [vmem:[#allocation2 + $0x70] sm:$0xf] }
 0x504   : > { %v13938_v38 = vcombine.low %v11668_v56, %v11671_v63  ;;  %v11709_v57 = vrot.slane %v11588_v33, 5  ;;  %v11689_v22 = vsel %vm16467_vm5, %v13909_v10, %v11688_v45  ;;  %v11704_v39 = vrot.slane %v11702_v48, 4  ;;  %v11594_v60 = vld [vmem:[#allocation2 + $0x7c] sm:$0xf]  ;;  %v11599_v41 = vld [vmem:[#allocation2 + $0x90] sm:$0xe] }
 0x505   : > { %v11699_v46 = vsel %vm16467_vm5, %v11697_v9, %v11698_v2  ;;  %v11696_v19 = vsel %vm16467_vm5, %v13910_v23, %v11695_v36  ;;  %v11712_v16 = vrot.slane %v11589_v11, 5  ;;  %v13911_v28 = vrot.slane %v11584_v31, 9  ;;  %v11609_v31 = vld [vmem:[#allocation2 + $0xb8] sm:$0xf] }
 0x506   : > { %v13942_v18 = vcombine.low %v11696_v19, %v11699_v46  ;;  %v11716_v5 = vrot.slane %v11591_v49, 5  ;;  %v13912_v27 = vrot.slane %v11587_v61, 9  ;;  %v11723_v13 = vrot.slane %v11594_v60, 5  ;;  %v11605_v49 = vld [vmem:[#allocation2 + $0xa8] sm:$0xe] }
 0x507   : > { %v11719_v34 = vrot.slane %v11592_v50, 5  ;;  %v13913_v0 = vrot.slane %v11590_v53, 9  ;;  %v11730_v4 = vrot.slane %v11597_v40, 5  ;;  %v13914_v21 = vrot.slane %v11593_v26, 9  ;;  %v11611_v40 = vld [vmem:[#allocation2 + $0xc0] sm:$0xe] }
 0x508   : > { %15283 = vmatmul.mubr.bf16.gmra.mrb[20].mxu1 %v13893_v30  ;;  %v11690_v30 = vrot.slane %v11688_v45, 4  ;;  %v11710_v63 = vsel %vm16467_vm5, %v13912_v27, %v11709_v57  ;;  %v11718_v44 = vrot.slane %v11716_v5, 4  ;;  %v11725_v12 = vrot.slane %v11723_v13, 4 }
 0x509   : > { %15286 = vmatprep.mubr.bf16.mxu1 %v13894_v37  ;;  %v11691_v37 = vrot.slane %v11580_v15, 5  ;;  %v11737_v43 = vrot.slane %v11600_v59, 5  ;;  %v11717_v55 = vsel %vm16467_vm5, %v13913_v0, %v11716_v5  ;;  %v11724_v1 = vsel %vm16467_vm5, %v13914_v21, %v11723_v13  ;;  %v11614_v59 = vld [vmem:[#allocation2 + $0xcc] sm:$0xe] }
 0x50a   : > { %v11720_v8 = vsel %vm16467_vm5, %v11718_v44, %v11719_v34  ;;  %v11732_v15 = vrot.slane %v11730_v4, 4  ;;  %v11744_v10 = vrot.slane %v11603_v14, 5  ;;  %v11613_v44 = vld [vmem:[#allocation2 + $0xc8] sm:$0x1]  ;;  %v13966_v14 = vld [vmem:[%s16166_s29 + $0x1c] sm:$0xf] }
 0x50b   : > { %v11692_v35 = vsel %vm16467_vm5, %v11690_v30, %v11691_v37  ;;  %v13945_v36 = vcombine.low %v11717_v55, %v11720_v8  ;;  %v11596_v30 = vld [vmem:[#allocation2 + $0x84] sm:$0xe]  ;;  %v11739_v6 = vrot.slane %v11737_v43, 4  ;;  %v11606_v37 = vld [vmem:[#allocation2 + $0xac] sm:$0xf]  ;;  %v11768_v26 = vrot.slane %v11613_v44, 5 }
 0x50c   : > { %v13941_v24 = vcombine.low %v11689_v22, %v11692_v35  ;;  %v13915_v33 = vrot.slane %v11596_v30, 9  ;;  %v13916_v35 = vrot.slane %v11599_v41, 9  ;;  %v11751_v23 = vrot.slane %v11606_v37, 5 }
 0x50e   : > { %v11731_v46 = vsel %vm16467_vm5, %v13915_v33, %v11730_v4  ;;  %v11738_v22 = vsel %vm16467_vm5, %v13916_v35, %v11737_v43  ;;  %v11753_v11 = vrot.slane %v11751_v23, 4  ;;  %v13920_v4 = vrot.slane %v11611_v40, 9 }
 0x50f   : > { %v13921_v43 = vrot.slane %v11614_v59, 9  ;;  %v12249_v33 = vshrl.u32 %v13966_v14, 16 }
 0x510   : > { %15287 = vmatmul.mubr.bf16.gmra.mrb[24].mxu1 %v13895_v25  ;;  %v11711_v25 = vrot.slane %v11709_v57, 4 }
 0x511   : > { %15290 = vmatprep.mubr.bf16.mxu1 %v13896_v58  ;;  %v11705_v58 = vrot.slane %v11586_v20, 5  ;;  %v11746_v20 = vrot.slane %v11744_v10, 4 }
 0x512   : > { %v11713_v47 = vsel %vm16467_vm5, %v11711_v25, %v11712_v16 }
 0x513   : > { %v11706_v52 = vsel %vm16467_vm5, %v11704_v39, %v11705_v58  ;;  %v13944_v56 = vcombine.low %v11710_v63, %v11713_v47  ;;  %v11602_v39 = vld [vmem:[#allocation2 + $0x9c] sm:$0xe]  ;;  %v11612_v58 = vld [vmem:[#allocation2 + $0xc4] sm:$0xf]  ;;  %v11615_v63 = vld [vmem:[#allocation2 + $0xd0] sm:$0xf] }
 0x514   : > { %v13917_v60 = vrot.slane %v11602_v39, 9  ;;  %v11765_v27 = vrot.slane %v11612_v58, 5  ;;  %v11772_v34 = vrot.slane %v11615_v63, 5  ;;  %v13964_v58 = vld [vmem:[%s16166_s29 + $0x14] sm:$0x1] }
 0x516   : > { %v11745_v47 = vsel %vm16467_vm5, %v13917_v60, %v11744_v10  ;;  %v11767_v53 = vrot.slane %v11765_v27, 4  ;;  %v11774_v55 = vrot.slane %v11772_v34, 4  ;;  %v13972_v60 = vld [vmem:[%s16166_s29 + $0x34] sm:$0xf] }
 0x518   : > { %15291 = vmatmul.mubr.bf16.gmra.mrb[28].mxu1 %v13897_v32  ;;  %v11703_v32 = vsel %vm16467_vm5, %v13911_v28, %v11702_v48  ;;  %v11758_v28 = vrot.slane %v11609_v31, 5  ;;  %v11769_v21 = vsel %vm16467_vm5, %v11767_v53, %v11768_v26 }
 0x519   : > { %15310 = vmatprep.mubr.bf16.mxu1 %v13938_v38  ;;  %v13943_v29 = vcombine.low %v11703_v32, %v11706_v52  ;;  %v11595_v38 = vld [vmem:[#allocation2 + $0x80] sm:$0x1]  ;;  %v13918_v52 = vrot.slane %v11605_v49, 9 }
 0x51a   : > { %v11726_v3 = vrot.slane %v11595_v38, 5  ;;  %v11608_v38 = vld [vmem:[#allocation2 + $0xb4] sm:$0xe] }
 0x51b   : > { %v11752_v32 = vsel %vm16467_vm5, %v13918_v52, %v11751_v23  ;;  %v13919_v0 = vrot.slane %v11608_v38, 9  ;;  %v13968_v52 = vld [vmem:[%s16166_s29 + $0x24] sm:$0xf] }
 0x51c   : > { %v11727_v45 = vsel %vm16467_vm5, %v11725_v12, %v11726_v3  ;;  %v11616_v3 = vld [vmem:[#allocation2 + $0xd4] sm:$0x1]  ;;  %v12260_v53 = vshrl.u32 %v13968_v52, 16 }
 0x51d   : > { %v13946_v7 = vcombine.low %v11724_v1, %v11727_v45  ;;  %v11759_v45 = vsel %vm16467_vm5, %v13919_v0, %v11758_v28  ;;  %v13970_v0 = vld [vmem:[%s16166_s29 + $0x2c] sm:$0x1] }
 0x520   : > { %15311 = vmatmul.mubr.bf16.vlgmr.msra.gmra.mrb[0].mxu1 %v13939_v62  ;;  %v11598_v62 = vld [vmem:[#allocation2 + $0x8c] sm:$0x1] }
 0x521   : > { %15314 = vmatprep.mubr.bf16.mxu1 %v13940_v54  ;;  %v11601_v54 = vld [vmem:[#allocation2 + $0x98] sm:$0x1]  ;;  %v11733_v9 = vrot.slane %v11598_v62, 5  ;;  %v11766_v62 = vsel %vm16467_vm5, %v13920_v4, %v11765_v27 }
 0x522   : > { %v11740_v42 = vrot.slane %v11601_v54, 5 }
 0x523   : > { %v11734_v2 = vsel %vm16467_vm5, %v11732_v15, %v11733_v9  ;;  %v11773_v15 = vsel %vm16467_vm5, %v13921_v43, %v11772_v34  ;;  %v13962_v9 = vld [vmem:[%s16166_s29 + $0xc] sm:$0xf] }
 0x524   : > { %v11741_v48 = vsel %vm16467_vm5, %v11739_v6, %v11740_v42  ;;  %v13947_v57 = vcombine.low %v11731_v46, %v11734_v2  ;;  %v13965_v6 = vld [vmem:[%s16166_s29 + $0x18] sm:$0xf]  ;;  %v12245_v42 = vshll.u32 %v13966_v14, 16  ;;  %v13963_v2 = vld [vmem:[%s16166_s29 + $0x10] sm:$0xf]  ;;  %v12212_v10 = vshrl.u32 %v13962_v9, 16 }
 0x525   : > { %v13948_v19 = vcombine.low %v11738_v22, %v11741_v48  ;;  %v12236_v41 = vshrl.u32 %v13965_v6, 16  ;;  %v12239_v37 = vshll.u32 %v13965_v6, 16  ;;  %v12215_v35 = vshll.u32 %v13962_v9, 16 }
 0x526   : > { %v12247_v51 = vrot.slane %v12245_v42, 5  ;;  %v12221_v46 = vshll.u32 %v13963_v2, 16  ;;  %v13974_v42 = vld [vmem:[%s16166_s29 + $0x3c] sm:$0xf] }
 0x527   : > { %v12238_v48 = vrot.slane %v12236_v41, 4  ;;  %v12241_v23 = vrot.slane %v12239_v37, 5  ;;  %v12217_v22 = vrot.slane %v12215_v35, 5  ;;  %v13978_v37 = vld [vmem:[%s16166_s29 + $0x4c] sm:$0xf] }
 0x528   : > { %15315 = vmatmul.mubr.bf16.gmra.mrb[4].mxu1 %v13941_v24  ;;  %v11604_v24 = vld [vmem:[#allocation2 + $0xa4] sm:$0x1] }
 0x529   : > { %15318 = vmatprep.mubr.bf16.mxu1 %v13942_v18  ;;  %v11607_v18 = vld [vmem:[#allocation2 + $0xb0] sm:$0x1]  ;;  %v11747_v25 = vrot.slane %v11604_v24, 5  ;;  %v12225_v24 = vshrl.u32 %v13963_v2, 16  ;;  %v12242_v39 = vor.u32 %v12241_v23, %v12238_v48  ;;  %v13983_v23 = vld [vmem:[%s16166_s29 + $0x60] sm:$0xf] }
 0x52a   : > { %v11754_v61 = vrot.slane %v11607_v18, 5  ;;  %v13971_v18 = vld [vmem:[%s16166_s29 + $0x30] sm:$0xf] }
 0x52b   : > { %v11748_v16 = vsel %vm16467_vm5, %v11746_v20, %v11747_v25  ;;  %v12251_v20 = vrot.slane %v12249_v33, 4  ;;  %v12223_v25 = vrot.slane %v12221_v46, 5  ;;  %v13975_v33 = vld [vmem:[%s16166_s29 + $0x40] sm:$0xf] }
 0x52c   : > { %v11755_v5 = vsel %vm16467_vm5, %v11753_v11, %v11754_v61  ;;  %v13949_v13 = vcombine.low %v11745_v47, %v11748_v16  ;;  %v12227_v61 = vrot.slane %v12225_v24, 4  ;;  %v12284_v16 = vshrl.u32 %v13971_v18, 16  ;;  %v13980_v24 = vld [vmem:[%s16166_s29 + $0x54] sm:$0xf] }
 0x52d   : > { %v13950_v50 = vcombine.low %v11752_v32, %v11755_v5  ;;  %v12252_v49 = vor.u32 %v12251_v20, %v12247_v51  ;;  %v12243_v5 = vrot.slane %v12242_v39, 4  ;;  %v12231_v47 = vshll.u32 %v13964_v58, 16  ;;  %v13969_v32 = vld [vmem:[%s16166_s29 + $0x28] sm:$0xf] }
 0x52e   : > { %v12286_v44 = vrot.slane %v12284_v16, 4  ;;  %v12269_v40 = vshll.u32 %v13969_v32, 16  ;;  %v12273_v34 = vshrl.u32 %v13969_v32, 16  ;;  %v12308_v20 = vshrl.u32 %v13974_v42, 16 }
 0x52f   : > { %v12253_v63 = vrot.slane %v12252_v49, 4  ;;  %v12248_v26 = vsel %vm16248_vm2, %v12243_v5, %v12247_v51  ;;  %v12233_v59 = vrot.slane %v12231_v47, 5  ;;  %v12317_v39 = vshll.u32 %v13975_v33, 16  ;;  %v13979_v47 = vld [vmem:[%s16166_s29 + $0x50] sm:$0x1] }
 0x530   : > { %15319 = vmatmul.mubr.bf16.gmra.mrb[8].mxu1 %v13943_v29  ;;  %v11610_v29 = vld [vmem:[#allocation2 + $0xbc] sm:$0x1]  ;;  %v18507_v6 = vunpack.c.l.bf16 %v12248_v26  ;;  %v12383_v49 = vshll.u32 %v13983_v23, 16  ;;  %v12359_v16 = vshll.u32 %v13980_v24, 16 }
 0x531   : > { %15322 = vmatprep.mubr.bf16.mxu1 %v13944_v56  ;;  %v11760_v56 = vrot.slane %v11758_v28, 4  ;;  %v11761_v12 = vrot.slane %v11610_v29, 5  ;;  %v12287_v28 = vshll.u32 %v13971_v18, 16  ;;  %v12311_v18 = vshll.u32 %v13974_v42, 16  ;;  %v13985_v42 = vld [vmem:[%s16166_s29 + $0x68] sm:$0x1] }
 0x533   : > { %v11762_v8 = vsel %vm16467_vm5, %v11760_v56, %v11761_v12  ;;  %v12297_v56 = vshrl.u32 %v13972_v60, 16  ;;  %v12289_v38 = vrot.slane %v12287_v28, 5  ;;  %v12263_v12 = vshll.u32 %v13968_v52, 16 }
 0x534   : > { %v13951_v1 = vcombine.low %v11759_v45, %v11762_v8 }
 0x535   : > { %v12290_v43 = vor.u32 %v12289_v38, %v12286_v44  ;;  %v13976_v38 = vld [vmem:[%s16166_s29 + $0x44] sm:$0x1] }
 0x537   : > { %v12291_v2 = vrot.slane %v12290_v43, 4 }
 0x538   : > { %15323 = vmatmul.mubr.bf16.gmra.mrb[12].mxu1 %v13945_v36  ;;  %v11775_v36 = vrot.slane %v11616_v3, 5  ;;  %v13973_v3 = vld [vmem:[%s16166_s29 + $0x38] sm:$0x1] }
 0x539   : > { %15326 = vmatprep.mubr.bf16.mxu1 %v13946_v7  ;;  %v13952_v7 = vcombine.low %v11766_v62, %v11769_v21  ;;  %v18504_v62 = vrot.slane %v12269_v40, 5  ;;  %v12385_v40 = vrot.slane %v12383_v49, 5 }
 0x53a   : > { %v11776_v54 = vsel %vm16467_vm5, %v11774_v55, %v11775_v36  ;;  %v12262_v55 = vrot.slane %v12260_v53, 4  ;;  %v12265_v36 = vrot.slane %v12263_v12, 5 }
 0x53b   : > { %v13953_v30 = vcombine.low %v11773_v15, %v11776_v54  ;;  %v12275_v15 = vrot.slane %v12273_v34, 4  ;;  %v12279_v54 = vshll.u32 %v13970_v0, 16 }
 0x53d   : > { %v12276_v46 = vor.u32 %v12275_v15, %v18504_v62 }
 0x53f   : > { %v12277_v26 = vrot.slane %v12276_v46, 4 }
 0x540   : > { %15327 = vmatmul.mubr.bf16.gmra.mrb[16].mxu1 %v13947_v57  ;;  %v12214_v57 = vrot.slane %v12212_v10, 4  ;;  %v12266_v10 = vor.u32 %v12265_v36, %v12262_v55  ;;  %v12351_v55 = vshll.u32 %v13979_v47, 16  ;;  %v12327_v36 = vshll.u32 %v13976_v38, 16  ;;  %v13987_v38 = vld [vmem:[%s16166_s29 + $0x70] sm:$0xf] }
 0x541   : > { %15330 = vmatprep.mubr.bf16.mxu1 %v13948_v19  ;;  %v13967_v19 = vld [vmem:[%s16166_s29 + $0x20] sm:$0x1] }
 0x542   : > { %v12255_v11 = vshll.u32 %v13967_v19, 16  ;;  %v12218_v31 = vor.u32 %v12217_v22, %v12214_v57  ;;  %v18523_v57 = vrot.slane %v12279_v54, 5  ;;  %v12341_v19 = vshll.u32 %v13978_v37, 16 }
 0x543   : > { %v12267_v58 = vrot.slane %v12266_v10, 4 }
 0x544   : > { %v12257_v27 = vrot.slane %v12255_v11, 5  ;;  %v12219_v29 = vrot.slane %v12218_v31, 4  ;;  %v12345_v11 = vshrl.u32 %v13978_v37, 16  ;;  %v12321_v31 = vshrl.u32 %v13975_v33, 16 }
 0x545   : > { %v18533_v32 = vrot.slane %v12341_v19, 5  ;;  %v12272_v34 = vsel %vm16248_vm2, %v12267_v58, %v18504_v62  ;;  %v13989_v19 = vld [vmem:[%s16166_s29 + $0x78] sm:$0xf] }
 0x546   : > { %v12224_v8 = vsel %vm16248_vm2, %v12219_v29, %v12223_v25  ;;  %v12258_v4 = vsel %vm16248_vm2, %v12253_v63, %v12257_v27  ;;  %v12310_v29 = vrot.slane %v12308_v20, 4  ;;  %v12313_v63 = vrot.slane %v12311_v18, 5 }
 0x547   : > { %v18509_v14 = vunpack.c.l.bf16 %v12224_v8  ;;  %v18511_v9 = vunpack.c.l.bf16 %v12258_v4  ;;  %v12347_v44 = vrot.slane %v12345_v11, 4  ;;  %v12323_v53 = vrot.slane %v12321_v31, 4  ;;  %v13986_v11 = vld [vmem:[%s16166_s29 + $0x6c] sm:$0xf] }
 0x548   : > { %15331 = vmatmul.mubr.bf16.gmra.mrb[20].mxu1 %v13949_v13  ;;  %v12293_v13 = vshll.u32 %v13972_v60, 16  ;;  %v12356_v60 = vshrl.u32 %v13980_v24, 16  ;;  %v12314_v43 = vor.u32 %v12313_v63, %v12310_v29  ;;  %v18546_v54 = vunpack.c.l.bf16 %v12272_v34 }
 0x549   : > { %15334 = vmatprep.mubr.bf16.mxu1 %v13950_v50  ;;  %v12228_v50 = vor.u32 %v12227_v61, %v12223_v25  ;;  %v12380_v25 = vshrl.u32 %v13983_v23, 16  ;;  %v12329_v24 = vrot.slane %v12327_v36, 5  ;;  %v12404_v47 = vshrl.u32 %v13986_v11, 16 }
 0x54a   : > { %v18502_v45 = vrot.slane %v12293_v13, 5  ;;  %v13984_v13 = vld [vmem:[%s16166_s29 + $0x64] sm:$0xf]  ;;  %v12315_v46 = vrot.slane %v12314_v43, 4  ;;  %v12417_v36 = vshrl.u32 %v13987_v38, 16 }
 0x54b   : > { %v12229_v21 = vrot.slane %v12228_v50, 4  ;;  %v18535_v50 = vrot.slane %v12317_v39, 5  ;;  %v12382_v12 = vrot.slane %v12380_v25, 4  ;;  %v12389_v0 = vshll.u32 %v13984_v13, 16 }
 0x54c   : > { %v12296_v52 = vsel %vm16248_vm2, %v12291_v2, %v18502_v45  ;;  %v12393_v8 = vshrl.u32 %v13984_v13, 16  ;;  %v12399_v39 = vshll.u32 %v13985_v42, 16  ;;  %v12407_v13 = vshll.u32 %v13986_v11, 16  ;;  %v13995_v42 = vld [vmem:[%s16166_s29 + $0x90] sm:$0xf] }
 0x54d   : > { %v12234_v41 = vsel %vm16248_vm2, %v12229_v21, %v12233_v59  ;;  %v12358_v59 = vrot.slane %v12356_v60, 4  ;;  %v12324_v15 = vor.u32 %v12323_v53, %v18535_v50  ;;  %v12386_v62 = vor.u32 %v12385_v40, %v12382_v12  ;;  %v13990_v60 = vld [vmem:[%s16166_s29 + $0x7c] sm:$0xf] }
 0x54e   : > { %v18526_v28 = vunpack.c.l.bf16 %v12234_v41  ;;  %v12282_v41 = vsel %vm16248_vm2, %v12277_v26, %v18523_v57  ;;  %v12391_v33 = vrot.slane %v12389_v0, 5  ;;  %v12395_v10 = vrot.slane %v12393_v8, 4 }
 0x54f   : > { %v12387_v18 = vrot.slane %v12386_v62, 4  ;;  %v18560_v31 = vunpack.c.l.bf16 %v12282_v41  ;;  %v12437_v12 = vshll.u32 %v13990_v60, 16  ;;  %v12406_v8 = vrot.slane %v12404_v47, 4 }
 0x550   : > { %15335 = vmatmul.mubr.bf16.gmra.mrb[24].mxu1 %v13951_v1  ;;  %v12299_v1 = vrot.slane %v12297_v56, 4  ;;  %v13981_v56 = vld [vmem:[%s16166_s29 + $0x58] sm:$0xf]  ;;  %v12396_v58 = vor.u32 %v12395_v10, %v12391_v33  ;;  %v12419_v11 = vrot.slane %v12417_v36, 4 }
 0x551   : > { %15338 = vmatprep.mubr.bf16.mxu1 %v13952_v7  ;;  %v12303_v7 = vshll.u32 %v13973_v3, 16  ;;  %v12361_v3 = vrot.slane %v12359_v16, 5  ;;  %v12365_v4 = vshll.u32 %v13981_v56, 16  ;;  %v12369_v21 = vshrl.u32 %v13981_v56, 16 }
 0x552   : > { %v12300_v35 = vor.u32 %v12299_v1, %v18502_v45  ;;  %v18542_v1 = vunpack.c.l.bf16 %v12296_v52  ;;  %v12428_v16 = vshrl.u32 %v13989_v19, 16  ;;  %v12431_v52 = vshll.u32 %v13989_v19, 16 }
 0x553   : > { %v18520_v51 = vrot.slane %v12303_v7, 5  ;;  %v12348_v7 = vor.u32 %v12347_v44, %v18533_v32  ;;  %v12362_v37 = vor.u32 %v12361_v3, %v12358_v59  ;;  %v12367_v2 = vrot.slane %v12365_v4, 5  ;;  %v18581_v3 = vld [vmem:[%s18797_s4] ss:$0 sm:$0xff] }
 0x554   : > { %v12301_v5 = vrot.slane %v12300_v35, 4  ;;  %v13982_v35 = vld [vmem:[%s16166_s29 + $0x5c] sm:$0x1]  ;;  %v12392_v56 = vsel %vm16248_vm2, %v12387_v18, %v12391_v33  ;;  %v12401_v44 = vrot.slane %v12399_v39, 5  ;;  %v12397_v40 = vrot.slane %v12396_v58, 4 }
 0x555   : > { %v12349_v20 = vrot.slane %v12348_v7, 4  ;;  %v12363_v25 = vrot.slane %v12362_v37, 4  ;;  %v12375_v49 = vshll.u32 %v13982_v35, 16  ;;  %v12430_v26 = vrot.slane %v12428_v16, 4  ;;  %v13991_v7 = vld [vmem:[%s16166_s29 + $0x80] sm:$0x1] }
 0x556   : > { %v12433_v59 = vrot.slane %v12431_v52, 5  ;;  %v12409_v4 = vrot.slane %v12407_v13, 5  ;;  %v18592_v62 = vunpack.c.l.bf16 %v12392_v56  ;;  %v18596_v41 = vrot.slane %v12437_v12, 5 }
 0x557   : > { %v12377_v53 = vrot.slane %v12375_v49, 5  ;;  %v12402_v10 = vsel %vm16248_vm2, %v12397_v40, %v12401_v44  ;;  %v12447_v19 = vshll.u32 %v13991_v7, 16 }
 0x558   : > { %15339 = vmatmul.mubr.bf16.gmra.mrb[28].mxu1 %v13953_v30  ;;  %v13977_v30 = vld [vmem:[%s16166_s29 + $0x48] sm:$0xf]  ;;  %v18621_v13 = vunpack.c.l.bf16 %v12402_v10 }
 0x559   : > { %v12332_v48 = vshrl.u32 %v13977_v30, 16  ;;  %v12335_v22 = vshll.u32 %v13977_v30, 16  ;;  %v12306_v30 = vsel %vm16248_vm2, %v12301_v5, %v18520_v51  ;;  %v12325_v51 = vrot.slane %v12324_v15, 4 }
 0x55a   : > { %v18558_v57 = vunpack.c.l.bf16 %v12306_v30  ;;  %v12449_v44 = vrot.slane %v12447_v19, 5 }
 0x55b   : > { %v12334_v61 = vrot.slane %v12332_v48, 4  ;;  %v12337_v27 = vrot.slane %v12335_v22, 5  ;;  %v12371_v48 = vrot.slane %v12369_v21, 4  ;;  %v12353_v22 = vrot.slane %v12351_v55, 5 }
 0x55c   : > { %v12330_v63 = vsel %vm16248_vm2, %v12325_v51, %v12329_v24  ;;  %v12413_v21 = vshll.u32 %v13987_v38, 16 }
 0x55d   : > { %v12338_v45 = vor.u32 %v12337_v27, %v12334_v61  ;;  %v12372_v61 = vor.u32 %v12371_v48, %v12367_v2  ;;  %v12320_v27 = vsel %vm16248_vm2, %v12315_v46, %v18535_v50  ;;  %v12354_v29 = vsel %vm16248_vm2, %v12349_v20, %v12353_v22  ;;  %v13988_v20 = vld [vmem:[%s16166_s29 + $0x74] sm:$0x1] }
 0x55e   : > { %v12441_v50 = vshrl.u32 %v13990_v60, 16  ;;  %v18587_v43 = vunpack.c.l.bf16 %v12354_v29  ;;  %v18589_v55 = vunpack.c.l.bf16 %v12330_v63  ;;  %v12434_v48 = vor.u32 %v12433_v59, %v12430_v26 }
 0x55f   : > { %v12339_v23 = vrot.slane %v12338_v45, 4  ;;  %v12373_v34 = vrot.slane %v12372_v61, 4  ;;  %v18585_v45 = vunpack.c.l.bf16 %v12320_v27  ;;  %v12410_v22 = vor.u32 %v12409_v4, %v12406_v8 }
 0x560   : > { %v12443_v37 = vrot.slane %v12441_v50, 4  ;;  %v18606_v24 = vrot.slane %v12413_v21, 5  ;;  %v12435_v52 = vrot.slane %v12434_v48, 4 }
 0x561   : > { %v12344_v5 = vsel %vm16248_vm2, %v12339_v23, %v18533_v32  ;;  %v12368_v32 = vsel %vm16248_vm2, %v12363_v25, %v12367_v2  ;;  %v12378_v35 = vsel %vm16248_vm2, %v12373_v34, %v12377_v53  ;;  %v12476_v25 = vshrl.u32 %v13995_v42, 16 }
 0x562   : > { %v18583_v0 = vunpack.c.l.bf16 %v12344_v5  ;;  %v18594_v30 = vunpack.c.l.bf16 %v12368_v32  ;;  %v12444_v61 = vor.u32 %v12443_v37, %v18596_v41  ;;  %v12423_v5 = vshll.u32 %v13988_v20, 16  ;;  %v13996_v32 = vld [vmem:[%s16166_s29 + $0x94] sm:$0xf] }
 0x563   : > { %v12411_v29 = vrot.slane %v12410_v22, 4  ;;  %v18625_v56 = vunpack.c.l.bf16 %v12378_v35  ;;  %v12420_v38 = vor.u32 %v12419_v11, %v18606_v24  ;;  %v12440_v26 = vsel %vm16248_vm2, %v12435_v52, %v18596_v41 }
 0x564   : > { %v12445_v12 = vrot.slane %v12444_v61, 4  ;;  %v18635_v59 = vrot.slane %v12423_v5, 5  ;;  %v12485_v7 = vshll.u32 %v13996_v32, 16  ;;  %v12489_v10 = vshrl.u32 %v13996_v32, 16 }
 0x565   : > { %v12416_v36 = vsel %vm16248_vm2, %v12411_v29, %v18606_v24 }
 0x5f3   : > { %v15312_v15 = vpop.f32.mrb[0].mxu1 }
 0x5f4   : > { %v12668_v33 = vadd.f32 %v15312_v15, %v18581_v3  ;;  %v11972_v2 = vpop.f32.mrb[1].mxu1  ;;  %v13993_v15 = vld [vmem:[%s16166_s29 + $0x88] sm:$0xf] }
 0x5f5   : > { %v12666_v23 = vadd.f32 %v18581_v3, %v11972_v2  ;;  %v15313_v46 = vpop.f32.mrb[2].mxu1  ;;  %v12421_v2 = vrot.slane %v12420_v38, 4  ;;  %v12461_v19 = vshll.u32 %v13993_v15, 16 }
 0x5f6   : > { %v12732_v51 = vadd.f32 %v18507_v6, %v12668_v33  ;;  %v12669_v18 = vadd.f32 %v15313_v46, %v18581_v3  ;;  %v11975_v39 = vpop.f32.mrb[3].mxu1  ;;  %v12479_v6 = vshll.u32 %v13995_v42, 16 }
 0x5f7   : > { %v12730_v49 = vadd.f32 %v18509_v14, %v12666_v23  ;;  %v12667_v58 = vadd.f32 %v18581_v3, %v11975_v39  ;;  %v13992_v14 = vld [vmem:[%s16166_s29 + $0x84] sm:$0xf]  ;;  %v12450_v23 = vsel %vm16248_vm2, %v12445_v12, %v12449_v44  ;;  %v12465_v39 = vshrl.u32 %v13993_v15, 16 }
 0x5f8   : > { %v12764_v60 = vmax.f32 %v12732_v51, 0.0  ;;  %v12733_v16 = vadd.f32 %v18511_v9, %v12669_v18  ;;  %v12481_v50 = vrot.slane %v12479_v6, 5  ;;  %v12452_v8 = vshrl.u32 %v13992_v14, 16 }
 0x5f9   : > { %v12762_v27 = vmax.f32 %v12730_v49, 0.0  ;;  %v12731_v47 = vadd.f32 %v18526_v28, %v12667_v58  ;;  %v12478_v28 = vrot.slane %v12476_v25, 4  ;;  %v12455_v37 = vshll.u32 %v13992_v14, 16 }
 0x5fa   : > { %12796 = vst [vmem:[%s18614_s7 + $0x10] sm:$0xff] %v12764_v60  ;;  %v12765_v63 = vmax.f32 %v12733_v16, 0.0  ;;  %v18653_v25 = vunpack.c.l.bf16 %v12440_v26  ;;  %v12487_v49 = vrot.slane %v12485_v7, 5  ;;  %v12491_v58 = vrot.slane %v12489_v10, 4  ;;  %v13997_v16 = vld [vmem:[%s16166_s29 + $0x98] sm:$0x1] }
 0x5fb   : > { %12794 = vst [vmem:[%s18614_s7] sm:$0xff] %v12762_v27  ;;  %v12763_v9 = vmax.f32 %v12731_v47, 0.0  ;;  %v15316_v53 = vpop.f32.mrb[4].mxu1  ;;  %v12482_v46 = vor.u32 %v12481_v50, %v12478_v28  ;;  %v12457_v18 = vrot.slane %v12455_v37, 5  ;;  %v18656_v6 = vunpack.c.l.bf16 %v12416_v36  ;;  %v13994_v47 = vld [vmem:[%s16166_s29 + $0x8c] sm:$0x1] }
 0x5fc   : > { %12797 = vst [vmem:[%s18614_s7 + $0x18] sm:$0xff] %v12765_v63  ;;  %v12672_v40 = vadd.f32 %v15316_v53, %v18581_v3  ;;  %v11988_v34 = vpop.f32.mrb[5].mxu1  ;;  %v18658_v60 = vunpack.c.l.bf16 %v12450_v23  ;;  %v12426_v27 = vsel %vm16248_vm2, %v12421_v2, %v18635_v59  ;;  %v18669_v32 = vrot.slane %v12461_v19, 5  ;;  %v13998_v7 = vld [vmem:[%s16166_s29 + $0x9c] sm:$0xf] }
 0x5fd   : > { %12795 = vst [vmem:[%s18614_s7 + $0x8] sm:$0xff] %v12763_v9  ;;  %v12670_v4 = vadd.f32 %v18581_v3, %v11988_v34  ;;  %v15317_v21 = vpop.f32.mrb[6].mxu1  ;;  %v12467_v9 = vrot.slane %v12465_v39, 4  ;;  %v12492_v50 = vor.u32 %v12491_v58, %v12487_v49  ;;  %v18683_v2 = vunpack.c.l.bf16 %v12426_v27 }
 0x5fe   : > { %v12736_v42 = vadd.f32 %v18542_v1, %v12672_v40  ;;  %v12673_v33 = vadd.f32 %v15317_v21, %v18581_v3  ;;  %v11991_v41 = vpop.f32.mrb[7].mxu1  ;;  %v12454_v1 = vrot.slane %v12452_v8, 4  ;;  %v12495_v40 = vshll.u32 %v13997_v16, 16 }
 0x5ff   : > { %v12734_v35 = vadd.f32 %v18546_v54, %v12670_v4  ;;  %v12671_v48 = vadd.f32 %v18581_v3, %v11991_v41  ;;  %v14001_v54 = vld [vmem:[%s16166_s29 + $0xa8] sm:$0xf]  ;;  %v12471_v8 = vshll.u32 %v13994_v47, 16  ;;  %v12493_v10 = vrot.slane %v12492_v50, 4 }
 0x600   : > { %v12768_v22 = vmax.f32 %v12736_v42, 0.0  ;;  %v12737_v24 = vadd.f32 %v18558_v57, %v12673_v33  ;;  %v12524_v29 = vshrl.u32 %v14001_v54, 16  ;;  %v12527_v14 = vshll.u32 %v14001_v54, 16  ;;  %v14002_v33 = vld [vmem:[%s16166_s29 + $0xac] sm:$0xf] }
 0x601   : > { %v12766_v20 = vmax.f32 %v12734_v35, 0.0  ;;  %v12735_v51 = vadd.f32 %v18560_v31, %v12671_v48  ;;  %v12483_v31 = vrot.slane %v12482_v46, 4  ;;  %v12458_v38 = vor.u32 %v12457_v18, %v12454_v1 }
 0x602   : > { %12800 = vst [vmem:[%s18614_s7 + $0x30] sm:$0xff] %v12768_v22  ;;  %v12769_v11 = vmax.f32 %v12737_v24, 0.0  ;;  %v12529_v36 = vrot.slane %v12527_v14, 5  ;;  %v12497_v35 = vrot.slane %v12495_v40, 5  ;;  %v12473_v46 = vrot.slane %v12471_v8, 5 }
 0x603   : > { %12798 = vst [vmem:[%s18614_s7 + $0x20] sm:$0xff] %v12766_v20  ;;  %v12767_v57 = vmax.f32 %v12735_v51, 0.0  ;;  %v15320_v61 = vpop.f32.mrb[8].mxu1  ;;  %v12488_v59 = vsel %vm16248_vm2, %v12483_v31, %v12487_v49  ;;  %v12459_v42 = vrot.slane %v12458_v38, 4  ;;  %v13999_v22 = vld [vmem:[%s16166_s29 + $0xa0] sm:$0xf] }
 0x604   : > { %12801 = vst [vmem:[%s18614_s7 + $0x38] sm:$0xff] %v12769_v11  ;;  %v12676_v52 = vadd.f32 %v15320_v61, %v18581_v3  ;;  %v12004_v5 = vpop.f32.mrb[9].mxu1  ;;  %v18686_v23 = vunpack.c.l.bf16 %v12488_v59  ;;  %v12533_v20 = vshll.u32 %v14002_v33, 16  ;;  %v12503_v51 = vshll.u32 %v13998_v7, 16 }
 0x605   : > { %12799 = vst [vmem:[%s18614_s7 + $0x28] sm:$0xff] %v12767_v57  ;;  %v12674_v63 = vadd.f32 %v18581_v3, %v12004_v5  ;;  %v15321_v44 = vpop.f32.mrb[10].mxu1  ;;  %v12464_v54 = vsel %vm16248_vm2, %v12459_v42, %v18669_v32  ;;  %v12537_v49 = vshrl.u32 %v14002_v33, 16  ;;  %v12498_v31 = vsel %vm16248_vm2, %v12493_v10, %v12497_v35 }
 0x606   : > { %v12740_v53 = vadd.f32 %v18583_v0, %v12676_v52  ;;  %v12677_v12 = vadd.f32 %v15321_v44, %v18581_v3  ;;  %v12007_v28 = vpop.f32.mrb[11].mxu1  ;;  %v12526_v0 = vrot.slane %v12524_v29, 4  ;;  %v12509_v16 = vshll.u32 %v13999_v22, 16  ;;  %v14003_v29 = vld [vmem:[%s16166_s29 + $0xb0] sm:$0x1] }
 0x607   : > { %v12738_v34 = vadd.f32 %v18585_v45, %v12674_v63  ;;  %v12675_v26 = vadd.f32 %v18581_v3, %v12007_v28  ;;  %v12468_v45 = vor.u32 %v12467_v9, %v18669_v32  ;;  %v12513_v47 = vshrl.u32 %v13999_v22, 16  ;;  %v14008_v22 = vld [vmem:[%s16166_s29 + $0xc4] sm:$0xf] }
 0x608   : > { %v12772_v4 = vmax.f32 %v12740_v53, 0.0  ;;  %v12741_v21 = vadd.f32 %v18587_v43, %v12677_v12  ;;  %v12530_v19 = vor.u32 %v12529_v36, %v12526_v0  ;;  %v12505_v44 = vrot.slane %v12503_v51, 5  ;;  %v14000_v53 = vld [vmem:[%s16166_s29 + $0xa4] sm:$0x1] }
 0x609   : > { %v12770_v15 = vmax.f32 %v12738_v34, 0.0  ;;  %v12739_v37 = vadd.f32 %v18589_v55, %v12675_v26  ;;  %v12500_v55 = vshrl.u32 %v13998_v7, 16  ;;  %v12469_v11 = vrot.slane %v12468_v45, 4  ;;  %v14007_v34 = vld [vmem:[%s16166_s29 + $0xc0] sm:$0xf] }
 0x60a   : > { %12804 = vst [vmem:[%s18614_s7 + $0x50] sm:$0xff] %v12772_v4  ;;  %v12773_v41 = vmax.f32 %v12741_v21, 0.0  ;;  %v12531_v63 = vrot.slane %v12530_v19, 4  ;;  %v18709_v28 = vunpack.c.l.bf16 %v12464_v54  ;;  %v12539_v50 = vrot.slane %v12537_v49, 4 }
 0x60b   : > { %12802 = vst [vmem:[%s18614_s7 + $0x40] sm:$0xff] %v12770_v15  ;;  %v12771_v43 = vmax.f32 %v12739_v37, 0.0  ;;  %v15324_v48 = vpop.f32.mrb[12].mxu1  ;;  %v12502_v27 = vrot.slane %v12500_v55, 4  ;;  %v12474_v9 = vsel %vm16248_vm2, %v12469_v11, %v12473_v46  ;;  %v12543_v40 = vshll.u32 %v14003_v29, 16 }
 0x60c   : > { %12805 = vst [vmem:[%s18614_s7 + $0x58] sm:$0xff] %v12773_v41  ;;  %v12680_v24 = vadd.f32 %v15324_v48, %v18581_v3  ;;  %v12020_v1 = vpop.f32.mrb[13].mxu1  ;;  %v18713_v59 = vunpack.c.l.bf16 %v12498_v31  ;;  %v12515_v8 = vrot.slane %v12513_v47, 4  ;;  %v18719_v0 = vunpack.c.l.bf16 %v12474_v9  ;;  %v14004_v41 = vld [vmem:[%s16166_s29 + $0xb4] sm:$0xf] }
 0x60d   : > { %12803 = vst [vmem:[%s18614_s7 + $0x48] sm:$0xff] %v12771_v43  ;;  %v12678_v18 = vadd.f32 %v18581_v3, %v12020_v1  ;;  %v15325_v39 = vpop.f32.mrb[14].mxu1  ;;  %v12506_v7 = vor.u32 %v12505_v44, %v12502_v27  ;;  %v12519_v42 = vshll.u32 %v14000_v53, 16  ;;  %v12572_v45 = vshrl.u32 %v14007_v34, 16 }
 0x60e   : > { %v12744_v58 = vadd.f32 %v18592_v62, %v12680_v24  ;;  %v12681_v57 = vadd.f32 %v15325_v39, %v18581_v3  ;;  %v12023_v61 = vpop.f32.mrb[15].mxu1  ;;  %v12575_v33 = vshll.u32 %v14007_v34, 16  ;;  %v18728_v46 = vrot.slane %v12543_v40, 5  ;;  %v14009_v40 = vld [vmem:[%s16166_s29 + $0xc8] sm:$0x1] }
 0x60f   : > { %v12742_v52 = vadd.f32 %v18594_v30, %v12678_v18  ;;  %v12679_v5 = vadd.f32 %v18581_v3, %v12023_v61  ;;  %v12535_v30 = vrot.slane %v12533_v20, 5  ;;  %v14005_v20 = vld [vmem:[%s16166_s29 + $0xb8] sm:$0xf]  ;;  %v12548_v18 = vshrl.u32 %v14004_v41, 16 }
 0x610   : > { %v12776_v14 = vmax.f32 %v12744_v58, 0.0  ;;  %v12745_v62 = vadd.f32 %v18621_v13, %v12681_v57  ;;  %v12551_v39 = vshll.u32 %v14004_v41, 16  ;;  %v12581_v49 = vshll.u32 %v14008_v22, 16 }
 0x611   : > { %v12774_v38 = vmax.f32 %v12742_v52, 0.0  ;;  %v12743_v32 = vadd.f32 %v18625_v56, %v12679_v5  ;;  %v18715_v56 = vrot.slane %v12509_v16, 5  ;;  %v12536_v36 = vsel %vm16248_vm2, %v12531_v63, %v12535_v30 }
 0x612   : > { %12808 = vst [vmem:[%s18614_s7 + $0x70] sm:$0xff] %v12776_v14  ;;  %v12777_v12 = vmax.f32 %v12745_v62, 0.0  ;;  %v12540_v48 = vor.u32 %v12539_v50, %v12535_v30  ;;  %v18733_v1 = vunpack.c.l.bf16 %v12536_v36  ;;  %v12585_v58 = vshrl.u32 %v14008_v22, 16 }
 0x613   : > { %12806 = vst [vmem:[%s18614_s7 + $0x60] sm:$0xff] %v12774_v38  ;;  %v12775_v13 = vmax.f32 %v12743_v32, 0.0  ;;  %v15328_v26 = vpop.f32.mrb[16].mxu1  ;;  %v12516_v19 = vor.u32 %v12515_v8, %v18715_v56  ;;  %v12507_v57 = vrot.slane %v12506_v7, 4  ;;  %v12557_v61 = vshll.u32 %v14005_v20, 16 }
 0x614   : > { %12809 = vst [vmem:[%s18614_s7 + $0x78] sm:$0xff] %v12777_v12  ;;  %v12684_v4 = vadd.f32 %v15328_v26, %v18581_v3  ;;  %v12036_v21 = vpop.f32.mrb[17].mxu1  ;;  %v12561_v31 = vshrl.u32 %v14005_v20, 16  ;;  %v12521_v5 = vrot.slane %v12519_v42, 5  ;;  %v12574_v27 = vrot.slane %v12572_v45, 4 }
 0x615   : > { %12807 = vst [vmem:[%s18614_s7 + $0x68] sm:$0xff] %v12775_v13  ;;  %v12682_v15 = vadd.f32 %v18581_v3, %v12036_v21  ;;  %v15329_v37 = vpop.f32.mrb[18].mxu1  ;;  %v12550_v14 = vrot.slane %v12548_v18, 4  ;;  %v12553_v62 = vrot.slane %v12551_v39, 5  ;;  %v12517_v38 = vrot.slane %v12516_v19, 4 }
 0x616   : > { %v12748_v10 = vadd.f32 %v18653_v25, %v12684_v4  ;;  %v12685_v35 = vadd.f32 %v15329_v37, %v18581_v3  ;;  %v12039_v43 = vpop.f32.mrb[19].mxu1  ;;  %v12583_v32 = vrot.slane %v12581_v49, 5  ;;  %v12587_v9 = vrot.slane %v12585_v58, 4  ;;  %v14006_v21 = vld [vmem:[%s16166_s29 + $0xbc] sm:$0x1] }
 0x617   : > { %v12746_v55 = vadd.f32 %v18656_v6, %v12682_v15  ;;  %v12683_v24 = vadd.f32 %v18581_v3, %v12039_v43  ;;  %v12559_v50 = vrot.slane %v12557_v61, 5  ;;  %v12563_v34 = vrot.slane %v12561_v31, 4 }
 0x618   : > { %v12780_v51 = vmax.f32 %v12748_v10, 0.0  ;;  %v12749_v25 = vadd.f32 %v18658_v60, %v12685_v35  ;;  %v12577_v60 = vrot.slane %v12575_v33, 5  ;;  %v12512_v8 = vsel %vm16248_vm2, %v12507_v57, %v18715_v56 }
 0x619   : > { %v12778_v54 = vmax.f32 %v12746_v55, 0.0  ;;  %v12747_v11 = vadd.f32 %v18683_v2, %v12683_v24  ;;  %v12541_v2 = vrot.slane %v12540_v48, 4  ;;  %v12554_v15 = vor.u32 %v12553_v62, %v12550_v14 }
 0x61a   : > { %12812 = vst [vmem:[%s18614_s7 + $0x90] sm:$0xff] %v12780_v51  ;;  %v12781_v6 = vmax.f32 %v12749_v25, 0.0  ;;  %v12578_v4 = vor.u32 %v12577_v60, %v12574_v27  ;;  %v12588_v42 = vor.u32 %v12587_v9, %v12583_v32  ;;  %v12591_v45 = vshll.u32 %v14009_v40, 16 }
 0x61b   : > { %12810 = vst [vmem:[%s18614_s7 + $0x80] sm:$0xff] %v12778_v54  ;;  %v12779_v16 = vmax.f32 %v12747_v11, 0.0  ;;  %v15332_v52 = vpop.f32.mrb[20].mxu1  ;;  %v12546_v7 = vsel %vm16248_vm2, %v12541_v2, %v18728_v46  ;;  %v12522_v33 = vsel %vm16248_vm2, %v12517_v38, %v12521_v5  ;;  %v12564_v41 = vor.u32 %v12563_v34, %v12559_v50 }
 0x61c   : > { %12813 = vst [vmem:[%s18614_s7 + $0x98] sm:$0xff] %v12781_v6  ;;  %v12688_v47 = vadd.f32 %v15332_v52, %v18581_v3  ;;  %v12052_v29 = vpop.f32.mrb[21].mxu1  ;;  %v12567_v10 = vshll.u32 %v14006_v21, 16  ;;  %v12722_v43 = vunpack.c.l.bf16 %v12512_v8  ;;  %v12579_v48 = vrot.slane %v12578_v4, 4 }
 0x61d   : > { %12811 = vst [vmem:[%s18614_s7 + $0x88] sm:$0xff] %v12779_v16  ;;  %v12686_v63 = vadd.f32 %v18581_v3, %v12052_v29  ;;  %v15333_v44 = vpop.f32.mrb[22].mxu1  ;;  %v12555_v55 = vrot.slane %v12554_v15, 4  ;;  %v12723_v20 = vunpack.c.l.bf16 %v12522_v33  ;;  %v12589_v51 = vrot.slane %v12588_v42, 4 }
 0x61e   : > { %v12752_v30 = vadd.f32 %v18686_v23, %v12688_v47  ;;  %v12689_v53 = vadd.f32 %v15333_v44, %v18581_v3  ;;  %v12055_v12 = vpop.f32.mrb[23].mxu1  ;;  %v12593_v25 = vrot.slane %v12591_v45, 5  ;;  %v12565_v11 = vrot.slane %v12564_v41, 4 }
 0x61f   : > { %v12750_v13 = vadd.f32 %v18709_v28, %v12686_v63  ;;  %v12687_v26 = vadd.f32 %v18581_v3, %v12055_v12  ;;  %v12569_v49 = vrot.slane %v12567_v10, 5  ;;  %v12584_v57 = vsel %vm16248_vm2, %v12579_v48, %v12583_v32 }
 0x620   : > { %v12784_v36 = vmax.f32 %v12752_v30, 0.0  ;;  %v12753_v23 = vadd.f32 %v18713_v59, %v12689_v53  ;;  %v12560_v16 = vsel %vm16248_vm2, %v12555_v55, %v12559_v50  ;;  %v12594_v5 = vsel %vm16248_vm2, %v12589_v51, %v12593_v25 }
 0x621   : > { %v12782_v37 = vmax.f32 %v12750_v13, 0.0  ;;  %v12751_v28 = vadd.f32 %v18719_v0, %v12687_v26  ;;  %v12725_v0 = vunpack.c.l.bf16 %v12546_v7  ;;  %v12728_v60 = vunpack.c.l.bf16 %v12584_v57 }
 0x622   : > { %12816 = vst [vmem:[%s18614_s7 + $0xb0] sm:$0xff] %v12784_v36  ;;  %v12785_v56 = vmax.f32 %v12753_v23, 0.0  ;;  %v12570_v47 = vsel %vm16248_vm2, %v12565_v11, %v12569_v49  ;;  %v12726_v14 = vunpack.c.l.bf16 %v12560_v16  ;;  %v12729_v44 = vunpack.c.l.bf16 %v12594_v5 }
 0x623   : > { %12814 = vst [vmem:[%s18614_s7 + $0xa0] sm:$0xff] %v12782_v37  ;;  %v12783_v59 = vmax.f32 %v12751_v28, 0.0  ;;  %v15336_v35 = vpop.f32.mrb[24].mxu1  ;;  %v12727_v9 = vunpack.c.l.bf16 %v12570_v47 }
 0x624   : > { %12817 = vst [vmem:[%s18614_s7 + $0xb8] sm:$0xff] %v12785_v56  ;;  %v12692_v46 = vadd.f32 %v15336_v35, %v18581_v3  ;;  %v12068_v22 = vpop.f32.mrb[25].mxu1 }
 0x625   : > { %12815 = vst [vmem:[%s18614_s7 + $0xa8] sm:$0xff] %v12783_v59  ;;  %v12690_v24 = vadd.f32 %v18581_v3, %v12068_v22  ;;  %v15337_v19 = vpop.f32.mrb[26].mxu1 }
 0x626   : > { %v12756_v18 = vadd.f32 %v18733_v1, %v12692_v46  ;;  %v12693_v39 = vadd.f32 %v15337_v19, %v18581_v3  ;;  %v12071_v54 = vpop.f32.mrb[27].mxu1 }
 0x627   : > { %v12754_v58 = vadd.f32 %v12722_v43, %v12690_v24  ;;  %v12691_v6 = vadd.f32 %v18581_v3, %v12071_v54 }
 0x628   : > { %v12788_v61 = vmax.f32 %v12756_v18, 0.0  ;;  %v12757_v31 = vadd.f32 %v12725_v0, %v12693_v39 }
 0x629   : > { %v12786_v1 = vmax.f32 %v12754_v58, 0.0  ;;  %v12755_v52 = vadd.f32 %v12723_v20, %v12691_v6 }
 0x62a   : > { %12820 = vst [vmem:[%s18614_s7 + $0xd0] sm:$0xff] %v12788_v61  ;;  %v12789_v27 = vmax.f32 %v12757_v31, 0.0 }
 0x62b   : > { %12818 = vst [vmem:[%s18614_s7 + $0xc0] sm:$0xff] %v12786_v1  ;;  %v12787_v29 = vmax.f32 %v12755_v52, 0.0  ;;  %v15340_v2 = vpop.f32.mrb[28].mxu1 }
 0x62c   : > { %12821 = vst [vmem:[%s18614_s7 + $0xd8] sm:$0xff] %v12789_v27  ;;  %v12696_v62 = vadd.f32 %v15340_v2, %v18581_v3  ;;  %v12084_v63 = vpop.f32.mrb[29].mxu1 }
 0x62d   : > { %12819 = vst [vmem:[%s18614_s7 + $0xc8] sm:$0xff] %v12787_v29  ;;  %v12694_v38 = vadd.f32 %v18581_v3, %v12084_v63  ;;  %v15341_v32 = vpop.f32.mrb[30].mxu1 }
 0x62e   : > { %v12760_v17 = vadd.f32 %v12728_v60, %v12696_v62  ;;  %v12697_v30 = vadd.f32 %v15341_v32, %v18581_v3  ;;  %v12087_v53 = vpop.f32.mrb[31].mxu1 }
 0x62f   : > { %v12758_v12 = vadd.f32 %v12726_v14, %v12694_v38  ;;  %v12695_v50 = vadd.f32 %v18581_v3, %v12087_v53 }
 0x630   : > { %v12792_v40 = vmax.f32 %v12760_v17, 0.0  ;;  %v12761_v34 = vadd.f32 %v12729_v44, %v12697_v30 }
 0x631   : > { %v12790_v13 = vmax.f32 %v12758_v12, 0.0  ;;  %v12759_v26 = vadd.f32 %v12727_v9, %v12695_v50 }
 0x632   : > { %12824 = vst [vmem:[%s18614_s7 + $0xf0] sm:$0xff] %v12792_v40  ;;  %v12793_v8 = vmax.f32 %v12761_v34, 0.0 }
 0x633   : > { %12822 = vst [vmem:[%s18614_s7 + $0xe0] sm:$0xff] %v12790_v13  ;;  %v12791_v4 = vmax.f32 %v12759_v26, 0.0 }
 0x634   : > { %12825 = vst [vmem:[%s18614_s7 + $0xf8] sm:$0xff] %v12793_v8 }
 0x635   : > { %12823 = vst [vmem:[%s18614_s7 + $0xe8] sm:$0xff] %v12791_v4 }
 0x636 PF: > { %s15_s18 = sadd.s32 1, %s16110_s18  }
 0x637   : > { %p12_p4 = scmp.ge.s32.totalorder %s15_s18, 4  }
 0x639   :  { %14 = sbr.rel (!%p12_p4) target bundleno = 1 (0x1), region = 90 }

</bundles_post_ra>
